<compile_context>
chip_gen: v7x
topology: tpu7x:2x2x1
jax: 0.10.0
libtpu: 0.0.40
codegen_flags: <defaults>
</compile_context>

<pallas_src>
import numpy as np

import jax
import jax.numpy as jnp
from jax import lax
from jax.experimental import pallas as pl
from jax.experimental.pallas import tpu as pltpu

# ----------------------- architecture constants -----------------------------
B = 2                       # batch
T = 6                       # fixed by x.view(batch*6, 1, H, W)
H_IMG, W_IMG = 8, 8         # original module: 40 x 30 (scaled down)
C1, C2 = 32, 64             # conv channels (same as module)
FLAT = C2 * H_IMG * W_IMG   # per-timestep features fed to the LSTM (4096)
HID = 128                   # LSTM hidden size
NHEADS = 4
HEAD = HID // NHEADS
BN_EPS = 1e-5

NI = B * T                  # number of conv images = LSTM (t, b) rows  (12)
NP = 16                     # image rows padded to a sublane-tile multiple
HP = H_IMG + 2              # y-padded image height (10)

_VMEM_LIMIT = 12 * 1024 * 1024


def _vmem_spec():
    return pl.BlockSpec(memory_space=pltpu.MemorySpace.VMEM)


# ============================ the fused kernel ================================
def _forward_kernel(xs_ref, w1b_ref, aff1_ref, w2b_ref, aff2_ref, wih0_hbm,
                    w_lstm_ref, b_lstm_ref, w_head_ref, b_head_ref,
                    w_fc2_ref, w_fc3_ref, o_ref,
                    wih0_vmem, dma_sem, h1pad_ref, h2_ref,
                    gx0_ref, gx1_ref, h0seq_ref, h1seq_ref):
    f32 = jnp.float32
    bf16 = jnp.bfloat16

    # ---- overlap the dominant 4 MiB wih0 HBM->VMEM DMA with the conv work ----
    wih0_cp = pltpu.make_async_copy(wih0_hbm, wih0_vmem, dma_sem.at[0])
    wih0_cp.start()

    rows_out = H_IMG * NP                              # 128 output slab rows

    def shifted_sum(g0, g1, g2):
        # slabs are (HP*NP, L) with rows r = y_pad*NP + n;
        # out[y*NP+n] = g0[(y+0)*NP+n] + g1[(y+1)*NP+n] + g2[(y+2)*NP+n]
        return (g0[0:rows_out, :] + g1[NP:NP + rows_out, :]
                + g2[2 * NP:2 * NP + rows_out, :])

    def conv_affine(acc, aff_ref):
        # Conv bias -> ReLU -> eval-mode BN folded to scale/shift
        y = jnp.maximum(acc + aff_ref[0:1, :], 0.0)
        return y * aff_ref[1:2, :] + aff_ref[2:3, :]

    # ------------------------------ conv1 ------------------------------------
    x = xs_ref[...]                                               # (160, 8) bf16
    g0 = jnp.dot(x, w1b_ref[0], preferred_element_type=f32)       # (160, 256)
    g1 = jnp.dot(x, w1b_ref[1], preferred_element_type=f32)
    g2 = jnp.dot(x, w1b_ref[2], preferred_element_type=f32)
    h1 = conv_affine(shifted_sum(g0, g1, g2), aff1_ref)           # (128, 256)

    # y-padded slab for conv2 (rows y_pad*NP + n), edges zero
    h1pad_ref[...] = jnp.zeros((HP * NP, W_IMG * C1), bf16)
    h1pad_ref[pl.ds(NP, rows_out), :] = h1.astype(bf16)

    # ------------------------------ conv2 ------------------------------------
    h1p = h1pad_ref[...]                                          # (160, 256)
    G0 = jnp.dot(h1p, w2b_ref[0], preferred_element_type=f32)     # (160, 512)
    G1 = jnp.dot(h1p, w2b_ref[1], preferred_element_type=f32)
    G2 = jnp.dot(h1p, w2b_ref[2], preferred_element_type=f32)
    h2 = conv_affine(shifted_sum(G0, G1, G2), aff2_ref)           # (128, 512)
    h2_ref[...] = h2.astype(bf16)

    # ---------------- LSTM layer 0: hoisted input projection -----------------
    wih0_cp.wait()                                                # DMA done
    gx = jnp.zeros((NP, 4 * HID), f32) + b_lstm_ref[0:1, :]
    wc = W_IMG * C2                                               # 512
    for y in range(H_IMG):                                        # 8 matmuls
        gx = gx + jnp.dot(h2_ref[y * NP:(y + 1) * NP, :],
                          wih0_vmem[y * wc:(y + 1) * wc, :],
                          preferred_element_type=f32)
    gx0_ref[...] = gx[0:NI, :]                                    # keep real rows

    def run_layer(gx_ref, whh, hseq_ref):
        h = jnp.zeros((B, HID), f32)
        c = jnp.zeros((B, HID), f32)
        for t in range(T):                                        # static unroll
            g = gx_ref[t * B:(t + 1) * B, :] + jnp.dot(
                h.astype(bf16), whh, preferred_element_type=f32)
            i_g = jax.nn.sigmoid(g[:, 0:HID])
            f_g = jax.nn.sigmoid(g[:, HID:2 * HID])
            g_g = jnp.tanh(g[:, 2 * HID:3 * HID])
            o_g = jax.nn.sigmoid(g[:, 3 * HID:4 * HID])
            c = f_g * c + i_g * g_g
            h = o_g * jnp.tanh(c)
            hseq_ref[t * B:(t + 1) * B, :] = h

    run_layer(gx0_ref, w_lstm_ref[0], h0seq_ref)

    # ---------------- LSTM layer 1 (inter-layer dropout = identity) ----------
    gx1 = jnp.dot(h0seq_ref[...].astype(bf16), w_lstm_ref[1],
                  preferred_element_type=f32) + b_lstm_ref[1:2, :]
    gx1_ref[...] = gx1
    run_layer(gx1_ref, w_lstm_ref[2], h1seq_ref)

    # -------- attention (only the last query position is ever used) ----------
    seq = h1seq_ref[...].astype(bf16)                             # (12, 128)
    kv = jnp.dot(seq, w_head_ref[:, HID:3 * HID],
                 preferred_element_type=f32) + b_head_ref[0:1, HID:3 * HID]
    k_all = kv[:, 0:HID]                                          # (12, 128)
    v_all = kv[:, HID:2 * HID]                                    # (12, 128)
    q_last = (jnp.dot(h1seq_ref[(T - 1) * B:T * B, :].astype(bf16),
                      w_head_ref[:, 0:HID], preferred_element_type=f32)
              + b_head_ref[0:1, 0:HID]) * (1.0 / (HEAD ** 0.5))   # (B, 128)

    # mask out keys belonging to the other batch row (rows are (t, b) t-major)
    row_b = lax.broadcasted_iota(jnp.int32, (B, NI), 0)
    col_b = lax.broadcasted_iota(jnp.int32, (B, NI), 1) % B
    same_batch = row_b == col_b                                   # (B, 12)

    outs = []
    for hh in range(NHEADS):                                      # 4 iterations
        lo = hh * HEAD
        qh = q_last[:, lo:lo + HEAD]                              # (B, 32)
        kh = k_all[:, lo:lo + HEAD]                               # (12, 32)
        vh = v_all[:, lo:lo + HEAD]                               # (12, 32)
        s = lax.dot_general(qh, kh, (((1,), (1,)), ((), ())),
                            preferred_element_type=f32)           # (B, 12)
        s = jnp.where(same_batch, s, -1e30)
        s = s - jnp.max(s, axis=-1, keepdims=True)
        p = jnp.exp(s)
        p = p * pl.reciprocal(jnp.sum(p, axis=-1, keepdims=True), approx=True)
        outs.append(jnp.dot(p.astype(bf16), vh.astype(bf16),
                            preferred_element_type=f32))          # (B, 32)
    attn = jnp.concatenate(outs, axis=-1)                         # (B, 128)

    # -------- out-projection + FC head (dropouts identity in eval) -----------
    y = jnp.dot(attn.astype(bf16), w_head_ref[:, 3 * HID:4 * HID],
                preferred_element_type=f32) + b_head_ref[1:2, 0:HID]
    y = jnp.maximum(jnp.dot(y.astype(bf16), w_head_ref[:, 4 * HID:4 * HID + 64],
                            preferred_element_type=f32)
                    + b_head_ref[2:3, 0:64], 0.0)
    y = jnp.maximum(jnp.dot(y.astype(bf16), w_fc2_ref[...],
                            preferred_element_type=f32)
                    + b_head_ref[3:4, 0:32], 0.0)
    y = jax.nn.sigmoid(jnp.dot(y.astype(bf16), w_fc3_ref[...],
                               preferred_element_type=f32)
                       + b_head_ref[4:5, 0:1])
    o_ref[...] = y                                                # (B, 1)


_fused_forward = pl.pallas_call(
    _forward_kernel,
    out_shape=jax.ShapeDtypeStruct((B, 1), jnp.float32),
    in_specs=([_vmem_spec()] * 5
              + [pl.BlockSpec(memory_space=pl.ANY)]               # wih0p in HBM
              + [_vmem_spec()] * 6),
    out_specs=_vmem_spec(),
    scratch_shapes=[
        pltpu.VMEM((H_IMG * W_IMG * C2, 4 * HID), jnp.bfloat16),  # wih0 VMEM copy
        pltpu.SemaphoreType.DMA((1,)),                            # its semaphore
        pltpu.VMEM((HP * NP, W_IMG * C1), jnp.bfloat16),          # padded conv1 out
        pltpu.VMEM((H_IMG * NP, W_IMG * C2), jnp.bfloat16),       # conv2 out
        pltpu.VMEM((NI, 4 * HID), jnp.float32),                   # gx layer 0
        pltpu.VMEM((NI, 4 * HID), jnp.float32),                   # gx layer 1
        pltpu.VMEM((NI, HID), jnp.float32),                       # layer-0 h seq
        pltpu.VMEM((NI, HID), jnp.float32),                       # layer-1 h seq
    ],
    compiler_params=pltpu.CompilerParams(vmem_limit_bytes=_VMEM_LIMIT),
)


# ----------------------- forward (per-call JAX glue is tiny) -----------------
def forward(x, prep):
    # x: (B, T, H, W).  Build the padded conv input slab:
    # rows = y_pad*NP + (t*B + b), lanes = x-coordinate.
    xt = x.reshape(B, T, H_IMG, W_IMG).transpose(2, 1, 0, 3)      # (H, T, B, W)
    xt = xt.reshape(H_IMG, NI, W_IMG)
    xt = jnp.pad(xt, ((1, 1), (0, NP - NI), (0, 0)))              # (10, 16, 8)
    xs_pad = xt.reshape(HP * NP, W_IMG).astype(jnp.bfloat16)

    out = _fused_forward(xs_pad, prep["w1b"], prep["aff1"], prep["w2b"],
                         prep["aff2"], prep["wih0p"], prep["w_lstm"],
                         prep["b_lstm"], prep["w_head"], prep["b_head"],
                         prep["w_fc2"], prep["w_fc3"])
    return out.reshape(B)                                         # .squeeze()


# ----------------------- one-time parameter preparation ----------------------
def prepare_params(p):
    """Done ONCE outside jit: band/permuted weights, folded BN, bf16 casts."""
    pn = {k: np.asarray(v, np.float32) for k, v in p.items()}

    def band(w4, cin, cout):
        # w4: (3, 3, cin, cout).  Band matrix folding the x-window + x-padding:
        # band[kh][xx*cin+ci, x*cout+co] = w4[kh, xx-x+1, ci, co]  (|xx-x|<=1)
        wb = np.zeros((3, W_IMG * cin, W_IMG * cout), np.float32)
        for kh in range(3):
            for x in range(W_IMG):
                for kw in range(3):
                    xx = x + kw - 1
                    if 0 <= xx < W_IMG:
                        wb[kh, xx * cin:(xx + 1) * cin,
                           x * cout:(x + 1) * cout] = w4[kh, kw]
        return wb

    def aff(bias, g, b, m, v):
        scale = g / np.sqrt(v + BN_EPS)
        shift = b - m * scale
        return np.stack([np.tile(bias, W_IMG), np.tile(scale, W_IMG),
                         np.tile(shift, W_IMG)], 0)               # (3, W*C)

    # permute wih0 rows from PyTorch (c, y, x) flatten order to (y, x, c)
    wih0p = (pn["lstm_wih0"].reshape(C2, H_IMG, W_IMG, 4 * HID)
             .transpose(1, 2, 0, 3).reshape(H_IMG * W_IMG * C2, 4 * HID))

    def padrow(v):
        r = np.zeros((4 * HID,), np.float32)
        r[:v.shape[0]] = v
        return r

    prep = {
        "w1b": jnp.asarray(band(pn["conv1_w"], 1, C1), jnp.bfloat16),
        "aff1": jnp.asarray(aff(pn["conv1_b"], pn["bn1_g"], pn["bn1_b"],
                                pn["bn1_m"], pn["bn1_v"]), jnp.float32),
        "w2b": jnp.asarray(band(pn["conv2_w"], C1, C2), jnp.bfloat16),
        "aff2": jnp.asarray(aff(pn["conv2_b"], pn["bn2_g"], pn["bn2_b"],
                                pn["bn2_m"], pn["bn2_v"]), jnp.float32),
        "wih0p": jnp.asarray(wih0p, jnp.bfloat16),
        "w_lstm": jnp.asarray(np.stack([pn["lstm_whh0"], pn["lstm_wih1"],
                                        pn["lstm_whh1"]], 0), jnp.bfloat16),
        "b_lstm": jnp.asarray(np.stack([pn["lstm_b0"], pn["lstm_b1"]], 0),
                              jnp.float32),
        "w_head": jnp.asarray(np.concatenate(
            [pn["wq"], pn["wk"], pn["wv"], pn["wo"], pn["fc1_w"]], axis=1),
            jnp.bfloat16),                                        # (128, 576)
        "b_head": jnp.asarray(np.stack(
            [padrow(np.concatenate([pn["bq"], pn["bk"], pn["bv"]])),
             padrow(pn["bo"]), padrow(pn["fc1_b"]), padrow(pn["fc2_b"]),
             padrow(pn["fc3_b"])], 0), jnp.float32),              # (5, 512)
        "w_fc2": jnp.asarray(pn["fc2_w"], jnp.bfloat16),
        "w_fc3": jnp.asarray(pn["fc3_w"], jnp.bfloat16),
    }
    return prep


# ----------------------- deterministic parameter init ------------------------
def init_params(key):
    ks = iter(jax.random.split(key, 40))

    def w(shape, fan_in):
        return (jax.random.normal(next(ks), shape, jnp.float32)
                / jnp.sqrt(float(fan_in)))

    p = {}
    p["conv1_w"] = w((3, 3, 1, C1), 9)
    p["conv1_b"] = w((C1,), 9)
    p["bn1_g"] = 1.0 + 0.1 * jax.random.normal(next(ks), (C1,), jnp.float32)
    p["bn1_b"] = 0.1 * jax.random.normal(next(ks), (C1,), jnp.float32)
    p["bn1_m"] = 0.1 * jax.random.normal(next(ks), (C1,), jnp.float32)
    p["bn1_v"] = 1.0 + 0.1 * jax.random.uniform(next(ks), (C1,), jnp.float32)
    p["conv2_w"] = w((3, 3, C1, C2), 9 * C1)
    p["conv2_b"] = w((C2,), 9 * C1)
    p["bn2_g"] = 1.0 + 0.1 * jax.random.normal(next(ks), (C2,), jnp.float32)
    p["bn2_b"] = 0.1 * jax.random.normal(next(ks), (C2,), jnp.float32)
    p["bn2_m"] = 0.1 * jax.random.normal(next(ks), (C2,), jnp.float32)
    p["bn2_v"] = 1.0 + 0.1 * jax.random.uniform(next(ks), (C2,), jnp.float32)
    # LSTM (2 layers), gate order (i, f, g, o); bias = b_ih + b_hh combined
    p["lstm_wih0"] = w((FLAT, 4 * HID), FLAT)
    p["lstm_whh0"] = w((HID, 4 * HID), HID)
    p["lstm_b0"] = w((4 * HID,), HID)
    p["lstm_wih1"] = w((HID, 4 * HID), HID)
    p["lstm_whh1"] = w((HID, 4 * HID), HID)
    p["lstm_b1"] = w((4 * HID,), HID)
    for name in ("wq", "wk", "wv", "wo"):
        p[name] = w((HID, HID), HID)
    for name in ("bq", "bk", "bv", "bo"):
        p[name] = w((HID,), HID)
    p["fc1_w"] = w((HID, 64), HID)
    p["fc1_b"] = w((64,), HID)
    p["fc2_w"] = w((64, 32), 64)
    p["fc2_b"] = w((32,), 64)
    p["fc3_w"] = w((32, 1), 32)
    p["fc3_b"] = w((1,), 32)
    return p


if __name__ == "__main__":
    key = jax.random.PRNGKey(0)
    pkey, xkey = jax.random.split(key)
    params = init_params(pkey)
    prep = prepare_params(params)        # one-time weight prep (outside jit)
    x = jax.random.normal(xkey, (B, T, H_IMG, W_IMG), jnp.float32)

    fwd = jax.jit(forward)
    out = jax.block_until_ready(fwd(x, prep))

    assert out.shape == (B,)
    assert bool(jnp.all(jnp.isfinite(out)))
    assert bool(jnp.all((out >= 0.0) & (out <= 1.0)))   # sigmoid output
    print("KERNEL_OK")
</pallas_src>

<mosaic_0001>
module attributes {stable_mosaic.version = 11 : i64} {
  func.func @_forward_kernel(%arg0: memref<160x8xbf16, #tpu.memory_space<vmem>>, %arg1: memref<3x8x256xbf16, #tpu.memory_space<vmem>>, %arg2: memref<3x256xf32, #tpu.memory_space<vmem>>, %arg3: memref<3x256x512xbf16, #tpu.memory_space<vmem>>, %arg4: memref<3x512xf32, #tpu.memory_space<vmem>>, %arg5: memref<4096x512xbf16, #tpu.memory_space<any>>, %arg6: memref<3x128x512xbf16, #tpu.memory_space<vmem>>, %arg7: memref<2x512xf32, #tpu.memory_space<vmem>>, %arg8: memref<128x576xbf16, #tpu.memory_space<vmem>>, %arg9: memref<5x512xf32, #tpu.memory_space<vmem>>, %arg10: memref<64x32xbf16, #tpu.memory_space<vmem>>, %arg11: memref<32x1xbf16, #tpu.memory_space<vmem>>, %arg12: memref<2x1xf32, #tpu.memory_space<vmem>>, %arg13: memref<4096x512xbf16, #tpu.memory_space<vmem>>, %arg14: memref<1x!tpu.dma_semaphore, #tpu.memory_space<semaphore_mem>>, %arg15: memref<160x256xbf16, #tpu.memory_space<vmem>>, %arg16: memref<128x512xbf16, #tpu.memory_space<vmem>>, %arg17: memref<12x512xf32, #tpu.memory_space<vmem>>, %arg18: memref<12x512xf32, #tpu.memory_space<vmem>>, %arg19: memref<12x128xf32, #tpu.memory_space<vmem>>, %arg20: memref<12x128xf32, #tpu.memory_space<vmem>>) attributes {dimension_semantics = [], scalar_prefetch = 0 : i64, scratch_operands = 8 : i64, tpu.core_type = #tpu.core_type<tc>} {
    %c0_i32 = arith.constant 0 : i32
    %0 = tpu.memref_slice %arg14[%c0_i32] : memref<1x!tpu.dma_semaphore, #tpu.memory_space<semaphore_mem>> -> memref<1x!tpu.dma_semaphore, #tpu.memory_space<semaphore_mem>>
    %1 = tpu.memref_squeeze %0 : memref<1x!tpu.dma_semaphore, #tpu.memory_space<semaphore_mem>> -> memref<!tpu.dma_semaphore, #tpu.memory_space<semaphore_mem>>
    tpu.enqueue_dma source(%arg5 : memref<4096x512xbf16, #tpu.memory_space<any>>) target(%arg13 : memref<4096x512xbf16, #tpu.memory_space<vmem>>) target_semaphore(%1 : memref<!tpu.dma_semaphore, #tpu.memory_space<semaphore_mem>>)
    %c0 = arith.constant 0 : index
    %c0_0 = arith.constant 0 : index
    %2 = vector.load %arg0[%c0, %c0_0] : memref<160x8xbf16, #tpu.memory_space<vmem>>, vector<160x8xbf16>
    %c0_1 = arith.constant 0 : index
    %c0_2 = arith.constant 0 : index
    %c0_3 = arith.constant 0 : index
    %3 = vector.load %arg1[%c0_1, %c0_2, %c0_3] : memref<3x8x256xbf16, #tpu.memory_space<vmem>>, vector<1x8x256xbf16>
    %4 = vector.shape_cast %3 : vector<1x8x256xbf16> to vector<8x256xbf16>
    %cst = arith.constant dense<0.000000e+00> : vector<160x256xf32>
    %5 = tpu.matmul %2, %4, %cst {dimension_numbers = #tpu.dot_dimension_numbers<[1], [0], [0], [1], [0, 0, 1, 1], [], []>} : vector<160x8xbf16>, vector<8x256xbf16>, vector<160x256xf32> -> vector<160x256xf32>
    %c1 = arith.constant 1 : index
    %c0_4 = arith.constant 0 : index
    %c0_5 = arith.constant 0 : index
    %6 = vector.load %arg1[%c1, %c0_4, %c0_5] : memref<3x8x256xbf16, #tpu.memory_space<vmem>>, vector<1x8x256xbf16>
    %7 = vector.shape_cast %6 : vector<1x8x256xbf16> to vector<8x256xbf16>
    %cst_6 = arith.constant dense<0.000000e+00> : vector<160x256xf32>
    %8 = tpu.matmul %2, %7, %cst_6 {dimension_numbers = #tpu.dot_dimension_numbers<[1], [0], [0], [1], [0, 0, 1, 1], [], []>} : vector<160x8xbf16>, vector<8x256xbf16>, vector<160x256xf32> -> vector<160x256xf32>
    %c2 = arith.constant 2 : index
    %c0_7 = arith.constant 0 : index
    %c0_8 = arith.constant 0 : index
    %9 = vector.load %arg1[%c2, %c0_7, %c0_8] : memref<3x8x256xbf16, #tpu.memory_space<vmem>>, vector<1x8x256xbf16>
    %10 = vector.shape_cast %9 : vector<1x8x256xbf16> to vector<8x256xbf16>
    %cst_9 = arith.constant dense<0.000000e+00> : vector<160x256xf32>
    %11 = tpu.matmul %2, %10, %cst_9 {dimension_numbers = #tpu.dot_dimension_numbers<[1], [0], [0], [1], [0, 0, 1, 1], [], []>} : vector<160x8xbf16>, vector<8x256xbf16>, vector<160x256xf32> -> vector<160x256xf32>
    %12 = vector.extract_strided_slice %5 {offsets = [0, 0], sizes = [128, 256], strides = [1, 1]} : vector<160x256xf32> to vector<128x256xf32>
    %13 = vector.extract_strided_slice %8 {offsets = [16, 0], sizes = [128, 256], strides = [1, 1]} : vector<160x256xf32> to vector<128x256xf32>
    %14 = arith.addf %12, %13 : vector<128x256xf32>
    %15 = vector.extract_strided_slice %11 {offsets = [32, 0], sizes = [128, 256], strides = [1, 1]} : vector<160x256xf32> to vector<128x256xf32>
    %16 = arith.addf %14, %15 : vector<128x256xf32>
    %c0_10 = arith.constant 0 : index
    %c0_11 = arith.constant 0 : index
    %17 = vector.load %arg2[%c0_10, %c0_11] : memref<3x256xf32, #tpu.memory_space<vmem>>, vector<1x256xf32>
    %18 = vector.broadcast %17 : vector<1x256xf32> to vector<128x256xf32>
    %19 = arith.addf %16, %18 : vector<128x256xf32>
    %cst_12 = arith.constant 0.000000e+00 : f32
    %20 = vector.broadcast %cst_12 : f32 to vector<128x256xf32>
    %21 = arith.maximumf %19, %20 : vector<128x256xf32>
    %c1_13 = arith.constant 1 : index
    %c0_14 = arith.constant 0 : index
    %22 = vector.load %arg2[%c1_13, %c0_14] : memref<3x256xf32, #tpu.memory_space<vmem>>, vector<1x256xf32>
    %23 = vector.broadcast %22 : vector<1x256xf32> to vector<128x256xf32>
    %24 = arith.mulf %21, %23 : vector<128x256xf32>
    %c2_15 = arith.constant 2 : index
    %c0_16 = arith.constant 0 : index
    %25 = vector.load %arg2[%c2_15, %c0_16] : memref<3x256xf32, #tpu.memory_space<vmem>>, vector<1x256xf32>
    %26 = vector.broadcast %25 : vector<1x256xf32> to vector<128x256xf32>
    %27 = arith.addf %24, %26 : vector<128x256xf32>
    %cst_17 = arith.constant 0.000000e+00 : bf16
    %28 = vector.broadcast %cst_17 : bf16 to vector<160x256xbf16>
    %c0_18 = arith.constant 0 : index
    %c0_19 = arith.constant 0 : index
    %29 = vector.load %arg15[%c0_18, %c0_19] : memref<160x256xbf16, #tpu.memory_space<vmem>>, vector<160x256xbf16>
    tpu.vector_store %arg15[%c0_18, %c0_19], %28 {strides = array<i32>} : memref<160x256xbf16, #tpu.memory_space<vmem>>, vector<160x256xbf16>,
    %30 = arith.truncf %27 : vector<128x256xf32> to vector<128x256xbf16>
    %c16 = arith.constant 16 : index
    %c0_20 = arith.constant 0 : index
    %31 = vector.load %arg15[%c16, %c0_20] : memref<160x256xbf16, #tpu.memory_space<vmem>>, vector<128x256xbf16>
    tpu.vector_store %arg15[%c16, %c0_20], %30 {strides = array<i32>} : memref<160x256xbf16, #tpu.memory_space<vmem>>, vector<128x256xbf16>,
    %c0_21 = arith.constant 0 : index
    %c0_22 = arith.constant 0 : index
    %32 = vector.load %arg15[%c0_21, %c0_22] : memref<160x256xbf16, #tpu.memory_space<vmem>>, vector<160x256xbf16>
    %c0_23 = arith.constant 0 : index
    %c0_24 = arith.constant 0 : index
    %c0_25 = arith.constant 0 : index
    %33 = vector.load %arg3[%c0_23, %c0_24, %c0_25] : memref<3x256x512xbf16, #tpu.memory_space<vmem>>, vector<1x256x512xbf16>
    %34 = vector.shape_cast %33 : vector<1x256x512xbf16> to vector<256x512xbf16>
    %cst_26 = arith.constant dense<0.000000e+00> : vector<160x512xf32>
    %35 = tpu.matmul %32, %34, %cst_26 {dimension_numbers = #tpu.dot_dimension_numbers<[1], [0], [0], [1], [0, 0, 1, 1], [], []>} : vector<160x256xbf16>, vector<256x512xbf16>, vector<160x512xf32> -> vector<160x512xf32>
    %c1_27 = arith.constant 1 : index
    %c0_28 = arith.constant 0 : index
    %c0_29 = arith.constant 0 : index
    %36 = vector.load %arg3[%c1_27, %c0_28, %c0_29] : memref<3x256x512xbf16, #tpu.memory_space<vmem>>, vector<1x256x512xbf16>
    %37 = vector.shape_cast %36 : vector<1x256x512xbf16> to vector<256x512xbf16>
    %cst_30 = arith.constant dense<0.000000e+00> : vector<160x512xf32>
    %38 = tpu.matmul %32, %37, %cst_30 {dimension_numbers = #tpu.dot_dimension_numbers<[1], [0], [0], [1], [0, 0, 1, 1], [], []>} : vector<160x256xbf16>, vector<256x512xbf16>, vector<160x512xf32> -> vector<160x512xf32>
    %c2_31 = arith.constant 2 : index
    %c0_32 = arith.constant 0 : index
    %c0_33 = arith.constant 0 : index
    %39 = vector.load %arg3[%c2_31, %c0_32, %c0_33] : memref<3x256x512xbf16, #tpu.memory_space<vmem>>, vector<1x256x512xbf16>
    %40 = vector.shape_cast %39 : vector<1x256x512xbf16> to vector<256x512xbf16>
    %cst_34 = arith.constant dense<0.000000e+00> : vector<160x512xf32>
    %41 = tpu.matmul %32, %40, %cst_34 {dimension_numbers = #tpu.dot_dimension_numbers<[1], [0], [0], [1], [0, 0, 1, 1], [], []>} : vector<160x256xbf16>, vector<256x512xbf16>, vector<160x512xf32> -> vector<160x512xf32>
    %42 = vector.extract_strided_slice %35 {offsets = [0, 0], sizes = [128, 512], strides = [1, 1]} : vector<160x512xf32> to vector<128x512xf32>
    %43 = vector.extract_strided_slice %38 {offsets = [16, 0], sizes = [128, 512], strides = [1, 1]} : vector<160x512xf32> to vector<128x512xf32>
    %44 = arith.addf %42, %43 : vector<128x512xf32>
    %45 = vector.extract_strided_slice %41 {offsets = [32, 0], sizes = [128, 512], strides = [1, 1]} : vector<160x512xf32> to vector<128x512xf32>
    %46 = arith.addf %44, %45 : vector<128x512xf32>
    %c0_35 = arith.constant 0 : index
    %c0_36 = arith.constant 0 : index
    %47 = vector.load %arg4[%c0_35, %c0_36] : memref<3x512xf32, #tpu.memory_space<vmem>>, vector<1x512xf32>
    %48 = vector.broadcast %47 : vector<1x512xf32> to vector<128x512xf32>
    %49 = arith.addf %46, %48 : vector<128x512xf32>
    %cst_37 = arith.constant 0.000000e+00 : f32
    %50 = vector.broadcast %cst_37 : f32 to vector<128x512xf32>
    %51 = arith.maximumf %49, %50 : vector<128x512xf32>
    %c1_38 = arith.constant 1 : index
    %c0_39 = arith.constant 0 : index
    %52 = vector.load %arg4[%c1_38, %c0_39] : memref<3x512xf32, #tpu.memory_space<vmem>>, vector<1x512xf32>
    %53 = vector.broadcast %52 : vector<1x512xf32> to vector<128x512xf32>
    %54 = arith.mulf %51, %53 : vector<128x512xf32>
    %c2_40 = arith.constant 2 : index
    %c0_41 = arith.constant 0 : index
    %55 = vector.load %arg4[%c2_40, %c0_41] : memref<3x512xf32, #tpu.memory_space<vmem>>, vector<1x512xf32>
    %56 = vector.broadcast %55 : vector<1x512xf32> to vector<128x512xf32>
    %57 = arith.addf %54, %56 : vector<128x512xf32>
    %58 = arith.truncf %57 : vector<128x512xf32> to vector<128x512xbf16>
    %c0_42 = arith.constant 0 : index
    %c0_43 = arith.constant 0 : index
    %59 = vector.load %arg16[%c0_42, %c0_43] : memref<128x512xbf16, #tpu.memory_space<vmem>>, vector<128x512xbf16>
    tpu.vector_store %arg16[%c0_42, %c0_43], %58 {strides = array<i32>} : memref<128x512xbf16, #tpu.memory_space<vmem>>, vector<128x512xbf16>,
    %c0_i32_44 = arith.constant 0 : i32
    %60 = tpu.memref_slice %arg14[%c0_i32_44] : memref<1x!tpu.dma_semaphore, #tpu.memory_space<semaphore_mem>> -> memref<1x!tpu.dma_semaphore, #tpu.memory_space<semaphore_mem>>
    %61 = tpu.memref_squeeze %60 : memref<1x!tpu.dma_semaphore, #tpu.memory_space<semaphore_mem>> -> memref<!tpu.dma_semaphore, #tpu.memory_space<semaphore_mem>>
    tpu.wait_dma2 semaphore(%61 : memref<!tpu.dma_semaphore, #tpu.memory_space<semaphore_mem>>) src(%arg5 : memref<4096x512xbf16, #tpu.memory_space<any>>) dst(%arg13 : memref<4096x512xbf16, #tpu.memory_space<vmem>>)
    %cst_45 = arith.constant 0.000000e+00 : f32
    %62 = vector.broadcast %cst_45 : f32 to vector<16x512xf32>
    %c0_46 = arith.constant 0 : index
    %c0_47 = arith.constant 0 : index
    %63 = vector.load %arg7[%c0_46, %c0_47] : memref<2x512xf32, #tpu.memory_space<vmem>>, vector<1x512xf32>
    %64 = vector.broadcast %63 : vector<1x512xf32> to vector<16x512xf32>
    %65 = arith.addf %62, %64 : vector<16x512xf32>
    %c0_48 = arith.constant 0 : index
    %c0_49 = arith.constant 0 : index
    %66 = vector.load %arg16[%c0_48, %c0_49] : memref<128x512xbf16, #tpu.memory_space<vmem>>, vector<16x512xbf16>
    %c0_50 = arith.constant 0 : index
    %c0_51 = arith.constant 0 : index
    %67 = vector.load %arg13[%c0_50, %c0_51] : memref<4096x512xbf16, #tpu.memory_space<vmem>>, vector<512x512xbf16>
    %cst_52 = arith.constant dense<0.000000e+00> : vector<16x512xf32>
    %68 = tpu.matmul %66, %67, %cst_52 {dimension_numbers = #tpu.dot_dimension_numbers<[1], [0], [0], [1], [0, 0, 1, 1], [], []>} : vector<16x512xbf16>, vector<512x512xbf16>, vector<16x512xf32> -> vector<16x512xf32>
    %69 = arith.addf %65, %68 : vector<16x512xf32>
    %c16_53 = arith.constant 16 : index
    %c0_54 = arith.constant 0 : index
    %70 = vector.load %arg16[%c16_53, %c0_54] : memref<128x512xbf16, #tpu.memory_space<vmem>>, vector<16x512xbf16>
    %c512 = arith.constant 512 : index
    %c0_55 = arith.constant 0 : index
    %71 = vector.load %arg13[%c512, %c0_55] : memref<4096x512xbf16, #tpu.memory_space<vmem>>, vector<512x512xbf16>
    %cst_56 = arith.constant dense<0.000000e+00> : vector<16x512xf32>
    %72 = tpu.matmul %70, %71, %cst_56 {dimension_numbers = #tpu.dot_dimension_numbers<[1], [0], [0], [1], [0, 0, 1, 1], [], []>} : vector<16x512xbf16>, vector<512x512xbf16>, vector<16x512xf32> -> vector<16x512xf32>
    %73 = arith.addf %69, %72 : vector<16x512xf32>
    %c32 = arith.constant 32 : index
    %c0_57 = arith.constant 0 : index
    %74 = vector.load %arg16[%c32, %c0_57] : memref<128x512xbf16, #tpu.memory_space<vmem>>, vector<16x512xbf16>
    %c1024 = arith.constant 1024 : index
    %c0_58 = arith.constant 0 : index
    %75 = vector.load %arg13[%c1024, %c0_58] : memref<4096x512xbf16, #tpu.memory_space<vmem>>, vector<512x512xbf16>
    %cst_59 = arith.constant dense<0.000000e+00> : vector<16x512xf32>
    %76 = tpu.matmul %74, %75, %cst_59 {dimension_numbers = #tpu.dot_dimension_numbers<[1], [0], [0], [1], [0, 0, 1, 1], [], []>} : vector<16x512xbf16>, vector<512x512xbf16>, vector<16x512xf32> -> vector<16x512xf32>
    %77 = arith.addf %73, %76 : vector<16x512xf32>
    %c48 = arith.constant 48 : index
    %c0_60 = arith.constant 0 : index
    %78 = vector.load %arg16[%c48, %c0_60] : memref<128x512xbf16, #tpu.memory_space<vmem>>, vector<16x512xbf16>
    %c1536 = arith.constant 1536 : index
    %c0_61 = arith.constant 0 : index
    %79 = vector.load %arg13[%c1536, %c0_61] : memref<4096x512xbf16, #tpu.memory_space<vmem>>, vector<512x512xbf16>
    %cst_62 = arith.constant dense<0.000000e+00> : vector<16x512xf32>
    %80 = tpu.matmul %78, %79, %cst_62 {dimension_numbers = #tpu.dot_dimension_numbers<[1], [0], [0], [1], [0, 0, 1, 1], [], []>} : vector<16x512xbf16>, vector<512x512xbf16>, vector<16x512xf32> -> vector<16x512xf32>
    %81 = arith.addf %77, %80 : vector<16x512xf32>
    %c64 = arith.constant 64 : index
    %c0_63 = arith.constant 0 : index
    %82 = vector.load %arg16[%c64, %c0_63] : memref<128x512xbf16, #tpu.memory_space<vmem>>, vector<16x512xbf16>
    %c2048 = arith.constant 2048 : index
    %c0_64 = arith.constant 0 : index
    %83 = vector.load %arg13[%c2048, %c0_64] : memref<4096x512xbf16, #tpu.memory_space<vmem>>, vector<512x512xbf16>
    %cst_65 = arith.constant dense<0.000000e+00> : vector<16x512xf32>
    %84 = tpu.matmul %82, %83, %cst_65 {dimension_numbers = #tpu.dot_dimension_numbers<[1], [0], [0], [1], [0, 0, 1, 1], [], []>} : vector<16x512xbf16>, vector<512x512xbf16>, vector<16x512xf32> -> vector<16x512xf32>
    %85 = arith.addf %81, %84 : vector<16x512xf32>
    %c80 = arith.constant 80 : index
    %c0_66 = arith.constant 0 : index
    %86 = vector.load %arg16[%c80, %c0_66] : memref<128x512xbf16, #tpu.memory_space<vmem>>, vector<16x512xbf16>
    %c2560 = arith.constant 2560 : index
    %c0_67 = arith.constant 0 : index
    %87 = vector.load %arg13[%c2560, %c0_67] : memref<4096x512xbf16, #tpu.memory_space<vmem>>, vector<512x512xbf16>
    %cst_68 = arith.constant dense<0.000000e+00> : vector<16x512xf32>
    %88 = tpu.matmul %86, %87, %cst_68 {dimension_numbers = #tpu.dot_dimension_numbers<[1], [0], [0], [1], [0, 0, 1, 1], [], []>} : vector<16x512xbf16>, vector<512x512xbf16>, vector<16x512xf32> -> vector<16x512xf32>
    %89 = arith.addf %85, %88 : vector<16x512xf32>
    %c96 = arith.constant 96 : index
    %c0_69 = arith.constant 0 : index
    %90 = vector.load %arg16[%c96, %c0_69] : memref<128x512xbf16, #tpu.memory_space<vmem>>, vector<16x512xbf16>
    %c3072 = arith.constant 3072 : index
    %c0_70 = arith.constant 0 : index
    %91 = vector.load %arg13[%c3072, %c0_70] : memref<4096x512xbf16, #tpu.memory_space<vmem>>, vector<512x512xbf16>
    %cst_71 = arith.constant dense<0.000000e+00> : vector<16x512xf32>
    %92 = tpu.matmul %90, %91, %cst_71 {dimension_numbers = #tpu.dot_dimension_numbers<[1], [0], [0], [1], [0, 0, 1, 1], [], []>} : vector<16x512xbf16>, vector<512x512xbf16>, vector<16x512xf32> -> vector<16x512xf32>
    %93 = arith.addf %89, %92 : vector<16x512xf32>
    %c112 = arith.constant 112 : index
    %c0_72 = arith.constant 0 : index
    %94 = vector.load %arg16[%c112, %c0_72] : memref<128x512xbf16, #tpu.memory_space<vmem>>, vector<16x512xbf16>
    %c3584 = arith.constant 3584 : index
    %c0_73 = arith.constant 0 : index
    %95 = vector.load %arg13[%c3584, %c0_73] : memref<4096x512xbf16, #tpu.memory_space<vmem>>, vector<512x512xbf16>
    %cst_74 = arith.constant dense<0.000000e+00> : vector<16x512xf32>
    %96 = tpu.matmul %94, %95, %cst_74 {dimension_numbers = #tpu.dot_dimension_numbers<[1], [0], [0], [1], [0, 0, 1, 1], [], []>} : vector<16x512xbf16>, vector<512x512xbf16>, vector<16x512xf32> -> vector<16x512xf32>
    %97 = arith.addf %93, %96 : vector<16x512xf32>
    %98 = vector.extract_strided_slice %97 {offsets = [0, 0], sizes = [12, 512], strides = [1, 1]} : vector<16x512xf32> to vector<12x512xf32>
    %c0_75 = arith.constant 0 : index
    %c0_76 = arith.constant 0 : index
    %99 = vector.load %arg17[%c0_75, %c0_76] : memref<12x512xf32, #tpu.memory_space<vmem>>, vector<12x512xf32>
    tpu.vector_store %arg17[%c0_75, %c0_76], %98 {strides = array<i32>} : memref<12x512xf32, #tpu.memory_space<vmem>>, vector<12x512xf32>,
    %c0_77 = arith.constant 0 : index
    %c0_78 = arith.constant 0 : index
    %c0_79 = arith.constant 0 : index
    %100 = vector.load %arg6[%c0_77, %c0_78, %c0_79] : memref<3x128x512xbf16, #tpu.memory_space<vmem>>, vector<1x128x512xbf16>
    %101 = vector.shape_cast %100 : vector<1x128x512xbf16> to vector<128x512xbf16>
    %cst_80 = arith.constant 0.000000e+00 : f32
    %102 = vector.broadcast %cst_80 : f32 to vector<2x128xf32>
    %cst_81 = arith.constant 0.000000e+00 : f32
    %103 = vector.broadcast %cst_81 : f32 to vector<2x128xf32>
    %c0_82 = arith.constant 0 : index
    %c0_83 = arith.constant 0 : index
    %104 = vector.load %arg17[%c0_82, %c0_83] : memref<12x512xf32, #tpu.memory_space<vmem>>, vector<2x512xf32>
    %105 = arith.truncf %102 : vector<2x128xf32> to vector<2x128xbf16>
    %cst_84 = arith.constant dense<0.000000e+00> : vector<2x512xf32>
    %106 = tpu.matmul %105, %101, %cst_84 {dimension_numbers = #tpu.dot_dimension_numbers<[1], [0], [0], [1], [0, 0, 1, 1], [], []>} : vector<2x128xbf16>, vector<128x512xbf16>, vector<2x512xf32> -> vector<2x512xf32>
    %107 = arith.addf %104, %106 : vector<2x512xf32>
    %108 = vector.extract_strided_slice %107 {offsets = [0, 0], sizes = [2, 128], strides = [1, 1]} : vector<2x512xf32> to vector<2x128xf32>
    %109 = arith.negf %108 : vector<2x128xf32>
    %110 = math.exp %109 : vector<2x128xf32>
    %cst_85 = arith.constant 1.000000e+00 : f32
    %111 = vector.broadcast %cst_85 : f32 to vector<2x128xf32>
    %112 = arith.addf %111, %110 : vector<2x128xf32>
    %113 = arith.divf %111, %112 : vector<2x128xf32>
    %114 = vector.extract_strided_slice %107 {offsets = [0, 128], sizes = [2, 128], strides = [1, 1]} : vector<2x512xf32> to vector<2x128xf32>
    %115 = arith.negf %114 : vector<2x128xf32>
    %116 = math.exp %115 : vector<2x128xf32>
    %cst_86 = arith.constant 1.000000e+00 : f32
    %117 = vector.broadcast %cst_86 : f32 to vector<2x128xf32>
    %118 = arith.addf %117, %116 : vector<2x128xf32>
    %119 = arith.divf %117, %118 : vector<2x128xf32>
    %120 = vector.extract_strided_slice %107 {offsets = [0, 256], sizes = [2, 128], strides = [1, 1]} : vector<2x512xf32> to vector<2x128xf32>
    %121 = math.tanh %120 : vector<2x128xf32>
    %122 = vector.extract_strided_slice %107 {offsets = [0, 384], sizes = [2, 128], strides = [1, 1]} : vector<2x512xf32> to vector<2x128xf32>
    %123 = arith.negf %122 : vector<2x128xf32>
    %124 = math.exp %123 : vector<2x128xf32>
    %cst_87 = arith.constant 1.000000e+00 : f32
    %125 = vector.broadcast %cst_87 : f32 to vector<2x128xf32>
    %126 = arith.addf %125, %124 : vector<2x128xf32>
    %127 = arith.divf %125, %126 : vector<2x128xf32>
    %128 = arith.mulf %119, %103 : vector<2x128xf32>
    %129 = arith.mulf %113, %121 : vector<2x128xf32>
    %130 = arith.addf %128, %129 : vector<2x128xf32>
    %131 = math.tanh %130 : vector<2x128xf32>
    %132 = arith.mulf %127, %131 : vector<2x128xf32>
    %c0_88 = arith.constant 0 : index
    %c0_89 = arith.constant 0 : index
    %133 = vector.load %arg19[%c0_88, %c0_89] : memref<12x128xf32, #tpu.memory_space<vmem>>, vector<2x128xf32>
    tpu.vector_store %arg19[%c0_88, %c0_89], %132 {strides = array<i32>} : memref<12x128xf32, #tpu.memory_space<vmem>>, vector<2x128xf32>,
    %c2_90 = arith.constant 2 : index
    %c0_91 = arith.constant 0 : index
    %134 = vector.load %arg17[%c2_90, %c0_91] : memref<12x512xf32, #tpu.memory_space<vmem>>, vector<2x512xf32>
    %135 = arith.truncf %132 : vector<2x128xf32> to vector<2x128xbf16>
    %cst_92 = arith.constant dense<0.000000e+00> : vector<2x512xf32>
    %136 = tpu.matmul %135, %101, %cst_92 {dimension_numbers = #tpu.dot_dimension_numbers<[1], [0], [0], [1], [0, 0, 1, 1], [], []>} : vector<2x128xbf16>, vector<128x512xbf16>, vector<2x512xf32> -> vector<2x512xf32>
    %137 = arith.addf %134, %136 : vector<2x512xf32>
    %138 = vector.extract_strided_slice %137 {offsets = [0, 0], sizes = [2, 128], strides = [1, 1]} : vector<2x512xf32> to vector<2x128xf32>
    %139 = arith.negf %138 : vector<2x128xf32>
    %140 = math.exp %139 : vector<2x128xf32>
    %cst_93 = arith.constant 1.000000e+00 : f32
    %141 = vector.broadcast %cst_93 : f32 to vector<2x128xf32>
    %142 = arith.addf %141, %140 : vector<2x128xf32>
    %143 = arith.divf %141, %142 : vector<2x128xf32>
    %144 = vector.extract_strided_slice %137 {offsets = [0, 128], sizes = [2, 128], strides = [1, 1]} : vector<2x512xf32> to vector<2x128xf32>
    %145 = arith.negf %144 : vector<2x128xf32>
    %146 = math.exp %145 : vector<2x128xf32>
    %cst_94 = arith.constant 1.000000e+00 : f32
    %147 = vector.broadcast %cst_94 : f32 to vector<2x128xf32>
    %148 = arith.addf %147, %146 : vector<2x128xf32>
    %149 = arith.divf %147, %148 : vector<2x128xf32>
    %150 = vector.extract_strided_slice %137 {offsets = [0, 256], sizes = [2, 128], strides = [1, 1]} : vector<2x512xf32> to vector<2x128xf32>
    %151 = math.tanh %150 : vector<2x128xf32>
    %152 = vector.extract_strided_slice %137 {offsets = [0, 384], sizes = [2, 128], strides = [1, 1]} : vector<2x512xf32> to vector<2x128xf32>
    %153 = arith.negf %152 : vector<2x128xf32>
    %154 = math.exp %153 : vector<2x128xf32>
    %cst_95 = arith.constant 1.000000e+00 : f32
    %155 = vector.broadcast %cst_95 : f32 to vector<2x128xf32>
    %156 = arith.addf %155, %154 : vector<2x128xf32>
    %157 = arith.divf %155, %156 : vector<2x128xf32>
    %158 = arith.mulf %149, %130 : vector<2x128xf32>
    %159 = arith.mulf %143, %151 : vector<2x128xf32>
    %160 = arith.addf %158, %159 : vector<2x128xf32>
    %161 = math.tanh %160 : vector<2x128xf32>
    %162 = arith.mulf %157, %161 : vector<2x128xf32>
    %c2_96 = arith.constant 2 : index
    %c0_97 = arith.constant 0 : index
    %163 = vector.load %arg19[%c2_96, %c0_97] : memref<12x128xf32, #tpu.memory_space<vmem>>, vector<2x128xf32>
    tpu.vector_store %arg19[%c2_96, %c0_97], %162 {strides = array<i32>} : memref<12x128xf32, #tpu.memory_space<vmem>>, vector<2x128xf32>,
    %c4 = arith.constant 4 : index
    %c0_98 = arith.constant 0 : index
    %164 = vector.load %arg17[%c4, %c0_98] : memref<12x512xf32, #tpu.memory_space<vmem>>, vector<2x512xf32>
    %165 = arith.truncf %162 : vector<2x128xf32> to vector<2x128xbf16>
    %cst_99 = arith.constant dense<0.000000e+00> : vector<2x512xf32>
    %166 = tpu.matmul %165, %101, %cst_99 {dimension_numbers = #tpu.dot_dimension_numbers<[1], [0], [0], [1], [0, 0, 1, 1], [], []>} : vector<2x128xbf16>, vector<128x512xbf16>, vector<2x512xf32> -> vector<2x512xf32>
    %167 = arith.addf %164, %166 : vector<2x512xf32>
    %168 = vector.extract_strided_slice %167 {offsets = [0, 0], sizes = [2, 128], strides = [1, 1]} : vector<2x512xf32> to vector<2x128xf32>
    %169 = arith.negf %168 : vector<2x128xf32>
    %170 = math.exp %169 : vector<2x128xf32>
    %cst_100 = arith.constant 1.000000e+00 : f32
    %171 = vector.broadcast %cst_100 : f32 to vector<2x128xf32>
    %172 = arith.addf %171, %170 : vector<2x128xf32>
    %173 = arith.divf %171, %172 : vector<2x128xf32>
    %174 = vector.extract_strided_slice %167 {offsets = [0, 128], sizes = [2, 128], strides = [1, 1]} : vector<2x512xf32> to vector<2x128xf32>
    %175 = arith.negf %174 : vector<2x128xf32>
    %176 = math.exp %175 : vector<2x128xf32>
    %cst_101 = arith.constant 1.000000e+00 : f32
    %177 = vector.broadcast %cst_101 : f32 to vector<2x128xf32>
    %178 = arith.addf %177, %176 : vector<2x128xf32>
    %179 = arith.divf %177, %178 : vector<2x128xf32>
    %180 = vector.extract_strided_slice %167 {offsets = [0, 256], sizes = [2, 128], strides = [1, 1]} : vector<2x512xf32> to vector<2x128xf32>
    %181 = math.tanh %180 : vector<2x128xf32>
    %182 = vector.extract_strided_slice %167 {offsets = [0, 384], sizes = [2, 128], strides = [1, 1]} : vector<2x512xf32> to vector<2x128xf32>
    %183 = arith.negf %182 : vector<2x128xf32>
    %184 = math.exp %183 : vector<2x128xf32>
    %cst_102 = arith.constant 1.000000e+00 : f32
    %185 = vector.broadcast %cst_102 : f32 to vector<2x128xf32>
    %186 = arith.addf %185, %184 : vector<2x128xf32>
    %187 = arith.divf %185, %186 : vector<2x128xf32>
    %188 = arith.mulf %179, %160 : vector<2x128xf32>
    %189 = arith.mulf %173, %181 : vector<2x128xf32>
    %190 = arith.addf %188, %189 : vector<2x128xf32>
    %191 = math.tanh %190 : vector<2x128xf32>
    %192 = arith.mulf %187, %191 : vector<2x128xf32>
    %c4_103 = arith.constant 4 : index
    %c0_104 = arith.constant 0 : index
    %193 = vector.load %arg19[%c4_103, %c0_104] : memref<12x128xf32, #tpu.memory_space<vmem>>, vector<2x128xf32>
    tpu.vector_store %arg19[%c4_103, %c0_104], %192 {strides = array<i32>} : memref<12x128xf32, #tpu.memory_space<vmem>>, vector<2x128xf32>,
    %c6 = arith.constant 6 : index
    %c0_105 = arith.constant 0 : index
    %194 = vector.load %arg17[%c6, %c0_105] : memref<12x512xf32, #tpu.memory_space<vmem>>, vector<2x512xf32>
    %195 = arith.truncf %192 : vector<2x128xf32> to vector<2x128xbf16>
    %cst_106 = arith.constant dense<0.000000e+00> : vector<2x512xf32>
    %196 = tpu.matmul %195, %101, %cst_106 {dimension_numbers = #tpu.dot_dimension_numbers<[1], [0], [0], [1], [0, 0, 1, 1], [], []>} : vector<2x128xbf16>, vector<128x512xbf16>, vector<2x512xf32> -> vector<2x512xf32>
    %197 = arith.addf %194, %196 : vector<2x512xf32>
    %198 = vector.extract_strided_slice %197 {offsets = [0, 0], sizes = [2, 128], strides = [1, 1]} : vector<2x512xf32> to vector<2x128xf32>
    %199 = arith.negf %198 : vector<2x128xf32>
    %200 = math.exp %199 : vector<2x128xf32>
    %cst_107 = arith.constant 1.000000e+00 : f32
    %201 = vector.broadcast %cst_107 : f32 to vector<2x128xf32>
    %202 = arith.addf %201, %200 : vector<2x128xf32>
    %203 = arith.divf %201, %202 : vector<2x128xf32>
    %204 = vector.extract_strided_slice %197 {offsets = [0, 128], sizes = [2, 128], strides = [1, 1]} : vector<2x512xf32> to vector<2x128xf32>
    %205 = arith.negf %204 : vector<2x128xf32>
    %206 = math.exp %205 : vector<2x128xf32>
    %cst_108 = arith.constant 1.000000e+00 : f32
    %207 = vector.broadcast %cst_108 : f32 to vector<2x128xf32>
    %208 = arith.addf %207, %206 : vector<2x128xf32>
    %209 = arith.divf %207, %208 : vector<2x128xf32>
    %210 = vector.extract_strided_slice %197 {offsets = [0, 256], sizes = [2, 128], strides = [1, 1]} : vector<2x512xf32> to vector<2x128xf32>
    %211 = math.tanh %210 : vector<2x128xf32>
    %212 = vector.extract_strided_slice %197 {offsets = [0, 384], sizes = [2, 128], strides = [1, 1]} : vector<2x512xf32> to vector<2x128xf32>
    %213 = arith.negf %212 : vector<2x128xf32>
    %214 = math.exp %213 : vector<2x128xf32>
    %cst_109 = arith.constant 1.000000e+00 : f32
    %215 = vector.broadcast %cst_109 : f32 to vector<2x128xf32>
    %216 = arith.addf %215, %214 : vector<2x128xf32>
    %217 = arith.divf %215, %216 : vector<2x128xf32>
    %218 = arith.mulf %209, %190 : vector<2x128xf32>
    %219 = arith.mulf %203, %211 : vector<2x128xf32>
    %220 = arith.addf %218, %219 : vector<2x128xf32>
    %221 = math.tanh %220 : vector<2x128xf32>
    %222 = arith.mulf %217, %221 : vector<2x128xf32>
    %c6_110 = arith.constant 6 : index
    %c0_111 = arith.constant 0 : index
    %223 = vector.load %arg19[%c6_110, %c0_111] : memref<12x128xf32, #tpu.memory_space<vmem>>, vector<2x128xf32>
    tpu.vector_store %arg19[%c6_110, %c0_111], %222 {strides = array<i32>} : memref<12x128xf32, #tpu.memory_space<vmem>>, vector<2x128xf32>,
    %c8 = arith.constant 8 : index
    %c0_112 = arith.constant 0 : index
    %224 = vector.load %arg17[%c8, %c0_112] : memref<12x512xf32, #tpu.memory_space<vmem>>, vector<2x512xf32>
    %225 = arith.truncf %222 : vector<2x128xf32> to vector<2x128xbf16>
    %cst_113 = arith.constant dense<0.000000e+00> : vector<2x512xf32>
    %226 = tpu.matmul %225, %101, %cst_113 {dimension_numbers = #tpu.dot_dimension_numbers<[1], [0], [0], [1], [0, 0, 1, 1], [], []>} : vector<2x128xbf16>, vector<128x512xbf16>, vector<2x512xf32> -> vector<2x512xf32>
    %227 = arith.addf %224, %226 : vector<2x512xf32>
    %228 = vector.extract_strided_slice %227 {offsets = [0, 0], sizes = [2, 128], strides = [1, 1]} : vector<2x512xf32> to vector<2x128xf32>
    %229 = arith.negf %228 : vector<2x128xf32>
    %230 = math.exp %229 : vector<2x128xf32>
    %cst_114 = arith.constant 1.000000e+00 : f32
    %231 = vector.broadcast %cst_114 : f32 to vector<2x128xf32>
    %232 = arith.addf %231, %230 : vector<2x128xf32>
    %233 = arith.divf %231, %232 : vector<2x128xf32>
    %234 = vector.extract_strided_slice %227 {offsets = [0, 128], sizes = [2, 128], strides = [1, 1]} : vector<2x512xf32> to vector<2x128xf32>
    %235 = arith.negf %234 : vector<2x128xf32>
    %236 = math.exp %235 : vector<2x128xf32>
    %cst_115 = arith.constant 1.000000e+00 : f32
    %237 = vector.broadcast %cst_115 : f32 to vector<2x128xf32>
    %238 = arith.addf %237, %236 : vector<2x128xf32>
    %239 = arith.divf %237, %238 : vector<2x128xf32>
    %240 = vector.extract_strided_slice %227 {offsets = [0, 256], sizes = [2, 128], strides = [1, 1]} : vector<2x512xf32> to vector<2x128xf32>
    %241 = math.tanh %240 : vector<2x128xf32>
    %242 = vector.extract_strided_slice %227 {offsets = [0, 384], sizes = [2, 128], strides = [1, 1]} : vector<2x512xf32> to vector<2x128xf32>
    %243 = arith.negf %242 : vector<2x128xf32>
    %244 = math.exp %243 : vector<2x128xf32>
    %cst_116 = arith.constant 1.000000e+00 : f32
    %245 = vector.broadcast %cst_116 : f32 to vector<2x128xf32>
    %246 = arith.addf %245, %244 : vector<2x128xf32>
    %247 = arith.divf %245, %246 : vector<2x128xf32>
    %248 = arith.mulf %239, %220 : vector<2x128xf32>
    %249 = arith.mulf %233, %241 : vector<2x128xf32>
    %250 = arith.addf %248, %249 : vector<2x128xf32>
    %251 = math.tanh %250 : vector<2x128xf32>
    %252 = arith.mulf %247, %251 : vector<2x128xf32>
    %c8_117 = arith.constant 8 : index
    %c0_118 = arith.constant 0 : index
    %253 = vector.load %arg19[%c8_117, %c0_118] : memref<12x128xf32, #tpu.memory_space<vmem>>, vector<2x128xf32>
    tpu.vector_store %arg19[%c8_117, %c0_118], %252 {strides = array<i32>} : memref<12x128xf32, #tpu.memory_space<vmem>>, vector<2x128xf32>,
    %c10 = arith.constant 10 : index
    %c0_119 = arith.constant 0 : index
    %254 = vector.load %arg17[%c10, %c0_119] : memref<12x512xf32, #tpu.memory_space<vmem>>, vector<2x512xf32>
    %255 = arith.truncf %252 : vector<2x128xf32> to vector<2x128xbf16>
    %cst_120 = arith.constant dense<0.000000e+00> : vector<2x512xf32>
    %256 = tpu.matmul %255, %101, %cst_120 {dimension_numbers = #tpu.dot_dimension_numbers<[1], [0], [0], [1], [0, 0, 1, 1], [], []>} : vector<2x128xbf16>, vector<128x512xbf16>, vector<2x512xf32> -> vector<2x512xf32>
    %257 = arith.addf %254, %256 : vector<2x512xf32>
    %258 = vector.extract_strided_slice %257 {offsets = [0, 0], sizes = [2, 128], strides = [1, 1]} : vector<2x512xf32> to vector<2x128xf32>
    %259 = arith.negf %258 : vector<2x128xf32>
    %260 = math.exp %259 : vector<2x128xf32>
    %cst_121 = arith.constant 1.000000e+00 : f32
    %261 = vector.broadcast %cst_121 : f32 to vector<2x128xf32>
    %262 = arith.addf %261, %260 : vector<2x128xf32>
    %263 = arith.divf %261, %262 : vector<2x128xf32>
    %264 = vector.extract_strided_slice %257 {offsets = [0, 128], sizes = [2, 128], strides = [1, 1]} : vector<2x512xf32> to vector<2x128xf32>
    %265 = arith.negf %264 : vector<2x128xf32>
    %266 = math.exp %265 : vector<2x128xf32>
    %cst_122 = arith.constant 1.000000e+00 : f32
    %267 = vector.broadcast %cst_122 : f32 to vector<2x128xf32>
    %268 = arith.addf %267, %266 : vector<2x128xf32>
    %269 = arith.divf %267, %268 : vector<2x128xf32>
    %270 = vector.extract_strided_slice %257 {offsets = [0, 256], sizes = [2, 128], strides = [1, 1]} : vector<2x512xf32> to vector<2x128xf32>
    %271 = math.tanh %270 : vector<2x128xf32>
    %272 = vector.extract_strided_slice %257 {offsets = [0, 384], sizes = [2, 128], strides = [1, 1]} : vector<2x512xf32> to vector<2x128xf32>
    %273 = arith.negf %272 : vector<2x128xf32>
    %274 = math.exp %273 : vector<2x128xf32>
    %cst_123 = arith.constant 1.000000e+00 : f32
    %275 = vector.broadcast %cst_123 : f32 to vector<2x128xf32>
    %276 = arith.addf %275, %274 : vector<2x128xf32>
    %277 = arith.divf %275, %276 : vector<2x128xf32>
    %278 = arith.mulf %269, %250 : vector<2x128xf32>
    %279 = arith.mulf %263, %271 : vector<2x128xf32>
    %280 = arith.addf %278, %279 : vector<2x128xf32>
    %281 = math.tanh %280 : vector<2x128xf32>
    %282 = arith.mulf %277, %281 : vector<2x128xf32>
    %c10_124 = arith.constant 10 : index
    %c0_125 = arith.constant 0 : index
    %283 = vector.load %arg19[%c10_124, %c0_125] : memref<12x128xf32, #tpu.memory_space<vmem>>, vector<2x128xf32>
    tpu.vector_store %arg19[%c10_124, %c0_125], %282 {strides = array<i32>} : memref<12x128xf32, #tpu.memory_space<vmem>>, vector<2x128xf32>,
    %c0_126 = arith.constant 0 : index
    %c0_127 = arith.constant 0 : index
    %284 = vector.load %arg19[%c0_126, %c0_127] : memref<12x128xf32, #tpu.memory_space<vmem>>, vector<12x128xf32>
    %285 = arith.truncf %284 : vector<12x128xf32> to vector<12x128xbf16>
    %c1_128 = arith.constant 1 : index
    %c0_129 = arith.constant 0 : index
    %c0_130 = arith.constant 0 : index
    %286 = vector.load %arg6[%c1_128, %c0_129, %c0_130] : memref<3x128x512xbf16, #tpu.memory_space<vmem>>, vector<1x128x512xbf16>
    %287 = vector.shape_cast %286 : vector<1x128x512xbf16> to vector<128x512xbf16>
    %cst_131 = arith.constant dense<0.000000e+00> : vector<12x512xf32>
    %288 = tpu.matmul %285, %287, %cst_131 {dimension_numbers = #tpu.dot_dimension_numbers<[1], [0], [0], [1], [0, 0, 1, 1], [], []>} : vector<12x128xbf16>, vector<128x512xbf16>, vector<12x512xf32> -> vector<12x512xf32>
    %c1_132 = arith.constant 1 : index
    %c0_133 = arith.constant 0 : index
    %289 = vector.load %arg7[%c1_132, %c0_133] : memref<2x512xf32, #tpu.memory_space<vmem>>, vector<1x512xf32>
    %290 = vector.broadcast %289 : vector<1x512xf32> to vector<12x512xf32>
    %291 = arith.addf %288, %290 : vector<12x512xf32>
    %c0_134 = arith.constant 0 : index
    %c0_135 = arith.constant 0 : index
    %292 = vector.load %arg18[%c0_134, %c0_135] : memref<12x512xf32, #tpu.memory_space<vmem>>, vector<12x512xf32>
    tpu.vector_store %arg18[%c0_134, %c0_135], %291 {strides = array<i32>} : memref<12x512xf32, #tpu.memory_space<vmem>>, vector<12x512xf32>,
    %c2_136 = arith.constant 2 : index
    %c0_137 = arith.constant 0 : index
    %c0_138 = arith.constant 0 : index
    %293 = vector.load %arg6[%c2_136, %c0_137, %c0_138] : memref<3x128x512xbf16, #tpu.memory_space<vmem>>, vector<1x128x512xbf16>
    %294 = vector.shape_cast %293 : vector<1x128x512xbf16> to vector<128x512xbf16>
    %cst_139 = arith.constant 0.000000e+00 : f32
    %295 = vector.broadcast %cst_139 : f32 to vector<2x128xf32>
    %cst_140 = arith.constant 0.000000e+00 : f32
    %296 = vector.broadcast %cst_140 : f32 to vector<2x128xf32>
    %c0_141 = arith.constant 0 : index
    %c0_142 = arith.constant 0 : index
    %297 = vector.load %arg18[%c0_141, %c0_142] : memref<12x512xf32, #tpu.memory_space<vmem>>, vector<2x512xf32>
    %298 = arith.truncf %295 : vector<2x128xf32> to vector<2x128xbf16>
    %cst_143 = arith.constant dense<0.000000e+00> : vector<2x512xf32>
    %299 = tpu.matmul %298, %294, %cst_143 {dimension_numbers = #tpu.dot_dimension_numbers<[1], [0], [0], [1], [0, 0, 1, 1], [], []>} : vector<2x128xbf16>, vector<128x512xbf16>, vector<2x512xf32> -> vector<2x512xf32>
    %300 = arith.addf %297, %299 : vector<2x512xf32>
    %301 = vector.extract_strided_slice %300 {offsets = [0, 0], sizes = [2, 128], strides = [1, 1]} : vector<2x512xf32> to vector<2x128xf32>
    %302 = arith.negf %301 : vector<2x128xf32>
    %303 = math.exp %302 : vector<2x128xf32>
    %cst_144 = arith.constant 1.000000e+00 : f32
    %304 = vector.broadcast %cst_144 : f32 to vector<2x128xf32>
    %305 = arith.addf %304, %303 : vector<2x128xf32>
    %306 = arith.divf %304, %305 : vector<2x128xf32>
    %307 = vector.extract_strided_slice %300 {offsets = [0, 128], sizes = [2, 128], strides = [1, 1]} : vector<2x512xf32> to vector<2x128xf32>
    %308 = arith.negf %307 : vector<2x128xf32>
    %309 = math.exp %308 : vector<2x128xf32>
    %cst_145 = arith.constant 1.000000e+00 : f32
    %310 = vector.broadcast %cst_145 : f32 to vector<2x128xf32>
    %311 = arith.addf %310, %309 : vector<2x128xf32>
    %312 = arith.divf %310, %311 : vector<2x128xf32>
    %313 = vector.extract_strided_slice %300 {offsets = [0, 256], sizes = [2, 128], strides = [1, 1]} : vector<2x512xf32> to vector<2x128xf32>
    %314 = math.tanh %313 : vector<2x128xf32>
    %315 = vector.extract_strided_slice %300 {offsets = [0, 384], sizes = [2, 128], strides = [1, 1]} : vector<2x512xf32> to vector<2x128xf32>
    %316 = arith.negf %315 : vector<2x128xf32>
    %317 = math.exp %316 : vector<2x128xf32>
    %cst_146 = arith.constant 1.000000e+00 : f32
    %318 = vector.broadcast %cst_146 : f32 to vector<2x128xf32>
    %319 = arith.addf %318, %317 : vector<2x128xf32>
    %320 = arith.divf %318, %319 : vector<2x128xf32>
    %321 = arith.mulf %312, %296 : vector<2x128xf32>
    %322 = arith.mulf %306, %314 : vector<2x128xf32>
    %323 = arith.addf %321, %322 : vector<2x128xf32>
    %324 = math.tanh %323 : vector<2x128xf32>
    %325 = arith.mulf %320, %324 : vector<2x128xf32>
    %c0_147 = arith.constant 0 : index
    %c0_148 = arith.constant 0 : index
    %326 = vector.load %arg20[%c0_147, %c0_148] : memref<12x128xf32, #tpu.memory_space<vmem>>, vector<2x128xf32>
    tpu.vector_store %arg20[%c0_147, %c0_148], %325 {strides = array<i32>} : memref<12x128xf32, #tpu.memory_space<vmem>>, vector<2x128xf32>,
    %c2_149 = arith.constant 2 : index
    %c0_150 = arith.constant 0 : index
    %327 = vector.load %arg18[%c2_149, %c0_150] : memref<12x512xf32, #tpu.memory_space<vmem>>, vector<2x512xf32>
    %328 = arith.truncf %325 : vector<2x128xf32> to vector<2x128xbf16>
    %cst_151 = arith.constant dense<0.000000e+00> : vector<2x512xf32>
    %329 = tpu.matmul %328, %294, %cst_151 {dimension_numbers = #tpu.dot_dimension_numbers<[1], [0], [0], [1], [0, 0, 1, 1], [], []>} : vector<2x128xbf16>, vector<128x512xbf16>, vector<2x512xf32> -> vector<2x512xf32>
    %330 = arith.addf %327, %329 : vector<2x512xf32>
    %331 = vector.extract_strided_slice %330 {offsets = [0, 0], sizes = [2, 128], strides = [1, 1]} : vector<2x512xf32> to vector<2x128xf32>
    %332 = arith.negf %331 : vector<2x128xf32>
    %333 = math.exp %332 : vector<2x128xf32>
    %cst_152 = arith.constant 1.000000e+00 : f32
    %334 = vector.broadcast %cst_152 : f32 to vector<2x128xf32>
    %335 = arith.addf %334, %333 : vector<2x128xf32>
    %336 = arith.divf %334, %335 : vector<2x128xf32>
    %337 = vector.extract_strided_slice %330 {offsets = [0, 128], sizes = [2, 128], strides = [1, 1]} : vector<2x512xf32> to vector<2x128xf32>
    %338 = arith.negf %337 : vector<2x128xf32>
    %339 = math.exp %338 : vector<2x128xf32>
    %cst_153 = arith.constant 1.000000e+00 : f32
    %340 = vector.broadcast %cst_153 : f32 to vector<2x128xf32>
    %341 = arith.addf %340, %339 : vector<2x128xf32>
    %342 = arith.divf %340, %341 : vector<2x128xf32>
    %343 = vector.extract_strided_slice %330 {offsets = [0, 256], sizes = [2, 128], strides = [1, 1]} : vector<2x512xf32> to vector<2x128xf32>
    %344 = math.tanh %343 : vector<2x128xf32>
    %345 = vector.extract_strided_slice %330 {offsets = [0, 384], sizes = [2, 128], strides = [1, 1]} : vector<2x512xf32> to vector<2x128xf32>
    %346 = arith.negf %345 : vector<2x128xf32>
    %347 = math.exp %346 : vector<2x128xf32>
    %cst_154 = arith.constant 1.000000e+00 : f32
    %348 = vector.broadcast %cst_154 : f32 to vector<2x128xf32>
    %349 = arith.addf %348, %347 : vector<2x128xf32>
    %350 = arith.divf %348, %349 : vector<2x128xf32>
    %351 = arith.mulf %342, %323 : vector<2x128xf32>
    %352 = arith.mulf %336, %344 : vector<2x128xf32>
    %353 = arith.addf %351, %352 : vector<2x128xf32>
    %354 = math.tanh %353 : vector<2x128xf32>
    %355 = arith.mulf %350, %354 : vector<2x128xf32>
    %c2_155 = arith.constant 2 : index
    %c0_156 = arith.constant 0 : index
    %356 = vector.load %arg20[%c2_155, %c0_156] : memref<12x128xf32, #tpu.memory_space<vmem>>, vector<2x128xf32>
    tpu.vector_store %arg20[%c2_155, %c0_156], %355 {strides = array<i32>} : memref<12x128xf32, #tpu.memory_space<vmem>>, vector<2x128xf32>,
    %c4_157 = arith.constant 4 : index
    %c0_158 = arith.constant 0 : index
    %357 = vector.load %arg18[%c4_157, %c0_158] : memref<12x512xf32, #tpu.memory_space<vmem>>, vector<2x512xf32>
    %358 = arith.truncf %355 : vector<2x128xf32> to vector<2x128xbf16>
    %cst_159 = arith.constant dense<0.000000e+00> : vector<2x512xf32>
    %359 = tpu.matmul %358, %294, %cst_159 {dimension_numbers = #tpu.dot_dimension_numbers<[1], [0], [0], [1], [0, 0, 1, 1], [], []>} : vector<2x128xbf16>, vector<128x512xbf16>, vector<2x512xf32> -> vector<2x512xf32>
    %360 = arith.addf %357, %359 : vector<2x512xf32>
    %361 = vector.extract_strided_slice %360 {offsets = [0, 0], sizes = [2, 128], strides = [1, 1]} : vector<2x512xf32> to vector<2x128xf32>
    %362 = arith.negf %361 : vector<2x128xf32>
    %363 = math.exp %362 : vector<2x128xf32>
    %cst_160 = arith.constant 1.000000e+00 : f32
    %364 = vector.broadcast %cst_160 : f32 to vector<2x128xf32>
    %365 = arith.addf %364, %363 : vector<2x128xf32>
    %366 = arith.divf %364, %365 : vector<2x128xf32>
    %367 = vector.extract_strided_slice %360 {offsets = [0, 128], sizes = [2, 128], strides = [1, 1]} : vector<2x512xf32> to vector<2x128xf32>
    %368 = arith.negf %367 : vector<2x128xf32>
    %369 = math.exp %368 : vector<2x128xf32>
    %cst_161 = arith.constant 1.000000e+00 : f32
    %370 = vector.broadcast %cst_161 : f32 to vector<2x128xf32>
    %371 = arith.addf %370, %369 : vector<2x128xf32>
    %372 = arith.divf %370, %371 : vector<2x128xf32>
    %373 = vector.extract_strided_slice %360 {offsets = [0, 256], sizes = [2, 128], strides = [1, 1]} : vector<2x512xf32> to vector<2x128xf32>
    %374 = math.tanh %373 : vector<2x128xf32>
    %375 = vector.extract_strided_slice %360 {offsets = [0, 384], sizes = [2, 128], strides = [1, 1]} : vector<2x512xf32> to vector<2x128xf32>
    %376 = arith.negf %375 : vector<2x128xf32>
    %377 = math.exp %376 : vector<2x128xf32>
    %cst_162 = arith.constant 1.000000e+00 : f32
    %378 = vector.broadcast %cst_162 : f32 to vector<2x128xf32>
    %379 = arith.addf %378, %377 : vector<2x128xf32>
    %380 = arith.divf %378, %379 : vector<2x128xf32>
    %381 = arith.mulf %372, %353 : vector<2x128xf32>
    %382 = arith.mulf %366, %374 : vector<2x128xf32>
    %383 = arith.addf %381, %382 : vector<2x128xf32>
    %384 = math.tanh %383 : vector<2x128xf32>
    %385 = arith.mulf %380, %384 : vector<2x128xf32>
    %c4_163 = arith.constant 4 : index
    %c0_164 = arith.constant 0 : index
    %386 = vector.load %arg20[%c4_163, %c0_164] : memref<12x128xf32, #tpu.memory_space<vmem>>, vector<2x128xf32>
    tpu.vector_store %arg20[%c4_163, %c0_164], %385 {strides = array<i32>} : memref<12x128xf32, #tpu.memory_space<vmem>>, vector<2x128xf32>,
    %c6_165 = arith.constant 6 : index
    %c0_166 = arith.constant 0 : index
    %387 = vector.load %arg18[%c6_165, %c0_166] : memref<12x512xf32, #tpu.memory_space<vmem>>, vector<2x512xf32>
    %388 = arith.truncf %385 : vector<2x128xf32> to vector<2x128xbf16>
    %cst_167 = arith.constant dense<0.000000e+00> : vector<2x512xf32>
    %389 = tpu.matmul %388, %294, %cst_167 {dimension_numbers = #tpu.dot_dimension_numbers<[1], [0], [0], [1], [0, 0, 1, 1], [], []>} : vector<2x128xbf16>, vector<128x512xbf16>, vector<2x512xf32> -> vector<2x512xf32>
    %390 = arith.addf %387, %389 : vector<2x512xf32>
    %391 = vector.extract_strided_slice %390 {offsets = [0, 0], sizes = [2, 128], strides = [1, 1]} : vector<2x512xf32> to vector<2x128xf32>
    %392 = arith.negf %391 : vector<2x128xf32>
    %393 = math.exp %392 : vector<2x128xf32>
    %cst_168 = arith.constant 1.000000e+00 : f32
    %394 = vector.broadcast %cst_168 : f32 to vector<2x128xf32>
    %395 = arith.addf %394, %393 : vector<2x128xf32>
    %396 = arith.divf %394, %395 : vector<2x128xf32>
    %397 = vector.extract_strided_slice %390 {offsets = [0, 128], sizes = [2, 128], strides = [1, 1]} : vector<2x512xf32> to vector<2x128xf32>
    %398 = arith.negf %397 : vector<2x128xf32>
    %399 = math.exp %398 : vector<2x128xf32>
    %cst_169 = arith.constant 1.000000e+00 : f32
    %400 = vector.broadcast %cst_169 : f32 to vector<2x128xf32>
    %401 = arith.addf %400, %399 : vector<2x128xf32>
    %402 = arith.divf %400, %401 : vector<2x128xf32>
    %403 = vector.extract_strided_slice %390 {offsets = [0, 256], sizes = [2, 128], strides = [1, 1]} : vector<2x512xf32> to vector<2x128xf32>
    %404 = math.tanh %403 : vector<2x128xf32>
    %405 = vector.extract_strided_slice %390 {offsets = [0, 384], sizes = [2, 128], strides = [1, 1]} : vector<2x512xf32> to vector<2x128xf32>
    %406 = arith.negf %405 : vector<2x128xf32>
    %407 = math.exp %406 : vector<2x128xf32>
    %cst_170 = arith.constant 1.000000e+00 : f32
    %408 = vector.broadcast %cst_170 : f32 to vector<2x128xf32>
    %409 = arith.addf %408, %407 : vector<2x128xf32>
    %410 = arith.divf %408, %409 : vector<2x128xf32>
    %411 = arith.mulf %402, %383 : vector<2x128xf32>
    %412 = arith.mulf %396, %404 : vector<2x128xf32>
    %413 = arith.addf %411, %412 : vector<2x128xf32>
    %414 = math.tanh %413 : vector<2x128xf32>
    %415 = arith.mulf %410, %414 : vector<2x128xf32>
    %c6_171 = arith.constant 6 : index
    %c0_172 = arith.constant 0 : index
    %416 = vector.load %arg20[%c6_171, %c0_172] : memref<12x128xf32, #tpu.memory_space<vmem>>, vector<2x128xf32>
    tpu.vector_store %arg20[%c6_171, %c0_172], %415 {strides = array<i32>} : memref<12x128xf32, #tpu.memory_space<vmem>>, vector<2x128xf32>,
    %c8_173 = arith.constant 8 : index
    %c0_174 = arith.constant 0 : index
    %417 = vector.load %arg18[%c8_173, %c0_174] : memref<12x512xf32, #tpu.memory_space<vmem>>, vector<2x512xf32>
    %418 = arith.truncf %415 : vector<2x128xf32> to vector<2x128xbf16>
    %cst_175 = arith.constant dense<0.000000e+00> : vector<2x512xf32>
    %419 = tpu.matmul %418, %294, %cst_175 {dimension_numbers = #tpu.dot_dimension_numbers<[1], [0], [0], [1], [0, 0, 1, 1], [], []>} : vector<2x128xbf16>, vector<128x512xbf16>, vector<2x512xf32> -> vector<2x512xf32>
    %420 = arith.addf %417, %419 : vector<2x512xf32>
    %421 = vector.extract_strided_slice %420 {offsets = [0, 0], sizes = [2, 128], strides = [1, 1]} : vector<2x512xf32> to vector<2x128xf32>
    %422 = arith.negf %421 : vector<2x128xf32>
    %423 = math.exp %422 : vector<2x128xf32>
    %cst_176 = arith.constant 1.000000e+00 : f32
    %424 = vector.broadcast %cst_176 : f32 to vector<2x128xf32>
    %425 = arith.addf %424, %423 : vector<2x128xf32>
    %426 = arith.divf %424, %425 : vector<2x128xf32>
    %427 = vector.extract_strided_slice %420 {offsets = [0, 128], sizes = [2, 128], strides = [1, 1]} : vector<2x512xf32> to vector<2x128xf32>
    %428 = arith.negf %427 : vector<2x128xf32>
    %429 = math.exp %428 : vector<2x128xf32>
    %cst_177 = arith.constant 1.000000e+00 : f32
    %430 = vector.broadcast %cst_177 : f32 to vector<2x128xf32>
    %431 = arith.addf %430, %429 : vector<2x128xf32>
    %432 = arith.divf %430, %431 : vector<2x128xf32>
    %433 = vector.extract_strided_slice %420 {offsets = [0, 256], sizes = [2, 128], strides = [1, 1]} : vector<2x512xf32> to vector<2x128xf32>
    %434 = math.tanh %433 : vector<2x128xf32>
    %435 = vector.extract_strided_slice %420 {offsets = [0, 384], sizes = [2, 128], strides = [1, 1]} : vector<2x512xf32> to vector<2x128xf32>
    %436 = arith.negf %435 : vector<2x128xf32>
    %437 = math.exp %436 : vector<2x128xf32>
    %cst_178 = arith.constant 1.000000e+00 : f32
    %438 = vector.broadcast %cst_178 : f32 to vector<2x128xf32>
    %439 = arith.addf %438, %437 : vector<2x128xf32>
    %440 = arith.divf %438, %439 : vector<2x128xf32>
    %441 = arith.mulf %432, %413 : vector<2x128xf32>
    %442 = arith.mulf %426, %434 : vector<2x128xf32>
    %443 = arith.addf %441, %442 : vector<2x128xf32>
    %444 = math.tanh %443 : vector<2x128xf32>
    %445 = arith.mulf %440, %444 : vector<2x128xf32>
    %c8_179 = arith.constant 8 : index
    %c0_180 = arith.constant 0 : index
    %446 = vector.load %arg20[%c8_179, %c0_180] : memref<12x128xf32, #tpu.memory_space<vmem>>, vector<2x128xf32>
    tpu.vector_store %arg20[%c8_179, %c0_180], %445 {strides = array<i32>} : memref<12x128xf32, #tpu.memory_space<vmem>>, vector<2x128xf32>,
    %c10_181 = arith.constant 10 : index
    %c0_182 = arith.constant 0 : index
    %447 = vector.load %arg18[%c10_181, %c0_182] : memref<12x512xf32, #tpu.memory_space<vmem>>, vector<2x512xf32>
    %448 = arith.truncf %445 : vector<2x128xf32> to vector<2x128xbf16>
    %cst_183 = arith.constant dense<0.000000e+00> : vector<2x512xf32>
    %449 = tpu.matmul %448, %294, %cst_183 {dimension_numbers = #tpu.dot_dimension_numbers<[1], [0], [0], [1], [0, 0, 1, 1], [], []>} : vector<2x128xbf16>, vector<128x512xbf16>, vector<2x512xf32> -> vector<2x512xf32>
    %450 = arith.addf %447, %449 : vector<2x512xf32>
    %451 = vector.extract_strided_slice %450 {offsets = [0, 0], sizes = [2, 128], strides = [1, 1]} : vector<2x512xf32> to vector<2x128xf32>
    %452 = arith.negf %451 : vector<2x128xf32>
    %453 = math.exp %452 : vector<2x128xf32>
    %cst_184 = arith.constant 1.000000e+00 : f32
    %454 = vector.broadcast %cst_184 : f32 to vector<2x128xf32>
    %455 = arith.addf %454, %453 : vector<2x128xf32>
    %456 = arith.divf %454, %455 : vector<2x128xf32>
    %457 = vector.extract_strided_slice %450 {offsets = [0, 128], sizes = [2, 128], strides = [1, 1]} : vector<2x512xf32> to vector<2x128xf32>
    %458 = arith.negf %457 : vector<2x128xf32>
    %459 = math.exp %458 : vector<2x128xf32>
    %cst_185 = arith.constant 1.000000e+00 : f32
    %460 = vector.broadcast %cst_185 : f32 to vector<2x128xf32>
    %461 = arith.addf %460, %459 : vector<2x128xf32>
    %462 = arith.divf %460, %461 : vector<2x128xf32>
    %463 = vector.extract_strided_slice %450 {offsets = [0, 256], sizes = [2, 128], strides = [1, 1]} : vector<2x512xf32> to vector<2x128xf32>
    %464 = math.tanh %463 : vector<2x128xf32>
    %465 = vector.extract_strided_slice %450 {offsets = [0, 384], sizes = [2, 128], strides = [1, 1]} : vector<2x512xf32> to vector<2x128xf32>
    %466 = arith.negf %465 : vector<2x128xf32>
    %467 = math.exp %466 : vector<2x128xf32>
    %cst_186 = arith.constant 1.000000e+00 : f32
    %468 = vector.broadcast %cst_186 : f32 to vector<2x128xf32>
    %469 = arith.addf %468, %467 : vector<2x128xf32>
    %470 = arith.divf %468, %469 : vector<2x128xf32>
    %471 = arith.mulf %462, %443 : vector<2x128xf32>
    %472 = arith.mulf %456, %464 : vector<2x128xf32>
    %473 = arith.addf %471, %472 : vector<2x128xf32>
    %474 = math.tanh %473 : vector<2x128xf32>
    %475 = arith.mulf %470, %474 : vector<2x128xf32>
    %c10_187 = arith.constant 10 : index
    %c0_188 = arith.constant 0 : index
    %476 = vector.load %arg20[%c10_187, %c0_188] : memref<12x128xf32, #tpu.memory_space<vmem>>, vector<2x128xf32>
    tpu.vector_store %arg20[%c10_187, %c0_188], %475 {strides = array<i32>} : memref<12x128xf32, #tpu.memory_space<vmem>>, vector<2x128xf32>,
    %c0_189 = arith.constant 0 : index
    %c0_190 = arith.constant 0 : index
    %477 = vector.load %arg20[%c0_189, %c0_190] : memref<12x128xf32, #tpu.memory_space<vmem>>, vector<12x128xf32>
    %478 = arith.truncf %477 : vector<12x128xf32> to vector<12x128xbf16>
    %c0_191 = arith.constant 0 : index
    %c128 = arith.constant 128 : index
    %479 = vector.load %arg8[%c0_191, %c128] : memref<128x576xbf16, #tpu.memory_space<vmem>>, vector<128x256xbf16>
    %cst_192 = arith.constant dense<0.000000e+00> : vector<12x256xf32>
    %480 = tpu.matmul %478, %479, %cst_192 {dimension_numbers = #tpu.dot_dimension_numbers<[1], [0], [0], [1], [0, 0, 1, 1], [], []>} : vector<12x128xbf16>, vector<128x256xbf16>, vector<12x256xf32> -> vector<12x256xf32>
    %c0_193 = arith.constant 0 : index
    %c128_194 = arith.constant 128 : index
    %481 = vector.load %arg9[%c0_193, %c128_194] : memref<5x512xf32, #tpu.memory_space<vmem>>, vector<1x256xf32>
    %482 = vector.broadcast %481 : vector<1x256xf32> to vector<12x256xf32>
    %483 = arith.addf %480, %482 : vector<12x256xf32>
    %484 = vector.extract_strided_slice %483 {offsets = [0, 0], sizes = [12, 128], strides = [1, 1]} : vector<12x256xf32> to vector<12x128xf32>
    %485 = vector.extract_strided_slice %483 {offsets = [0, 128], sizes = [12, 128], strides = [1, 1]} : vector<12x256xf32> to vector<12x128xf32>
    %c10_195 = arith.constant 10 : index
    %c0_196 = arith.constant 0 : index
    %486 = vector.load %arg20[%c10_195, %c0_196] : memref<12x128xf32, #tpu.memory_space<vmem>>, vector<2x128xf32>
    %487 = arith.truncf %486 : vector<2x128xf32> to vector<2x128xbf16>
    %c0_197 = arith.constant 0 : index
    %c0_198 = arith.constant 0 : index
    %488 = vector.load %arg8[%c0_197, %c0_198] : memref<128x576xbf16, #tpu.memory_space<vmem>>, vector<128x128xbf16>
    %cst_199 = arith.constant dense<0.000000e+00> : vector<2x128xf32>
    %489 = tpu.matmul %487, %488, %cst_199 {dimension_numbers = #tpu.dot_dimension_numbers<[1], [0], [0], [1], [0, 0, 1, 1], [], []>} : vector<2x128xbf16>, vector<128x128xbf16>, vector<2x128xf32> -> vector<2x128xf32>
    %c0_200 = arith.constant 0 : index
    %c0_201 = arith.constant 0 : index
    %490 = vector.load %arg9[%c0_200, %c0_201] : memref<5x512xf32, #tpu.memory_space<vmem>>, vector<1x128xf32>
    %491 = vector.broadcast %490 : vector<1x128xf32> to vector<2x128xf32>
    %492 = arith.addf %489, %491 : vector<2x128xf32>
    %cst_202 = arith.constant 0.176776692 : f32
    %493 = vector.broadcast %cst_202 : f32 to vector<2x128xf32>
    %494 = arith.mulf %492, %493 : vector<2x128xf32>
    %495 = tpu.iota {dimensions = array<i32: 0>} : vector<2x12xi32>
    %496 = tpu.iota {dimensions = array<i32: 1>} : vector<2x12xi32>
    %c2_i32 = arith.constant 2 : i32
    %c0_i32_203 = arith.constant 0 : i32
    %497 = arith.cmpi eq, %c2_i32, %c0_i32_203 : i32
    %c1_i32 = arith.constant 1 : i32
    %498 = arith.select %497, %c1_i32, %c2_i32 : i32
    %499 = vector.broadcast %498 : i32 to vector<2x12xi32>
    %500 = arith.remsi %496, %499 : vector<2x12xi32>
    %c0_i32_204 = arith.constant 0 : i32
    %501 = vector.broadcast %c0_i32_204 : i32 to vector<2x12xi32>
    %502 = arith.cmpi ne, %500, %501 : vector<2x12xi32>
    %c0_i32_205 = arith.constant 0 : i32
    %503 = vector.broadcast %c0_i32_205 : i32 to vector<2x12xi32>
    %504 = arith.cmpi slt, %500, %503 : vector<2x12xi32>
    %c0_i32_206 = arith.constant 0 : i32
    %505 = arith.cmpi slt, %498, %c0_i32_206 : i32
    %506 = vector.broadcast %505 : i1 to vector<2x12xi1>
    %507 = vector.broadcast %506 : vector<2x12xi1> to vector<2x12xi1>
    %508 = arith.xori %504, %507 : vector<2x12xi1>
    %509 = arith.andi %508, %502 : vector<2x12xi1>
    %510 = vector.broadcast %498 : i32 to vector<2x12xi32>
    %511 = arith.addi %500, %510 : vector<2x12xi32>
    %512 = arith.select %509, %511, %500 : vector<2x12xi1>, vector<2x12xi32>
    %513 = arith.cmpi eq, %495, %512 : vector<2x12xi32>
    %514 = vector.extract_strided_slice %494 {offsets = [0, 0], sizes = [2, 32], strides = [1, 1]} : vector<2x128xf32> to vector<2x32xf32>
    %515 = vector.extract_strided_slice %484 {offsets = [0, 0], sizes = [12, 32], strides = [1, 1]} : vector<12x128xf32> to vector<12x32xf32>
    %516 = vector.extract_strided_slice %485 {offsets = [0, 0], sizes = [12, 32], strides = [1, 1]} : vector<12x128xf32> to vector<12x32xf32>
    %cst_207 = arith.constant dense<0.000000e+00> : vector<2x12xf32>
    %517 = tpu.matmul %514, %515, %cst_207 {dimension_numbers = #tpu.dot_dimension_numbers<[1], [1], [0], [0], [0, 0, 1, 0], [], []>} : vector<2x32xf32>, vector<12x32xf32>, vector<2x12xf32> -> vector<2x12xf32>
    %cst_208 = arith.constant -1.000000e+30 : f32
    %518 = vector.broadcast %cst_208 : f32 to vector<2x12xf32>
    %519 = arith.select %513, %517, %518 : vector<2x12xi1>, vector<2x12xf32>
    %cst_209 = arith.constant dense<0xFF800000> : vector<2xf32>
    %520 = vector.multi_reduction <maximumf>, %519, %cst_209 [1] : vector<2x12xf32> to vector<2xf32>
    %521 = vector.shape_cast %520 : vector<2xf32> to vector<2x1xf32>
    %522 = vector.broadcast %521 : vector<2x1xf32> to vector<2x12xf32>
    %523 = arith.subf %519, %522 : vector<2x12xf32>
    %524 = math.exp %523 : vector<2x12xf32>
    %cst_210 = arith.constant dense<0.000000e+00> : vector<2xf32>
    %525 = vector.multi_reduction <add>, %524, %cst_210 [1] : vector<2x12xf32> to vector<2xf32>
    %526 = vector.shape_cast %525 : vector<2xf32> to vector<2x1xf32>
    %527 = tpu.reciprocal %526 {approx = true} : vector<2x1xf32> -> vector<2x1xf32>
    %528 = vector.broadcast %527 : vector<2x1xf32> to vector<2x12xf32>
    %529 = arith.mulf %524, %528 : vector<2x12xf32>
    %530 = arith.truncf %529 : vector<2x12xf32> to vector<2x12xbf16>
    %531 = arith.truncf %516 : vector<12x32xf32> to vector<12x32xbf16>
    %cst_211 = arith.constant dense<0.000000e+00> : vector<2x32xf32>
    %532 = tpu.matmul %530, %531, %cst_211 {dimension_numbers = #tpu.dot_dimension_numbers<[1], [0], [0], [1], [0, 0, 1, 1], [], []>} : vector<2x12xbf16>, vector<12x32xbf16>, vector<2x32xf32> -> vector<2x32xf32>
    %533 = vector.extract_strided_slice %494 {offsets = [0, 32], sizes = [2, 32], strides = [1, 1]} : vector<2x128xf32> to vector<2x32xf32>
    %534 = vector.extract_strided_slice %484 {offsets = [0, 32], sizes = [12, 32], strides = [1, 1]} : vector<12x128xf32> to vector<12x32xf32>
    %535 = vector.extract_strided_slice %485 {offsets = [0, 32], sizes = [12, 32], strides = [1, 1]} : vector<12x128xf32> to vector<12x32xf32>
    %cst_212 = arith.constant dense<0.000000e+00> : vector<2x12xf32>
    %536 = tpu.matmul %533, %534, %cst_212 {dimension_numbers = #tpu.dot_dimension_numbers<[1], [1], [0], [0], [0, 0, 1, 0], [], []>} : vector<2x32xf32>, vector<12x32xf32>, vector<2x12xf32> -> vector<2x12xf32>
    %cst_213 = arith.constant -1.000000e+30 : f32
    %537 = vector.broadcast %cst_213 : f32 to vector<2x12xf32>
    %538 = arith.select %513, %536, %537 : vector<2x12xi1>, vector<2x12xf32>
    %cst_214 = arith.constant dense<0xFF800000> : vector<2xf32>
    %539 = vector.multi_reduction <maximumf>, %538, %cst_214 [1] : vector<2x12xf32> to vector<2xf32>
    %540 = vector.shape_cast %539 : vector<2xf32> to vector<2x1xf32>
    %541 = vector.broadcast %540 : vector<2x1xf32> to vector<2x12xf32>
    %542 = arith.subf %538, %541 : vector<2x12xf32>
    %543 = math.exp %542 : vector<2x12xf32>
    %cst_215 = arith.constant dense<0.000000e+00> : vector<2xf32>
    %544 = vector.multi_reduction <add>, %543, %cst_215 [1] : vector<2x12xf32> to vector<2xf32>
    %545 = vector.shape_cast %544 : vector<2xf32> to vector<2x1xf32>
    %546 = tpu.reciprocal %545 {approx = true} : vector<2x1xf32> -> vector<2x1xf32>
    %547 = vector.broadcast %546 : vector<2x1xf32> to vector<2x12xf32>
    %548 = arith.mulf %543, %547 : vector<2x12xf32>
    %549 = arith.truncf %548 : vector<2x12xf32> to vector<2x12xbf16>
    %550 = arith.truncf %535 : vector<12x32xf32> to vector<12x32xbf16>
    %cst_216 = arith.constant dense<0.000000e+00> : vector<2x32xf32>
    %551 = tpu.matmul %549, %550, %cst_216 {dimension_numbers = #tpu.dot_dimension_numbers<[1], [0], [0], [1], [0, 0, 1, 1], [], []>} : vector<2x12xbf16>, vector<12x32xbf16>, vector<2x32xf32> -> vector<2x32xf32>
    %552 = vector.extract_strided_slice %494 {offsets = [0, 64], sizes = [2, 32], strides = [1, 1]} : vector<2x128xf32> to vector<2x32xf32>
    %553 = vector.extract_strided_slice %484 {offsets = [0, 64], sizes = [12, 32], strides = [1, 1]} : vector<12x128xf32> to vector<12x32xf32>
    %554 = vector.extract_strided_slice %485 {offsets = [0, 64], sizes = [12, 32], strides = [1, 1]} : vector<12x128xf32> to vector<12x32xf32>
    %cst_217 = arith.constant dense<0.000000e+00> : vector<2x12xf32>
    %555 = tpu.matmul %552, %553, %cst_217 {dimension_numbers = #tpu.dot_dimension_numbers<[1], [1], [0], [0], [0, 0, 1, 0], [], []>} : vector<2x32xf32>, vector<12x32xf32>, vector<2x12xf32> -> vector<2x12xf32>
    %cst_218 = arith.constant -1.000000e+30 : f32
    %556 = vector.broadcast %cst_218 : f32 to vector<2x12xf32>
    %557 = arith.select %513, %555, %556 : vector<2x12xi1>, vector<2x12xf32>
    %cst_219 = arith.constant dense<0xFF800000> : vector<2xf32>
    %558 = vector.multi_reduction <maximumf>, %557, %cst_219 [1] : vector<2x12xf32> to vector<2xf32>
    %559 = vector.shape_cast %558 : vector<2xf32> to vector<2x1xf32>
    %560 = vector.broadcast %559 : vector<2x1xf32> to vector<2x12xf32>
    %561 = arith.subf %557, %560 : vector<2x12xf32>
    %562 = math.exp %561 : vector<2x12xf32>
    %cst_220 = arith.constant dense<0.000000e+00> : vector<2xf32>
    %563 = vector.multi_reduction <add>, %562, %cst_220 [1] : vector<2x12xf32> to vector<2xf32>
    %564 = vector.shape_cast %563 : vector<2xf32> to vector<2x1xf32>
    %565 = tpu.reciprocal %564 {approx = true} : vector<2x1xf32> -> vector<2x1xf32>
    %566 = vector.broadcast %565 : vector<2x1xf32> to vector<2x12xf32>
    %567 = arith.mulf %562, %566 : vector<2x12xf32>
    %568 = arith.truncf %567 : vector<2x12xf32> to vector<2x12xbf16>
    %569 = arith.truncf %554 : vector<12x32xf32> to vector<12x32xbf16>
    %cst_221 = arith.constant dense<0.000000e+00> : vector<2x32xf32>
    %570 = tpu.matmul %568, %569, %cst_221 {dimension_numbers = #tpu.dot_dimension_numbers<[1], [0], [0], [1], [0, 0, 1, 1], [], []>} : vector<2x12xbf16>, vector<12x32xbf16>, vector<2x32xf32> -> vector<2x32xf32>
    %571 = vector.extract_strided_slice %494 {offsets = [0, 96], sizes = [2, 32], strides = [1, 1]} : vector<2x128xf32> to vector<2x32xf32>
    %572 = vector.extract_strided_slice %484 {offsets = [0, 96], sizes = [12, 32], strides = [1, 1]} : vector<12x128xf32> to vector<12x32xf32>
    %573 = vector.extract_strided_slice %485 {offsets = [0, 96], sizes = [12, 32], strides = [1, 1]} : vector<12x128xf32> to vector<12x32xf32>
    %cst_222 = arith.constant dense<0.000000e+00> : vector<2x12xf32>
    %574 = tpu.matmul %571, %572, %cst_222 {dimension_numbers = #tpu.dot_dimension_numbers<[1], [1], [0], [0], [0, 0, 1, 0], [], []>} : vector<2x32xf32>, vector<12x32xf32>, vector<2x12xf32> -> vector<2x12xf32>
    %cst_223 = arith.constant -1.000000e+30 : f32
    %575 = vector.broadcast %cst_223 : f32 to vector<2x12xf32>
    %576 = arith.select %513, %574, %575 : vector<2x12xi1>, vector<2x12xf32>
    %cst_224 = arith.constant dense<0xFF800000> : vector<2xf32>
    %577 = vector.multi_reduction <maximumf>, %576, %cst_224 [1] : vector<2x12xf32> to vector<2xf32>
    %578 = vector.shape_cast %577 : vector<2xf32> to vector<2x1xf32>
    %579 = vector.broadcast %578 : vector<2x1xf32> to vector<2x12xf32>
    %580 = arith.subf %576, %579 : vector<2x12xf32>
    %581 = math.exp %580 : vector<2x12xf32>
    %cst_225 = arith.constant dense<0.000000e+00> : vector<2xf32>
    %582 = vector.multi_reduction <add>, %581, %cst_225 [1] : vector<2x12xf32> to vector<2xf32>
    %583 = vector.shape_cast %582 : vector<2xf32> to vector<2x1xf32>
    %584 = tpu.reciprocal %583 {approx = true} : vector<2x1xf32> -> vector<2x1xf32>
    %585 = vector.broadcast %584 : vector<2x1xf32> to vector<2x12xf32>
    %586 = arith.mulf %581, %585 : vector<2x12xf32>
    %587 = arith.truncf %586 : vector<2x12xf32> to vector<2x12xbf16>
    %588 = arith.truncf %573 : vector<12x32xf32> to vector<12x32xbf16>
    %cst_226 = arith.constant dense<0.000000e+00> : vector<2x32xf32>
    %589 = tpu.matmul %587, %588, %cst_226 {dimension_numbers = #tpu.dot_dimension_numbers<[1], [0], [0], [1], [0, 0, 1, 1], [], []>} : vector<2x12xbf16>, vector<12x32xbf16>, vector<2x32xf32> -> vector<2x32xf32>
    %590 = tpu.concatenate %532, %551, %570, %589 in 1 : vector<2x32xf32>, vector<2x32xf32>, vector<2x32xf32>, vector<2x32xf32> -> vector<2x128xf32>
    %591 = arith.truncf %590 : vector<2x128xf32> to vector<2x128xbf16>
    %c0_227 = arith.constant 0 : index
    %c384 = arith.constant 384 : index
    %592 = vector.load %arg8[%c0_227, %c384] : memref<128x576xbf16, #tpu.memory_space<vmem>>, vector<128x128xbf16>
    %cst_228 = arith.constant dense<0.000000e+00> : vector<2x128xf32>
    %593 = tpu.matmul %591, %592, %cst_228 {dimension_numbers = #tpu.dot_dimension_numbers<[1], [0], [0], [1], [0, 0, 1, 1], [], []>} : vector<2x128xbf16>, vector<128x128xbf16>, vector<2x128xf32> -> vector<2x128xf32>
    %c1_229 = arith.constant 1 : index
    %c0_230 = arith.constant 0 : index
    %594 = vector.load %arg9[%c1_229, %c0_230] : memref<5x512xf32, #tpu.memory_space<vmem>>, vector<1x128xf32>
    %595 = vector.broadcast %594 : vector<1x128xf32> to vector<2x128xf32>
    %596 = arith.addf %593, %595 : vector<2x128xf32>
    %597 = arith.truncf %596 : vector<2x128xf32> to vector<2x128xbf16>
    %c0_231 = arith.constant 0 : index
    %c512_232 = arith.constant 512 : index
    %598 = vector.load %arg8[%c0_231, %c512_232] : memref<128x576xbf16, #tpu.memory_space<vmem>>, vector<128x64xbf16>
    %cst_233 = arith.constant dense<0.000000e+00> : vector<2x64xf32>
    %599 = tpu.matmul %597, %598, %cst_233 {dimension_numbers = #tpu.dot_dimension_numbers<[1], [0], [0], [1], [0, 0, 1, 1], [], []>} : vector<2x128xbf16>, vector<128x64xbf16>, vector<2x64xf32> -> vector<2x64xf32>
    %c2_234 = arith.constant 2 : index
    %c0_235 = arith.constant 0 : index
    %600 = vector.load %arg9[%c2_234, %c0_235] : memref<5x512xf32, #tpu.memory_space<vmem>>, vector<1x64xf32>
    %601 = vector.broadcast %600 : vector<1x64xf32> to vector<2x64xf32>
    %602 = arith.addf %599, %601 : vector<2x64xf32>
    %cst_236 = arith.constant 0.000000e+00 : f32
    %603 = vector.broadcast %cst_236 : f32 to vector<2x64xf32>
    %604 = arith.maximumf %602, %603 : vector<2x64xf32>
    %605 = arith.truncf %604 : vector<2x64xf32> to vector<2x64xbf16>
    %c0_237 = arith.constant 0 : index
    %c0_238 = arith.constant 0 : index
    %606 = vector.load %arg10[%c0_237, %c0_238] : memref<64x32xbf16, #tpu.memory_space<vmem>>, vector<64x32xbf16>
    %cst_239 = arith.constant dense<0.000000e+00> : vector<2x32xf32>
    %607 = tpu.matmul %605, %606, %cst_239 {dimension_numbers = #tpu.dot_dimension_numbers<[1], [0], [0], [1], [0, 0, 1, 1], [], []>} : vector<2x64xbf16>, vector<64x32xbf16>, vector<2x32xf32> -> vector<2x32xf32>
    %c3 = arith.constant 3 : index
    %c0_240 = arith.constant 0 : index
    %608 = vector.load %arg9[%c3, %c0_240] : memref<5x512xf32, #tpu.memory_space<vmem>>, vector<1x32xf32>
    %609 = vector.broadcast %608 : vector<1x32xf32> to vector<2x32xf32>
    %610 = arith.addf %607, %609 : vector<2x32xf32>
    %cst_241 = arith.constant 0.000000e+00 : f32
    %611 = vector.broadcast %cst_241 : f32 to vector<2x32xf32>
    %612 = arith.maximumf %610, %611 : vector<2x32xf32>
    %613 = arith.truncf %612 : vector<2x32xf32> to vector<2x32xbf16>
    %c0_242 = arith.constant 0 : index
    %c0_243 = arith.constant 0 : index
    %614 = vector.load %arg11[%c0_242, %c0_243] : memref<32x1xbf16, #tpu.memory_space<vmem>>, vector<32x1xbf16>
    %cst_244 = arith.constant dense<0.000000e+00> : vector<2x1xf32>
    %615 = tpu.matmul %613, %614, %cst_244 {dimension_numbers = #tpu.dot_dimension_numbers<[1], [0], [0], [1], [0, 0, 1, 1], [], []>} : vector<2x32xbf16>, vector<32x1xbf16>, vector<2x1xf32> -> vector<2x1xf32>
    %c4_245 = arith.constant 4 : index
    %c0_246 = arith.constant 0 : index
    %616 = vector.load %arg9[%c4_245, %c0_246] : memref<5x512xf32, #tpu.memory_space<vmem>>, vector<1x1xf32>
    %617 = vector.broadcast %616 : vector<1x1xf32> to vector<2x1xf32>
    %618 = arith.addf %615, %617 : vector<2x1xf32>
    %619 = arith.negf %618 : vector<2x1xf32>
    %620 = math.exp %619 : vector<2x1xf32>
    %cst_247 = arith.constant 1.000000e+00 : f32
    %621 = vector.broadcast %cst_247 : f32 to vector<2x1xf32>
    %622 = arith.addf %621, %620 : vector<2x1xf32>
    %623 = arith.divf %621, %622 : vector<2x1xf32>
    %c0_248 = arith.constant 0 : index
    %c0_249 = arith.constant 0 : index
    %624 = vector.load %arg12[%c0_248, %c0_249] : memref<2x1xf32, #tpu.memory_space<vmem>>, vector<2x1xf32>
    tpu.vector_store %arg12[%c0_248, %c0_249], %623 {strides = array<i32>} : memref<2x1xf32, #tpu.memory_space<vmem>>, vector<2x1xf32>,
    return
  }
}

</mosaic_0001>

<bundles_post_ra>
// kernel: forward.1
= control target key start
LH: loop header
LB: loop body
LE: loop exit
PB: predicated region body
PF: predicated region fallthrough
CT: control target
= control target key end

     0   :  { %17 = vsyncpa [#allocation11], 0  ;;  %s13304_s0 = inlined_call_operand.vmem [shape: bf16[160,8], index: 0, kind: input, shape index: {}]   ;;  %s13305_s1 = inlined_call_operand.hbm [shape: bf16[3,8,256], index: 1, kind: input, shape index: {}]   ;;  %s13306_s2 = inlined_call_operand.hbm [shape: f32[3,256], index: 2, kind: input, shape index: {}]   ;;  %s13307_s3 = inlined_call_operand.hbm [shape: bf16[3,256,512], index: 3, kind: input, shape index: {}]   ;;  %s13308_s4 = inlined_call_operand.hbm [shape: f32[3,512], index: 4, kind: input, shape index: {}]   ;;  %s13309_s5 = inlined_call_operand.hbm [shape: bf16[4096,512], index: 5, kind: input, shape index: {}]   ;;  %s13310_s6 = inlined_call_operand.hbm [shape: bf16[3,128,512], index: 6, kind: input, shape index: {}]   ;;  %s13311_s7 = inlined_call_operand.hbm [shape: f32[2,512], index: 7, kind: input, shape index: {}]   ;;  %s13312_s8 = inlined_call_operand.vmem [shape: bf16[128,576], index: 8, kind: input, shape index: {}]   ;;  %s13313_s9 = inlined_call_operand.hbm [shape: f32[5,512], index: 9, kind: input, shape index: {}]   ;;  %s13314_s10 = inlined_call_operand.vmem [shape: bf16[64,32], index: 10, kind: input, shape index: {}]   ;;  %s13315_s11 = inlined_call_operand.vmem [shape: bf16[32,1], index: 11, kind: input, shape index: {}]   ;;  %s13316_s12 = inlined_call_operand.vmem [shape: f32[2,1], index: 12, kind: output, shape index: {}]  }
   0x1   :  { %18 = vsyncpa [#allocation13], 0 }
   0x2   :  { %19 = vsyncpa [#allocation16], 0 }
   0x3   :  { %20 = vsyncpa [#allocation19], 0  ;;  %s11324_s21 = smov [#allocation12]   ;;  %s11325_s23 = smov [#allocation15]  }
   0x4   :  { %s41_s22 = sshll.u32 %s11324_s21, 4  ;;  %s63_s24 = sshll.u32 %s11325_s23, 4  ;;  %s42_s22 = int_to_ptr.vmem [resolvable:$true] %s41_s22  ;;  %s64_s24 = int_to_ptr.vmem [resolvable:$true] %s63_s24 }
   0x5   :  { %s11160_s27 = scalar_lea.hbm %s13306_s2, 128 }
   0x6   :  { %p11161_p0 = scmp.ne.s32.totalorder %s13306_s2, %s11160_s27  ;;  %p11164_p1 = scmp.lt.u32.totalorder %s11160_s27, %s13306_s2 }
   0x8   :  { %p11166_p2 = pnand %p11164_p1, %p11161_p0 }
   0xa   :  { %11169 = shalt.err (!%p11166_p2)
}
   0xb   :  { %s11170_s14 = scalar_lea.vmem %s42_s22, 128  ;;  %p11175_p4 = scmp.lt.s32.totalorder %s42_s22, %s42_s22 }
   0xc   :  { %p11171_p3 = scmp.ne.s32.totalorder %s42_s22, %s11170_s14  ;;  %p11176_p5 = scmp.lt.s32.totalorder %s11170_s14, %s11170_s14 }
   0xe   :  { %p11177_p6 = por %p11176_p5, %p11175_p4 }
  0x10   :  { %p11178_p7 = pnand %p11177_p6, %p11171_p3 }
  0x12   :  { %11181 = shalt.err (!%p11178_p7)
}
  0x13   :  { %44 = dma.hbm_to_vmem [thread:$0]  %s13306_s2, 128, %s42_s22, [#allocation13]  }
  0x14   :  { %s11182_s19 = scalar_lea.hbm %s13308_s4, 256 }
  0x15   :  { %p11183_p8 = scmp.ne.s32.totalorder %s13308_s4, %s11182_s19  ;;  %p11186_p9 = scmp.lt.u32.totalorder %s11182_s19, %s13308_s4 }
  0x17   :  { %p11188_p10 = pnand %p11186_p9, %p11183_p8 }
  0x19   :  { %11191 = shalt.err (!%p11188_p10)
}
  0x1a   :  { %s11192_s26 = scalar_lea.vmem %s64_s24, 256  ;;  %p11197_p12 = scmp.lt.s32.totalorder %s64_s24, %s64_s24 }
  0x1b   :  { %p11193_p11 = scmp.ne.s32.totalorder %s64_s24, %s11192_s26  ;;  %p11198_p13 = scmp.lt.s32.totalorder %s11192_s26, %s11192_s26 }
  0x1d   :  { %p11199_p0 = por %p11198_p13, %p11197_p12 }
  0x1f   :  { %p11200_p1 = pnand %p11199_p0, %p11193_p11 }
  0x21   :  { %11203 = shalt.err (!%p11200_p1)
}
  0x22   :  { %66 = dma.hbm_to_vmem [thread:$0]  %s13308_s4, 256, %s64_s24, [#allocation16]  }
  0x23   :  { %s11326_s27 = smov [#allocation18]   ;;  %s11327_s29 = smov [#allocation10]  }
  0x24   :  { %s85_s28 = sshll.u32 %s11326_s27, 4  ;;  %s28_s30 = sshll.u32 %s11327_s29, 4  ;;  %s86_s28 = int_to_ptr.vmem [resolvable:$true] %s85_s28  ;;  %s11437_s30 = int_to_ptr.vmem [resolvable:$true] %s28_s30 }
  0x25   :  { %s11204_s15 = scalar_lea.hbm %s13311_s7, 128 }
  0x26   :  { %p11205_p2 = scmp.ne.s32.totalorder %s13311_s7, %s11204_s15  ;;  %p11208_p3 = scmp.lt.u32.totalorder %s11204_s15, %s13311_s7 }
  0x28   :  { %p11210_p4 = pnand %p11208_p3, %p11205_p2 }
  0x2a   :  { %11213 = shalt.err (!%p11210_p4)
}
  0x2b   :  { %s11214_s4 = scalar_lea.vmem %s86_s28, 128  ;;  %p11219_p6 = scmp.lt.s32.totalorder %s86_s28, %s86_s28 }
  0x2c   :  { %p11215_p5 = scmp.ne.s32.totalorder %s86_s28, %s11214_s4  ;;  %p11220_p7 = scmp.lt.s32.totalorder %s11214_s4, %s11214_s4 }
  0x2e   :  { %p11221_p8 = por %p11220_p7, %p11219_p6 }
  0x30   :  { %p11222_p9 = pnand %p11221_p8, %p11215_p5 }
  0x32   :  { %11225 = shalt.err (!%p11222_p9)
}
  0x33   :  { %88 = dma.hbm_to_vmem [thread:$0]  %s13311_s7, 128, %s86_s28, [#allocation19]  }
  0x34   :  { %s11226_s25 = scalar_lea.hbm %s13305_s1, 384 }
  0x35   :  { %p11227_p10 = scmp.ne.s32.totalorder %s13305_s1, %s11226_s25  ;;  %p11230_p11 = scmp.lt.u32.totalorder %s11226_s25, %s13305_s1 }
  0x37   :  { %p11232_p12 = pnand %p11230_p11, %p11227_p10 }
  0x39   :  { %11235 = shalt.err (!%p11232_p12)
}
  0x3a   :  { %s11236_s29 = scalar_lea.vmem %s11437_s30, 384  ;;  %p11241_p0 = scmp.lt.s32.totalorder %s11437_s30, %s11437_s30 }
  0x3b   :  { %p11237_p13 = scmp.ne.s32.totalorder %s11437_s30, %s11236_s29  ;;  %p11242_p1 = scmp.lt.s32.totalorder %s11236_s29, %s11236_s29 }
  0x3d   :  { %p11243_p2 = por %p11242_p1, %p11241_p0 }
  0x3f   :  { %p11244_p3 = pnand %p11243_p2, %p11237_p13 }
  0x41   :  { %11247 = shalt.err (!%p11244_p3)
}
  0x42   :  { %s11328_s7 = smov 128   ;;  %s11329_s28 = smov 8  }
  0x43   :  { %34 = dma.hbm_to_vmem [thread:$0]  %s13305_s1, 384, %s11437_s30, [#allocation11], %s11328_s7, %s11328_s7, %s11329_s28  }
  0x44   :  { %s11330_s15 = smov [#allocation14]   ;;  %s11248_s19 = scalar_lea.hbm %s13307_s3, 24576 }
  0x45   :  { %s50_s16 = sshll.u32 %s11330_s15, 4  ;;  %p11249_p4 = scmp.ne.s32.totalorder %s13307_s3, %s11248_s19  ;;  %s51_s16 = int_to_ptr.vmem [resolvable:$true] %s50_s16 }
  0x46   :  { %p11252_p5 = scmp.lt.u32.totalorder %s11248_s19, %s13307_s3 }
  0x48   :  { %p11254_p6 = pnand %p11252_p5, %p11249_p4 }
  0x4a   :  { %11257 = shalt.err (!%p11254_p6)
}
  0x4b   :  { %s11258_s23 = scalar_lea.vmem %s51_s16, 24576  ;;  %p11263_p8 = scmp.lt.s32.totalorder %s51_s16, %s51_s16 }
  0x4c   :  { %p11259_p7 = scmp.ne.s32.totalorder %s51_s16, %s11258_s23  ;;  %p11264_p9 = scmp.lt.s32.totalorder %s11258_s23, %s11258_s23 }
  0x4e   :  { %p11265_p10 = por %p11264_p9, %p11263_p8 }
  0x50   :  { %p11266_p11 = pnand %p11265_p10, %p11259_p7 }
  0x52   :  { %11269 = shalt.err (!%p11266_p11)
}
  0x53   :  { %s11331_s1 = smov 256   ;;  %s11332_s30 = smov 16  }
  0x54   :  { %56 = dma.hbm_to_vmem [thread:$0]  %s13307_s3, 24576, %s51_s16, [#allocation13], %s11331_s1, %s11331_s1, %s11332_s30  }
  0x55   :  { %s11333_s2 = smov [#allocation17]   ;;  %s11334_s27 = smov [#allocation20]  }
  0x56   :  { %s72_s22 = sshll.u32 %s11333_s2, 4  ;;  %s97_s29 = sshll.u32 %s11334_s27, 4  ;;  %s73_s22 = int_to_ptr.vmem [resolvable:$true] %s72_s22  ;;  %s98_s29 = int_to_ptr.vmem [resolvable:$true] %s97_s29 }
  0x57   :  { %s11270_s14 = scalar_lea.hbm %s13310_s6, 12288 }
  0x58   :  { %p11271_p12 = scmp.ne.s32.totalorder %s13310_s6, %s11270_s14  ;;  %p11274_p13 = scmp.lt.u32.totalorder %s11270_s14, %s13310_s6 }
  0x5a   :  { %p11276_p0 = pnand %p11274_p13, %p11271_p12 }
  0x5c   :  { %11279 = shalt.err (!%p11276_p0)
}
  0x5d   :  { %s11280_s3 = scalar_lea.vmem %s73_s22, 12288  ;;  %p11285_p2 = scmp.lt.s32.totalorder %s73_s22, %s73_s22 }
  0x5e   :  { %p11281_p1 = scmp.ne.s32.totalorder %s73_s22, %s11280_s3  ;;  %p11286_p3 = scmp.lt.s32.totalorder %s11280_s3, %s11280_s3 }
  0x60   :  { %p11287_p4 = por %p11286_p3, %p11285_p2 }
  0x62   :  { %p11288_p5 = pnand %p11287_p4, %p11281_p1 }
  0x64   :  { %11291 = shalt.err (!%p11288_p5)
}
  0x65   :  { %78 = dma.hbm_to_vmem [thread:$0]  %s13310_s6, 12288, %s73_s22, [#allocation16], %s11331_s1, %s11331_s1, %s11332_s30  }
  0x66   :  { %s11292_s21 = scalar_lea.hbm %s13313_s9, 512 }
  0x67   :  { %p11293_p6 = scmp.ne.s32.totalorder %s13313_s9, %s11292_s21  ;;  %p11296_p7 = scmp.lt.u32.totalorder %s11292_s21, %s13313_s9 }
  0x69   :  { %p11298_p8 = pnand %p11296_p7, %p11293_p6 }
  0x6b   :  { %11301 = shalt.err (!%p11298_p8)
}
  0x6c   :  { %s11302_s27 = scalar_lea.vmem %s98_s29, 512  ;;  %p11307_p10 = scmp.lt.s32.totalorder %s98_s29, %s98_s29 }
  0x6d   :  { %p11303_p9 = scmp.ne.s32.totalorder %s98_s29, %s11302_s27  ;;  %p11308_p11 = scmp.lt.s32.totalorder %s11302_s27, %s11302_s27 }
  0x6f   :  { %p11309_p12 = por %p11308_p11, %p11307_p10 }
  0x71   :  { %p11310_p13 = pnand %p11309_p12, %p11303_p9 }
  0x73   :  { %11313 = shalt.err (!%p11310_p13)
}
  0x74   :  { %100 = dma.hbm_to_vmem [thread:$0]  %s13313_s9, 512, %s98_s29, [#allocation19]  }
  0x75   :  { %11314 = dma.done.wait [#allocation11], 384  }
  0x76   :  { %11315 = vsyncadd [#allocation11], 4294966912 }
  0x77   :  { %11316 = dma.done.wait [#allocation13], 24704  }
  0x78   :  { %11317 = vsyncadd [#allocation13], 4294942592 }
  0x79   :  { %11318 = dma.done.wait [#allocation16], 12544  }
  0x7a   :  { %11319 = vsyncadd [#allocation16], 4294954752 }
  0x7b   :  { %11320 = dma.done.wait [#allocation19], 640  }
  0x7c   :  { %11321 = vsyncadd [#allocation19], 4294966656  ;;  %s131_s22 = sld [smem:[#allocation0]]   ;;  %s11335_s28 = smov 512   ;;  %v13318_v0 = vmov 0   ;;  %vm269_vm0 = vcmask 1043456  }
  0x7d   :  { %143 = sst [smem:[#allocation22]] %s11335_s28  ;;  %308 = vmatprep.mubr.bf16.mxu1 %v13318_v0  ;;  %584 = vmatprep.mubr.bf16.mxu0 %v13318_v0  ;;  %s11337_s13 = smov 4   ;;  %vm238_vm1 = vcmask 64512  }
  0x7e   :  { %145 = sst [smem:[#allocation22 + $0x1]] %s11335_s28  ;;  %s11338_s9 = smov 64  }
  0x7f   :  { %147 = sst [smem:[#allocation22 + $0x2]] %s11337_s13  ;;  %s11339_s29 = smov [#allocation2]  }
  0x80   :  { %149 = sst [smem:[#allocation22 + $0x3]] %s11338_s9  ;;  %s139_s14 = sshll.u32 %s11339_s29, 4  ;;  %s140_s14 = int_to_ptr.vmem [resolvable:$true] %s139_s14 }
  0x81   :  { %151 = sst [smem:[#allocation22 + $0x4]] %s11328_s7  ;;  %s11340_s15 = smov 2  }
  0x82   :  { %153 = sst [smem:[#allocation22 + $0x5]] %s11340_s15  ;;  %s9409_s17 = sshll.u32 %s131_s22, 26 }
  0x83   :  { %155 = sst [smem:[#allocation22 + $0x6]] %s11331_s1  ;;  %s9410_s18 = sadd.s32 134217728, %s9409_s17 }
  0x84   :  { %157 = sst [smem:[#allocation22 + $0x7]] %s11338_s9  ;;  %s11341_s19 = smov [#allocation3]  }
  0x85   :  { %159 = sst [smem:[#allocation22 + $0x8]] %s11337_s13  ;;  %s11342_s3 = smov [#allocation21]  }
  0x86   :  { %161 = dma.general %s13309_s5, 131072, %s140_s14, %s11341_s19, %s11342_s3, [#allocation22], %s9410_s18, 0  }
  0x87   :  { %v182_v1 = vld [vmem:[#allocation10] sm:$0xff]  ;;  %v402_v4 = vld [vmem:[#allocation10 + $0x8] sm:$0xff]  ;;  %v540_v10 = vld [vmem:[#allocation10 + $0x10] sm:$0xff] }
  0x88   :  { %v9422_v2 = vcombine.high %v182_v1, %v182_v1  ;;  %v9421_v3 = vcombine.low %v182_v1, %v182_v1  ;;  %v9435_v5 = vcombine.high %v402_v4, %v402_v4  ;;  %v9434_v6 = vcombine.low %v402_v4, %v402_v4  ;;  %v10401_v8 = vld [vmem:[%s13304_s0] sm:$0xff]   ;;  %v10404_v11 = vld [vmem:[%s13304_s0 + $0x8] sm:$0xff]   ;;  %v10405_v15 = vld [vmem:[%s13304_s0 + $0x10] sm:$0xff]  }
  0x89   :  { %v9448_v12 = vcombine.high %v540_v10, %v540_v10  ;;  %v9447_v13 = vcombine.low %v540_v10, %v540_v10  ;;  %v10406_v16 = vld [vmem:[%s13304_s0 + $0x18] sm:$0xff]   ;;  %v10407_v17 = vld [vmem:[%s13304_s0 + $0x20] sm:$0xff]   ;;  %v10408_v18 = vld [vmem:[%s13304_s0 + $0x28] sm:$0xff]  }
  0x8a   :  { %9423 = vmatprep.subr.msk.bf16.mxu1 %vm269_vm0, %v9422_v2  ;;  %v271_v7 = vsel %vm269_vm0, %v9421_v3, 0  ;;  %v409_v9 = vsel %vm269_vm0, %v9434_v6, 0  ;;  %v10409_v19 = vld [vmem:[%s13304_s0 + $0x30] sm:$0xff]   ;;  %v10410_v20 = vld [vmem:[%s13304_s0 + $0x38] sm:$0xff]   ;;  %v10411_v21 = vld [vmem:[%s13304_s0 + $0x40] sm:$0xff]  }
  0x8b   :  { %277 = vmatpush1.bf16.msra.mxu1 %v271_v7  ;;  %9449 = vmatprep.subr.msk.bf16.mxu0 %vm269_vm0, %v9448_v12  ;;  %v547_v14 = vsel %vm269_vm0, %v9447_v13, 0  ;;  %v10414_v22 = vld [vmem:[%s13304_s0 + $0x48] sm:$0xff]   ;;  %v10417_v23 = vld [vmem:[#allocation14 + $0x4] ss:$16 sps:$4 sm:$0xff]   ;;  %v10415_v24 = vld [vmem:[#allocation14] ss:$16 sps:$4 sm:$0xff]  }
  0x8c   :  { %9436 = vmatprep.subr.msk.bf16.mxu1 %vm269_vm0, %v9435_v5  ;;  %553 = vmatpush1.bf16.msra.mxu0 %v547_v14  ;;  %v10420_v25 = vld [vmem:[#allocation14 + $0x24] ss:$16 sps:$4 sm:$0xff]   ;;  %v10418_v26 = vld [vmem:[#allocation14 + $0x20] ss:$16 sps:$4 sm:$0xff]   ;;  %v10465_v55 = vld [vmem:[#allocation14 + $0xc] ss:$16 sps:$4 sm:$0xff]  }
  0x8d   :  { %v10423_v27 = vld [vmem:[#allocation14 + $0x44] ss:$16 sps:$4 sm:$0xff]   ;;  %v10421_v28 = vld [vmem:[#allocation14 + $0x40] ss:$16 sps:$4 sm:$0xff]   ;;  %v10463_v58 = vld [vmem:[#allocation14 + $0x8] ss:$16 sps:$4 sm:$0xff]  }
  0x8e   :  { %9424 = vmatmul.mubr.msk.bf16.vlgmr.msra.gmra.mrb[0].mxu1 %vm238_vm1, %v10401_v8  ;;  %v10426_v29 = vld [vmem:[#allocation14 + $0x64] ss:$16 sps:$4 sm:$0xff]   ;;  %v10424_v30 = vld [vmem:[#allocation14 + $0x60] ss:$16 sps:$4 sm:$0xff]   ;;  %v10468_v60 = vld [vmem:[#allocation14 + $0x2c] ss:$16 sps:$4 sm:$0xff]  }
  0x8f   :  { %415 = vmatpush1.bf16.msra.mxu1 %v409_v9  ;;  %318 = vmatprep.mubr.bf16.mxu1 %v13318_v0  ;;  %v10429_v31 = vld [vmem:[#allocation14 + $0x84] ss:$16 sps:$4 sm:$0xff]   ;;  %v10427_v32 = vld [vmem:[#allocation14 + $0x80] ss:$16 sps:$4 sm:$0xff]   ;;  %v10466_v62 = vld [vmem:[#allocation14 + $0x28] ss:$16 sps:$4 sm:$0xff]  }
  0x90   :  { %10053 = vmatprep.subr.msk.bf16.mxu1 %vm269_vm0, %v9448_v12  ;;  %9450 = vmatmul.mubr.msk.bf16.vlgmr.msra.gmra.mrb[0].mxu0 %vm238_vm1, %v10401_v8  ;;  %v10432_v33 = vld [vmem:[#allocation14 + $0xa4] ss:$16 sps:$4 sm:$0xff]   ;;  %v10430_v34 = vld [vmem:[#allocation14 + $0xa0] ss:$16 sps:$4 sm:$0xff]   ;;  %v10471_v63 = vld [vmem:[#allocation14 + $0x4c] ss:$16 sps:$4 sm:$0xff]  }
  0x91   :  { %590 = vmatprep.mubr.bf16.mxu0 %v13318_v0  ;;  %v10435_v35 = vld [vmem:[#allocation14 + $0xc4] ss:$16 sps:$4 sm:$0xff]   ;;  %v10433_v36 = vld [vmem:[#allocation14 + $0xc0] ss:$16 sps:$4 sm:$0xff]   ;;  %v10469_v3 = vld [vmem:[#allocation14 + $0x48] ss:$16 sps:$4 sm:$0xff]  }
  0x92   :  { %v10438_v37 = vld [vmem:[#allocation14 + $0xe4] ss:$16 sps:$4 sm:$0xff]   ;;  %v10436_v38 = vld [vmem:[#allocation14 + $0xe0] ss:$16 sps:$4 sm:$0xff]   ;;  %v10474_v5 = vld [vmem:[#allocation14 + $0x6c] ss:$16 sps:$4 sm:$0xff]  }
  0x93   :  { %v10441_v39 = vld [vmem:[#allocation14 + $0x104] ss:$16 sps:$4 sm:$0xff]   ;;  %v10439_v40 = vld [vmem:[#allocation14 + $0x100] ss:$16 sps:$4 sm:$0xff]   ;;  %v10472_v7 = vld [vmem:[#allocation14 + $0x68] ss:$16 sps:$4 sm:$0xff]  }
  0x94   :  { %v10444_v41 = vld [vmem:[#allocation14 + $0x124] ss:$16 sps:$4 sm:$0xff]   ;;  %v10442_v42 = vld [vmem:[#allocation14 + $0x120] ss:$16 sps:$4 sm:$0xff]   ;;  %v10480_v13 = vld [vmem:[#allocation14 + $0xac] ss:$16 sps:$4 sm:$0xff]  }
  0x95   :  { %v10447_v43 = vld [vmem:[#allocation14 + $0x144] ss:$16 sps:$4 sm:$0xff]   ;;  %v10445_v44 = vld [vmem:[#allocation14 + $0x140] ss:$16 sps:$4 sm:$0xff]  }
  0x96   :  { %9425 = vmatmul.mubr.msk.bf16.gmra.mrb[4].mxu1 %vm238_vm1, %v10404_v11  ;;  %v10450_v45 = vld [vmem:[#allocation14 + $0x164] ss:$16 sps:$4 sm:$0xff]   ;;  %v10448_v46 = vld [vmem:[#allocation14 + $0x160] ss:$16 sps:$4 sm:$0xff]  }
  0x97   :  { %328 = vmatprep.mubr.bf16.mxu1 %v13318_v0  ;;  %v10453_v47 = vld [vmem:[#allocation14 + $0x184] ss:$16 sps:$4 sm:$0xff]   ;;  %v10451_v48 = vld [vmem:[#allocation14 + $0x180] ss:$16 sps:$4 sm:$0xff]  }
  0x98   :  { %9451 = vmatmul.mubr.msk.bf16.gmra.mrb[4].mxu0 %vm238_vm1, %v10404_v11  ;;  %v10456_v49 = vld [vmem:[#allocation14 + $0x1a4] ss:$16 sps:$4 sm:$0xff]   ;;  %v10454_v50 = vld [vmem:[#allocation14 + $0x1a0] ss:$16 sps:$4 sm:$0xff]  }
  0x99   :  { %596 = vmatprep.mubr.bf16.mxu0 %v13318_v0  ;;  %v10459_v51 = vld [vmem:[#allocation14 + $0x1c4] ss:$16 sps:$4 sm:$0xff]   ;;  %v10457_v52 = vld [vmem:[#allocation14 + $0x1c0] ss:$16 sps:$4 sm:$0xff]  }
  0x9a   :  { %v10462_v53 = vld [vmem:[#allocation14 + $0x1e4] ss:$16 sps:$4 sm:$0xff]   ;;  %v10460_v54 = vld [vmem:[#allocation14 + $0x1e0] ss:$16 sps:$4 sm:$0xff]  }
  0x9e   :  { %9426 = vmatmul.mubr.msk.bf16.gmra.mrb[8].mxu1 %vm238_vm1, %v10405_v15 }
  0x9f   :  { %338 = vmatprep.mubr.bf16.mxu1 %v13318_v0 }
  0xa0   :  { %9452 = vmatmul.mubr.msk.bf16.gmra.mrb[8].mxu0 %vm238_vm1, %v10405_v15 }
  0xa1   :  { %606 = vmatprep.mubr.bf16.mxu0 %v13318_v0 }
  0xa6   :  { %9427 = vmatmul.mubr.msk.bf16.gmra.mrb[12].mxu1 %vm238_vm1, %v10406_v16 }
  0xa7   :  { %348 = vmatprep.mubr.bf16.mxu1 %v13318_v0 }
  0xa8   :  { %9453 = vmatmul.mubr.msk.bf16.gmra.mrb[12].mxu0 %vm238_vm1, %v10406_v16 }
  0xa9   :  { %616 = vmatprep.mubr.bf16.mxu0 %v13318_v0 }
  0xae   :  { %9428 = vmatmul.mubr.msk.bf16.gmra.mrb[16].mxu1 %vm238_vm1, %v10407_v17 }
  0xaf   :  { %358 = vmatprep.mubr.bf16.mxu1 %v13318_v0 }
  0xb0   :  { %9454 = vmatmul.mubr.msk.bf16.gmra.mrb[16].mxu0 %vm238_vm1, %v10407_v17 }
  0xb1   :  { %626 = vmatprep.mubr.bf16.mxu0 %v13318_v0 }
  0xb6   :  { %9429 = vmatmul.mubr.msk.bf16.gmra.mrb[20].mxu1 %vm238_vm1, %v10408_v18 }
  0xb7   :  { %368 = vmatprep.mubr.bf16.mxu1 %v13318_v0 }
  0xb8   :  { %9455 = vmatmul.mubr.msk.bf16.gmra.mrb[20].mxu0 %vm238_vm1, %v10408_v18 }
  0xb9   :  { %636 = vmatprep.mubr.bf16.mxu0 %v13318_v0 }
  0xbe   :  { %9430 = vmatmul.mubr.msk.bf16.gmra.mrb[24].mxu1 %vm238_vm1, %v10409_v19 }
  0xbf   :  { %378 = vmatprep.mubr.bf16.mxu1 %v13318_v0 }
  0xc0   :  { %9456 = vmatmul.mubr.msk.bf16.gmra.mrb[24].mxu0 %vm238_vm1, %v10409_v19 }
  0xc1   :  { %646 = vmatprep.mubr.bf16.mxu0 %v13318_v0 }
  0xc6   :  { %9431 = vmatmul.mubr.msk.bf16.gmra.mrb[28].mxu1 %vm238_vm1, %v10410_v20 }
  0xc7   :  { %388 = vmatprep.mubr.bf16.mxu1 %v13318_v0 }
  0xc8   :  { %9457 = vmatmul.mubr.msk.bf16.gmra.mrb[28].mxu0 %vm238_vm1, %v10410_v20 }
  0xce   :  { %9432 = vmatmul.mubr.msk.bf16.gmra.mrb[32].mxu1 %vm238_vm1, %v10411_v21 }
  0xcf   :  { %394 = vmatprep.mubr.bf16.mxu1 %v13318_v0 }
  0xd6   :  { %9433 = vmatmul.mubr.msk.bf16.gmra.mrb[36].mxu1 %vm238_vm1, %v10414_v22 }
  0xd7   :  { %446 = vmatprep.mubr.bf16.mxu1 %v13318_v0 }
  0xde   :  { %9437 = vmatmul.mubr.msk.bf16.vlgmr.msra.gmra.mrb[40].mxu1 %vm238_vm1, %v10401_v8  ;;  %v10477_v8 = vld [vmem:[#allocation14 + $0x8c] ss:$16 sps:$4 sm:$0xff]  }
  0xdf   :  { %10054 = vmatpush1.bf16.msra.mxu1 %v547_v14  ;;  %452 = vmatprep.mubr.bf16.mxu1 %v13318_v0 }
  0xe0   :  { %1363 = vmatprep.subr.bf16.mxu1 %v10417_v23  ;;  %v10484_v23 = vld [vmem:[#allocation14 + $0xe8] ss:$16 sps:$4 sm:$0xff]  }
  0xe6   :  { %9438 = vmatmul.mubr.msk.bf16.gmra.mrb[0].mxu1 %vm238_vm1, %v10404_v11  ;;  %v10475_v11 = vld [vmem:[#allocation14 + $0x88] ss:$16 sps:$4 sm:$0xff]  }
  0xe7   :  { %462 = vmatprep.mubr.bf16.mxu1 %v13318_v0 }
  0xee   :  { %9439 = vmatmul.mubr.msk.bf16.gmra.mrb[4].mxu1 %vm238_vm1, %v10405_v15  ;;  %v10478_v15 = vld [vmem:[#allocation14 + $0xa8] ss:$16 sps:$4 sm:$0xff]  }
  0xef   :  { %472 = vmatprep.mubr.bf16.mxu1 %v13318_v0 }
  0xf6   :  { %9440 = vmatmul.mubr.msk.bf16.gmra.mrb[8].mxu1 %vm238_vm1, %v10406_v16  ;;  %v10483_v16 = vld [vmem:[#allocation14 + $0xcc] ss:$16 sps:$4 sm:$0xff]  }
  0xf7   :  { %482 = vmatprep.mubr.bf16.mxu1 %v13318_v0 }
  0xfe   :  { %9441 = vmatmul.mubr.msk.bf16.gmra.mrb[12].mxu1 %vm238_vm1, %v10407_v17 }
  0xff   :  { %492 = vmatprep.mubr.bf16.mxu1 %v13318_v0 }
 0x106   :  { %9442 = vmatmul.mubr.msk.bf16.gmra.mrb[16].mxu1 %vm238_vm1, %v10408_v18 }
 0x107   :  { %502 = vmatprep.mubr.bf16.mxu1 %v13318_v0 }
 0x10e   :  { %9443 = vmatmul.mubr.msk.bf16.gmra.mrb[20].mxu1 %vm238_vm1, %v10409_v19  ;;  %v10481_v19 = vld [vmem:[#allocation14 + $0xc8] ss:$16 sps:$4 sm:$0xff]  }
 0x10f   :  { %512 = vmatprep.mubr.bf16.mxu1 %v13318_v0 }
 0x116   :  { %9444 = vmatmul.mubr.msk.bf16.gmra.mrb[24].mxu1 %vm238_vm1, %v10410_v20 }
 0x117   :  { %522 = vmatprep.mubr.bf16.mxu1 %v13318_v0 }
 0x11e   :  { %9445 = vmatmul.mubr.msk.bf16.gmra.mrb[28].mxu1 %vm238_vm1, %v10411_v21 }
 0x11f   :  { %532 = vmatprep.mubr.bf16.mxu1 %v13318_v0 }
 0x126   :  { %9446 = vmatmul.mubr.msk.bf16.gmra.mrb[44].mxu1 %vm238_vm1, %v10414_v22 }
 0x127   :  { %656 = vmatprep.mubr.bf16.mxu1 %v13318_v0 }
 0x12e   :  { %9458 = vmatmul.mubr.msk.bf16.vlgmr.msra.gmra.mrb[24].mxu1 %vm238_vm1, %v10411_v21  ;;  %v10486_v21 = vld [vmem:[#allocation14 + $0xec] ss:$16 sps:$4 sm:$0xff]  }
 0x12f   :  { %666 = vmatprep.mubr.bf16.mxu1 %v13318_v0  ;;  %1364 = vmatpush1.bf16.msra.mxu1 %v10415_v24  ;;  %v10489_v24 = vld [vmem:[#allocation14 + $0x10c] ss:$16 sps:$4 sm:$0xff]  }
 0x130   :  { %1365 = vmatprep.subr.bf16.mxu1 %v10420_v25 }
 0x133   :  { %1366 = vmatpush1.bf16.msra.mxu1 %v10418_v26 }
 0x134   :  { %1367 = vmatprep.subr.bf16.mxu1 %v10423_v27  ;;  %v10487_v27 = vld [vmem:[#allocation14 + $0x108] ss:$16 sps:$4 sm:$0xff]  }
 0x136   :  { %9459 = vmatmul.mubr.msk.bf16.gmra.mrb[28].mxu1 %vm238_vm1, %v10414_v22 }
 0x137   :  { %1368 = vmatpush1.bf16.msra.mxu1 %v10421_v28  ;;  %1395 = vmatprep.mubr.bf16.mxu1 %v13318_v0 }
 0x138   :  { %1369 = vmatprep.subr.bf16.mxu1 %v10426_v29  ;;  %v10492_v29 = vld [vmem:[#allocation14 + $0x12c] ss:$16 sps:$4 sm:$0xff]  }
 0x13b   :  { %1370 = vmatpush1.bf16.msra.mxu1 %v10424_v30 }
 0x13c   :  { %1371 = vmatprep.subr.bf16.mxu1 %v10429_v31  ;;  %v10490_v31 = vld [vmem:[#allocation14 + $0x128] ss:$16 sps:$4 sm:$0xff]  }
 0x13f   :  { %1372 = vmatpush1.bf16.msra.mxu1 %v10427_v32  ;;  %v10495_v32 = vld [vmem:[#allocation14 + $0x14c] ss:$16 sps:$4 sm:$0xff]  }
 0x140   :  { %1373 = vmatprep.subr.bf16.mxu1 %v10432_v33 }
 0x143   :  { %1374 = vmatpush1.bf16.msra.mxu1 %v10430_v34 }
 0x144   :  { %1375 = vmatprep.subr.bf16.mxu1 %v10435_v35  ;;  %v10493_v35 = vld [vmem:[#allocation14 + $0x148] ss:$16 sps:$4 sm:$0xff]  }
 0x147   :  { %1376 = vmatpush1.bf16.msra.mxu1 %v10433_v36 }
 0x148   :  { %1377 = vmatprep.subr.bf16.mxu1 %v10438_v37  ;;  %v10498_v37 = vld [vmem:[#allocation14 + $0x16c] ss:$16 sps:$4 sm:$0xff]  }
 0x14b   :  { %1378 = vmatpush1.bf16.msra.mxu1 %v10436_v38 }
 0x14c   :  { %1379 = vmatprep.subr.bf16.mxu1 %v10441_v39  ;;  %v10496_v39 = vld [vmem:[#allocation14 + $0x168] ss:$16 sps:$4 sm:$0xff]  }
 0x14f   :  { %1380 = vmatpush1.bf16.msra.mxu1 %v10439_v40  ;;  %v10501_v40 = vld [vmem:[#allocation14 + $0x18c] ss:$16 sps:$4 sm:$0xff]  }
 0x150   :  { %1381 = vmatprep.subr.bf16.mxu1 %v10444_v41 }
 0x153   :  { %1382 = vmatpush1.bf16.msra.mxu1 %v10442_v42 }
 0x154   :  { %1383 = vmatprep.subr.bf16.mxu1 %v10447_v43  ;;  %v10499_v43 = vld [vmem:[#allocation14 + $0x188] ss:$16 sps:$4 sm:$0xff]  }
 0x157   :  { %1384 = vmatpush1.bf16.msra.mxu1 %v10445_v44 }
 0x158   :  { %1385 = vmatprep.subr.bf16.mxu1 %v10450_v45  ;;  %v10504_v45 = vld [vmem:[#allocation14 + $0x1ac] ss:$16 sps:$4 sm:$0xff]  }
 0x15b   :  { %1386 = vmatpush1.bf16.msra.mxu1 %v10448_v46 }
 0x15c   :  { %1387 = vmatprep.subr.bf16.mxu1 %v10453_v47  ;;  %v10502_v47 = vld [vmem:[#allocation14 + $0x1a8] ss:$16 sps:$4 sm:$0xff]  }
 0x15f   :  { %1388 = vmatpush1.bf16.msra.mxu1 %v10451_v48  ;;  %v10507_v48 = vld [vmem:[#allocation14 + $0x1cc] ss:$16 sps:$4 sm:$0xff]  }
 0x160   :  { %1389 = vmatprep.subr.bf16.mxu1 %v10456_v49 }
 0x163   :  { %1390 = vmatpush1.bf16.msra.mxu1 %v10454_v50  ;;  %v586_v56 = vpop.f32.mrb[0].mxu0 }
 0x164   :  { %1391 = vmatprep.subr.bf16.mxu1 %v10459_v51  ;;  %v587_v57 = vpop.f32.mrb[1].mxu0 }
 0x165   :  { %v588_v59 = vpop.f32.mrb[2].mxu0  ;;  %v10510_v57 = vld [vmem:[#allocation14 + $0x1ec] ss:$16 sps:$4 sm:$0xff]  }
 0x166   :  { %v589_v61 = vpop.f32.mrb[3].mxu0  ;;  %v10508_v59 = vld [vmem:[#allocation14 + $0x1e8] ss:$16 sps:$4 sm:$0xff]  }
 0x167   :  { %1392 = vmatpush1.bf16.msra.mxu1 %v10457_v52 }
 0x168   :  { %1393 = vmatprep.subr.bf16.mxu1 %v10462_v53 }
 0x16b   :  { %1394 = vmatpush1.bf16.msra.mxu1 %v10460_v54  ;;  %v592_v1 = vpop.f32.mrb[4].mxu0  ;;  %v10505_v54 = vld [vmem:[#allocation14 + $0x1c8] ss:$16 sps:$4 sm:$0xff]  }
 0x16c   :  { %1488 = vmatprep.subr.bf16.mxu1 %v10465_v55  ;;  %v593_v2 = vpop.f32.mrb[5].mxu0 }
 0x16d   :  { %v594_v4 = vpop.f32.mrb[6].mxu0  ;;  %v13317_v2 = vlaneseq }
 0x16e   :  { %1396 = vmatmul.mubr.bf16.vlgmr.msra.gmra.mrb[48].mxu1 %v13318_v0  ;;  %v595_v6 = vpop.f32.mrb[7].mxu0 }
 0x16f   :  { %1489 = vmatpush1.bf16.msra.mxu1 %v10463_v58 }
 0x170   :  { %1490 = vmatprep.subr.bf16.mxu1 %v10468_v60  ;;  %v10513_v60 = vld [vmem:[#allocation14 + $0x204] ss:$16 sps:$4 sm:$0xff]  }
 0x173   :  { %1491 = vmatpush1.bf16.msra.mxu1 %v10466_v62  ;;  %v11616_v9 = vpop.f32.mrb[8].mxu0 }
 0x174   :  { %1492 = vmatprep.subr.bf16.mxu1 %v10471_v63  ;;  %v11618_v10 = vpop.f32.mrb[9].mxu0 }
 0x175   :  { %v11620_v12 = vpop.f32.mrb[10].mxu0 }
 0x176   :  { %v11622_v14 = vpop.f32.mrb[11].mxu0 }
 0x177   :  { %1493 = vmatpush1.bf16.msra.mxu1 %v10469_v3  ;;  %v11665_v3 = vshrl.u32 %v13317_v2, 7 }
 0x178   :  { %1494 = vmatprep.subr.bf16.mxu1 %v10474_v5 }
 0x179   :  { %13323 = vst [vmem:[#allocation28_spill] sm:$0xff] %v11665_v3 }
 0x17b   :  { %1495 = vmatpush1.bf16.msra.mxu1 %v10472_v7  ;;  %v11624_v17 = vpop.f32.mrb[12].mxu0 }
 0x17c   :  { %1496 = vmatprep.subr.bf16.mxu1 %v10477_v8  ;;  %v11626_v18 = vpop.f32.mrb[13].mxu0  ;;  %v11668_v8 = vsub.s32 0, %v11665_v3 }
 0x17d   :  { %v11628_v20 = vpop.f32.mrb[14].mxu0 }
 0x17e   :  { %v11630_v22 = vpop.f32.mrb[15].mxu0 }
 0x17f   :  { %1497 = vmatpush1.bf16.msra.mxu1 %v10475_v11  ;;  %v741_v11 = vld [vmem:[#allocation12] ss:$4 sm:$0x3] }
 0x180   :  { %1498 = vmatprep.subr.bf16.mxu1 %v10480_v13  ;;  %v11671_v13 = vsub.s32 1, %v11665_v3 }
 0x182   :  { %13324 = vst [vmem:[#allocation29_spill] sm:$0xff] %v11671_v13 }
 0x183   :  { %1499 = vmatpush1.bf16.msra.mxu1 %v10478_v15  ;;  %v11632_v25 = vpop.f32.mrb[16].mxu0  ;;  %v11674_v15 = vrot.slane %v741_v11, %v11668_v8 }
 0x184   :  { %1500 = vmatprep.subr.bf16.mxu1 %v10483_v16  ;;  %v11634_v26 = vpop.f32.mrb[17].mxu0 }
 0x185   :  { %v11636_v28 = vpop.f32.mrb[18].mxu0 }
 0x186   :  { %v11638_v30 = vpop.f32.mrb[19].mxu0 }
 0x187   :  { %1501 = vmatpush1.bf16.msra.mxu1 %v10481_v19  ;;  %v818_v19 = vld [vmem:[#allocation12 + $0x1] ss:$4 sm:$0x3] }
 0x188   :  { %1502 = vmatprep.subr.bf16.mxu1 %v10486_v21  ;;  %v11677_v21 = vrot.slane %v741_v11, %v11671_v13 }
 0x18b   :  { %1503 = vmatpush1.bf16.msra.mxu1 %v10484_v23  ;;  %v11640_v33 = vpop.f32.mrb[20].mxu0 }
 0x18c   :  { %1504 = vmatprep.subr.bf16.mxu1 %v10489_v24  ;;  %v11642_v34 = vpop.f32.mrb[21].mxu0 }
 0x18d   :  { %v11644_v36 = vpop.f32.mrb[22].mxu0 }
 0x18e   :  { %v11646_v38 = vpop.f32.mrb[23].mxu0 }
 0x18f   :  { %1505 = vmatpush1.bf16.msra.mxu1 %v10487_v27 }
 0x190   :  { %1506 = vmatprep.subr.bf16.mxu1 %v10492_v29 }
 0x193   :  { %1507 = vmatpush1.bf16.msra.mxu1 %v10490_v31  ;;  %v11648_v41 = vpop.f32.mrb[24].mxu0 }
 0x194   :  { %1508 = vmatprep.subr.bf16.mxu1 %v10495_v32  ;;  %v11650_v42 = vpop.f32.mrb[25].mxu0  ;;  %v11683_v32 = vrot.slane %v818_v19, %v11668_v8 }
 0x195   :  { %v11652_v44 = vpop.f32.mrb[26].mxu0 }
 0x196   :  { %v11654_v46 = vpop.f32.mrb[27].mxu0 }
 0x197   :  { %1509 = vmatpush1.bf16.msra.mxu1 %v10493_v35 }
 0x198   :  { %1510 = vmatprep.subr.bf16.mxu1 %v10498_v37 }
 0x19b   :  { %1511 = vmatpush1.bf16.msra.mxu1 %v10496_v39  ;;  %v11656_v51 = vpop.f32.mrb[28].mxu0  ;;  %v863_v39 = vld [vmem:[#allocation12 + $0x2] ss:$4 sm:$0x3] }
 0x19c   :  { %1512 = vmatprep.subr.bf16.mxu1 %v10501_v40  ;;  %v11658_v53 = vpop.f32.mrb[29].mxu0 }
 0x19d   :  { %v11660_v56 = vpop.f32.mrb[30].mxu0 }
 0x19e   :  { %v11662_v58 = vpop.f32.mrb[31].mxu0 }
 0x19f   :  { %1513 = vmatpush1.bf16.msra.mxu1 %v10499_v43  ;;  %v11688_v43 = vrot.slane %v818_v19, %v11671_v13 }
 0x1a0   :  { %1514 = vmatprep.subr.bf16.mxu1 %v10504_v45 }
 0x1a1   :  { %v390_v49 = vpop.f32.mrb[32].mxu1 }
 0x1a2   :  { %v391_v50 = vpop.f32.mrb[33].mxu1 }
 0x1a3   :  { %v392_v52 = vpop.f32.mrb[34].mxu1  ;;  %1515 = vmatpush1.bf16.msra.mxu1 %v10502_v47  ;;  %v11695_v50 = vrot.slane %v863_v39, %v11668_v8 }
 0x1a4   :  { %v393_v55 = vpop.f32.mrb[35].mxu1  ;;  %1516 = vmatprep.subr.bf16.mxu1 %v10507_v48 }
 0x1a7   :  { %1517 = vmatpush1.bf16.msra.mxu1 %v10505_v54  ;;  %v11699_v54 = vrot.slane %v863_v39, %v11671_v13 }
 0x1a8   :  { %1518 = vmatprep.subr.bf16.mxu1 %v10510_v57 }
 0x1a9   :  { %v396_v61 = vpop.f32.mrb[36].mxu1 }
 0x1aa   :  { %v397_v62 = vpop.f32.mrb[37].mxu1 }
 0x1ab   :  { %v398_v63 = vpop.f32.mrb[38].mxu1  ;;  %1519 = vmatpush1.bf16.msra.mxu1 %v10508_v59 }
 0x1ac   :  { %v399_v1 = vpop.f32.mrb[39].mxu1  ;;  %1998 = vmatprep.subr.bf16.mxu1 %v10513_v60 }
 0x1b1   :  { %v448_v4 = vpop.f32.mrb[40].mxu1 }
 0x1b2   :  { %v449_v5 = vpop.f32.mrb[41].mxu1 }
 0x1b3   :  { %v450_v6 = vpop.f32.mrb[42].mxu1 }
 0x1b4   :  { %v451_v7 = vpop.f32.mrb[43].mxu1 }
 0x1b9   :  { %v454_v16 = vpop.f32.mrb[0].mxu1 }
 0x1ba   :  { %v10055_v23 = vadd.f32 %v11616_v9, %v454_v16  ;;  %v456_v24 = vpop.f32.mrb[1].mxu1 }
 0x1bb   :  { %v10056_v27 = vadd.f32 %v11618_v10, %v456_v24  ;;  %v458_v29 = vpop.f32.mrb[2].mxu1 }
 0x1bc   :  { %v753_v31 = vadd.f32 %v10055_v23, %v11674_v15  ;;  %v10057_v35 = vadd.f32 %v11620_v12, %v458_v29  ;;  %v460_v37 = vpop.f32.mrb[3].mxu1 }
 0x1bd   :  { %v754_v40 = vadd.f32 %v10056_v27, %v11677_v21  ;;  %v10058_v9 = vadd.f32 %v11622_v14, %v460_v37 }
 0x1be   :  { %v785_v45 = vmax.f32 %v753_v31, 0.0  ;;  %v755_v10 = vadd.f32 %v10057_v35, %v11674_v15 }
 0x1bf   :  { %v786_v47 = vmax.f32 %v754_v40, 0.0  ;;  %v756_v48 = vadd.f32 %v10058_v9, %v11677_v21 }
 0x1c0   :  { %v830_v49 = vmul.f32 %v11683_v32, %v785_v45  ;;  %v787_v12 = vmax.f32 %v755_v10, 0.0 }
 0x1c1   :  { %v831_v52 = vmul.f32 %v11688_v43, %v786_v47  ;;  %v788_v55 = vmax.f32 %v756_v48, 0.0  ;;  %v464_v57 = vpop.f32.mrb[4].mxu1 }
 0x1c2   :  { %v832_v14 = vmul.f32 %v11683_v32, %v787_v12  ;;  %v10059_v59 = vadd.f32 %v11624_v17, %v464_v57  ;;  %v466_v60 = vpop.f32.mrb[5].mxu1  ;;  %v875_v1 = vadd.f32 %v11695_v50, %v830_v49 }
 0x1c3   :  { %v833_v61 = vmul.f32 %v11688_v43, %v788_v55  ;;  %v10060_v62 = vadd.f32 %v11626_v18, %v466_v60  ;;  %v468_v63 = vpop.f32.mrb[6].mxu1  ;;  %v876_v11 = vadd.f32 %v11699_v54, %v831_v52 }
 0x1c4   :  { %v877_v4 = vadd.f32 %v11695_v50, %v832_v14  ;;  %v757_v5 = vadd.f32 %v10059_v59, %v11674_v15  ;;  %v10061_v6 = vadd.f32 %v11628_v20, %v468_v63  ;;  %v470_v7 = vpop.f32.mrb[7].mxu1 }
 0x1c5   :  { %v878_v16 = vadd.f32 %v11699_v54, %v833_v61  ;;  %v758_v17 = vadd.f32 %v10060_v62, %v11677_v21  ;;  %v10062_v19 = vadd.f32 %v11630_v22, %v470_v7 }
 0x1c6   :  { %v11713_v23 = vpack.c.bf16 %v877_v4, %v875_v1  ;;  %v789_v18 = vmax.f32 %v757_v5, 0.0  ;;  %v759_v24 = vadd.f32 %v10061_v6, %v11674_v15 }
 0x1c7   :  { %v11716_v27 = vpack.c.bf16 %v878_v16, %v876_v11  ;;  %v790_v29 = vmax.f32 %v758_v17, 0.0  ;;  %v760_v31 = vadd.f32 %v10062_v19, %v11677_v21 }
 0x1c8   :  { %v834_v20 = vmul.f32 %v11683_v32, %v789_v18  ;;  %v791_v35 = vmax.f32 %v759_v24, 0.0 }
 0x1c9   :  { %v835_v37 = vmul.f32 %v11688_v43, %v790_v29  ;;  %v792_v39 = vmax.f32 %v760_v31, 0.0  ;;  %v474_v40 = vpop.f32.mrb[8].mxu1  ;;  %1405 = vmatprep.mubr.bf16.mxu1 %v11716_v27 }
 0x1ca   :  { %v836_v22 = vmul.f32 %v11683_v32, %v791_v35  ;;  %v10063_v9 = vadd.f32 %v11632_v25, %v474_v40  ;;  %v476_v45 = vpop.f32.mrb[9].mxu1  ;;  %1406 = vmatmul.mubr.bf16.gmra.mrb[52].mxu1 %v11713_v23  ;;  %v879_v49 = vadd.f32 %v11695_v50, %v834_v20 }
 0x1cb   :  { %v837_v10 = vmul.f32 %v11688_v43, %v792_v39  ;;  %v10064_v47 = vadd.f32 %v11634_v26, %v476_v45  ;;  %v478_v48 = vpop.f32.mrb[10].mxu1  ;;  %v880_v14 = vadd.f32 %v11699_v54, %v835_v37 }
 0x1cc   :  { %v881_v12 = vadd.f32 %v11695_v50, %v836_v22  ;;  %v761_v52 = vadd.f32 %v10063_v9, %v11674_v15  ;;  %v10065_v55 = vadd.f32 %v11636_v28, %v478_v48  ;;  %v480_v57 = vpop.f32.mrb[11].mxu1 }
 0x1cd   :  { %v882_v25 = vadd.f32 %v11699_v54, %v837_v10  ;;  %v762_v59 = vadd.f32 %v10064_v47, %v11677_v21  ;;  %v10066_v60 = vadd.f32 %v11638_v30, %v480_v57 }
 0x1ce   :  { %v11735_v61 = vpack.c.bf16 %v881_v12, %v879_v49  ;;  %v793_v26 = vmax.f32 %v761_v52, 0.0  ;;  %v763_v62 = vadd.f32 %v10065_v55, %v11674_v15 }
 0x1cf   :  { %v11738_v63 = vpack.c.bf16 %v882_v25, %v880_v14  ;;  %v794_v1 = vmax.f32 %v762_v59, 0.0  ;;  %v764_v4 = vadd.f32 %v10066_v60, %v11677_v21 }
 0x1d0   :  { %v838_v28 = vmul.f32 %v11683_v32, %v793_v26  ;;  %v795_v5 = vmax.f32 %v763_v62, 0.0 }
 0x1d1   :  { %v839_v6 = vmul.f32 %v11688_v43, %v794_v1  ;;  %v796_v7 = vmax.f32 %v764_v4, 0.0  ;;  %v484_v11 = vpop.f32.mrb[12].mxu1  ;;  %1415 = vmatprep.mubr.bf16.mxu1 %v11738_v63 }
 0x1d2   :  { %v840_v30 = vmul.f32 %v11683_v32, %v795_v5  ;;  %v10067_v16 = vadd.f32 %v11640_v33, %v484_v11  ;;  %v486_v17 = vpop.f32.mrb[13].mxu1  ;;  %1416 = vmatmul.mubr.bf16.gmra.mrb[56].mxu1 %v11735_v61  ;;  %v883_v29 = vadd.f32 %v11695_v50, %v838_v28 }
 0x1d3   :  { %v841_v19 = vmul.f32 %v11688_v43, %v796_v7  ;;  %v10068_v18 = vadd.f32 %v11642_v34, %v486_v17  ;;  %v488_v24 = vpop.f32.mrb[14].mxu1  ;;  %v884_v39 = vadd.f32 %v11699_v54, %v839_v6 }
 0x1d4   :  { %v885_v31 = vadd.f32 %v11695_v50, %v840_v30  ;;  %v765_v20 = vadd.f32 %v10067_v16, %v11674_v15  ;;  %v10069_v35 = vadd.f32 %v11644_v36, %v488_v24  ;;  %v490_v37 = vpop.f32.mrb[15].mxu1 }
 0x1d5   :  { %v886_v33 = vadd.f32 %v11699_v54, %v841_v19  ;;  %v766_v40 = vadd.f32 %v10068_v18, %v11677_v21  ;;  %v10070_v22 = vadd.f32 %v11646_v38, %v490_v37 }
 0x1d6   :  { %v11757_v9 = vpack.c.bf16 %v885_v31, %v883_v29  ;;  %v797_v34 = vmax.f32 %v765_v20, 0.0  ;;  %v767_v45 = vadd.f32 %v10069_v35, %v11674_v15 }
 0x1d7   :  { %v11760_v10 = vpack.c.bf16 %v886_v33, %v884_v39  ;;  %v798_v47 = vmax.f32 %v766_v40, 0.0  ;;  %v768_v48 = vadd.f32 %v10070_v22, %v11677_v21 }
 0x1d8   :  { %v842_v36 = vmul.f32 %v11683_v32, %v797_v34  ;;  %v799_v49 = vmax.f32 %v767_v45, 0.0 }
 0x1d9   :  { %v843_v12 = vmul.f32 %v11688_v43, %v798_v47  ;;  %v800_v52 = vmax.f32 %v768_v48, 0.0  ;;  %v494_v55 = vpop.f32.mrb[16].mxu1  ;;  %1425 = vmatprep.mubr.bf16.mxu1 %v11760_v10 }
 0x1da   :  { %v844_v38 = vmul.f32 %v11683_v32, %v799_v49  ;;  %v10071_v57 = vadd.f32 %v11648_v41, %v494_v55  ;;  %v496_v14 = vpop.f32.mrb[17].mxu1  ;;  %1426 = vmatmul.mubr.bf16.gmra.mrb[60].mxu1 %v11757_v9  ;;  %v887_v26 = vadd.f32 %v11695_v50, %v842_v36 }
 0x1db   :  { %v845_v25 = vmul.f32 %v11688_v43, %v800_v52  ;;  %v10072_v59 = vadd.f32 %v11650_v42, %v496_v14  ;;  %v498_v60 = vpop.f32.mrb[18].mxu1  ;;  %v888_v5 = vadd.f32 %v11699_v54, %v843_v12 }
 0x1dc   :  { %v889_v62 = vadd.f32 %v11695_v50, %v844_v38  ;;  %v769_v1 = vadd.f32 %v10071_v57, %v11674_v15  ;;  %v10073_v4 = vadd.f32 %v11652_v44, %v498_v60  ;;  %v500_v28 = vpop.f32.mrb[19].mxu1 }
 0x1dd   :  { %v890_v41 = vadd.f32 %v11699_v54, %v845_v25  ;;  %v770_v6 = vadd.f32 %v10072_v59, %v11677_v21  ;;  %v10074_v7 = vadd.f32 %v11654_v46, %v500_v28 }
 0x1de   :  { %v11779_v11 = vpack.c.bf16 %v889_v62, %v887_v26  ;;  %v801_v42 = vmax.f32 %v769_v1, 0.0  ;;  %v771_v30 = vadd.f32 %v10073_v4, %v11674_v15 }
 0x1df   :  { %v11782_v16 = vpack.c.bf16 %v890_v41, %v888_v5  ;;  %v802_v17 = vmax.f32 %v770_v6, 0.0  ;;  %v772_v19 = vadd.f32 %v10074_v7, %v11677_v21 }
 0x1e0   :  { %v846_v44 = vmul.f32 %v11683_v32, %v801_v42  ;;  %v803_v18 = vmax.f32 %v771_v30, 0.0 }
 0x1e1   :  { %v847_v24 = vmul.f32 %v11688_v43, %v802_v17  ;;  %v804_v29 = vmax.f32 %v772_v19, 0.0  ;;  %v504_v31 = vpop.f32.mrb[20].mxu1  ;;  %1435 = vmatprep.mubr.bf16.mxu1 %v11782_v16 }
 0x1e2   :  { %v848_v46 = vmul.f32 %v11683_v32, %v803_v18  ;;  %v10075_v20 = vadd.f32 %v11656_v51, %v504_v31  ;;  %v506_v35 = vpop.f32.mrb[21].mxu1  ;;  %1436 = vmatmul.mubr.bf16.gmra.mrb[64].mxu1 %v11779_v11  ;;  %v891_v40 = vadd.f32 %v11695_v50, %v846_v44 }
 0x1e3   :  { %v849_v37 = vmul.f32 %v11688_v43, %v804_v29  ;;  %v10076_v39 = vadd.f32 %v11658_v53, %v506_v35  ;;  %v508_v33 = vpop.f32.mrb[22].mxu1  ;;  %v892_v48 = vadd.f32 %v11699_v54, %v847_v24 }
 0x1e4   :  { %v893_v22 = vadd.f32 %v11695_v50, %v848_v46  ;;  %v773_v34 = vadd.f32 %v10075_v20, %v11674_v15  ;;  %v10077_v45 = vadd.f32 %v11660_v56, %v508_v33  ;;  %v510_v47 = vpop.f32.mrb[23].mxu1 }
 0x1e5   :  { %v894_v51 = vadd.f32 %v11699_v54, %v849_v37  ;;  %v774_v36 = vadd.f32 %v10076_v39, %v11677_v21  ;;  %v10078_v49 = vadd.f32 %v11662_v58, %v510_v47 }
 0x1e6   :  { %v11801_v12 = vpack.c.bf16 %v893_v22, %v891_v40  ;;  %v805_v53 = vmax.f32 %v773_v34, 0.0  ;;  %v775_v52 = vadd.f32 %v10077_v45, %v11674_v15 }
 0x1e7   :  { %v11804_v55 = vpack.c.bf16 %v894_v51, %v892_v48  ;;  %v806_v38 = vmax.f32 %v774_v36, 0.0  ;;  %v776_v57 = vadd.f32 %v10078_v49, %v11677_v21 }
 0x1e8   :  { %v850_v56 = vmul.f32 %v11683_v32, %v805_v53  ;;  %v807_v14 = vmax.f32 %v775_v52, 0.0 }
 0x1e9   :  { %v851_v25 = vmul.f32 %v11688_v43, %v806_v38  ;;  %v808_v59 = vmax.f32 %v776_v57, 0.0  ;;  %1445 = vmatprep.mubr.bf16.mxu1 %v11804_v55 }
 0x1ea   :  { %v852_v58 = vmul.f32 %v11683_v32, %v807_v14  ;;  %1446 = vmatmul.mubr.bf16.gmra.mrb[68].mxu1 %v11801_v12  ;;  %v895_v26 = vadd.f32 %v11695_v50, %v850_v56 }
 0x1eb   :  { %v853_v60 = vmul.f32 %v11688_v43, %v808_v59  ;;  %v896_v1 = vadd.f32 %v11699_v54, %v851_v25 }
 0x1ec   :  { %v897_v62 = vadd.f32 %v11695_v50, %v852_v58 }
 0x1ed   :  { %v898_v4 = vadd.f32 %v11699_v54, %v853_v60 }
 0x1ee   :  { %v11817_v28 = vpack.c.bf16 %v897_v62, %v895_v26 }
 0x1ef   :  { %v11819_v5 = vpack.c.bf16 %v898_v4, %v896_v1 }
 0x1f1   :  { %1455 = vmatprep.mubr.bf16.mxu1 %v11819_v5 }
 0x1f2   :  { %1456 = vmatmul.mubr.bf16.gmra.mrb[72].mxu1 %v11817_v28 }
 0x1f9   :  { %v534_v41 = vpop.f32.mrb[44].mxu1 }
 0x1fa   :  { %v535_v6 = vpop.f32.mrb[45].mxu1 }
 0x1fb   :  { %v536_v7 = vpop.f32.mrb[46].mxu1 }
 0x1fc   :  { %v537_v42 = vpop.f32.mrb[47].mxu1 }
 0x201   :  { %v658_v30 = vpop.f32.mrb[24].mxu1 }
 0x202   :  { %v777_v17 = vadd.f32 %v11674_v15, %v658_v30  ;;  %v660_v19 = vpop.f32.mrb[25].mxu1 }
 0x203   :  { %v778_v44 = vadd.f32 %v11677_v21, %v660_v19  ;;  %v662_v18 = vpop.f32.mrb[26].mxu1  ;;  %v10522_v19 = vld [vmem:[#allocation14 + $0x264] ss:$16 sps:$4 sm:$0xff]  }
 0x204   :  { %v809_v24 = vmax.f32 %v777_v17, 0.0  ;;  %v779_v29 = vadd.f32 %v11674_v15, %v662_v18  ;;  %v664_v31 = vpop.f32.mrb[27].mxu1  ;;  %v10517_v17 = vld [vmem:[#allocation14 + $0x240] ss:$16 sps:$4 sm:$0xff]   ;;  %v10525_v18 = vld [vmem:[#allocation14 + $0x284] ss:$16 sps:$4 sm:$0xff]  }
 0x205   :  { %v810_v46 = vmax.f32 %v778_v44, 0.0  ;;  %v780_v20 = vadd.f32 %v11677_v21, %v664_v31  ;;  %v10520_v44 = vld [vmem:[#allocation14 + $0x260] ss:$16 sps:$4 sm:$0xff]  }
 0x206   :  { %v854_v35 = vmul.f32 %v11683_v32, %v809_v24  ;;  %v811_v37 = vmax.f32 %v779_v29, 0.0  ;;  %v10523_v24 = vld [vmem:[#allocation14 + $0x280] ss:$16 sps:$4 sm:$0xff]   ;;  %v10528_v29 = vld [vmem:[#allocation14 + $0x2a4] ss:$16 sps:$4 sm:$0xff]  }
 0x207   :  { %v855_v39 = vmul.f32 %v11688_v43, %v810_v46  ;;  %v812_v33 = vmax.f32 %v780_v20, 0.0  ;;  %v10526_v31 = vld [vmem:[#allocation14 + $0x2a0] ss:$16 sps:$4 sm:$0xff]   ;;  %v10531_v46 = vld [vmem:[#allocation14 + $0x2c4] ss:$16 sps:$4 sm:$0xff]  }
 0x208   :  { %v856_v40 = vmul.f32 %v11683_v32, %v811_v37  ;;  %v899_v45 = vadd.f32 %v11695_v50, %v854_v35  ;;  %v10529_v20 = vld [vmem:[#allocation14 + $0x2c0] ss:$16 sps:$4 sm:$0xff]   ;;  %v10534_v35 = vld [vmem:[#allocation14 + $0x2e4] ss:$16 sps:$4 sm:$0xff]  }
 0x209   :  { %v857_v22 = vmul.f32 %v11688_v43, %v812_v33  ;;  %v668_v34 = vpop.f32.mrb[28].mxu1  ;;  %v900_v36 = vadd.f32 %v11699_v54, %v855_v39  ;;  %v10532_v37 = vld [vmem:[#allocation14 + $0x2e0] ss:$16 sps:$4 sm:$0xff]   ;;  %v10537_v39 = vld [vmem:[#allocation14 + $0x304] ss:$16 sps:$4 sm:$0xff]  }
 0x20a   :  { %v901_v47 = vadd.f32 %v11695_v50, %v856_v40  ;;  %v781_v48 = vadd.f32 %v11674_v15, %v668_v34  ;;  %v670_v51 = vpop.f32.mrb[29].mxu1  ;;  %v10535_v33 = vld [vmem:[#allocation14 + $0x300] ss:$16 sps:$4 sm:$0xff]   ;;  %v10540_v40 = vld [vmem:[#allocation14 + $0x324] ss:$16 sps:$4 sm:$0xff]  }
 0x20b   :  { %v902_v49 = vadd.f32 %v11699_v54, %v857_v22  ;;  %v782_v53 = vadd.f32 %v11677_v21, %v670_v51  ;;  %v672_v52 = vpop.f32.mrb[30].mxu1  ;;  %v10538_v22 = vld [vmem:[#allocation14 + $0x320] ss:$16 sps:$4 sm:$0xff]   ;;  %v10543_v34 = vld [vmem:[#allocation14 + $0x344] ss:$16 sps:$4 sm:$0xff]  }
 0x20c   :  { %v11837_v38 = vpack.c.bf16 %v901_v47, %v899_v45  ;;  %v813_v57 = vmax.f32 %v781_v48, 0.0  ;;  %v783_v56 = vadd.f32 %v11674_v15, %v672_v52  ;;  %v674_v14 = vpop.f32.mrb[31].mxu1  ;;  %v10541_v45 = vld [vmem:[#allocation14 + $0x340] ss:$16 sps:$4 sm:$0xff]   ;;  %v10546_v47 = vld [vmem:[#allocation14 + $0x364] ss:$16 sps:$4 sm:$0xff]  }
 0x20d   :  { %v11840_v25 = vpack.c.bf16 %v902_v49, %v900_v36  ;;  %v814_v59 = vmax.f32 %v782_v53, 0.0  ;;  %v784_v58 = vadd.f32 %v11677_v21, %v674_v14  ;;  %v10544_v48 = vld [vmem:[#allocation14 + $0x360] ss:$16 sps:$4 sm:$0xff]   ;;  %v10549_v51 = vld [vmem:[#allocation14 + $0x384] ss:$16 sps:$4 sm:$0xff]  }
 0x20e   :  { %v858_v60 = vmul.f32 %v11683_v32, %v813_v57  ;;  %v815_v26 = vmax.f32 %v783_v56, 0.0  ;;  %v10547_v36 = vld [vmem:[#allocation14 + $0x380] ss:$16 sps:$4 sm:$0xff]   ;;  %v10552_v49 = vld [vmem:[#allocation14 + $0x3a4] ss:$16 sps:$4 sm:$0xff]  }
 0x20f   :  { %v859_v62 = vmul.f32 %v11688_v43, %v814_v59  ;;  %v816_v1 = vmax.f32 %v784_v58, 0.0  ;;  %1465 = vmatprep.mubr.bf16.mxu1 %v11840_v25  ;;  %v10550_v53 = vld [vmem:[#allocation14 + $0x3a0] ss:$16 sps:$4 sm:$0xff]   ;;  %v10555_v52 = vld [vmem:[#allocation14 + $0x3c4] ss:$16 sps:$4 sm:$0xff]  }
 0x210   :  { %v860_v4 = vmul.f32 %v11683_v32, %v815_v26  ;;  %1466 = vmatmul.mubr.bf16.gmra.mrb[76].mxu1 %v11837_v38  ;;  %v903_v41 = vadd.f32 %v11695_v50, %v858_v60  ;;  %v10511_v32 = vld [vmem:[#allocation14 + $0x200] ss:$16 sps:$4 sm:$0xff]   ;;  %v10558_v56 = vld [vmem:[#allocation14 + $0x3e4] ss:$16 sps:$4 sm:$0xff]   ;;  %v10561_v59 = vld [vmem:[#allocation14 + $0x20c] ss:$16 sps:$4 sm:$0xff]  }
 0x211   :  { %v861_v15 = vmul.f32 %v11688_v43, %v816_v1  ;;  %v904_v21 = vadd.f32 %v11699_v54, %v859_v62  ;;  %v10516_v43 = vld [vmem:[#allocation14 + $0x224] ss:$16 sps:$4 sm:$0xff]   ;;  %v10553_v57 = vld [vmem:[#allocation14 + $0x3c0] ss:$16 sps:$4 sm:$0xff]   ;;  %v10559_v58 = vld [vmem:[#allocation14 + $0x208] ss:$16 sps:$4 sm:$0xff]  }
 0x212   :  { %v905_v6 = vadd.f32 %v11695_v50, %v860_v4  ;;  %v10514_v50 = vld [vmem:[#allocation14 + $0x220] ss:$16 sps:$4 sm:$0xff]   ;;  %v10564_v60 = vld [vmem:[#allocation14 + $0x22c] ss:$16 sps:$4 sm:$0xff]   ;;  %v10562_v26 = vld [vmem:[#allocation14 + $0x228] ss:$16 sps:$4 sm:$0xff]  }
 0x213   :  { %v906_v7 = vadd.f32 %v11699_v54, %v861_v15  ;;  %v10519_v54 = vld [vmem:[#allocation14 + $0x244] ss:$16 sps:$4 sm:$0xff]   ;;  %v10556_v14 = vld [vmem:[#allocation14 + $0x3e0] ss:$16 sps:$4 sm:$0xff]   ;;  %v10567_v62 = vld [vmem:[#allocation14 + $0x24c] ss:$16 sps:$4 sm:$0xff]  }
 0x214   :  { %v11853_v42 = vpack.c.bf16 %v905_v6, %v903_v41  ;;  %v10565_v1 = vld [vmem:[#allocation14 + $0x248] ss:$16 sps:$4 sm:$0xff]   ;;  %v10570_v4 = vld [vmem:[#allocation14 + $0x26c] ss:$16 sps:$4 sm:$0xff]  }
 0x215   :  { %v11855_v30 = vpack.c.bf16 %v906_v7, %v904_v21  ;;  %v10568_v15 = vld [vmem:[#allocation14 + $0x268] ss:$16 sps:$4 sm:$0xff]   ;;  %v10573_v41 = vld [vmem:[#allocation14 + $0x28c] ss:$16 sps:$4 sm:$0xff]  }
 0x216   :  { %v10571_v6 = vld [vmem:[#allocation14 + $0x288] ss:$16 sps:$4 sm:$0xff]   ;;  %v10576_v21 = vld [vmem:[#allocation14 + $0x2ac] ss:$16 sps:$4 sm:$0xff]  }
 0x217   :  { %1475 = vmatprep.mubr.bf16.mxu1 %v11855_v30  ;;  %v10574_v7 = vld [vmem:[#allocation14 + $0x2a8] ss:$16 sps:$4 sm:$0xff]  }
 0x218   :  { %1476 = vmatmul.mubr.bf16.gmra.mrb[80].mxu1 %v11853_v42 }
 0x219   :  { %1481 = vmatprep.mubr.bf16.mxu1 %v13318_v0 }
 0x220   :  { %1482 = vmatmul.mubr.bf16.gmra.mrb[84].mxu1 %v13318_v0 }
 0x221   :  { %1520 = vmatprep.mubr.bf16.mxu1 %v13318_v0 }
 0x228   :  { %1521 = vmatmul.mubr.bf16.vlgmr.msra.gmra.mrb[88].mxu1 %v13318_v0 }
 0x229   :  { %1530 = vmatprep.mubr.bf16.mxu1 %v11716_v27  ;;  %1999 = vmatpush1.bf16.msra.mxu1 %v10511_v32  ;;  %v10579_v32 = vld [vmem:[#allocation14 + $0x2cc] ss:$16 sps:$4 sm:$0xff]  }
 0x22a   :  { %2000 = vmatprep.subr.bf16.mxu1 %v10516_v43  ;;  %v10577_v43 = vld [vmem:[#allocation14 + $0x2c8] ss:$16 sps:$4 sm:$0xff]  }
 0x22d   :  { %2001 = vmatpush1.bf16.msra.mxu1 %v10514_v50  ;;  %v10582_v50 = vld [vmem:[#allocation14 + $0x2ec] ss:$16 sps:$4 sm:$0xff]  }
 0x22e   :  { %2002 = vmatprep.subr.bf16.mxu1 %v10519_v54  ;;  %v10580_v54 = vld [vmem:[#allocation14 + $0x2e8] ss:$16 sps:$4 sm:$0xff]  }
 0x230   :  { %1531 = vmatmul.mubr.bf16.gmra.mrb[92].mxu1 %v11713_v23 }
 0x231   :  { %1540 = vmatprep.mubr.bf16.mxu1 %v11738_v63  ;;  %2003 = vmatpush1.bf16.msra.mxu1 %v10517_v17  ;;  %v10585_v17 = vld [vmem:[#allocation14 + $0x30c] ss:$16 sps:$4 sm:$0xff]  }
 0x232   :  { %2004 = vmatprep.subr.bf16.mxu1 %v10522_v19  ;;  %v10583_v19 = vld [vmem:[#allocation14 + $0x308] ss:$16 sps:$4 sm:$0xff]  }
 0x235   :  { %2005 = vmatpush1.bf16.msra.mxu1 %v10520_v44  ;;  %v10588_v44 = vld [vmem:[#allocation14 + $0x32c] ss:$16 sps:$4 sm:$0xff]  }
 0x236   :  { %2006 = vmatprep.subr.bf16.mxu1 %v10525_v18  ;;  %v10586_v18 = vld [vmem:[#allocation14 + $0x328] ss:$16 sps:$4 sm:$0xff]  }
 0x238   :  { %1541 = vmatmul.mubr.bf16.gmra.mrb[96].mxu1 %v11735_v61 }
 0x239   :  { %1550 = vmatprep.mubr.bf16.mxu1 %v11760_v10  ;;  %2007 = vmatpush1.bf16.msra.mxu1 %v10523_v24  ;;  %v10591_v24 = vld [vmem:[#allocation14 + $0x34c] ss:$16 sps:$4 sm:$0xff]  }
 0x23a   :  { %2008 = vmatprep.subr.bf16.mxu1 %v10528_v29  ;;  %v10589_v29 = vld [vmem:[#allocation14 + $0x348] ss:$16 sps:$4 sm:$0xff]  }
 0x23d   :  { %2009 = vmatpush1.bf16.msra.mxu1 %v10526_v31  ;;  %v10594_v31 = vld [vmem:[#allocation14 + $0x36c] ss:$16 sps:$4 sm:$0xff]  }
 0x23e   :  { %2010 = vmatprep.subr.bf16.mxu1 %v10531_v46  ;;  %v10592_v46 = vld [vmem:[#allocation14 + $0x368] ss:$16 sps:$4 sm:$0xff]  }
 0x240   :  { %1551 = vmatmul.mubr.bf16.gmra.mrb[100].mxu1 %v11757_v9 }
 0x241   :  { %1560 = vmatprep.mubr.bf16.mxu1 %v11782_v16  ;;  %2011 = vmatpush1.bf16.msra.mxu1 %v10529_v20  ;;  %v10597_v20 = vld [vmem:[#allocation14 + $0x38c] ss:$16 sps:$4 sm:$0xff]  }
 0x242   :  { %2012 = vmatprep.subr.bf16.mxu1 %v10534_v35  ;;  %v10595_v35 = vld [vmem:[#allocation14 + $0x388] ss:$16 sps:$4 sm:$0xff]  }
 0x245   :  { %2013 = vmatpush1.bf16.msra.mxu1 %v10532_v37  ;;  %v10600_v37 = vld [vmem:[#allocation14 + $0x3ac] ss:$16 sps:$4 sm:$0xff]  }
 0x246   :  { %2014 = vmatprep.subr.bf16.mxu1 %v10537_v39  ;;  %v10598_v39 = vld [vmem:[#allocation14 + $0x3a8] ss:$16 sps:$4 sm:$0xff]  }
 0x248   :  { %1561 = vmatmul.mubr.bf16.gmra.mrb[104].mxu1 %v11779_v11 }
 0x249   :  { %1570 = vmatprep.mubr.bf16.mxu1 %v11804_v55  ;;  %2015 = vmatpush1.bf16.msra.mxu1 %v10535_v33  ;;  %v10603_v33 = vld [vmem:[#allocation14 + $0x3cc] ss:$16 sps:$4 sm:$0xff]  }
 0x24a   :  { %2016 = vmatprep.subr.bf16.mxu1 %v10540_v40  ;;  %v10601_v40 = vld [vmem:[#allocation14 + $0x3c8] ss:$16 sps:$4 sm:$0xff]  }
 0x24d   :  { %2017 = vmatpush1.bf16.msra.mxu1 %v10538_v22  ;;  %v10606_v22 = vld [vmem:[#allocation14 + $0x3ec] ss:$16 sps:$4 sm:$0xff]  }
 0x24e   :  { %2018 = vmatprep.subr.bf16.mxu1 %v10543_v34  ;;  %v10604_v34 = vld [vmem:[#allocation14 + $0x3e8] ss:$16 sps:$4 sm:$0xff]  }
 0x250   :  { %1571 = vmatmul.mubr.bf16.gmra.mrb[108].mxu1 %v11801_v12 }
 0x251   :  { %1580 = vmatprep.mubr.bf16.mxu1 %v11819_v5  ;;  %2019 = vmatpush1.bf16.msra.mxu1 %v10541_v45  ;;  %v10609_v45 = vld [vmem:[#allocation14 + $0x404] ss:$16 sps:$4 sm:$0xff]  }
 0x252   :  { %2020 = vmatprep.subr.bf16.mxu1 %v10546_v47  ;;  %v10607_v47 = vld [vmem:[#allocation14 + $0x400] ss:$16 sps:$4 sm:$0xff]  }
 0x255   :  { %2021 = vmatpush1.bf16.msra.mxu1 %v10544_v48  ;;  %v10612_v48 = vld [vmem:[#allocation14 + $0x424] ss:$16 sps:$4 sm:$0xff]  }
 0x256   :  { %2022 = vmatprep.subr.bf16.mxu1 %v10549_v51  ;;  %v10610_v51 = vld [vmem:[#allocation14 + $0x420] ss:$16 sps:$4 sm:$0xff]  }
 0x258   :  { %1581 = vmatmul.mubr.bf16.gmra.mrb[112].mxu1 %v11817_v28 }
 0x259   :  { %1590 = vmatprep.mubr.bf16.mxu1 %v11840_v25  ;;  %2023 = vmatpush1.bf16.msra.mxu1 %v10547_v36  ;;  %v10615_v36 = vld [vmem:[#allocation14 + $0x444] ss:$16 sps:$4 sm:$0xff]  }
 0x25a   :  { %2024 = vmatprep.subr.bf16.mxu1 %v10552_v49  ;;  %v10613_v49 = vld [vmem:[#allocation14 + $0x440] ss:$16 sps:$4 sm:$0xff]  }
 0x25d   :  { %2025 = vmatpush1.bf16.msra.mxu1 %v10550_v53  ;;  %v10618_v53 = vld [vmem:[#allocation14 + $0x464] ss:$16 sps:$4 sm:$0xff]  }
 0x25e   :  { %2026 = vmatprep.subr.bf16.mxu1 %v10555_v52  ;;  %v10616_v52 = vld [vmem:[#allocation14 + $0x460] ss:$16 sps:$4 sm:$0xff]  }
 0x260   :  { %1591 = vmatmul.mubr.bf16.gmra.mrb[116].mxu1 %v11837_v38 }
 0x261   :  { %1600 = vmatprep.mubr.bf16.mxu1 %v11855_v30  ;;  %2027 = vmatpush1.bf16.msra.mxu1 %v10553_v57  ;;  %v10621_v57 = vld [vmem:[#allocation14 + $0x484] ss:$16 sps:$4 sm:$0xff]  }
 0x262   :  { %2028 = vmatprep.subr.bf16.mxu1 %v10558_v56  ;;  %v10619_v56 = vld [vmem:[#allocation14 + $0x480] ss:$16 sps:$4 sm:$0xff]  }
 0x265   :  { %2029 = vmatpush1.bf16.msra.mxu1 %v10556_v14  ;;  %v10624_v14 = vld [vmem:[#allocation14 + $0x4a4] ss:$16 sps:$4 sm:$0xff]  }
 0x266   :  { %2123 = vmatprep.subr.bf16.mxu1 %v10561_v59  ;;  %v10622_v59 = vld [vmem:[#allocation14 + $0x4a0] ss:$16 sps:$4 sm:$0xff]  }
 0x268   :  { %1601 = vmatmul.mubr.bf16.gmra.mrb[120].mxu1 %v11853_v42 }
 0x269   :  { %1606 = vmatprep.mubr.bf16.mxu1 %v13318_v0 }
 0x270   :  { %1607 = vmatmul.mubr.bf16.gmra.mrb[124].mxu1 %v13318_v0 }
 0x271   :  { %2030 = vmatprep.mubr.bf16.mxu1 %v13318_v0 }
 0x278   :  { %2031 = vmatmul.mubr.bf16.vlgmr.msra.gmra.mrb[128].mxu1 %v13318_v0 }
 0x279   :  { %2036 = vmatprep.mubr.bf16.mxu1 %v11716_v27  ;;  %2124 = vmatpush1.bf16.msra.mxu1 %v10559_v58  ;;  %v10627_v58 = vld [vmem:[#allocation14 + $0x4c4] ss:$16 sps:$4 sm:$0xff]  }
 0x27a   :  { %2125 = vmatprep.subr.bf16.mxu1 %v10564_v60  ;;  %v10625_v60 = vld [vmem:[#allocation14 + $0x4c0] ss:$16 sps:$4 sm:$0xff]  }
 0x27d   :  { %2126 = vmatpush1.bf16.msra.mxu1 %v10562_v26  ;;  %v10630_v26 = vld [vmem:[#allocation14 + $0x4e4] ss:$16 sps:$4 sm:$0xff]  }
 0x27e   :  { %2127 = vmatprep.subr.bf16.mxu1 %v10567_v62  ;;  %v10628_v62 = vld [vmem:[#allocation14 + $0x4e0] ss:$16 sps:$4 sm:$0xff]  }
 0x280   :  { %2037 = vmatmul.mubr.bf16.gmra.mrb[48].mxu1 %v11713_v23 }
 0x281   :  { %2046 = vmatprep.mubr.bf16.mxu1 %v11738_v63  ;;  %2128 = vmatpush1.bf16.msra.mxu1 %v10565_v1  ;;  %v10633_v1 = vld [vmem:[#allocation14 + $0x504] ss:$16 sps:$4 sm:$0xff]  }
 0x282   :  { %2129 = vmatprep.subr.bf16.mxu1 %v10570_v4  ;;  %v10631_v4 = vld [vmem:[#allocation14 + $0x500] ss:$16 sps:$4 sm:$0xff]  }
 0x285   :  { %2130 = vmatpush1.bf16.msra.mxu1 %v10568_v15  ;;  %v10636_v15 = vld [vmem:[#allocation14 + $0x524] ss:$16 sps:$4 sm:$0xff]  }
 0x286   :  { %2131 = vmatprep.subr.bf16.mxu1 %v10573_v41  ;;  %v10634_v41 = vld [vmem:[#allocation14 + $0x520] ss:$16 sps:$4 sm:$0xff]  }
 0x288   :  { %2047 = vmatmul.mubr.bf16.gmra.mrb[52].mxu1 %v11735_v61 }
 0x289   :  { %2056 = vmatprep.mubr.bf16.mxu1 %v11760_v10  ;;  %2132 = vmatpush1.bf16.msra.mxu1 %v10571_v6  ;;  %v10639_v6 = vld [vmem:[#allocation14 + $0x544] ss:$16 sps:$4 sm:$0xff]  }
 0x28a   :  { %2133 = vmatprep.subr.bf16.mxu1 %v10576_v21 }
 0x28d   :  { %2134 = vmatpush1.bf16.msra.mxu1 %v10574_v7 }
 0x28e   :  { %2135 = vmatprep.subr.bf16.mxu1 %v10579_v32 }
 0x290   :  { %2057 = vmatmul.mubr.bf16.gmra.mrb[56].mxu1 %v11757_v9 }
 0x291   :  { %2066 = vmatprep.mubr.bf16.mxu1 %v11782_v16  ;;  %2136 = vmatpush1.bf16.msra.mxu1 %v10577_v43  ;;  %v10637_v43 = vld [vmem:[#allocation14 + $0x540] ss:$16 sps:$4 sm:$0xff]  }
 0x292   :  { %2137 = vmatprep.subr.bf16.mxu1 %v10582_v50 }
 0x295   :  { %2138 = vmatpush1.bf16.msra.mxu1 %v10580_v54  ;;  %v10642_v54 = vld [vmem:[#allocation14 + $0x564] ss:$16 sps:$4 sm:$0xff]  }
 0x296   :  { %2139 = vmatprep.subr.bf16.mxu1 %v10585_v17  ;;  %v10640_v17 = vld [vmem:[#allocation14 + $0x560] ss:$16 sps:$4 sm:$0xff]  }
 0x298   :  { %2067 = vmatmul.mubr.bf16.gmra.mrb[60].mxu1 %v11779_v11 }
 0x299   :  { %2076 = vmatprep.mubr.bf16.mxu1 %v11804_v55  ;;  %2140 = vmatpush1.bf16.msra.mxu1 %v10583_v19  ;;  %v10645_v19 = vld [vmem:[#allocation14 + $0x584] ss:$16 sps:$4 sm:$0xff]  }
 0x29a   :  { %2141 = vmatprep.subr.bf16.mxu1 %v10588_v44 }
 0x29d   :  { %2142 = vmatpush1.bf16.msra.mxu1 %v10586_v18 }
 0x29e   :  { %2143 = vmatprep.subr.bf16.mxu1 %v10591_v24 }
 0x2a0   :  { %2077 = vmatmul.mubr.bf16.gmra.mrb[64].mxu1 %v11801_v12 }
 0x2a1   :  { %2086 = vmatprep.mubr.bf16.mxu1 %v11819_v5  ;;  %2144 = vmatpush1.bf16.msra.mxu1 %v10589_v29  ;;  %v10643_v29 = vld [vmem:[#allocation14 + $0x580] ss:$16 sps:$4 sm:$0xff]  }
 0x2a2   :  { %2145 = vmatprep.subr.bf16.mxu1 %v10594_v31 }
 0x2a5   :  { %2146 = vmatpush1.bf16.msra.mxu1 %v10592_v46  ;;  %v10648_v46 = vld [vmem:[#allocation14 + $0x5a4] ss:$16 sps:$4 sm:$0xff]  }
 0x2a6   :  { %2147 = vmatprep.subr.bf16.mxu1 %v10597_v20  ;;  %v10646_v20 = vld [vmem:[#allocation14 + $0x5a0] ss:$16 sps:$4 sm:$0xff]  }
 0x2a8   :  { %2087 = vmatmul.mubr.bf16.gmra.mrb[68].mxu1 %v11817_v28 }
 0x2a9   :  { %2096 = vmatprep.mubr.bf16.mxu1 %v11840_v25  ;;  %2148 = vmatpush1.bf16.msra.mxu1 %v10595_v35  ;;  %v10651_v35 = vld [vmem:[#allocation14 + $0x5c4] ss:$16 sps:$4 sm:$0xff]  }
 0x2aa   :  { %2149 = vmatprep.subr.bf16.mxu1 %v10600_v37  ;;  %v10649_v37 = vld [vmem:[#allocation14 + $0x5c0] ss:$16 sps:$4 sm:$0xff]  }
 0x2ad   :  { %2150 = vmatpush1.bf16.msra.mxu1 %v10598_v39  ;;  %v10654_v39 = vld [vmem:[#allocation14 + $0x5e4] ss:$16 sps:$4 sm:$0xff]  }
 0x2ae   :  { %2151 = vmatprep.subr.bf16.mxu1 %v10603_v33  ;;  %v10652_v33 = vld [vmem:[#allocation14 + $0x5e0] ss:$16 sps:$4 sm:$0xff]  }
 0x2b0   :  { %2097 = vmatmul.mubr.bf16.gmra.mrb[72].mxu1 %v11837_v38 }
 0x2b1   :  { %2106 = vmatprep.mubr.bf16.mxu1 %v11855_v30  ;;  %2152 = vmatpush1.bf16.msra.mxu1 %v10601_v40  ;;  %v10657_v40 = vld [vmem:[#allocation14 + $0x40c] ss:$16 sps:$4 sm:$0xff]  }
 0x2b2   :  { %2153 = vmatprep.subr.bf16.mxu1 %v10606_v22  ;;  %v10655_v22 = vld [vmem:[#allocation14 + $0x408] ss:$16 sps:$4 sm:$0xff]  }
 0x2b5   :  { %2154 = vmatpush1.bf16.msra.mxu1 %v10604_v34  ;;  %v10660_v34 = vld [vmem:[#allocation14 + $0x42c] ss:$16 sps:$4 sm:$0xff]  }
 0x2b6   :  { %2633 = vmatprep.subr.bf16.mxu1 %v10609_v45  ;;  %v10658_v45 = vld [vmem:[#allocation14 + $0x428] ss:$16 sps:$4 sm:$0xff]  }
 0x2b8   :  { %2107 = vmatmul.mubr.bf16.gmra.mrb[76].mxu1 %v11853_v42 }
 0x2b9   :  { %2116 = vmatprep.mubr.bf16.mxu1 %v13318_v0 }
 0x2c0   :  { %2117 = vmatmul.mubr.bf16.gmra.mrb[132].mxu1 %v13318_v0 }
 0x2c1   :  { %2155 = vmatprep.mubr.bf16.mxu1 %v13318_v0 }
 0x2c8   :  { %2156 = vmatmul.mubr.bf16.vlgmr.msra.gmra.mrb[136].mxu1 %v13318_v0 }
 0x2c9   :  { %2161 = vmatprep.mubr.bf16.mxu1 %v11716_v27  ;;  %2634 = vmatpush1.bf16.msra.mxu1 %v10607_v47  ;;  %v10663_v47 = vld [vmem:[#allocation14 + $0x44c] ss:$16 sps:$4 sm:$0xff]  }
 0x2ca   :  { %2635 = vmatprep.subr.bf16.mxu1 %v10612_v48  ;;  %v10661_v48 = vld [vmem:[#allocation14 + $0x448] ss:$16 sps:$4 sm:$0xff]  }
 0x2cd   :  { %2636 = vmatpush1.bf16.msra.mxu1 %v10610_v51  ;;  %v10666_v51 = vld [vmem:[#allocation14 + $0x46c] ss:$16 sps:$4 sm:$0xff]  }
 0x2ce   :  { %2637 = vmatprep.subr.bf16.mxu1 %v10615_v36  ;;  %v10664_v36 = vld [vmem:[#allocation14 + $0x468] ss:$16 sps:$4 sm:$0xff]  }
 0x2d0   :  { %2162 = vmatmul.mubr.bf16.gmra.mrb[88].mxu1 %v11713_v23 }
 0x2d1   :  { %2171 = vmatprep.mubr.bf16.mxu1 %v11738_v63  ;;  %2638 = vmatpush1.bf16.msra.mxu1 %v10613_v49  ;;  %v10669_v49 = vld [vmem:[#allocation14 + $0x48c] ss:$16 sps:$4 sm:$0xff]  }
 0x2d2   :  { %2639 = vmatprep.subr.bf16.mxu1 %v10618_v53  ;;  %v10667_v53 = vld [vmem:[#allocation14 + $0x488] ss:$16 sps:$4 sm:$0xff]  }
 0x2d5   :  { %2640 = vmatpush1.bf16.msra.mxu1 %v10616_v52  ;;  %v10672_v52 = vld [vmem:[#allocation14 + $0x4ac] ss:$16 sps:$4 sm:$0xff]  }
 0x2d6   :  { %2641 = vmatprep.subr.bf16.mxu1 %v10621_v57  ;;  %v10670_v57 = vld [vmem:[#allocation14 + $0x4a8] ss:$16 sps:$4 sm:$0xff]  }
 0x2d8   :  { %2172 = vmatmul.mubr.bf16.gmra.mrb[92].mxu1 %v11735_v61 }
 0x2d9   :  { %2181 = vmatprep.mubr.bf16.mxu1 %v11760_v10  ;;  %2642 = vmatpush1.bf16.msra.mxu1 %v10619_v56  ;;  %v10675_v56 = vld [vmem:[#allocation14 + $0x4cc] ss:$16 sps:$4 sm:$0xff]  }
 0x2da   :  { %2643 = vmatprep.subr.bf16.mxu1 %v10624_v14  ;;  %v10673_v14 = vld [vmem:[#allocation14 + $0x4c8] ss:$16 sps:$4 sm:$0xff]  }
 0x2dd   :  { %2644 = vmatpush1.bf16.msra.mxu1 %v10622_v59  ;;  %v10678_v59 = vld [vmem:[#allocation14 + $0x4ec] ss:$16 sps:$4 sm:$0xff]  }
 0x2de   :  { %2645 = vmatprep.subr.bf16.mxu1 %v10627_v58  ;;  %v10676_v58 = vld [vmem:[#allocation14 + $0x4e8] ss:$16 sps:$4 sm:$0xff]  }
 0x2e0   :  { %2182 = vmatmul.mubr.bf16.gmra.mrb[96].mxu1 %v11757_v9 }
 0x2e1   :  { %2191 = vmatprep.mubr.bf16.mxu1 %v11782_v16  ;;  %2646 = vmatpush1.bf16.msra.mxu1 %v10625_v60  ;;  %v10681_v60 = vld [vmem:[#allocation14 + $0x50c] ss:$16 sps:$4 sm:$0xff]  }
 0x2e2   :  { %2647 = vmatprep.subr.bf16.mxu1 %v10630_v26  ;;  %v10679_v26 = vld [vmem:[#allocation14 + $0x508] ss:$16 sps:$4 sm:$0xff]  }
 0x2e5   :  { %2648 = vmatpush1.bf16.msra.mxu1 %v10628_v62  ;;  %v10684_v62 = vld [vmem:[#allocation14 + $0x52c] ss:$16 sps:$4 sm:$0xff]  }
 0x2e6   :  { %2649 = vmatprep.subr.bf16.mxu1 %v10633_v1  ;;  %v10682_v1 = vld [vmem:[#allocation14 + $0x528] ss:$16 sps:$4 sm:$0xff]  }
 0x2e8   :  { %2192 = vmatmul.mubr.bf16.gmra.mrb[100].mxu1 %v11779_v11 }
 0x2e9   :  { %2201 = vmatprep.mubr.bf16.mxu1 %v11804_v55  ;;  %2650 = vmatpush1.bf16.msra.mxu1 %v10631_v4  ;;  %v10687_v4 = vld [vmem:[#allocation14 + $0x54c] ss:$16 sps:$4 sm:$0xff]  }
 0x2ea   :  { %2651 = vmatprep.subr.bf16.mxu1 %v10636_v15 }
 0x2eb   :  { %v1477_v21 = vpop.f32.mrb[80].mxu1 }
 0x2ec   :  { %v1478_v7 = vpop.f32.mrb[81].mxu1  ;;  %v10685_v21 = vld [vmem:[#allocation14 + $0x548] ss:$16 sps:$4 sm:$0xff]  }
 0x2ed   :  { %v1479_v32 = vpop.f32.mrb[82].mxu1  ;;  %2652 = vmatpush1.bf16.msra.mxu1 %v10634_v41 }
 0x2ee   :  { %v1480_v50 = vpop.f32.mrb[83].mxu1  ;;  %2653 = vmatprep.subr.bf16.mxu1 %v10639_v6  ;;  %v10690_v32 = vld [vmem:[#allocation14 + $0x56c] ss:$16 sps:$4 sm:$0xff]  }
 0x2ef   :  { %v10693_v50 = vld [vmem:[#allocation14 + $0x58c] ss:$16 sps:$4 sm:$0xff]  }
 0x2f0   :  { %2202 = vmatmul.mubr.bf16.gmra.mrb[104].mxu1 %v11801_v12 }
 0x2f1   :  { %2211 = vmatprep.mubr.bf16.mxu1 %v11819_v5  ;;  %2654 = vmatpush1.bf16.msra.mxu1 %v10637_v43  ;;  %v10688_v43 = vld [vmem:[#allocation14 + $0x568] ss:$16 sps:$4 sm:$0xff]  }
 0x2f2   :  { %2655 = vmatprep.subr.bf16.mxu1 %v10642_v54 }
 0x2f3   :  { %v1483_v44 = vpop.f32.mrb[84].mxu1 }
 0x2f4   :  { %v1484_v18 = vpop.f32.mrb[85].mxu1  ;;  %v10691_v44 = vld [vmem:[#allocation14 + $0x588] ss:$16 sps:$4 sm:$0xff]  }
 0x2f5   :  { %v1485_v24 = vpop.f32.mrb[86].mxu1  ;;  %2656 = vmatpush1.bf16.msra.mxu1 %v10640_v17 }
 0x2f6   :  { %v1486_v31 = vpop.f32.mrb[87].mxu1  ;;  %2657 = vmatprep.subr.bf16.mxu1 %v10645_v19  ;;  %v10696_v24 = vld [vmem:[#allocation14 + $0x5ac] ss:$16 sps:$4 sm:$0xff]  }
 0x2f7   :  { %v10699_v31 = vld [vmem:[#allocation14 + $0x5cc] ss:$16 sps:$4 sm:$0xff]  }
 0x2f8   :  { %2212 = vmatmul.mubr.bf16.gmra.mrb[108].mxu1 %v11817_v28 }
 0x2f9   :  { %2221 = vmatprep.mubr.bf16.mxu1 %v11840_v25  ;;  %2658 = vmatpush1.bf16.msra.mxu1 %v10643_v29  ;;  %v10694_v29 = vld [vmem:[#allocation14 + $0x5a8] ss:$16 sps:$4 sm:$0xff]  }
 0x2fa   :  { %2659 = vmatprep.subr.bf16.mxu1 %v10648_v46 }
 0x2fd   :  { %2660 = vmatpush1.bf16.msra.mxu1 %v10646_v20 }
 0x2fe   :  { %2661 = vmatprep.subr.bf16.mxu1 %v10651_v35 }
 0x300   :  { %2222 = vmatmul.mubr.bf16.gmra.mrb[112].mxu1 %v11837_v38 }
 0x301   :  { %2231 = vmatprep.mubr.bf16.mxu1 %v11855_v30  ;;  %2662 = vmatpush1.bf16.msra.mxu1 %v10649_v37  ;;  %v10697_v37 = vld [vmem:[#allocation14 + $0x5c8] ss:$16 sps:$4 sm:$0xff]  }
 0x302   :  { %2663 = vmatprep.subr.bf16.mxu1 %v10654_v39 }
 0x305   :  { %2664 = vmatpush1.bf16.msra.mxu1 %v10652_v33  ;;  %v10702_v33 = vld [vmem:[#allocation14 + $0x5ec] ss:$16 sps:$4 sm:$0xff]  }
 0x306   :  { %2758 = vmatprep.subr.bf16.mxu1 %v10657_v40  ;;  %v10700_v40 = vld [vmem:[#allocation14 + $0x5e8] ss:$16 sps:$4 sm:$0xff]  }
 0x308   :  { %2232 = vmatmul.mubr.bf16.gmra.mrb[116].mxu1 %v11853_v42 }
 0x309   :  { %2241 = vmatprep.mubr.bf16.mxu1 %v13318_v0 }
 0x310   :  { %2242 = vmatmul.mubr.bf16.gmra.mrb[140].mxu1 %v13318_v0 }
 0x311   :  { %2665 = vmatprep.mubr.bf16.mxu1 %v13318_v0 }
 0x318   :  { %2666 = vmatmul.mubr.bf16.vlgmr.msra.gmra.mrb[144].mxu1 %v13318_v0 }
 0x319   :  { %2671 = vmatprep.mubr.bf16.mxu1 %v11716_v27  ;;  %2759 = vmatpush1.bf16.msra.mxu1 %v10655_v22 }
 0x31a   :  { %2760 = vmatprep.subr.bf16.mxu1 %v10660_v34 }
 0x31d   :  { %2761 = vmatpush1.bf16.msra.mxu1 %v10658_v45 }
 0x31e   :  { %2762 = vmatprep.subr.bf16.mxu1 %v10663_v47 }
 0x320   :  { %2672 = vmatmul.mubr.bf16.gmra.mrb[148].mxu1 %v11713_v23 }
 0x321   :  { %2677 = vmatprep.mubr.bf16.mxu1 %v11738_v63  ;;  %2763 = vmatpush1.bf16.msra.mxu1 %v10661_v48 }
 0x322   :  { %2764 = vmatprep.subr.bf16.mxu1 %v10666_v51 }
 0x325   :  { %2765 = vmatpush1.bf16.msra.mxu1 %v10664_v36  ;;  %v11967_v36 = vld [vmem:[#allocation15 + $0x1] ss:$4 sm:$0xf] }
 0x326   :  { %2766 = vmatprep.subr.bf16.mxu1 %v10669_v49 }
 0x328   :  { %2678 = vmatmul.mubr.bf16.gmra.mrb[48].mxu1 %v11735_v61 }
 0x329   :  { %2687 = vmatprep.mubr.bf16.mxu1 %v11760_v10  ;;  %2767 = vmatpush1.bf16.msra.mxu1 %v10667_v53 }
 0x32a   :  { %2768 = vmatprep.subr.bf16.mxu1 %v10672_v52 }
 0x32d   :  { %2769 = vmatpush1.bf16.msra.mxu1 %v10670_v57  ;;  %v11976_v57 = vrot.slane %v11967_v36, %v11668_v8 }
 0x32e   :  { %2770 = vmatprep.subr.bf16.mxu1 %v10675_v56 }
 0x330   :  { %2688 = vmatmul.mubr.bf16.gmra.mrb[52].mxu1 %v11757_v9 }
 0x331   :  { %2697 = vmatprep.mubr.bf16.mxu1 %v11782_v16  ;;  %2771 = vmatpush1.bf16.msra.mxu1 %v10673_v14  ;;  %v11978_v14 = vld [vmem:[#allocation15 + $0x2] ss:$4 sm:$0xf] }
 0x332   :  { %2772 = vmatprep.subr.bf16.mxu1 %v10678_v59 }
 0x335   :  { %2773 = vmatpush1.bf16.msra.mxu1 %v10676_v58  ;;  %v11983_v58 = vrot.slane %v11967_v36, %v11671_v13 }
 0x336   :  { %2774 = vmatprep.subr.bf16.mxu1 %v10681_v60 }
 0x338   :  { %2698 = vmatmul.mubr.bf16.gmra.mrb[56].mxu1 %v11779_v11 }
 0x339   :  { %2707 = vmatprep.mubr.bf16.mxu1 %v11804_v55  ;;  %2775 = vmatpush1.bf16.msra.mxu1 %v10679_v26 }
 0x33a   :  { %2776 = vmatprep.subr.bf16.mxu1 %v10684_v62 }
 0x33b   :  { %v1602_v15 = vpop.f32.mrb[120].mxu1 }
 0x33c   :  { %v1603_v41 = vpop.f32.mrb[121].mxu1 }
 0x33d   :  { %v1604_v6 = vpop.f32.mrb[122].mxu1  ;;  %2777 = vmatpush1.bf16.msra.mxu1 %v10682_v1 }
 0x33e   :  { %v1605_v7 = vpop.f32.mrb[123].mxu1  ;;  %2778 = vmatprep.subr.bf16.mxu1 %v10687_v4  ;;  %v11990_v6 = vrot.slane %v11978_v14, %v11668_v8 }
 0x340   :  { %2708 = vmatmul.mubr.bf16.gmra.mrb[60].mxu1 %v11801_v12 }
 0x341   :  { %2717 = vmatprep.mubr.bf16.mxu1 %v11819_v5  ;;  %2779 = vmatpush1.bf16.msra.mxu1 %v10685_v21 }
 0x342   :  { %2780 = vmatprep.subr.bf16.mxu1 %v10690_v32  ;;  %v11995_v32 = vrot.slane %v11978_v14, %v11671_v13 }
 0x343   :  { %v1608_v54 = vpop.f32.mrb[124].mxu1 }
 0x344   :  { %v1609_v17 = vpop.f32.mrb[125].mxu1 }
 0x345   :  { %v1610_v19 = vpop.f32.mrb[126].mxu1  ;;  %2781 = vmatpush1.bf16.msra.mxu1 %v10688_v43 }
 0x346   :  { %v1611_v18 = vpop.f32.mrb[127].mxu1  ;;  %2782 = vmatprep.subr.bf16.mxu1 %v10693_v50 }
 0x348   :  { %2718 = vmatmul.mubr.bf16.gmra.mrb[64].mxu1 %v11817_v28 }
 0x349   :  { %2727 = vmatprep.mubr.bf16.mxu1 %v11840_v25  ;;  %2783 = vmatpush1.bf16.msra.mxu1 %v10691_v44 }
 0x34a   :  { %2784 = vmatprep.subr.bf16.mxu1 %v10696_v24 }
 0x34b   :  { %v2032_v46 = vpop.f32.mrb[128].mxu1 }
 0x34c   :  { %v2033_v20 = vpop.f32.mrb[129].mxu1 }
 0x34d   :  { %v2034_v35 = vpop.f32.mrb[130].mxu1  ;;  %2785 = vmatpush1.bf16.msra.mxu1 %v10694_v29 }
 0x34e   :  { %v2035_v39 = vpop.f32.mrb[131].mxu1  ;;  %2786 = vmatprep.subr.bf16.mxu1 %v10699_v31 }
 0x350   :  { %2728 = vmatmul.mubr.bf16.gmra.mrb[68].mxu1 %v11837_v38 }
 0x351   :  { %2737 = vmatprep.mubr.bf16.mxu1 %v11855_v30  ;;  %2787 = vmatpush1.bf16.msra.mxu1 %v10697_v37 }
 0x352   :  { %2788 = vmatprep.subr.bf16.mxu1 %v10702_v33 }
 0x355   :  { %2789 = vmatpush1.bf16.msra.mxu1 %v10700_v40 }
 0x358   :  { %2738 = vmatmul.mubr.bf16.gmra.mrb[72].mxu1 %v11853_v42 }
 0x359   :  { %2747 = vmatprep.mubr.bf16.mxu1 %v13318_v0 }
 0x360   :  { %2748 = vmatmul.mubr.bf16.gmra.mrb[76].mxu1 %v13318_v0 }
 0x361   :  { %2790 = vmatprep.mubr.bf16.mxu1 %v13318_v0 }
 0x368   :  { %2791 = vmatmul.mubr.bf16.vlgmr.msra.gmra.mrb[152].mxu1 %v13318_v0 }
 0x369   :  { %2796 = vmatprep.mubr.bf16.mxu1 %v11716_v27 }
 0x370   :  { %2797 = vmatmul.mubr.bf16.gmra.mrb[156].mxu1 %v11713_v23 }
 0x371   :  { %2802 = vmatprep.mubr.bf16.mxu1 %v11738_v63 }
 0x378   :  { %2803 = vmatmul.mubr.bf16.gmra.mrb[88].mxu1 %v11735_v61 }
 0x379   :  { %2812 = vmatprep.mubr.bf16.mxu1 %v11760_v10 }
 0x380   :  { %2813 = vmatmul.mubr.bf16.gmra.mrb[92].mxu1 %v11757_v9 }
 0x381   :  { %2822 = vmatprep.mubr.bf16.mxu1 %v11782_v16 }
 0x388   :  { %2823 = vmatmul.mubr.bf16.gmra.mrb[96].mxu1 %v11779_v11 }
 0x389   :  { %2832 = vmatprep.mubr.bf16.mxu1 %v11804_v55 }
 0x390   :  { %2833 = vmatmul.mubr.bf16.gmra.mrb[100].mxu1 %v11801_v12 }
 0x391   :  { %2842 = vmatprep.mubr.bf16.mxu1 %v11819_v5 }
 0x393   :  { %v2118_v27 = vpop.f32.mrb[132].mxu1 }
 0x394   :  { %v2119_v23 = vpop.f32.mrb[133].mxu1 }
 0x395   :  { %v2120_v22 = vpop.f32.mrb[134].mxu1 }
 0x396   :  { %v2121_v63 = vpop.f32.mrb[135].mxu1 }
 0x398   :  { %2843 = vmatmul.mubr.bf16.gmra.mrb[104].mxu1 %v11817_v28 }
 0x399   :  { %2852 = vmatprep.mubr.bf16.mxu1 %v11840_v25 }
 0x39b   :  { %v2157_v61 = vpop.f32.mrb[136].mxu1 }
 0x39c   :  { %v2158_v9 = vpop.f32.mrb[137].mxu1 }
 0x39d   :  { %v2159_v10 = vpop.f32.mrb[138].mxu1 }
 0x39e   :  { %v2160_v16 = vpop.f32.mrb[139].mxu1 }
 0x3a0   :  { %2853 = vmatmul.mubr.bf16.gmra.mrb[108].mxu1 %v11837_v38  ;;  %v11961_v38 = vld [vmem:[#allocation15] ss:$4 sm:$0xf] }
 0x3a1   :  { %2862 = vmatprep.mubr.bf16.mxu1 %v11855_v30  ;;  %v11971_v49 = vrot.slane %v11961_v38, %v11671_v13 }
 0x3a8   :  { %2863 = vmatmul.mubr.bf16.gmra.mrb[112].mxu1 %v11853_v42  ;;  %v11965_v42 = vrot.slane %v11961_v38, %v11668_v8 }
 0x3a9   :  { %2872 = vmatprep.mubr.bf16.mxu1 %v13318_v0 }
 0x3b0   :  { %2873 = vmatmul.mubr.bf16.gmra.mrb[116].mxu1 %v13318_v0 }
 0x3e3   :  { %v2243_v11 = vpop.f32.mrb[140].mxu1 }
 0x3e4   :  { %v2244_v12 = vpop.f32.mrb[141].mxu1 }
 0x3e5   :  { %v2245_v55 = vpop.f32.mrb[142].mxu1 }
 0x3e6   :  { %v2246_v28 = vpop.f32.mrb[143].mxu1 }
 0x3eb   :  { %v2667_v5 = vpop.f32.mrb[144].mxu1 }
 0x3ec   :  { %v2668_v25 = vpop.f32.mrb[145].mxu1 }
 0x3ed   :  { %v2669_v34 = vpop.f32.mrb[146].mxu1 }
 0x3ee   :  { %v2670_v45 = vpop.f32.mrb[147].mxu1 }
 0x3f3   :  { %v2673_v47 = vpop.f32.mrb[148].mxu1 }
 0x3f4   :  { %v2674_v48 = vpop.f32.mrb[149].mxu1 }
 0x3f5   :  { %v2675_v51 = vpop.f32.mrb[150].mxu1 }
 0x3f6   :  { %v2676_v30 = vpop.f32.mrb[151].mxu1 }
 0x3fb   :  { %v2679_v53 = vpop.f32.mrb[48].mxu1 }
 0x3fc   :  { %v3033_v52 = vadd.f32 %v11965_v42, %v2679_v53  ;;  %v2681_v56 = vpop.f32.mrb[49].mxu1 }
 0x3fd   :  { %v3034_v59 = vadd.f32 %v11971_v49, %v2681_v56  ;;  %v2683_v60 = vpop.f32.mrb[50].mxu1 }
 0x3fe   :  { %v3097_v26 = vmax.f32 %v3033_v52, 0.0  ;;  %v3037_v62 = vadd.f32 %v11965_v42, %v2683_v60  ;;  %v2685_v1 = vpop.f32.mrb[51].mxu1 }
 0x3ff   :  { %v3098_v4 = vmax.f32 %v3034_v59, 0.0  ;;  %v3038_v15 = vadd.f32 %v11971_v49, %v2685_v1 }
 0x400   :  { %v3184_v41 = vmul.f32 %v11976_v57, %v3097_v26  ;;  %v3101_v21 = vmax.f32 %v3037_v62, 0.0 }
 0x401   :  { %v3185_v7 = vmul.f32 %v11983_v58, %v3098_v4  ;;  %v3102_v43 = vmax.f32 %v3038_v15, 0.0 }
 0x402   :  { %v3188_v50 = vmul.f32 %v11976_v57, %v3101_v21  ;;  %v3271_v19 = vadd.f32 %v11990_v6, %v3184_v41 }
 0x403   :  { %v3189_v54 = vmul.f32 %v11983_v58, %v3102_v43  ;;  %v2689_v17 = vpop.f32.mrb[52].mxu1  ;;  %v3272_v29 = vadd.f32 %v11995_v32, %v3185_v7 }
 0x404   :  { %v3275_v44 = vadd.f32 %v11990_v6, %v3188_v50  ;;  %v3041_v18 = vadd.f32 %v11965_v42, %v2689_v17  ;;  %v2691_v24 = vpop.f32.mrb[53].mxu1 }
 0x405   :  { %v3276_v31 = vadd.f32 %v11995_v32, %v3189_v54  ;;  %v3042_v46 = vadd.f32 %v11971_v49, %v2691_v24  ;;  %v2693_v20 = vpop.f32.mrb[54].mxu1 }
 0x406   :  { %v12005_v35 = vpack.c.bf16 %v3275_v44, %v3271_v19  ;;  %v3105_v37 = vmax.f32 %v3041_v18, 0.0  ;;  %v3045_v39 = vadd.f32 %v11965_v42, %v2693_v20  ;;  %v2695_v33 = vpop.f32.mrb[55].mxu1 }
 0x407   :  { %v12008_v40 = vpack.c.bf16 %v3276_v31, %v3272_v29  ;;  %v3106_v27 = vmax.f32 %v3042_v46, 0.0  ;;  %v3046_v23 = vadd.f32 %v11971_v49, %v2695_v33 }
 0x408   :  { %v3192_v22 = vmul.f32 %v11976_v57, %v3105_v37  ;;  %v3109_v63 = vmax.f32 %v3045_v39, 0.0 }
 0x409   :  { %v3193_v61 = vmul.f32 %v11983_v58, %v3106_v27  ;;  %v3110_v9 = vmax.f32 %v3046_v23, 0.0 }
 0x40a   :  { %v3196_v10 = vmul.f32 %v11976_v57, %v3109_v63  ;;  %v3279_v12 = vadd.f32 %v11990_v6, %v3192_v22 }
 0x40b   :  { %v3197_v16 = vmul.f32 %v11983_v58, %v3110_v9  ;;  %v2699_v11 = vpop.f32.mrb[56].mxu1  ;;  %v3280_v25 = vadd.f32 %v11995_v32, %v3193_v61 }
 0x40c   :  { %v3283_v55 = vadd.f32 %v11990_v6, %v3196_v10  ;;  %v3049_v28 = vadd.f32 %v11965_v42, %v2699_v11  ;;  %v2701_v5 = vpop.f32.mrb[57].mxu1 }
 0x40d   :  { %v3284_v34 = vadd.f32 %v11995_v32, %v3197_v16  ;;  %v3050_v45 = vadd.f32 %v11971_v49, %v2701_v5  ;;  %v2703_v47 = vpop.f32.mrb[58].mxu1 }
 0x40e   :  { %v12021_v48 = vpack.c.bf16 %v3283_v55, %v3279_v12  ;;  %v3113_v51 = vmax.f32 %v3049_v28, 0.0  ;;  %v3053_v30 = vadd.f32 %v11965_v42, %v2703_v47  ;;  %v2705_v53 = vpop.f32.mrb[59].mxu1 }
 0x40f   :  { %v12024_v52 = vpack.c.bf16 %v3284_v34, %v3280_v25  ;;  %v3114_v56 = vmax.f32 %v3050_v45, 0.0  ;;  %v3054_v59 = vadd.f32 %v11971_v49, %v2705_v53 }
 0x410   :  { %v3200_v60 = vmul.f32 %v11976_v57, %v3113_v51  ;;  %v3117_v26 = vmax.f32 %v3053_v30, 0.0 }
 0x411   :  { %v3201_v62 = vmul.f32 %v11983_v58, %v3114_v56  ;;  %v3118_v1 = vmax.f32 %v3054_v59, 0.0 }
 0x412   :  { %v3204_v4 = vmul.f32 %v11976_v57, %v3117_v26  ;;  %v3287_v21 = vadd.f32 %v11990_v6, %v3200_v60 }
 0x413   :  { %v3205_v15 = vmul.f32 %v11983_v58, %v3118_v1  ;;  %v2709_v41 = vpop.f32.mrb[60].mxu1  ;;  %v3288_v54 = vadd.f32 %v11995_v32, %v3201_v62 }
 0x414   :  { %v3291_v7 = vadd.f32 %v11990_v6, %v3204_v4  ;;  %v3057_v43 = vadd.f32 %v11965_v42, %v2709_v41  ;;  %v2711_v50 = vpop.f32.mrb[61].mxu1 }
 0x415   :  { %v3292_v17 = vadd.f32 %v11995_v32, %v3205_v15  ;;  %v3058_v19 = vadd.f32 %v11971_v49, %v2711_v50  ;;  %v2713_v44 = vpop.f32.mrb[62].mxu1 }
 0x416   :  { %v12037_v18 = vpack.c.bf16 %v3291_v7, %v3287_v21  ;;  %v3121_v24 = vmax.f32 %v3057_v43, 0.0  ;;  %v3061_v29 = vadd.f32 %v11965_v42, %v2713_v44  ;;  %v2715_v31 = vpop.f32.mrb[63].mxu1 }
 0x417   :  { %v12040_v46 = vpack.c.bf16 %v3292_v17, %v3288_v54  ;;  %v3122_v20 = vmax.f32 %v3058_v19, 0.0  ;;  %v3062_v37 = vadd.f32 %v11971_v49, %v2715_v31 }
 0x418   :  { %v3208_v39 = vmul.f32 %v11976_v57, %v3121_v24  ;;  %v3125_v33 = vmax.f32 %v3061_v29, 0.0 }
 0x419   :  { %v3209_v27 = vmul.f32 %v11983_v58, %v3122_v20  ;;  %v3126_v23 = vmax.f32 %v3062_v37, 0.0 }
 0x41a   :  { %v3212_v22 = vmul.f32 %v11976_v57, %v3125_v33  ;;  %v3295_v9 = vadd.f32 %v11990_v6, %v3208_v39 }
 0x41b   :  { %v3213_v63 = vmul.f32 %v11983_v58, %v3126_v23  ;;  %v2719_v61 = vpop.f32.mrb[64].mxu1  ;;  %v3296_v12 = vadd.f32 %v11995_v32, %v3209_v27 }
 0x41c   :  { %v3299_v10 = vadd.f32 %v11990_v6, %v3212_v22  ;;  %v3065_v16 = vadd.f32 %v11965_v42, %v2719_v61  ;;  %v2721_v11 = vpop.f32.mrb[65].mxu1 }
 0x41d   :  { %v3300_v55 = vadd.f32 %v11995_v32, %v3213_v63  ;;  %v3066_v28 = vadd.f32 %v11971_v49, %v2721_v11  ;;  %v2723_v5 = vpop.f32.mrb[66].mxu1 }
 0x41e   :  { %v12053_v25 = vpack.c.bf16 %v3299_v10, %v3295_v9  ;;  %v3129_v34 = vmax.f32 %v3065_v16, 0.0  ;;  %v3069_v45 = vadd.f32 %v11965_v42, %v2723_v5  ;;  %v2725_v47 = vpop.f32.mrb[67].mxu1 }
 0x41f   :  { %v12056_v51 = vpack.c.bf16 %v3300_v55, %v3296_v12  ;;  %v3130_v30 = vmax.f32 %v3066_v28, 0.0  ;;  %v3070_v53 = vadd.f32 %v11971_v49, %v2725_v47 }
 0x420   :  { %v3216_v56 = vmul.f32 %v11976_v57, %v3129_v34  ;;  %v3133_v59 = vmax.f32 %v3069_v45, 0.0 }
 0x421   :  { %v3217_v60 = vmul.f32 %v11983_v58, %v3130_v30  ;;  %v3134_v26 = vmax.f32 %v3070_v53, 0.0 }
 0x422   :  { %v3220_v62 = vmul.f32 %v11976_v57, %v3133_v59  ;;  %v3303_v15 = vadd.f32 %v11990_v6, %v3216_v56 }
 0x423   :  { %v3221_v1 = vmul.f32 %v11983_v58, %v3134_v26  ;;  %v2729_v4 = vpop.f32.mrb[68].mxu1  ;;  %v3304_v43 = vadd.f32 %v11995_v32, %v3217_v60 }
 0x424   :  { %v3307_v41 = vadd.f32 %v11990_v6, %v3220_v62  ;;  %v3073_v21 = vadd.f32 %v11965_v42, %v2729_v4  ;;  %v2731_v7 = vpop.f32.mrb[69].mxu1 }
 0x425   :  { %v3308_v50 = vadd.f32 %v11995_v32, %v3221_v1  ;;  %v3074_v54 = vadd.f32 %v11971_v49, %v2731_v7  ;;  %v2733_v17 = vpop.f32.mrb[70].mxu1 }
 0x426   :  { %v12069_v19 = vpack.c.bf16 %v3307_v41, %v3303_v15  ;;  %v3137_v44 = vmax.f32 %v3073_v21, 0.0  ;;  %v3077_v24 = vadd.f32 %v11965_v42, %v2733_v17  ;;  %v2735_v29 = vpop.f32.mrb[71].mxu1 }
 0x427   :  { %v12072_v31 = vpack.c.bf16 %v3308_v50, %v3304_v43  ;;  %v3138_v20 = vmax.f32 %v3074_v54, 0.0  ;;  %v3078_v37 = vadd.f32 %v11971_v49, %v2735_v29 }
 0x428   :  { %v3224_v39 = vmul.f32 %v11976_v57, %v3137_v44  ;;  %v3141_v33 = vmax.f32 %v3077_v24, 0.0 }
 0x429   :  { %v3225_v27 = vmul.f32 %v11983_v58, %v3138_v20  ;;  %v3142_v23 = vmax.f32 %v3078_v37, 0.0 }
 0x42a   :  { %v3228_v22 = vmul.f32 %v11976_v57, %v3141_v33  ;;  %v3311_v9 = vadd.f32 %v11990_v6, %v3224_v39 }
 0x42b   :  { %v3229_v63 = vmul.f32 %v11983_v58, %v3142_v23  ;;  %v2739_v61 = vpop.f32.mrb[72].mxu1  ;;  %v3312_v12 = vadd.f32 %v11995_v32, %v3225_v27 }
 0x42c   :  { %v3315_v10 = vadd.f32 %v11990_v6, %v3228_v22  ;;  %v3081_v16 = vadd.f32 %v11965_v42, %v2739_v61  ;;  %v2741_v11 = vpop.f32.mrb[73].mxu1 }
 0x42d   :  { %v3316_v55 = vadd.f32 %v11995_v32, %v3229_v63  ;;  %v3082_v28 = vadd.f32 %v11971_v49, %v2741_v11  ;;  %v2743_v5 = vpop.f32.mrb[74].mxu1 }
 0x42e   :  { %v12085_v34 = vpack.c.bf16 %v3315_v10, %v3311_v9  ;;  %v3145_v45 = vmax.f32 %v3081_v16, 0.0  ;;  %v3085_v47 = vadd.f32 %v11965_v42, %v2743_v5  ;;  %v2745_v30 = vpop.f32.mrb[75].mxu1 }
 0x42f   :  { %v12088_v53 = vpack.c.bf16 %v3316_v55, %v3312_v12  ;;  %v3146_v56 = vmax.f32 %v3082_v28, 0.0  ;;  %v3086_v59 = vadd.f32 %v11971_v49, %v2745_v30 }
 0x430   :  { %v3232_v60 = vmul.f32 %v11976_v57, %v3145_v45  ;;  %v3149_v26 = vmax.f32 %v3085_v47, 0.0 }
 0x431   :  { %v3233_v62 = vmul.f32 %v11983_v58, %v3146_v56  ;;  %v3150_v1 = vmax.f32 %v3086_v59, 0.0 }
 0x432   :  { %v3236_v4 = vmul.f32 %v11976_v57, %v3149_v26  ;;  %v3319_v21 = vadd.f32 %v11990_v6, %v3232_v60  ;;  %v12123_v60 = vsub.s32 3, %v11665_v3 }
 0x433   :  { %v3237_v15 = vmul.f32 %v11983_v58, %v3150_v1  ;;  %v2749_v41 = vpop.f32.mrb[76].mxu1  ;;  %v3320_v54 = vadd.f32 %v11995_v32, %v3233_v62 }
 0x434   :  { %v3323_v7 = vadd.f32 %v11990_v6, %v3236_v4  ;;  %v3089_v43 = vadd.f32 %v11965_v42, %v2749_v41  ;;  %v2751_v50 = vpop.f32.mrb[77].mxu1 }
 0x435   :  { %v3324_v17 = vadd.f32 %v11995_v32, %v3237_v15  ;;  %v3090_v44 = vadd.f32 %v11971_v49, %v2751_v50  ;;  %v2753_v24 = vpop.f32.mrb[78].mxu1 }
 0x436   :  { %v12101_v29 = vpack.c.bf16 %v3323_v7, %v3319_v21  ;;  %v3153_v20 = vmax.f32 %v3089_v43, 0.0  ;;  %v3093_v37 = vadd.f32 %v11965_v42, %v2753_v24  ;;  %v2755_v39 = vpop.f32.mrb[79].mxu1  ;;  %v12141_v21 = vrot.slane %v11967_v36, %v12123_v60 }
 0x437   :  { %v12104_v33 = vpack.c.bf16 %v3324_v17, %v3320_v54  ;;  %v3154_v27 = vmax.f32 %v3090_v44, 0.0  ;;  %v3094_v23 = vadd.f32 %v11971_v49, %v2755_v39 }
 0x438   :  { %v3240_v22 = vmul.f32 %v11976_v57, %v3153_v20  ;;  %v3157_v63 = vmax.f32 %v3093_v37, 0.0 }
 0x439   :  { %v3241_v61 = vmul.f32 %v11983_v58, %v3154_v27  ;;  %v3158_v9 = vmax.f32 %v3094_v23, 0.0 }
 0x43a   :  { %v3244_v10 = vmul.f32 %v11976_v57, %v3157_v63  ;;  %v3327_v12 = vadd.f32 %v11990_v6, %v3240_v22 }
 0x43b   :  { %v3245_v16 = vmul.f32 %v11983_v58, %v3158_v9  ;;  %v2792_v11 = vpop.f32.mrb[152].mxu1  ;;  %v3328_v28 = vadd.f32 %v11995_v32, %v3241_v61  ;;  %v12120_v58 = vsub.s32 2, %v11665_v3 }
 0x43c   :  { %v3331_v42 = vadd.f32 %v11990_v6, %v3244_v10  ;;  %v2793_v55 = vpop.f32.mrb[153].mxu1 }
 0x43d   :  { %v3332_v49 = vadd.f32 %v11995_v32, %v3245_v16  ;;  %v2794_v5 = vpop.f32.mrb[154].mxu1  ;;  %v12127_v26 = vrot.slane %v11961_v38, %v12120_v58  ;;  %v12131_v32 = vrot.slane %v11961_v38, %v12123_v60  ;;  %v12136_v4 = vrot.slane %v11967_v36, %v12120_v58 }
 0x43e   :  { %v12115_v45 = vpack.c.bf16 %v3331_v42, %v3327_v12  ;;  %v2795_v47 = vpop.f32.mrb[155].mxu1  ;;  %v12148_v24 = vrot.slane %v11978_v14, %v12120_v58  ;;  %v12153_v36 = vrot.slane %v11978_v14, %v12123_v60 }
 0x43f   :  { %v12117_v30 = vpack.c.bf16 %v3332_v49, %v3328_v28 }
 0x443   :  { %v2798_v56 = vpop.f32.mrb[156].mxu1 }
 0x444   :  { %v2799_v57 = vpop.f32.mrb[157].mxu1 }
 0x445   :  { %v2800_v59 = vpop.f32.mrb[158].mxu1 }
 0x446   :  { %v2801_v6 = vpop.f32.mrb[159].mxu1 }
 0x44b   :  { %v2804_v62 = vpop.f32.mrb[88].mxu1 }
 0x44c   :  { %v3035_v1 = vadd.f32 %v12127_v26, %v2804_v62  ;;  %v2806_v15 = vpop.f32.mrb[89].mxu1 }
 0x44d   :  { %v3036_v41 = vadd.f32 %v12131_v32, %v2806_v15  ;;  %v2808_v7 = vpop.f32.mrb[90].mxu1 }
 0x44e   :  { %v3099_v43 = vmax.f32 %v3035_v1, 0.0  ;;  %v3039_v50 = vadd.f32 %v12127_v26, %v2808_v7  ;;  %v2810_v38 = vpop.f32.mrb[91].mxu1 }
 0x44f   :  { %v3100_v54 = vmax.f32 %v3036_v41, 0.0  ;;  %v3040_v17 = vadd.f32 %v12131_v32, %v2810_v38 }
 0x450   :  { %v3186_v44 = vmul.f32 %v12136_v4, %v3099_v43  ;;  %v3103_v20 = vmax.f32 %v3039_v50, 0.0 }
 0x451   :  { %v3187_v37 = vmul.f32 %v12141_v21, %v3100_v54  ;;  %v3104_v39 = vmax.f32 %v3040_v17, 0.0 }
 0x452   :  { %v3190_v27 = vmul.f32 %v12136_v4, %v3103_v20  ;;  %v3273_v63 = vadd.f32 %v12148_v24, %v3186_v44 }
 0x453   :  { %v3191_v23 = vmul.f32 %v12141_v21, %v3104_v39  ;;  %v2814_v22 = vpop.f32.mrb[92].mxu1  ;;  %v3274_v16 = vadd.f32 %v12153_v36, %v3187_v37 }
 0x454   :  { %v3277_v61 = vadd.f32 %v12148_v24, %v3190_v27  ;;  %v3043_v9 = vadd.f32 %v12127_v26, %v2814_v22  ;;  %v2816_v10 = vpop.f32.mrb[93].mxu1 }
 0x455   :  { %v3278_v11 = vadd.f32 %v12153_v36, %v3191_v23  ;;  %v3044_v14 = vadd.f32 %v12131_v32, %v2816_v10  ;;  %v2818_v12 = vpop.f32.mrb[94].mxu1 }
 0x456   :  { %v12163_v42 = vpack.c.bf16 %v3277_v61, %v3273_v63  ;;  %v3107_v55 = vmax.f32 %v3043_v9, 0.0  ;;  %v3047_v28 = vadd.f32 %v12127_v26, %v2818_v12  ;;  %v2820_v49 = vpop.f32.mrb[95].mxu1 }
 0x457   :  { %v12166_v5 = vpack.c.bf16 %v3278_v11, %v3274_v16  ;;  %v3108_v47 = vmax.f32 %v3044_v14, 0.0  ;;  %v3048_v56 = vadd.f32 %v12131_v32, %v2820_v49 }
 0x458   :  { %v3194_v57 = vmul.f32 %v12136_v4, %v3107_v55  ;;  %v3111_v59 = vmax.f32 %v3047_v28, 0.0 }
 0x459   :  { %v3195_v6 = vmul.f32 %v12141_v21, %v3108_v47  ;;  %v3112_v62 = vmax.f32 %v3048_v56, 0.0 }
 0x45a   :  { %v3198_v1 = vmul.f32 %v12136_v4, %v3111_v59  ;;  %v3281_v7 = vadd.f32 %v12148_v24, %v3194_v57 }
 0x45b   :  { %v3199_v15 = vmul.f32 %v12141_v21, %v3112_v62  ;;  %v2824_v41 = vpop.f32.mrb[96].mxu1  ;;  %v3282_v54 = vadd.f32 %v12153_v36, %v3195_v6 }
 0x45c   :  { %v3285_v43 = vadd.f32 %v12148_v24, %v3198_v1  ;;  %v3051_v50 = vadd.f32 %v12127_v26, %v2824_v41  ;;  %v2826_v38 = vpop.f32.mrb[97].mxu1 }
 0x45d   :  { %v3286_v17 = vadd.f32 %v12153_v36, %v3199_v15  ;;  %v3052_v44 = vadd.f32 %v12131_v32, %v2826_v38  ;;  %v2828_v20 = vpop.f32.mrb[98].mxu1 }
 0x45e   :  { %v12179_v37 = vpack.c.bf16 %v3285_v43, %v3281_v7  ;;  %v3115_v39 = vmax.f32 %v3051_v50, 0.0  ;;  %v3055_v27 = vadd.f32 %v12127_v26, %v2828_v20  ;;  %v2830_v23 = vpop.f32.mrb[99].mxu1 }
 0x45f   :  { %v12182_v22 = vpack.c.bf16 %v3286_v17, %v3282_v54  ;;  %v3116_v63 = vmax.f32 %v3052_v44, 0.0  ;;  %v3056_v61 = vadd.f32 %v12131_v32, %v2830_v23 }
 0x460   :  { %v3202_v9 = vmul.f32 %v12136_v4, %v3115_v39  ;;  %v3119_v10 = vmax.f32 %v3055_v27, 0.0 }
 0x461   :  { %v3203_v16 = vmul.f32 %v12141_v21, %v3116_v63  ;;  %v3120_v11 = vmax.f32 %v3056_v61, 0.0 }
 0x462   :  { %v3206_v14 = vmul.f32 %v12136_v4, %v3119_v10  ;;  %v3289_v28 = vadd.f32 %v12148_v24, %v3202_v9 }
 0x463   :  { %v3207_v12 = vmul.f32 %v12141_v21, %v3120_v11  ;;  %v2834_v55 = vpop.f32.mrb[100].mxu1  ;;  %v3290_v57 = vadd.f32 %v12153_v36, %v3203_v16 }
 0x464   :  { %v3293_v49 = vadd.f32 %v12148_v24, %v3206_v14  ;;  %v3059_v47 = vadd.f32 %v12127_v26, %v2834_v55  ;;  %v2836_v56 = vpop.f32.mrb[101].mxu1 }
 0x465   :  { %v3294_v59 = vadd.f32 %v12153_v36, %v3207_v12  ;;  %v3060_v6 = vadd.f32 %v12131_v32, %v2836_v56  ;;  %v2838_v62 = vpop.f32.mrb[102].mxu1 }
 0x466   :  { %v12195_v1 = vpack.c.bf16 %v3293_v49, %v3289_v28  ;;  %v3123_v15 = vmax.f32 %v3059_v47, 0.0  ;;  %v3063_v41 = vadd.f32 %v12127_v26, %v2838_v62  ;;  %v2840_v7 = vpop.f32.mrb[103].mxu1 }
 0x467   :  { %v12198_v43 = vpack.c.bf16 %v3294_v59, %v3290_v57  ;;  %v3124_v50 = vmax.f32 %v3060_v6, 0.0  ;;  %v3064_v38 = vadd.f32 %v12131_v32, %v2840_v7 }
 0x468   :  { %v3210_v54 = vmul.f32 %v12136_v4, %v3123_v15  ;;  %v3127_v17 = vmax.f32 %v3063_v41, 0.0 }
 0x469   :  { %v3211_v44 = vmul.f32 %v12141_v21, %v3124_v50  ;;  %v3128_v20 = vmax.f32 %v3064_v38, 0.0 }
 0x46a   :  { %v3214_v39 = vmul.f32 %v12136_v4, %v3127_v17  ;;  %v3297_v63 = vadd.f32 %v12148_v24, %v3210_v54 }
 0x46b   :  { %v3215_v27 = vmul.f32 %v12141_v21, %v3128_v20  ;;  %v2844_v23 = vpop.f32.mrb[104].mxu1  ;;  %v3298_v16 = vadd.f32 %v12153_v36, %v3211_v44 }
 0x46c   :  { %v3301_v61 = vadd.f32 %v12148_v24, %v3214_v39  ;;  %v3067_v9 = vadd.f32 %v12127_v26, %v2844_v23  ;;  %v2846_v10 = vpop.f32.mrb[105].mxu1 }
 0x46d   :  { %v3302_v11 = vadd.f32 %v12153_v36, %v3215_v27  ;;  %v3068_v14 = vadd.f32 %v12131_v32, %v2846_v10  ;;  %v2848_v12 = vpop.f32.mrb[106].mxu1 }
 0x46e   :  { %v12211_v55 = vpack.c.bf16 %v3301_v61, %v3297_v63  ;;  %v3131_v28 = vmax.f32 %v3067_v9, 0.0  ;;  %v3071_v49 = vadd.f32 %v12127_v26, %v2848_v12  ;;  %v2850_v47 = vpop.f32.mrb[107].mxu1 }
 0x46f   :  { %v12214_v56 = vpack.c.bf16 %v3302_v11, %v3298_v16  ;;  %v3132_v57 = vmax.f32 %v3068_v14, 0.0  ;;  %v3072_v59 = vadd.f32 %v12131_v32, %v2850_v47 }
 0x470   :  { %v3218_v6 = vmul.f32 %v12136_v4, %v3131_v28  ;;  %v3135_v62 = vmax.f32 %v3071_v49, 0.0 }
 0x471   :  { %v3219_v15 = vmul.f32 %v12141_v21, %v3132_v57  ;;  %v3136_v41 = vmax.f32 %v3072_v59, 0.0 }
 0x472   :  { %v3222_v7 = vmul.f32 %v12136_v4, %v3135_v62  ;;  %v3305_v54 = vadd.f32 %v12148_v24, %v3218_v6 }
 0x473   :  { %v3223_v50 = vmul.f32 %v12141_v21, %v3136_v41  ;;  %v2854_v38 = vpop.f32.mrb[108].mxu1  ;;  %v3306_v39 = vadd.f32 %v12153_v36, %v3219_v15 }
 0x474   :  { %v3309_v17 = vadd.f32 %v12148_v24, %v3222_v7  ;;  %v3075_v44 = vadd.f32 %v12127_v26, %v2854_v38  ;;  %v2856_v20 = vpop.f32.mrb[109].mxu1 }
 0x475   :  { %v3310_v27 = vadd.f32 %v12153_v36, %v3223_v50  ;;  %v3076_v23 = vadd.f32 %v12131_v32, %v2856_v20  ;;  %v2858_v63 = vpop.f32.mrb[110].mxu1 }
 0x476   :  { %v12227_v61 = vpack.c.bf16 %v3309_v17, %v3305_v54  ;;  %v3139_v9 = vmax.f32 %v3075_v44, 0.0  ;;  %v3079_v10 = vadd.f32 %v12127_v26, %v2858_v63  ;;  %v2860_v16 = vpop.f32.mrb[111].mxu1 }
 0x477   :  { %v12230_v11 = vpack.c.bf16 %v3310_v27, %v3306_v39  ;;  %v3140_v14 = vmax.f32 %v3076_v23, 0.0  ;;  %v3080_v12 = vadd.f32 %v12131_v32, %v2860_v16 }
 0x478   :  { %v3226_v28 = vmul.f32 %v12136_v4, %v3139_v9  ;;  %v3143_v49 = vmax.f32 %v3079_v10, 0.0 }
 0x479   :  { %v3227_v47 = vmul.f32 %v12141_v21, %v3140_v14  ;;  %v3144_v57 = vmax.f32 %v3080_v12, 0.0 }
 0x47a   :  { %v3230_v59 = vmul.f32 %v12136_v4, %v3143_v49  ;;  %v3313_v15 = vadd.f32 %v12148_v24, %v3226_v28 }
 0x47b   :  { %v3231_v6 = vmul.f32 %v12141_v21, %v3144_v57  ;;  %v2864_v62 = vpop.f32.mrb[112].mxu1  ;;  %v3314_v38 = vadd.f32 %v12153_v36, %v3227_v47 }
 0x47c   :  { %v3317_v41 = vadd.f32 %v12148_v24, %v3230_v59  ;;  %v3083_v7 = vadd.f32 %v12127_v26, %v2864_v62  ;;  %v2866_v50 = vpop.f32.mrb[113].mxu1 }
 0x47d   :  { %v3318_v54 = vadd.f32 %v12153_v36, %v3231_v6  ;;  %v3084_v17 = vadd.f32 %v12131_v32, %v2866_v50  ;;  %v2868_v44 = vpop.f32.mrb[114].mxu1 }
 0x47e   :  { %v12243_v20 = vpack.c.bf16 %v3317_v41, %v3313_v15  ;;  %v3147_v39 = vmax.f32 %v3083_v7, 0.0  ;;  %v3087_v27 = vadd.f32 %v12127_v26, %v2868_v44  ;;  %v2870_v23 = vpop.f32.mrb[115].mxu1 }
 0x47f   :  { %v12246_v63 = vpack.c.bf16 %v3318_v54, %v3314_v38  ;;  %v3148_v9 = vmax.f32 %v3084_v17, 0.0  ;;  %v3088_v10 = vadd.f32 %v12131_v32, %v2870_v23 }
 0x480   :  { %v3234_v16 = vmul.f32 %v12136_v4, %v3147_v39  ;;  %v3151_v14 = vmax.f32 %v3087_v27, 0.0 }
 0x481   :  { %v3235_v12 = vmul.f32 %v12141_v21, %v3148_v9  ;;  %v3152_v28 = vmax.f32 %v3088_v10, 0.0 }
 0x482   :  { %v3238_v49 = vmul.f32 %v12136_v4, %v3151_v14  ;;  %v3321_v59 = vadd.f32 %v12148_v24, %v3234_v16 }
 0x483   :  { %v3239_v47 = vmul.f32 %v12141_v21, %v3152_v28  ;;  %v2874_v57 = vpop.f32.mrb[116].mxu1  ;;  %v3322_v41 = vadd.f32 %v12153_v36, %v3235_v12 }
 0x484   :  { %v3325_v6 = vadd.f32 %v12148_v24, %v3238_v49  ;;  %v3091_v62 = vadd.f32 %v12127_v26, %v2874_v57  ;;  %v2876_v15 = vpop.f32.mrb[117].mxu1 }
 0x485   :  { %v3326_v7 = vadd.f32 %v12153_v36, %v3239_v47  ;;  %v3092_v50 = vadd.f32 %v12131_v32, %v2876_v15  ;;  %v2878_v38 = vpop.f32.mrb[118].mxu1 }
 0x486   :  { %v12259_v54 = vpack.c.bf16 %v3325_v6, %v3321_v59  ;;  %v3155_v17 = vmax.f32 %v3091_v62, 0.0  ;;  %v3095_v44 = vadd.f32 %v12127_v26, %v2878_v38  ;;  %v2880_v39 = vpop.f32.mrb[119].mxu1 }
 0x487   :  { %v12262_v27 = vpack.c.bf16 %v3326_v7, %v3322_v41  ;;  %v3156_v23 = vmax.f32 %v3092_v50, 0.0  ;;  %v3096_v9 = vadd.f32 %v12131_v32, %v2880_v39 }
 0x488   :  { %v3242_v10 = vmul.f32 %v12136_v4, %v3155_v17  ;;  %v3159_v16 = vmax.f32 %v3095_v44, 0.0 }
 0x489   :  { %v3243_v14 = vmul.f32 %v12141_v21, %v3156_v23  ;;  %v3160_v12 = vmax.f32 %v3096_v9, 0.0 }
 0x48a   :  { %v3246_v28 = vmul.f32 %v12136_v4, %v3159_v16  ;;  %v3329_v47 = vadd.f32 %v12148_v24, %v3242_v10 }
 0x48b   :  { %v3247_v49 = vmul.f32 %v12141_v21, %v3160_v12  ;;  %v3330_v57 = vadd.f32 %v12153_v36, %v3243_v14 }
 0x48c   :  { %v3333_v26 = vadd.f32 %v12148_v24, %v3246_v28 }
 0x48d   :  { %v3334_v59 = vadd.f32 %v12153_v36, %v3247_v49 }
 0x48e   :  { %v12273_v6 = vpack.c.bf16 %v3333_v26, %v3329_v47 }
 0x48f   :  { %v12275_v32 = vpack.c.bf16 %v3334_v59, %v3330_v57 }
 0x490   :  { %11322 = dma.done.wait [#allocation3], 131072 }
 0x491   :  { %11323 = vsyncadd [#allocation3], 4294836224  ;;  %3722 = vmatprep.mubr.bf16.mxu0 %v12166_v5  ;;  %3593 = vmatprep.mubr.bf16.mxu1 %v12008_v40  ;;  %v3500_v4 = vld [vmem:[#allocation2 + $0x218] sm:$0xff]  ;;  %v3499_v21 = vld [vmem:[#allocation2 + $0x210] sm:$0xff]  ;;  %vm11344_vm2 = vmmov 0   ;;  %vm8445_vm3 = vcmask 261120  }
 0x492   :  { %v3504_v62 = vld [vmem:[#allocation2 + $0x238] sm:$0xff]  ;;  %3690 = vmatprep.subr.bf16.mxu0 %v3500_v4  ;;  %v3503_v24 = vld [vmem:[#allocation2 + $0x230] sm:$0xff]  ;;  %vm13109_vm4 = vmpackc.low %vm8445_vm3, %vm8445_vm3  ;;  %vm8544_vm5 = vcmask 1045504   ;;  %s11346_s29 = smov 96   ;;  %vm8526_vm7 = vcmask 91136   ;;  %vm8540_vm8 = vcmask 97280  }
 0x493   :  { %3691 = vmatpush1.bf16.msra.mxu0 %v3499_v21  ;;  %v3508_v15 = vld [vmem:[#allocation2 + $0x258] sm:$0xff]  ;;  %v3507_v36 = vld [vmem:[#allocation2 + $0x250] sm:$0xff]  ;;  %s11347_s14 = smov 32   ;;  %vm9031_vm9 = vcmask 523264   ;;  %vm9033_vm10 = vcmask 785408   ;;  %vm9393_vm11 = vcmask 1024  }
 0x494   :  { %3692 = vmatprep.subr.bf16.mxu0 %v3504_v62  ;;  %v3512_v41 = vld [vmem:[#allocation2 + $0x278] sm:$0xff]  ;;  %v3511_v7 = vld [vmem:[#allocation2 + $0x270] sm:$0xff] }
 0x495   :  { %v3516_v50 = vld [vmem:[#allocation2 + $0x298] sm:$0xff]  ;;  %v3515_v38 = vld [vmem:[#allocation2 + $0x290] sm:$0xff] }
 0x496   :  { %v3520_v17 = vld [vmem:[#allocation2 + $0x2b8] sm:$0xff]  ;;  %v3519_v44 = vld [vmem:[#allocation2 + $0x2b0] sm:$0xff] }
 0x497   :  { %3693 = vmatpush1.bf16.msra.mxu0 %v3503_v24  ;;  %v3524_v39 = vld [vmem:[#allocation2 + $0x2d8] sm:$0xff]  ;;  %v3523_v23 = vld [vmem:[#allocation2 + $0x2d0] sm:$0xff] }
 0x498   :  { %3694 = vmatprep.subr.bf16.mxu0 %v3508_v15  ;;  %v3528_v9 = vld [vmem:[#allocation2 + $0x2f8] sm:$0xff]  ;;  %v3527_v10 = vld [vmem:[#allocation2 + $0x2f0] sm:$0xff] }
 0x499   :  { %v3532_v16 = vld [vmem:[#allocation2 + $0x318] sm:$0xff]  ;;  %v3531_v14 = vld [vmem:[#allocation2 + $0x310] sm:$0xff] }
 0x49a   :  { %v3536_v12 = vld [vmem:[#allocation2 + $0x338] sm:$0xff]  ;;  %v3535_v28 = vld [vmem:[#allocation2 + $0x330] sm:$0xff] }
 0x49b   :  { %3695 = vmatpush1.bf16.msra.mxu0 %v3507_v36  ;;  %v3540_v49 = vld [vmem:[#allocation2 + $0x358] sm:$0xff]  ;;  %v3539_v47 = vld [vmem:[#allocation2 + $0x350] sm:$0xff] }
 0x49c   :  { %3696 = vmatprep.subr.bf16.mxu0 %v3512_v41  ;;  %v3544_v26 = vld [vmem:[#allocation2 + $0x378] sm:$0xff]  ;;  %v3543_v57 = vld [vmem:[#allocation2 + $0x370] sm:$0xff] }
 0x49d   :  { %v3548_v59 = vld [vmem:[#allocation2 + $0x398] sm:$0xff]  ;;  %v3547_v4 = vld [vmem:[#allocation2 + $0x390] sm:$0xff] }
 0x49e   :  { %v3552_v21 = vld [vmem:[#allocation2 + $0x3b8] sm:$0xff]  ;;  %v3551_v62 = vld [vmem:[#allocation2 + $0x3b0] sm:$0xff] }
 0x49f   :  { %3697 = vmatpush1.bf16.msra.mxu0 %v3511_v7  ;;  %v3556_v24 = vld [vmem:[#allocation2 + $0x3d8] sm:$0xff]  ;;  %v3555_v15 = vld [vmem:[#allocation2 + $0x3d0] sm:$0xff]  ;;  %v3746_v7 = vld [vmem:[#allocation2 + $0x408] sm:$0xff] }
 0x4a0   :  { %3698 = vmatprep.subr.bf16.mxu0 %v3516_v50  ;;  %v3560_v36 = vld [vmem:[#allocation2 + $0x3f8] sm:$0xff]  ;;  %v3559_v41 = vld [vmem:[#allocation2 + $0x3f0] sm:$0xff]  ;;  %v3745_v50 = vld [vmem:[#allocation2 + $0x400] sm:$0xff] }
 0x4a3   :  { %3699 = vmatpush1.bf16.msra.mxu0 %v3515_v38  ;;  %v3750_v38 = vld [vmem:[#allocation2 + $0x428] sm:$0xff] }
 0x4a4   :  { %3700 = vmatprep.subr.bf16.mxu0 %v3520_v17  ;;  %v3749_v17 = vld [vmem:[#allocation2 + $0x420] sm:$0xff] }
 0x4a7   :  { %3701 = vmatpush1.bf16.msra.mxu0 %v3519_v44  ;;  %v3754_v44 = vld [vmem:[#allocation2 + $0x448] sm:$0xff] }
 0x4a8   :  { %3702 = vmatprep.subr.bf16.mxu0 %v3524_v39  ;;  %v3753_v39 = vld [vmem:[#allocation2 + $0x440] sm:$0xff] }
 0x4ab   :  { %3703 = vmatpush1.bf16.msra.mxu0 %v3523_v23  ;;  %v3758_v23 = vld [vmem:[#allocation2 + $0x468] sm:$0xff] }
 0x4ac   :  { %3704 = vmatprep.subr.bf16.mxu0 %v3528_v9  ;;  %v3757_v9 = vld [vmem:[#allocation2 + $0x460] sm:$0xff] }
 0x4af   :  { %3705 = vmatpush1.bf16.msra.mxu0 %v3527_v10  ;;  %v3762_v10 = vld [vmem:[#allocation2 + $0x488] sm:$0xff] }
 0x4b0   :  { %3706 = vmatprep.subr.bf16.mxu0 %v3532_v16  ;;  %v3761_v16 = vld [vmem:[#allocation2 + $0x480] sm:$0xff] }
 0x4b3   :  { %3707 = vmatpush1.bf16.msra.mxu0 %v3531_v14  ;;  %v3766_v14 = vld [vmem:[#allocation2 + $0x4a8] sm:$0xff] }
 0x4b4   :  { %3708 = vmatprep.subr.bf16.mxu0 %v3536_v12  ;;  %v3765_v12 = vld [vmem:[#allocation2 + $0x4a0] sm:$0xff] }
 0x4b7   :  { %3709 = vmatpush1.bf16.msra.mxu0 %v3535_v28  ;;  %v3770_v28 = vld [vmem:[#allocation2 + $0x4c8] sm:$0xff] }
 0x4b8   :  { %3710 = vmatprep.subr.bf16.mxu0 %v3540_v49  ;;  %v3769_v49 = vld [vmem:[#allocation2 + $0x4c0] sm:$0xff] }
 0x4bb   :  { %3711 = vmatpush1.bf16.msra.mxu0 %v3539_v47  ;;  %v3774_v47 = vld [vmem:[#allocation2 + $0x4e8] sm:$0xff] }
 0x4bc   :  { %3712 = vmatprep.subr.bf16.mxu0 %v3544_v26  ;;  %v3773_v26 = vld [vmem:[#allocation2 + $0x4e0] sm:$0xff] }
 0x4bf   :  { %3713 = vmatpush1.bf16.msra.mxu0 %v3543_v57  ;;  %v3778_v57 = vld [vmem:[#allocation2 + $0x508] sm:$0xff] }
 0x4c0   :  { %3714 = vmatprep.subr.bf16.mxu0 %v3548_v59  ;;  %v3777_v59 = vld [vmem:[#allocation2 + $0x500] sm:$0xff] }
 0x4c3   :  { %3715 = vmatpush1.bf16.msra.mxu0 %v3547_v4  ;;  %v3782_v4 = vld [vmem:[#allocation2 + $0x528] sm:$0xff] }
 0x4c4   :  { %3716 = vmatprep.subr.bf16.mxu0 %v3552_v21  ;;  %v3781_v21 = vld [vmem:[#allocation2 + $0x520] sm:$0xff] }
 0x4c7   :  { %3717 = vmatpush1.bf16.msra.mxu0 %v3551_v62  ;;  %v3786_v62 = vld [vmem:[#allocation2 + $0x548] sm:$0xff] }
 0x4c8   :  { %3718 = vmatprep.subr.bf16.mxu0 %v3556_v24  ;;  %v3785_v24 = vld [vmem:[#allocation2 + $0x540] sm:$0xff] }
 0x4cb   :  { %3719 = vmatpush1.bf16.msra.mxu0 %v3555_v15  ;;  %v3790_v15 = vld [vmem:[#allocation2 + $0x568] sm:$0xff] }
 0x4cc   :  { %3720 = vmatprep.subr.bf16.mxu0 %v3560_v36  ;;  %v3789_v36 = vld [vmem:[#allocation2 + $0x560] sm:$0xff] }
 0x4cf   :  { %3721 = vmatpush1.bf16.msra.mxu0 %v3559_v41  ;;  %v3794_v41 = vld [vmem:[#allocation2 + $0x588] sm:$0xff] }
 0x4d0   :  { %3873 = vmatprep.subr.bf16.mxu0 %v3746_v7  ;;  %v3793_v7 = vld [vmem:[#allocation2 + $0x580] sm:$0xff] }
 0x4d2   :  { %3723 = vmatmul.mubr.bf16.vlgmr.msra.gmra.mrb[32].mxu0 %v12163_v42 }
 0x4d3   :  { %3874 = vmatpush1.bf16.msra.mxu0 %v3745_v50  ;;  %3905 = vmatprep.mubr.bf16.mxu0 %v12024_v52  ;;  %v3798_v50 = vld [vmem:[#allocation2 + $0x5a8] sm:$0xff] }
 0x4d4   :  { %3875 = vmatprep.subr.bf16.mxu0 %v3750_v38  ;;  %v3797_v38 = vld [vmem:[#allocation2 + $0x5a0] sm:$0xff] }
 0x4d7   :  { %3876 = vmatpush1.bf16.msra.mxu0 %v3749_v17  ;;  %v3802_v17 = vld [vmem:[#allocation2 + $0x5c8] sm:$0xff] }
 0x4d8   :  { %3877 = vmatprep.subr.bf16.mxu0 %v3754_v44  ;;  %v3801_v44 = vld [vmem:[#allocation2 + $0x5c0] sm:$0xff] }
 0x4db   :  { %3878 = vmatpush1.bf16.msra.mxu0 %v3753_v39  ;;  %v3806_v39 = vld [vmem:[#allocation2 + $0x5e8] sm:$0xff] }
 0x4dc   :  { %3879 = vmatprep.subr.bf16.mxu0 %v3758_v23  ;;  %v3805_v23 = vld [vmem:[#allocation2 + $0x5e0] sm:$0xff] }
 0x4df   :  { %3880 = vmatpush1.bf16.msra.mxu0 %v3757_v9  ;;  %v3810_v9 = vld [vmem:[#allocation2 + $0x608] sm:$0xff] }
 0x4e0   :  { %3881 = vmatprep.subr.bf16.mxu0 %v3762_v10  ;;  %v3809_v10 = vld [vmem:[#allocation2 + $0x600] sm:$0xff] }
 0x4e3   :  { %3882 = vmatpush1.bf16.msra.mxu0 %v3761_v16  ;;  %v3814_v16 = vld [vmem:[#allocation2 + $0x628] sm:$0xff] }
 0x4e4   :  { %3883 = vmatprep.subr.bf16.mxu0 %v3766_v14  ;;  %v3813_v14 = vld [vmem:[#allocation2 + $0x620] sm:$0xff] }
 0x4e7   :  { %3884 = vmatpush1.bf16.msra.mxu0 %v3765_v12  ;;  %v3818_v12 = vld [vmem:[#allocation2 + $0x648] sm:$0xff] }
 0x4e8   :  { %3885 = vmatprep.subr.bf16.mxu0 %v3770_v28  ;;  %v3817_v28 = vld [vmem:[#allocation2 + $0x640] sm:$0xff] }
 0x4eb   :  { %3886 = vmatpush1.bf16.msra.mxu0 %v3769_v49  ;;  %v3822_v49 = vld [vmem:[#allocation2 + $0x668] sm:$0xff] }
 0x4ec   :  { %3887 = vmatprep.subr.bf16.mxu0 %v3774_v47  ;;  %v3821_v47 = vld [vmem:[#allocation2 + $0x660] sm:$0xff] }
 0x4ef   :  { %3888 = vmatpush1.bf16.msra.mxu0 %v3773_v26  ;;  %v3826_v26 = vld [vmem:[#allocation2 + $0x688] sm:$0xff] }
 0x4f0   :  { %3889 = vmatprep.subr.bf16.mxu0 %v3778_v57  ;;  %v3825_v57 = vld [vmem:[#allocation2 + $0x680] sm:$0xff] }
 0x4f3   :  { %3890 = vmatpush1.bf16.msra.mxu0 %v3777_v59  ;;  %v3830_v59 = vld [vmem:[#allocation2 + $0x6a8] sm:$0xff] }
 0x4f4   :  { %3891 = vmatprep.subr.bf16.mxu0 %v3782_v4  ;;  %v3829_v4 = vld [vmem:[#allocation2 + $0x6a0] sm:$0xff] }
 0x4f7   :  { %3892 = vmatpush1.bf16.msra.mxu0 %v3781_v21  ;;  %v3834_v21 = vld [vmem:[#allocation2 + $0x6c8] sm:$0xff] }
 0x4f8   :  { %3893 = vmatprep.subr.bf16.mxu0 %v3786_v62  ;;  %v3833_v62 = vld [vmem:[#allocation2 + $0x6c0] sm:$0xff] }
 0x4fb   :  { %3894 = vmatpush1.bf16.msra.mxu0 %v3785_v24  ;;  %v3838_v24 = vld [vmem:[#allocation2 + $0x6e8] sm:$0xff] }
 0x4fc   :  { %3895 = vmatprep.subr.bf16.mxu0 %v3790_v15  ;;  %v3837_v15 = vld [vmem:[#allocation2 + $0x6e0] sm:$0xff] }
 0x4ff   :  { %3896 = vmatpush1.bf16.msra.mxu0 %v3789_v36  ;;  %v3842_v36 = vld [vmem:[#allocation2 + $0x708] sm:$0xff] }
 0x500   :  { %3897 = vmatprep.subr.bf16.mxu0 %v3794_v41  ;;  %v3841_v41 = vld [vmem:[#allocation2 + $0x700] sm:$0xff] }
 0x503   :  { %3898 = vmatpush1.bf16.msra.mxu0 %v3793_v7  ;;  %v3846_v7 = vld [vmem:[#allocation2 + $0x728] sm:$0xff] }
 0x504   :  { %3899 = vmatprep.subr.bf16.mxu0 %v3798_v50  ;;  %v3845_v50 = vld [vmem:[#allocation2 + $0x720] sm:$0xff] }
 0x507   :  { %3900 = vmatpush1.bf16.msra.mxu0 %v3797_v38  ;;  %v3850_v38 = vld [vmem:[#allocation2 + $0x748] sm:$0xff] }
 0x508   :  { %3901 = vmatprep.subr.bf16.mxu0 %v3802_v17  ;;  %v3849_v17 = vld [vmem:[#allocation2 + $0x740] sm:$0xff] }
 0x50b   :  { %3902 = vmatpush1.bf16.msra.mxu0 %v3801_v44  ;;  %v3854_v44 = vld [vmem:[#allocation2 + $0x768] sm:$0xff] }
 0x50c   :  { %3903 = vmatprep.subr.bf16.mxu0 %v3806_v39  ;;  %v3853_v39 = vld [vmem:[#allocation2 + $0x760] sm:$0xff] }
 0x50f   :  { %3904 = vmatpush1.bf16.msra.mxu0 %v3805_v23  ;;  %v3858_v23 = vld [vmem:[#allocation2 + $0x788] sm:$0xff] }
 0x510   :  { %3916 = vmatprep.subr.bf16.mxu0 %v3810_v9  ;;  %v3857_v9 = vld [vmem:[#allocation2 + $0x780] sm:$0xff] }
 0x512   :  { %3906 = vmatmul.mubr.bf16.vlgmr.msra.gmra.mrb[36].mxu0 %v12021_v48 }
 0x513   :  { %3917 = vmatpush1.bf16.msra.mxu0 %v3809_v10  ;;  %3948 = vmatprep.mubr.bf16.mxu0 %v12182_v22  ;;  %v3862_v10 = vld [vmem:[#allocation2 + $0x7a8] sm:$0xff] }
 0x514   :  { %3918 = vmatprep.subr.bf16.mxu0 %v3814_v16  ;;  %v3861_v16 = vld [vmem:[#allocation2 + $0x7a0] sm:$0xff] }
 0x517   :  { %3919 = vmatpush1.bf16.msra.mxu0 %v3813_v14  ;;  %v3866_v14 = vld [vmem:[#allocation2 + $0x7c8] sm:$0xff] }
 0x518   :  { %3920 = vmatprep.subr.bf16.mxu0 %v3818_v12  ;;  %v3865_v12 = vld [vmem:[#allocation2 + $0x7c0] sm:$0xff] }
 0x51b   :  { %3921 = vmatpush1.bf16.msra.mxu0 %v3817_v28  ;;  %v3870_v28 = vld [vmem:[#allocation2 + $0x7e8] sm:$0xff] }
 0x51c   :  { %3922 = vmatprep.subr.bf16.mxu0 %v3822_v49  ;;  %v3869_v49 = vld [vmem:[#allocation2 + $0x7e0] sm:$0xff] }
 0x51f   :  { %3923 = vmatpush1.bf16.msra.mxu0 %v3821_v47  ;;  %v3748_v47 = vld [vmem:[#allocation2 + $0x418] sm:$0xff] }
 0x520   :  { %3924 = vmatprep.subr.bf16.mxu0 %v3826_v26  ;;  %v3747_v26 = vld [vmem:[#allocation2 + $0x410] sm:$0xff] }
 0x523   :  { %3925 = vmatpush1.bf16.msra.mxu0 %v3825_v57  ;;  %v3752_v57 = vld [vmem:[#allocation2 + $0x438] sm:$0xff] }
 0x524   :  { %3926 = vmatprep.subr.bf16.mxu0 %v3830_v59  ;;  %v3751_v59 = vld [vmem:[#allocation2 + $0x430] sm:$0xff] }
 0x527   :  { %3927 = vmatpush1.bf16.msra.mxu0 %v3829_v4  ;;  %v3756_v4 = vld [vmem:[#allocation2 + $0x458] sm:$0xff] }
 0x528   :  { %3928 = vmatprep.subr.bf16.mxu0 %v3834_v21  ;;  %v3755_v21 = vld [vmem:[#allocation2 + $0x450] sm:$0xff] }
 0x52b   :  { %3929 = vmatpush1.bf16.msra.mxu0 %v3833_v62  ;;  %v3760_v62 = vld [vmem:[#allocation2 + $0x478] sm:$0xff] }
 0x52c   :  { %3930 = vmatprep.subr.bf16.mxu0 %v3838_v24  ;;  %v3759_v24 = vld [vmem:[#allocation2 + $0x470] sm:$0xff] }
 0x52f   :  { %3931 = vmatpush1.bf16.msra.mxu0 %v3837_v15  ;;  %v3764_v15 = vld [vmem:[#allocation2 + $0x498] sm:$0xff] }
 0x530   :  { %3932 = vmatprep.subr.bf16.mxu0 %v3842_v36  ;;  %v3763_v36 = vld [vmem:[#allocation2 + $0x490] sm:$0xff] }
 0x533   :  { %3933 = vmatpush1.bf16.msra.mxu0 %v3841_v41  ;;  %v3768_v41 = vld [vmem:[#allocation2 + $0x4b8] sm:$0xff] }
 0x534   :  { %3934 = vmatprep.subr.bf16.mxu0 %v3846_v7  ;;  %v3767_v7 = vld [vmem:[#allocation2 + $0x4b0] sm:$0xff] }
 0x537   :  { %3935 = vmatpush1.bf16.msra.mxu0 %v3845_v50  ;;  %v3772_v50 = vld [vmem:[#allocation2 + $0x4d8] sm:$0xff] }
 0x538   :  { %3936 = vmatprep.subr.bf16.mxu0 %v3850_v38  ;;  %v3776_v38 = vld [vmem:[#allocation2 + $0x4f8] sm:$0xff] }
 0x53b   :  { %3937 = vmatpush1.bf16.msra.mxu0 %v3849_v17  ;;  %v3775_v17 = vld [vmem:[#allocation2 + $0x4f0] sm:$0xff] }
 0x53c   :  { %3938 = vmatprep.subr.bf16.mxu0 %v3854_v44  ;;  %v3780_v44 = vld [vmem:[#allocation2 + $0x518] sm:$0xff] }
 0x53f   :  { %3939 = vmatpush1.bf16.msra.mxu0 %v3853_v39  ;;  %v3779_v39 = vld [vmem:[#allocation2 + $0x510] sm:$0xff] }
 0x540   :  { %3940 = vmatprep.subr.bf16.mxu0 %v3858_v23  ;;  %v3784_v23 = vld [vmem:[#allocation2 + $0x538] sm:$0xff] }
 0x543   :  { %3941 = vmatpush1.bf16.msra.mxu0 %v3857_v9  ;;  %v3783_v9 = vld [vmem:[#allocation2 + $0x530] sm:$0xff] }
 0x544   :  { %3942 = vmatprep.subr.bf16.mxu0 %v3862_v10  ;;  %v3788_v10 = vld [vmem:[#allocation2 + $0x558] sm:$0xff] }
 0x547   :  { %3943 = vmatpush1.bf16.msra.mxu0 %v3861_v16  ;;  %v3787_v16 = vld [vmem:[#allocation2 + $0x550] sm:$0xff] }
 0x548   :  { %3944 = vmatprep.subr.bf16.mxu0 %v3866_v14  ;;  %v3792_v14 = vld [vmem:[#allocation2 + $0x578] sm:$0xff] }
 0x54b   :  { %3945 = vmatpush1.bf16.msra.mxu0 %v3865_v12  ;;  %v3791_v12 = vld [vmem:[#allocation2 + $0x570] sm:$0xff] }
 0x54c   :  { %3946 = vmatprep.subr.bf16.mxu0 %v3870_v28  ;;  %v3796_v28 = vld [vmem:[#allocation2 + $0x598] sm:$0xff] }
 0x54f   :  { %3947 = vmatpush1.bf16.msra.mxu0 %v3869_v49  ;;  %v3795_v49 = vld [vmem:[#allocation2 + $0x590] sm:$0xff] }
 0x550   :  { %3959 = vmatprep.subr.bf16.mxu0 %v3748_v47  ;;  %v3800_v47 = vld [vmem:[#allocation2 + $0x5b8] sm:$0xff] }
 0x552   :  { %3949 = vmatmul.mubr.bf16.vlgmr.msra.gmra.mrb[36].mxu0 %v12179_v37 }
 0x553   :  { %3960 = vmatpush1.bf16.msra.mxu0 %v3747_v26  ;;  %3991 = vmatprep.mubr.bf16.mxu0 %v12024_v52  ;;  %v3771_v52 = vld [vmem:[#allocation2 + $0x4d0] sm:$0xff] }
 0x554   :  { %3961 = vmatprep.subr.bf16.mxu0 %v3752_v57  ;;  %v3799_v26 = vld [vmem:[#allocation2 + $0x5b0] sm:$0xff]  ;;  %v3804_v57 = vld [vmem:[#allocation2 + $0x5d8] sm:$0xff] }
 0x557   :  { %3962 = vmatpush1.bf16.msra.mxu0 %v3751_v59  ;;  %v3803_v59 = vld [vmem:[#allocation2 + $0x5d0] sm:$0xff] }
 0x558   :  { %3963 = vmatprep.subr.bf16.mxu0 %v3756_v4  ;;  %v3808_v4 = vld [vmem:[#allocation2 + $0x5f8] sm:$0xff] }
 0x55b   :  { %3964 = vmatpush1.bf16.msra.mxu0 %v3755_v21  ;;  %v3807_v21 = vld [vmem:[#allocation2 + $0x5f0] sm:$0xff] }
 0x55c   :  { %3965 = vmatprep.subr.bf16.mxu0 %v3760_v62  ;;  %v3812_v62 = vld [vmem:[#allocation2 + $0x618] sm:$0xff] }
 0x55f   :  { %3966 = vmatpush1.bf16.msra.mxu0 %v3759_v24  ;;  %v3811_v24 = vld [vmem:[#allocation2 + $0x610] sm:$0xff] }
 0x560   :  { %3967 = vmatprep.subr.bf16.mxu0 %v3764_v15  ;;  %v3816_v15 = vld [vmem:[#allocation2 + $0x638] sm:$0xff] }
 0x563   :  { %3968 = vmatpush1.bf16.msra.mxu0 %v3763_v36  ;;  %v3815_v36 = vld [vmem:[#allocation2 + $0x630] sm:$0xff] }
 0x564   :  { %3969 = vmatprep.subr.bf16.mxu0 %v3768_v41  ;;  %v3820_v41 = vld [vmem:[#allocation2 + $0x658] sm:$0xff] }
 0x567   :  { %3970 = vmatpush1.bf16.msra.mxu0 %v3767_v7  ;;  %v3819_v7 = vld [vmem:[#allocation2 + $0x650] sm:$0xff] }
 0x568   :  { %3971 = vmatprep.subr.bf16.mxu0 %v3772_v50  ;;  %v3824_v50 = vld [vmem:[#allocation2 + $0x678] sm:$0xff] }
 0x56b   :  { %3972 = vmatpush1.bf16.msra.mxu0 %v3771_v52  ;;  %v3823_v52 = vld [vmem:[#allocation2 + $0x670] sm:$0xff] }
 0x56c   :  { %3973 = vmatprep.subr.bf16.mxu0 %v3776_v38  ;;  %v3828_v38 = vld [vmem:[#allocation2 + $0x698] sm:$0xff] }
 0x56f   :  { %3974 = vmatpush1.bf16.msra.mxu0 %v3775_v17  ;;  %v3827_v17 = vld [vmem:[#allocation2 + $0x690] sm:$0xff] }
 0x570   :  { %3975 = vmatprep.subr.bf16.mxu0 %v3780_v44  ;;  %v3832_v44 = vld [vmem:[#allocation2 + $0x6b8] sm:$0xff] }
 0x573   :  { %3976 = vmatpush1.bf16.msra.mxu0 %v3779_v39  ;;  %v3836_v39 = vld [vmem:[#allocation2 + $0x6d8] sm:$0xff] }
 0x574   :  { %3977 = vmatprep.subr.bf16.mxu0 %v3784_v23  ;;  %v3840_v23 = vld [vmem:[#allocation2 + $0x6f8] sm:$0xff] }
 0x577   :  { %3978 = vmatpush1.bf16.msra.mxu0 %v3783_v9  ;;  %v3839_v9 = vld [vmem:[#allocation2 + $0x6f0] sm:$0xff] }
 0x578   :  { %3979 = vmatprep.subr.bf16.mxu0 %v3788_v10  ;;  %v3844_v10 = vld [vmem:[#allocation2 + $0x718] sm:$0xff] }
 0x57b   :  { %3980 = vmatpush1.bf16.msra.mxu0 %v3787_v16  ;;  %v3843_v16 = vld [vmem:[#allocation2 + $0x710] sm:$0xff] }
 0x57c   :  { %3981 = vmatprep.subr.bf16.mxu0 %v3792_v14  ;;  %v3848_v14 = vld [vmem:[#allocation2 + $0x738] sm:$0xff] }
 0x57f   :  { %3982 = vmatpush1.bf16.msra.mxu0 %v3791_v12  ;;  %v3847_v12 = vld [vmem:[#allocation2 + $0x730] sm:$0xff] }
 0x580   :  { %3983 = vmatprep.subr.bf16.mxu0 %v3796_v28  ;;  %v3852_v28 = vld [vmem:[#allocation2 + $0x758] sm:$0xff] }
 0x583   :  { %3984 = vmatpush1.bf16.msra.mxu0 %v3795_v49  ;;  %v3851_v49 = vld [vmem:[#allocation2 + $0x750] sm:$0xff] }
 0x584   :  { %3985 = vmatprep.subr.bf16.mxu0 %v3800_v47  ;;  %v3856_v47 = vld [vmem:[#allocation2 + $0x778] sm:$0xff] }
 0x587   :  { %3986 = vmatpush1.bf16.msra.mxu0 %v3799_v26  ;;  %v3855_v26 = vld [vmem:[#allocation2 + $0x770] sm:$0xff] }
 0x588   :  { %3987 = vmatprep.subr.bf16.mxu0 %v3804_v57  ;;  %v3860_v57 = vld [vmem:[#allocation2 + $0x798] sm:$0xff] }
 0x58b   :  { %3988 = vmatpush1.bf16.msra.mxu0 %v3803_v59  ;;  %v3859_v59 = vld [vmem:[#allocation2 + $0x790] sm:$0xff] }
 0x58c   :  { %3989 = vmatprep.subr.bf16.mxu0 %v3808_v4  ;;  %v3864_v4 = vld [vmem:[#allocation2 + $0x7b8] sm:$0xff] }
 0x58f   :  { %3990 = vmatpush1.bf16.msra.mxu0 %v3807_v21  ;;  %v3863_v21 = vld [vmem:[#allocation2 + $0x7b0] sm:$0xff] }
 0x590   :  { %4002 = vmatprep.subr.bf16.mxu0 %v3812_v62  ;;  %v3868_v62 = vld [vmem:[#allocation2 + $0x7d8] sm:$0xff] }
 0x592   :  { %3992 = vmatmul.mubr.bf16.vlgmr.msra.gmra.mrb[32].mxu0 %v12021_v48  ;;  %v3831_v48 = vld [vmem:[#allocation2 + $0x6b0] sm:$0xff] }
 0x593   :  { %4003 = vmatpush1.bf16.msra.mxu0 %v3811_v24  ;;  %4034 = vmatprep.mubr.bf16.mxu0 %v12182_v22  ;;  %v3835_v22 = vld [vmem:[#allocation2 + $0x6d0] sm:$0xff] }
 0x594   :  { %4004 = vmatprep.subr.bf16.mxu0 %v3816_v15  ;;  %v3867_v24 = vld [vmem:[#allocation2 + $0x7d0] sm:$0xff]  ;;  %v3872_v15 = vld [vmem:[#allocation2 + $0x7f8] sm:$0xff] }
 0x597   :  { %4005 = vmatpush1.bf16.msra.mxu0 %v3815_v36  ;;  %v3871_v36 = vld [vmem:[#allocation2 + $0x7f0] sm:$0xff] }
 0x598   :  { %4006 = vmatprep.subr.bf16.mxu0 %v3820_v41  ;;  %v4058_v41 = vld [vmem:[#allocation2 + $0x808] sm:$0xff] }
 0x59b   :  { %4007 = vmatpush1.bf16.msra.mxu0 %v3819_v7  ;;  %v4057_v7 = vld [vmem:[#allocation2 + $0x800] sm:$0xff] }
 0x59c   :  { %4008 = vmatprep.subr.bf16.mxu0 %v3824_v50  ;;  %v4062_v50 = vld [vmem:[#allocation2 + $0x828] sm:$0xff] }
 0x59f   :  { %4009 = vmatpush1.bf16.msra.mxu0 %v3823_v52  ;;  %v4061_v52 = vld [vmem:[#allocation2 + $0x820] sm:$0xff] }
 0x5a0   :  { %4010 = vmatprep.subr.bf16.mxu0 %v3828_v38  ;;  %v4066_v38 = vld [vmem:[#allocation2 + $0x848] sm:$0xff] }
 0x5a3   :  { %4011 = vmatpush1.bf16.msra.mxu0 %v3827_v17  ;;  %v4065_v17 = vld [vmem:[#allocation2 + $0x840] sm:$0xff] }
 0x5a4   :  { %4012 = vmatprep.subr.bf16.mxu0 %v3832_v44  ;;  %v4070_v44 = vld [vmem:[#allocation2 + $0x868] sm:$0xff] }
 0x5a7   :  { %4013 = vmatpush1.bf16.msra.mxu0 %v3831_v48  ;;  %v4069_v48 = vld [vmem:[#allocation2 + $0x860] sm:$0xff] }
 0x5a8   :  { %4014 = vmatprep.subr.bf16.mxu0 %v3836_v39  ;;  %v4074_v39 = vld [vmem:[#allocation2 + $0x888] sm:$0xff] }
 0x5ab   :  { %4015 = vmatpush1.bf16.msra.mxu0 %v3835_v22  ;;  %v4073_v22 = vld [vmem:[#allocation2 + $0x880] sm:$0xff] }
 0x5ac   :  { %4016 = vmatprep.subr.bf16.mxu0 %v3840_v23  ;;  %v4078_v23 = vld [vmem:[#allocation2 + $0x8a8] sm:$0xff] }
 0x5af   :  { %4017 = vmatpush1.bf16.msra.mxu0 %v3839_v9  ;;  %v4082_v9 = vld [vmem:[#allocation2 + $0x8c8] sm:$0xff] }
 0x5b0   :  { %4018 = vmatprep.subr.bf16.mxu0 %v3844_v10  ;;  %v4081_v10 = vld [vmem:[#allocation2 + $0x8c0] sm:$0xff] }
 0x5b3   :  { %4019 = vmatpush1.bf16.msra.mxu0 %v3843_v16  ;;  %v4086_v16 = vld [vmem:[#allocation2 + $0x8e8] sm:$0xff] }
 0x5b4   :  { %4020 = vmatprep.subr.bf16.mxu0 %v3848_v14  ;;  %v4085_v14 = vld [vmem:[#allocation2 + $0x8e0] sm:$0xff] }
 0x5b7   :  { %4021 = vmatpush1.bf16.msra.mxu0 %v3847_v12  ;;  %v4090_v12 = vld [vmem:[#allocation2 + $0x908] sm:$0xff] }
 0x5b8   :  { %4022 = vmatprep.subr.bf16.mxu0 %v3852_v28  ;;  %v4089_v28 = vld [vmem:[#allocation2 + $0x900] sm:$0xff] }
 0x5bb   :  { %4023 = vmatpush1.bf16.msra.mxu0 %v3851_v49  ;;  %v4094_v49 = vld [vmem:[#allocation2 + $0x928] sm:$0xff] }
 0x5bc   :  { %4024 = vmatprep.subr.bf16.mxu0 %v3856_v47  ;;  %v4093_v47 = vld [vmem:[#allocation2 + $0x920] sm:$0xff] }
 0x5bf   :  { %4025 = vmatpush1.bf16.msra.mxu0 %v3855_v26  ;;  %v4098_v26 = vld [vmem:[#allocation2 + $0x948] sm:$0xff] }
 0x5c0   :  { %4026 = vmatprep.subr.bf16.mxu0 %v3860_v57  ;;  %v4097_v57 = vld [vmem:[#allocation2 + $0x940] sm:$0xff] }
 0x5c3   :  { %4027 = vmatpush1.bf16.msra.mxu0 %v3859_v59  ;;  %v4102_v59 = vld [vmem:[#allocation2 + $0x968] sm:$0xff] }
 0x5c4   :  { %4028 = vmatprep.subr.bf16.mxu0 %v3864_v4  ;;  %v4101_v4 = vld [vmem:[#allocation2 + $0x960] sm:$0xff] }
 0x5c7   :  { %4029 = vmatpush1.bf16.msra.mxu0 %v3863_v21  ;;  %v4106_v21 = vld [vmem:[#allocation2 + $0x988] sm:$0xff] }
 0x5c8   :  { %4030 = vmatprep.subr.bf16.mxu0 %v3868_v62  ;;  %v4105_v62 = vld [vmem:[#allocation2 + $0x980] sm:$0xff] }
 0x5cb   :  { %4031 = vmatpush1.bf16.msra.mxu0 %v3867_v24  ;;  %v4110_v24 = vld [vmem:[#allocation2 + $0x9a8] sm:$0xff] }
 0x5cc   :  { %4032 = vmatprep.subr.bf16.mxu0 %v3872_v15  ;;  %v4109_v15 = vld [vmem:[#allocation2 + $0x9a0] sm:$0xff] }
 0x5cf   :  { %4033 = vmatpush1.bf16.msra.mxu0 %v3871_v36  ;;  %v4114_v36 = vld [vmem:[#allocation2 + $0x9c8] sm:$0xff] }
 0x5d0   :  { %4185 = vmatprep.subr.bf16.mxu0 %v4058_v41  ;;  %v4113_v41 = vld [vmem:[#allocation2 + $0x9c0] sm:$0xff] }
 0x5d2   :  { %4035 = vmatmul.mubr.bf16.vlgmr.msra.gmra.mrb[32].mxu0 %v12179_v37  ;;  %v4077_v37 = vld [vmem:[#allocation2 + $0x8a0] sm:$0xff] }
 0x5d3   :  { %4186 = vmatpush1.bf16.msra.mxu0 %v4057_v7  ;;  %4217 = vmatprep.mubr.bf16.mxu0 %v12040_v46  ;;  %v4118_v7 = vld [vmem:[#allocation2 + $0x9e8] sm:$0xff] }
 0x5d4   :  { %4187 = vmatprep.subr.bf16.mxu0 %v4062_v50  ;;  %v4117_v50 = vld [vmem:[#allocation2 + $0x9e0] sm:$0xff] }
 0x5d7   :  { %4188 = vmatpush1.bf16.msra.mxu0 %v4061_v52  ;;  %v4122_v52 = vld [vmem:[#allocation2 + $0xa08] sm:$0xff] }
 0x5d8   :  { %4189 = vmatprep.subr.bf16.mxu0 %v4066_v38  ;;  %v4121_v38 = vld [vmem:[#allocation2 + $0xa00] sm:$0xff] }
 0x5db   :  { %4190 = vmatpush1.bf16.msra.mxu0 %v4065_v17  ;;  %v4126_v17 = vld [vmem:[#allocation2 + $0xa28] sm:$0xff] }
 0x5dc   :  { %4191 = vmatprep.subr.bf16.mxu0 %v4070_v44  ;;  %v4125_v44 = vld [vmem:[#allocation2 + $0xa20] sm:$0xff] }
 0x5df   :  { %4192 = vmatpush1.bf16.msra.mxu0 %v4069_v48  ;;  %v4130_v48 = vld [vmem:[#allocation2 + $0xa48] sm:$0xff] }
 0x5e0   :  { %4193 = vmatprep.subr.bf16.mxu0 %v4074_v39  ;;  %v4129_v39 = vld [vmem:[#allocation2 + $0xa40] sm:$0xff] }
 0x5e3   :  { %4194 = vmatpush1.bf16.msra.mxu0 %v4073_v22  ;;  %v4134_v22 = vld [vmem:[#allocation2 + $0xa68] sm:$0xff] }
 0x5e4   :  { %4195 = vmatprep.subr.bf16.mxu0 %v4078_v23  ;;  %v4133_v23 = vld [vmem:[#allocation2 + $0xa60] sm:$0xff] }
 0x5e7   :  { %4196 = vmatpush1.bf16.msra.mxu0 %v4077_v37  ;;  %v4138_v37 = vld [vmem:[#allocation2 + $0xa88] sm:$0xff] }
 0x5e8   :  { %4197 = vmatprep.subr.bf16.mxu0 %v4082_v9  ;;  %v4137_v9 = vld [vmem:[#allocation2 + $0xa80] sm:$0xff] }
 0x5eb   :  { %4198 = vmatpush1.bf16.msra.mxu0 %v4081_v10  ;;  %v4142_v10 = vld [vmem:[#allocation2 + $0xaa8] sm:$0xff] }
 0x5ec   :  { %4199 = vmatprep.subr.bf16.mxu0 %v4086_v16  ;;  %v4141_v16 = vld [vmem:[#allocation2 + $0xaa0] sm:$0xff] }
 0x5ef   :  { %4200 = vmatpush1.bf16.msra.mxu0 %v4085_v14  ;;  %v4146_v14 = vld [vmem:[#allocation2 + $0xac8] sm:$0xff] }
 0x5f0   :  { %4201 = vmatprep.subr.bf16.mxu0 %v4090_v12  ;;  %v4145_v12 = vld [vmem:[#allocation2 + $0xac0] sm:$0xff] }
 0x5f3   :  { %4202 = vmatpush1.bf16.msra.mxu0 %v4089_v28  ;;  %v4150_v28 = vld [vmem:[#allocation2 + $0xae8] sm:$0xff] }
 0x5f4   :  { %4203 = vmatprep.subr.bf16.mxu0 %v4094_v49  ;;  %v4149_v49 = vld [vmem:[#allocation2 + $0xae0] sm:$0xff] }
 0x5f7   :  { %4204 = vmatpush1.bf16.msra.mxu0 %v4093_v47  ;;  %v4154_v47 = vld [vmem:[#allocation2 + $0xb08] sm:$0xff] }
 0x5f8   :  { %4205 = vmatprep.subr.bf16.mxu0 %v4098_v26  ;;  %v4153_v26 = vld [vmem:[#allocation2 + $0xb00] sm:$0xff] }
 0x5fb   :  { %4206 = vmatpush1.bf16.msra.mxu0 %v4097_v57  ;;  %v4158_v57 = vld [vmem:[#allocation2 + $0xb28] sm:$0xff] }
 0x5fc   :  { %4207 = vmatprep.subr.bf16.mxu0 %v4102_v59  ;;  %v4157_v59 = vld [vmem:[#allocation2 + $0xb20] sm:$0xff] }
 0x5ff   :  { %4208 = vmatpush1.bf16.msra.mxu0 %v4101_v4  ;;  %v4162_v4 = vld [vmem:[#allocation2 + $0xb48] sm:$0xff] }
 0x600   :  { %4209 = vmatprep.subr.bf16.mxu0 %v4106_v21  ;;  %v4161_v21 = vld [vmem:[#allocation2 + $0xb40] sm:$0xff] }
 0x603   :  { %4210 = vmatpush1.bf16.msra.mxu0 %v4105_v62  ;;  %v4166_v62 = vld [vmem:[#allocation2 + $0xb68] sm:$0xff] }
 0x604   :  { %4211 = vmatprep.subr.bf16.mxu0 %v4110_v24  ;;  %v4165_v24 = vld [vmem:[#allocation2 + $0xb60] sm:$0xff] }
 0x607   :  { %4212 = vmatpush1.bf16.msra.mxu0 %v4109_v15  ;;  %v4170_v15 = vld [vmem:[#allocation2 + $0xb88] sm:$0xff] }
 0x608   :  { %4213 = vmatprep.subr.bf16.mxu0 %v4114_v36  ;;  %v4169_v36 = vld [vmem:[#allocation2 + $0xb80] sm:$0xff] }
 0x60b   :  { %4214 = vmatpush1.bf16.msra.mxu0 %v4113_v41  ;;  %v4174_v41 = vld [vmem:[#allocation2 + $0xba8] sm:$0xff] }
 0x60c   :  { %4215 = vmatprep.subr.bf16.mxu0 %v4118_v7  ;;  %v4173_v7 = vld [vmem:[#allocation2 + $0xba0] sm:$0xff] }
 0x60f   :  { %4216 = vmatpush1.bf16.msra.mxu0 %v4117_v50  ;;  %v4178_v50 = vld [vmem:[#allocation2 + $0xbc8] sm:$0xff] }
 0x610   :  { %4228 = vmatprep.subr.bf16.mxu0 %v4122_v52  ;;  %v4177_v52 = vld [vmem:[#allocation2 + $0xbc0] sm:$0xff] }
 0x612   :  { %4218 = vmatmul.mubr.bf16.vlgmr.msra.gmra.mrb[36].mxu0 %v12037_v18 }
 0x613   :  { %4229 = vmatpush1.bf16.msra.mxu0 %v4121_v38  ;;  %4260 = vmatprep.mubr.bf16.mxu0 %v12198_v43  ;;  %v4182_v38 = vld [vmem:[#allocation2 + $0xbe8] sm:$0xff] }
 0x614   :  { %4230 = vmatprep.subr.bf16.mxu0 %v4126_v17  ;;  %v4181_v17 = vld [vmem:[#allocation2 + $0xbe0] sm:$0xff] }
 0x617   :  { %4231 = vmatpush1.bf16.msra.mxu0 %v4125_v44  ;;  %v4060_v44 = vld [vmem:[#allocation2 + $0x818] sm:$0xff] }
 0x618   :  { %4232 = vmatprep.subr.bf16.mxu0 %v4130_v48  ;;  %v4059_v48 = vld [vmem:[#allocation2 + $0x810] sm:$0xff] }
 0x61b   :  { %4233 = vmatpush1.bf16.msra.mxu0 %v4129_v39  ;;  %v4064_v39 = vld [vmem:[#allocation2 + $0x838] sm:$0xff] }
 0x61c   :  { %4234 = vmatprep.subr.bf16.mxu0 %v4134_v22  ;;  %v4063_v22 = vld [vmem:[#allocation2 + $0x830] sm:$0xff] }
 0x61f   :  { %4235 = vmatpush1.bf16.msra.mxu0 %v4133_v23  ;;  %v4068_v23 = vld [vmem:[#allocation2 + $0x858] sm:$0xff] }
 0x620   :  { %4236 = vmatprep.subr.bf16.mxu0 %v4138_v37  ;;  %v4067_v37 = vld [vmem:[#allocation2 + $0x850] sm:$0xff] }
 0x623   :  { %4237 = vmatpush1.bf16.msra.mxu0 %v4137_v9  ;;  %v4072_v9 = vld [vmem:[#allocation2 + $0x878] sm:$0xff] }
 0x624   :  { %4238 = vmatprep.subr.bf16.mxu0 %v4142_v10  ;;  %v4071_v10 = vld [vmem:[#allocation2 + $0x870] sm:$0xff] }
 0x627   :  { %4239 = vmatpush1.bf16.msra.mxu0 %v4141_v16  ;;  %v4076_v16 = vld [vmem:[#allocation2 + $0x898] sm:$0xff] }
 0x628   :  { %4240 = vmatprep.subr.bf16.mxu0 %v4146_v14  ;;  %v4075_v14 = vld [vmem:[#allocation2 + $0x890] sm:$0xff] }
 0x62b   :  { %4241 = vmatpush1.bf16.msra.mxu0 %v4145_v12  ;;  %v4080_v12 = vld [vmem:[#allocation2 + $0x8b8] sm:$0xff] }
 0x62c   :  { %4242 = vmatprep.subr.bf16.mxu0 %v4150_v28  ;;  %v4079_v28 = vld [vmem:[#allocation2 + $0x8b0] sm:$0xff] }
 0x62f   :  { %4243 = vmatpush1.bf16.msra.mxu0 %v4149_v49  ;;  %v4084_v49 = vld [vmem:[#allocation2 + $0x8d8] sm:$0xff] }
 0x630   :  { %4244 = vmatprep.subr.bf16.mxu0 %v4154_v47  ;;  %v4088_v47 = vld [vmem:[#allocation2 + $0x8f8] sm:$0xff] }
 0x633   :  { %4245 = vmatpush1.bf16.msra.mxu0 %v4153_v26  ;;  %v4087_v26 = vld [vmem:[#allocation2 + $0x8f0] sm:$0xff] }
 0x634   :  { %4246 = vmatprep.subr.bf16.mxu0 %v4158_v57  ;;  %v4092_v57 = vld [vmem:[#allocation2 + $0x918] sm:$0xff] }
 0x637   :  { %4247 = vmatpush1.bf16.msra.mxu0 %v4157_v59  ;;  %v4091_v59 = vld [vmem:[#allocation2 + $0x910] sm:$0xff] }
 0x638   :  { %4248 = vmatprep.subr.bf16.mxu0 %v4162_v4  ;;  %v4096_v4 = vld [vmem:[#allocation2 + $0x938] sm:$0xff] }
 0x63b   :  { %4249 = vmatpush1.bf16.msra.mxu0 %v4161_v21  ;;  %v4095_v21 = vld [vmem:[#allocation2 + $0x930] sm:$0xff] }
 0x63c   :  { %4250 = vmatprep.subr.bf16.mxu0 %v4166_v62  ;;  %v4100_v62 = vld [vmem:[#allocation2 + $0x958] sm:$0xff] }
 0x63f   :  { %4251 = vmatpush1.bf16.msra.mxu0 %v4165_v24  ;;  %v4099_v24 = vld [vmem:[#allocation2 + $0x950] sm:$0xff] }
 0x640   :  { %4252 = vmatprep.subr.bf16.mxu0 %v4170_v15  ;;  %v4104_v15 = vld [vmem:[#allocation2 + $0x978] sm:$0xff] }
 0x643   :  { %4253 = vmatpush1.bf16.msra.mxu0 %v4169_v36  ;;  %v4103_v36 = vld [vmem:[#allocation2 + $0x970] sm:$0xff] }
 0x644   :  { %4254 = vmatprep.subr.bf16.mxu0 %v4174_v41  ;;  %v4108_v41 = vld [vmem:[#allocation2 + $0x998] sm:$0xff] }
 0x647   :  { %4255 = vmatpush1.bf16.msra.mxu0 %v4173_v7  ;;  %v4107_v7 = vld [vmem:[#allocation2 + $0x990] sm:$0xff] }
 0x648   :  { %4256 = vmatprep.subr.bf16.mxu0 %v4178_v50  ;;  %v4112_v50 = vld [vmem:[#allocation2 + $0x9b8] sm:$0xff] }
 0x64b   :  { %4257 = vmatpush1.bf16.msra.mxu0 %v4177_v52  ;;  %v4111_v52 = vld [vmem:[#allocation2 + $0x9b0] sm:$0xff] }
 0x64c   :  { %4258 = vmatprep.subr.bf16.mxu0 %v4182_v38  ;;  %v4116_v38 = vld [vmem:[#allocation2 + $0x9d8] sm:$0xff] }
 0x64f   :  { %4259 = vmatpush1.bf16.msra.mxu0 %v4181_v17  ;;  %v4115_v17 = vld [vmem:[#allocation2 + $0x9d0] sm:$0xff] }
 0x650   :  { %4271 = vmatprep.subr.bf16.mxu0 %v4060_v44  ;;  %v4120_v44 = vld [vmem:[#allocation2 + $0x9f8] sm:$0xff] }
 0x652   :  { %4261 = vmatmul.mubr.bf16.vlgmr.msra.gmra.mrb[36].mxu0 %v12195_v1 }
 0x653   :  { %4272 = vmatpush1.bf16.msra.mxu0 %v4059_v48  ;;  %4303 = vmatprep.mubr.bf16.mxu0 %v12040_v46  ;;  %v4083_v46 = vld [vmem:[#allocation2 + $0x8d0] sm:$0xff] }
 0x654   :  { %4273 = vmatprep.subr.bf16.mxu0 %v4064_v39  ;;  %v4119_v48 = vld [vmem:[#allocation2 + $0x9f0] sm:$0xff]  ;;  %v4124_v39 = vld [vmem:[#allocation2 + $0xa18] sm:$0xff] }
 0x657   :  { %4274 = vmatpush1.bf16.msra.mxu0 %v4063_v22  ;;  %v4123_v22 = vld [vmem:[#allocation2 + $0xa10] sm:$0xff] }
 0x658   :  { %4275 = vmatprep.subr.bf16.mxu0 %v4068_v23  ;;  %v4128_v23 = vld [vmem:[#allocation2 + $0xa38] sm:$0xff] }
 0x65b   :  { %4276 = vmatpush1.bf16.msra.mxu0 %v4067_v37  ;;  %v4127_v37 = vld [vmem:[#allocation2 + $0xa30] sm:$0xff] }
 0x65c   :  { %4277 = vmatprep.subr.bf16.mxu0 %v4072_v9  ;;  %v4132_v9 = vld [vmem:[#allocation2 + $0xa58] sm:$0xff] }
 0x65f   :  { %4278 = vmatpush1.bf16.msra.mxu0 %v4071_v10  ;;  %v4131_v10 = vld [vmem:[#allocation2 + $0xa50] sm:$0xff] }
 0x660   :  { %4279 = vmatprep.subr.bf16.mxu0 %v4076_v16  ;;  %v4136_v16 = vld [vmem:[#allocation2 + $0xa78] sm:$0xff] }
 0x663   :  { %4280 = vmatpush1.bf16.msra.mxu0 %v4075_v14  ;;  %v4135_v14 = vld [vmem:[#allocation2 + $0xa70] sm:$0xff] }
 0x664   :  { %4281 = vmatprep.subr.bf16.mxu0 %v4080_v12  ;;  %v4140_v12 = vld [vmem:[#allocation2 + $0xa98] sm:$0xff] }
 0x667   :  { %4282 = vmatpush1.bf16.msra.mxu0 %v4079_v28  ;;  %v4139_v28 = vld [vmem:[#allocation2 + $0xa90] sm:$0xff] }
 0x668   :  { %4283 = vmatprep.subr.bf16.mxu0 %v4084_v49  ;;  %v4144_v49 = vld [vmem:[#allocation2 + $0xab8] sm:$0xff] }
 0x66b   :  { %4284 = vmatpush1.bf16.msra.mxu0 %v4083_v46  ;;  %v4148_v46 = vld [vmem:[#allocation2 + $0xad8] sm:$0xff] }
 0x66c   :  { %4285 = vmatprep.subr.bf16.mxu0 %v4088_v47  ;;  %v4152_v47 = vld [vmem:[#allocation2 + $0xaf8] sm:$0xff] }
 0x66f   :  { %4286 = vmatpush1.bf16.msra.mxu0 %v4087_v26  ;;  %v4151_v26 = vld [vmem:[#allocation2 + $0xaf0] sm:$0xff] }
 0x670   :  { %4287 = vmatprep.subr.bf16.mxu0 %v4092_v57  ;;  %v4156_v57 = vld [vmem:[#allocation2 + $0xb18] sm:$0xff] }
 0x673   :  { %4288 = vmatpush1.bf16.msra.mxu0 %v4091_v59  ;;  %v4155_v59 = vld [vmem:[#allocation2 + $0xb10] sm:$0xff] }
 0x674   :  { %4289 = vmatprep.subr.bf16.mxu0 %v4096_v4  ;;  %v4160_v4 = vld [vmem:[#allocation2 + $0xb38] sm:$0xff] }
 0x677   :  { %4290 = vmatpush1.bf16.msra.mxu0 %v4095_v21  ;;  %v4159_v21 = vld [vmem:[#allocation2 + $0xb30] sm:$0xff] }
 0x678   :  { %4291 = vmatprep.subr.bf16.mxu0 %v4100_v62  ;;  %v4164_v62 = vld [vmem:[#allocation2 + $0xb58] sm:$0xff] }
 0x67b   :  { %4292 = vmatpush1.bf16.msra.mxu0 %v4099_v24  ;;  %v4163_v24 = vld [vmem:[#allocation2 + $0xb50] sm:$0xff] }
 0x67c   :  { %4293 = vmatprep.subr.bf16.mxu0 %v4104_v15  ;;  %v4168_v15 = vld [vmem:[#allocation2 + $0xb78] sm:$0xff] }
 0x67f   :  { %4294 = vmatpush1.bf16.msra.mxu0 %v4103_v36  ;;  %v4167_v36 = vld [vmem:[#allocation2 + $0xb70] sm:$0xff] }
 0x680   :  { %4295 = vmatprep.subr.bf16.mxu0 %v4108_v41  ;;  %v4172_v41 = vld [vmem:[#allocation2 + $0xb98] sm:$0xff] }
 0x683   :  { %4296 = vmatpush1.bf16.msra.mxu0 %v4107_v7  ;;  %v4171_v7 = vld [vmem:[#allocation2 + $0xb90] sm:$0xff] }
 0x684   :  { %4297 = vmatprep.subr.bf16.mxu0 %v4112_v50  ;;  %v4176_v50 = vld [vmem:[#allocation2 + $0xbb8] sm:$0xff] }
 0x687   :  { %4298 = vmatpush1.bf16.msra.mxu0 %v4111_v52  ;;  %v4175_v52 = vld [vmem:[#allocation2 + $0xbb0] sm:$0xff] }
 0x688   :  { %4299 = vmatprep.subr.bf16.mxu0 %v4116_v38  ;;  %v4180_v38 = vld [vmem:[#allocation2 + $0xbd8] sm:$0xff] }
 0x68b   :  { %4300 = vmatpush1.bf16.msra.mxu0 %v4115_v17  ;;  %v4179_v17 = vld [vmem:[#allocation2 + $0xbd0] sm:$0xff] }
 0x68c   :  { %4301 = vmatprep.subr.bf16.mxu0 %v4120_v44  ;;  %v4184_v44 = vld [vmem:[#allocation2 + $0xbf8] sm:$0xff] }
 0x68f   :  { %4302 = vmatpush1.bf16.msra.mxu0 %v4119_v48  ;;  %v4183_v48 = vld [vmem:[#allocation2 + $0xbf0] sm:$0xff] }
 0x690   :  { %4314 = vmatprep.subr.bf16.mxu0 %v4124_v39  ;;  %v4370_v39 = vld [vmem:[#allocation2 + $0xc08] sm:$0xff] }
 0x692   :  { %4304 = vmatmul.mubr.bf16.vlgmr.msra.gmra.mrb[32].mxu0 %v12037_v18  ;;  %v4143_v18 = vld [vmem:[#allocation2 + $0xab0] sm:$0xff] }
 0x693   :  { %4315 = vmatpush1.bf16.msra.mxu0 %v4123_v22  ;;  %4346 = vmatprep.mubr.bf16.mxu0 %v12198_v43  ;;  %v4147_v43 = vld [vmem:[#allocation2 + $0xad0] sm:$0xff]  ;;  %v4369_v22 = vld [vmem:[#allocation2 + $0xc00] sm:$0xff] }
 0x694   :  { %4316 = vmatprep.subr.bf16.mxu0 %v4128_v23  ;;  %v4374_v23 = vld [vmem:[#allocation2 + $0xc28] sm:$0xff] }
 0x697   :  { %4317 = vmatpush1.bf16.msra.mxu0 %v4127_v37  ;;  %v4373_v37 = vld [vmem:[#allocation2 + $0xc20] sm:$0xff] }
 0x698   :  { %4318 = vmatprep.subr.bf16.mxu0 %v4132_v9  ;;  %v4378_v9 = vld [vmem:[#allocation2 + $0xc48] sm:$0xff] }
 0x69b   :  { %4319 = vmatpush1.bf16.msra.mxu0 %v4131_v10  ;;  %v4377_v10 = vld [vmem:[#allocation2 + $0xc40] sm:$0xff] }
 0x69c   :  { %4320 = vmatprep.subr.bf16.mxu0 %v4136_v16  ;;  %v4382_v16 = vld [vmem:[#allocation2 + $0xc68] sm:$0xff] }
 0x69f   :  { %4321 = vmatpush1.bf16.msra.mxu0 %v4135_v14  ;;  %v4381_v14 = vld [vmem:[#allocation2 + $0xc60] sm:$0xff] }
 0x6a0   :  { %4322 = vmatprep.subr.bf16.mxu0 %v4140_v12  ;;  %v4386_v12 = vld [vmem:[#allocation2 + $0xc88] sm:$0xff] }
 0x6a3   :  { %4323 = vmatpush1.bf16.msra.mxu0 %v4139_v28  ;;  %v4385_v28 = vld [vmem:[#allocation2 + $0xc80] sm:$0xff] }
 0x6a4   :  { %4324 = vmatprep.subr.bf16.mxu0 %v4144_v49  ;;  %v4390_v49 = vld [vmem:[#allocation2 + $0xca8] sm:$0xff] }
 0x6a7   :  { %4325 = vmatpush1.bf16.msra.mxu0 %v4143_v18  ;;  %v4394_v18 = vld [vmem:[#allocation2 + $0xcc8] sm:$0xff] }
 0x6a8   :  { %4326 = vmatprep.subr.bf16.mxu0 %v4148_v46  ;;  %v4393_v46 = vld [vmem:[#allocation2 + $0xcc0] sm:$0xff] }
 0x6ab   :  { %4327 = vmatpush1.bf16.msra.mxu0 %v4147_v43  ;;  %v4398_v43 = vld [vmem:[#allocation2 + $0xce8] sm:$0xff] }
 0x6ac   :  { %4328 = vmatprep.subr.bf16.mxu0 %v4152_v47  ;;  %v4397_v47 = vld [vmem:[#allocation2 + $0xce0] sm:$0xff] }
 0x6af   :  { %4329 = vmatpush1.bf16.msra.mxu0 %v4151_v26  ;;  %v4402_v26 = vld [vmem:[#allocation2 + $0xd08] sm:$0xff] }
 0x6b0   :  { %4330 = vmatprep.subr.bf16.mxu0 %v4156_v57  ;;  %v4401_v57 = vld [vmem:[#allocation2 + $0xd00] sm:$0xff] }
 0x6b3   :  { %4331 = vmatpush1.bf16.msra.mxu0 %v4155_v59  ;;  %v4406_v59 = vld [vmem:[#allocation2 + $0xd28] sm:$0xff] }
 0x6b4   :  { %4332 = vmatprep.subr.bf16.mxu0 %v4160_v4  ;;  %v4405_v4 = vld [vmem:[#allocation2 + $0xd20] sm:$0xff] }
 0x6b7   :  { %4333 = vmatpush1.bf16.msra.mxu0 %v4159_v21  ;;  %v4410_v21 = vld [vmem:[#allocation2 + $0xd48] sm:$0xff] }
 0x6b8   :  { %4334 = vmatprep.subr.bf16.mxu0 %v4164_v62  ;;  %v4409_v62 = vld [vmem:[#allocation2 + $0xd40] sm:$0xff] }
 0x6bb   :  { %4335 = vmatpush1.bf16.msra.mxu0 %v4163_v24  ;;  %v4414_v24 = vld [vmem:[#allocation2 + $0xd68] sm:$0xff] }
 0x6bc   :  { %4336 = vmatprep.subr.bf16.mxu0 %v4168_v15  ;;  %v4413_v15 = vld [vmem:[#allocation2 + $0xd60] sm:$0xff] }
 0x6bf   :  { %4337 = vmatpush1.bf16.msra.mxu0 %v4167_v36  ;;  %v4418_v36 = vld [vmem:[#allocation2 + $0xd88] sm:$0xff] }
 0x6c0   :  { %4338 = vmatprep.subr.bf16.mxu0 %v4172_v41  ;;  %v4417_v41 = vld [vmem:[#allocation2 + $0xd80] sm:$0xff] }
 0x6c3   :  { %4339 = vmatpush1.bf16.msra.mxu0 %v4171_v7  ;;  %v4422_v7 = vld [vmem:[#allocation2 + $0xda8] sm:$0xff] }
 0x6c4   :  { %4340 = vmatprep.subr.bf16.mxu0 %v4176_v50  ;;  %v4421_v50 = vld [vmem:[#allocation2 + $0xda0] sm:$0xff] }
 0x6c7   :  { %4341 = vmatpush1.bf16.msra.mxu0 %v4175_v52  ;;  %v4426_v52 = vld [vmem:[#allocation2 + $0xdc8] sm:$0xff] }
 0x6c8   :  { %4342 = vmatprep.subr.bf16.mxu0 %v4180_v38  ;;  %v4425_v38 = vld [vmem:[#allocation2 + $0xdc0] sm:$0xff] }
 0x6cb   :  { %4343 = vmatpush1.bf16.msra.mxu0 %v4179_v17  ;;  %v4430_v17 = vld [vmem:[#allocation2 + $0xde8] sm:$0xff] }
 0x6cc   :  { %4344 = vmatprep.subr.bf16.mxu0 %v4184_v44  ;;  %v4429_v44 = vld [vmem:[#allocation2 + $0xde0] sm:$0xff] }
 0x6cf   :  { %4345 = vmatpush1.bf16.msra.mxu0 %v4183_v48  ;;  %v4434_v48 = vld [vmem:[#allocation2 + $0xe08] sm:$0xff] }
 0x6d0   :  { %4497 = vmatprep.subr.bf16.mxu0 %v4370_v39  ;;  %v4433_v39 = vld [vmem:[#allocation2 + $0xe00] sm:$0xff] }
 0x6d2   :  { %4347 = vmatmul.mubr.bf16.vlgmr.msra.gmra.mrb[32].mxu0 %v12195_v1  ;;  %v4389_v1 = vld [vmem:[#allocation2 + $0xca0] sm:$0xff] }
 0x6d3   :  { %4498 = vmatpush1.bf16.msra.mxu0 %v4369_v22  ;;  %4529 = vmatprep.mubr.bf16.mxu0 %v12056_v51  ;;  %v4438_v22 = vld [vmem:[#allocation2 + $0xe28] sm:$0xff] }
 0x6d4   :  { %4499 = vmatprep.subr.bf16.mxu0 %v4374_v23  ;;  %v4437_v23 = vld [vmem:[#allocation2 + $0xe20] sm:$0xff] }
 0x6d7   :  { %4500 = vmatpush1.bf16.msra.mxu0 %v4373_v37  ;;  %v4442_v37 = vld [vmem:[#allocation2 + $0xe48] sm:$0xff] }
 0x6d8   :  { %4501 = vmatprep.subr.bf16.mxu0 %v4378_v9  ;;  %v4441_v9 = vld [vmem:[#allocation2 + $0xe40] sm:$0xff] }
 0x6db   :  { %4502 = vmatpush1.bf16.msra.mxu0 %v4377_v10  ;;  %v4446_v10 = vld [vmem:[#allocation2 + $0xe68] sm:$0xff] }
 0x6dc   :  { %4503 = vmatprep.subr.bf16.mxu0 %v4382_v16  ;;  %v4445_v16 = vld [vmem:[#allocation2 + $0xe60] sm:$0xff] }
 0x6df   :  { %4504 = vmatpush1.bf16.msra.mxu0 %v4381_v14  ;;  %v4450_v14 = vld [vmem:[#allocation2 + $0xe88] sm:$0xff] }
 0x6e0   :  { %4505 = vmatprep.subr.bf16.mxu0 %v4386_v12  ;;  %v4449_v12 = vld [vmem:[#allocation2 + $0xe80] sm:$0xff] }
 0x6e3   :  { %4506 = vmatpush1.bf16.msra.mxu0 %v4385_v28  ;;  %v4454_v28 = vld [vmem:[#allocation2 + $0xea8] sm:$0xff] }
 0x6e4   :  { %4507 = vmatprep.subr.bf16.mxu0 %v4390_v49  ;;  %v4453_v49 = vld [vmem:[#allocation2 + $0xea0] sm:$0xff] }
 0x6e7   :  { %4508 = vmatpush1.bf16.msra.mxu0 %v4389_v1  ;;  %v4458_v1 = vld [vmem:[#allocation2 + $0xec8] sm:$0xff] }
 0x6e8   :  { %4509 = vmatprep.subr.bf16.mxu0 %v4394_v18  ;;  %v4457_v18 = vld [vmem:[#allocation2 + $0xec0] sm:$0xff] }
 0x6eb   :  { %4510 = vmatpush1.bf16.msra.mxu0 %v4393_v46  ;;  %v4462_v46 = vld [vmem:[#allocation2 + $0xee8] sm:$0xff] }
 0x6ec   :  { %4511 = vmatprep.subr.bf16.mxu0 %v4398_v43  ;;  %v4461_v43 = vld [vmem:[#allocation2 + $0xee0] sm:$0xff] }
 0x6ef   :  { %4512 = vmatpush1.bf16.msra.mxu0 %v4397_v47  ;;  %v4466_v47 = vld [vmem:[#allocation2 + $0xf08] sm:$0xff] }
 0x6f0   :  { %4513 = vmatprep.subr.bf16.mxu0 %v4402_v26  ;;  %v4465_v26 = vld [vmem:[#allocation2 + $0xf00] sm:$0xff] }
 0x6f3   :  { %4514 = vmatpush1.bf16.msra.mxu0 %v4401_v57  ;;  %v4470_v57 = vld [vmem:[#allocation2 + $0xf28] sm:$0xff] }
 0x6f4   :  { %4515 = vmatprep.subr.bf16.mxu0 %v4406_v59  ;;  %v4469_v59 = vld [vmem:[#allocation2 + $0xf20] sm:$0xff] }
 0x6f7   :  { %4516 = vmatpush1.bf16.msra.mxu0 %v4405_v4  ;;  %v4474_v4 = vld [vmem:[#allocation2 + $0xf48] sm:$0xff] }
 0x6f8   :  { %4517 = vmatprep.subr.bf16.mxu0 %v4410_v21  ;;  %v4473_v21 = vld [vmem:[#allocation2 + $0xf40] sm:$0xff] }
 0x6fb   :  { %4518 = vmatpush1.bf16.msra.mxu0 %v4409_v62  ;;  %v4478_v62 = vld [vmem:[#allocation2 + $0xf68] sm:$0xff] }
 0x6fc   :  { %4519 = vmatprep.subr.bf16.mxu0 %v4414_v24  ;;  %v4477_v24 = vld [vmem:[#allocation2 + $0xf60] sm:$0xff] }
 0x6ff   :  { %4520 = vmatpush1.bf16.msra.mxu0 %v4413_v15  ;;  %v4482_v15 = vld [vmem:[#allocation2 + $0xf88] sm:$0xff] }
 0x700   :  { %4521 = vmatprep.subr.bf16.mxu0 %v4418_v36  ;;  %v4481_v36 = vld [vmem:[#allocation2 + $0xf80] sm:$0xff] }
 0x703   :  { %4522 = vmatpush1.bf16.msra.mxu0 %v4417_v41  ;;  %v4486_v41 = vld [vmem:[#allocation2 + $0xfa8] sm:$0xff] }
 0x704   :  { %4523 = vmatprep.subr.bf16.mxu0 %v4422_v7  ;;  %v4485_v7 = vld [vmem:[#allocation2 + $0xfa0] sm:$0xff] }
 0x707   :  { %4524 = vmatpush1.bf16.msra.mxu0 %v4421_v50  ;;  %v4490_v50 = vld [vmem:[#allocation2 + $0xfc8] sm:$0xff] }
 0x708   :  { %4525 = vmatprep.subr.bf16.mxu0 %v4426_v52  ;;  %v4489_v52 = vld [vmem:[#allocation2 + $0xfc0] sm:$0xff] }
 0x70b   :  { %4526 = vmatpush1.bf16.msra.mxu0 %v4425_v38  ;;  %v4494_v38 = vld [vmem:[#allocation2 + $0xfe8] sm:$0xff] }
 0x70c   :  { %4527 = vmatprep.subr.bf16.mxu0 %v4430_v17  ;;  %v4493_v17 = vld [vmem:[#allocation2 + $0xfe0] sm:$0xff] }
 0x70f   :  { %4528 = vmatpush1.bf16.msra.mxu0 %v4429_v44  ;;  %v4372_v44 = vld [vmem:[#allocation2 + $0xc18] sm:$0xff] }
 0x710   :  { %4540 = vmatprep.subr.bf16.mxu0 %v4434_v48  ;;  %v4371_v48 = vld [vmem:[#allocation2 + $0xc10] sm:$0xff] }
 0x712   :  { %4530 = vmatmul.mubr.bf16.vlgmr.msra.gmra.mrb[36].mxu0 %v12053_v25 }
 0x713   :  { %4541 = vmatpush1.bf16.msra.mxu0 %v4433_v39  ;;  %4572 = vmatprep.mubr.bf16.mxu0 %v12214_v56  ;;  %v4376_v39 = vld [vmem:[#allocation2 + $0xc38] sm:$0xff] }
 0x714   :  { %4542 = vmatprep.subr.bf16.mxu0 %v4438_v22  ;;  %v4375_v22 = vld [vmem:[#allocation2 + $0xc30] sm:$0xff] }
 0x717   :  { %4543 = vmatpush1.bf16.msra.mxu0 %v4437_v23  ;;  %v4380_v23 = vld [vmem:[#allocation2 + $0xc58] sm:$0xff] }
 0x718   :  { %4544 = vmatprep.subr.bf16.mxu0 %v4442_v37  ;;  %v4379_v37 = vld [vmem:[#allocation2 + $0xc50] sm:$0xff] }
 0x71b   :  { %4545 = vmatpush1.bf16.msra.mxu0 %v4441_v9  ;;  %v4384_v9 = vld [vmem:[#allocation2 + $0xc78] sm:$0xff] }
 0x71c   :  { %4546 = vmatprep.subr.bf16.mxu0 %v4446_v10  ;;  %v4383_v10 = vld [vmem:[#allocation2 + $0xc70] sm:$0xff] }
 0x71f   :  { %4547 = vmatpush1.bf16.msra.mxu0 %v4445_v16  ;;  %v4388_v16 = vld [vmem:[#allocation2 + $0xc98] sm:$0xff] }
 0x720   :  { %4548 = vmatprep.subr.bf16.mxu0 %v4450_v14  ;;  %v4387_v14 = vld [vmem:[#allocation2 + $0xc90] sm:$0xff] }
 0x723   :  { %4549 = vmatpush1.bf16.msra.mxu0 %v4449_v12  ;;  %v4392_v12 = vld [vmem:[#allocation2 + $0xcb8] sm:$0xff] }
 0x724   :  { %4550 = vmatprep.subr.bf16.mxu0 %v4454_v28  ;;  %v4391_v28 = vld [vmem:[#allocation2 + $0xcb0] sm:$0xff] }
 0x727   :  { %4551 = vmatpush1.bf16.msra.mxu0 %v4453_v49  ;;  %v4396_v49 = vld [vmem:[#allocation2 + $0xcd8] sm:$0xff] }
 0x728   :  { %4552 = vmatprep.subr.bf16.mxu0 %v4458_v1  ;;  %v4400_v1 = vld [vmem:[#allocation2 + $0xcf8] sm:$0xff] }
 0x72b   :  { %4553 = vmatpush1.bf16.msra.mxu0 %v4457_v18  ;;  %v4399_v18 = vld [vmem:[#allocation2 + $0xcf0] sm:$0xff] }
 0x72c   :  { %4554 = vmatprep.subr.bf16.mxu0 %v4462_v46  ;;  %v4404_v46 = vld [vmem:[#allocation2 + $0xd18] sm:$0xff] }
 0x72f   :  { %4555 = vmatpush1.bf16.msra.mxu0 %v4461_v43  ;;  %v4403_v43 = vld [vmem:[#allocation2 + $0xd10] sm:$0xff] }
 0x730   :  { %4556 = vmatprep.subr.bf16.mxu0 %v4466_v47  ;;  %v4408_v47 = vld [vmem:[#allocation2 + $0xd38] sm:$0xff] }
 0x733   :  { %4557 = vmatpush1.bf16.msra.mxu0 %v4465_v26  ;;  %v4407_v26 = vld [vmem:[#allocation2 + $0xd30] sm:$0xff] }
 0x734   :  { %4558 = vmatprep.subr.bf16.mxu0 %v4470_v57  ;;  %v4412_v57 = vld [vmem:[#allocation2 + $0xd58] sm:$0xff] }
 0x737   :  { %4559 = vmatpush1.bf16.msra.mxu0 %v4469_v59  ;;  %v4411_v59 = vld [vmem:[#allocation2 + $0xd50] sm:$0xff] }
 0x738   :  { %4560 = vmatprep.subr.bf16.mxu0 %v4474_v4  ;;  %v4416_v4 = vld [vmem:[#allocation2 + $0xd78] sm:$0xff] }
 0x73b   :  { %4561 = vmatpush1.bf16.msra.mxu0 %v4473_v21  ;;  %v4415_v21 = vld [vmem:[#allocation2 + $0xd70] sm:$0xff] }
 0x73c   :  { %4562 = vmatprep.subr.bf16.mxu0 %v4478_v62  ;;  %v4420_v62 = vld [vmem:[#allocation2 + $0xd98] sm:$0xff] }
 0x73f   :  { %4563 = vmatpush1.bf16.msra.mxu0 %v4477_v24  ;;  %v4419_v24 = vld [vmem:[#allocation2 + $0xd90] sm:$0xff] }
 0x740   :  { %4564 = vmatprep.subr.bf16.mxu0 %v4482_v15  ;;  %v4424_v15 = vld [vmem:[#allocation2 + $0xdb8] sm:$0xff] }
 0x743   :  { %4565 = vmatpush1.bf16.msra.mxu0 %v4481_v36  ;;  %v4423_v36 = vld [vmem:[#allocation2 + $0xdb0] sm:$0xff] }
 0x744   :  { %4566 = vmatprep.subr.bf16.mxu0 %v4486_v41  ;;  %v4428_v41 = vld [vmem:[#allocation2 + $0xdd8] sm:$0xff] }
 0x747   :  { %4567 = vmatpush1.bf16.msra.mxu0 %v4485_v7  ;;  %v4427_v7 = vld [vmem:[#allocation2 + $0xdd0] sm:$0xff] }
 0x748   :  { %4568 = vmatprep.subr.bf16.mxu0 %v4490_v50  ;;  %v4432_v50 = vld [vmem:[#allocation2 + $0xdf8] sm:$0xff] }
 0x74b   :  { %4569 = vmatpush1.bf16.msra.mxu0 %v4489_v52  ;;  %v4431_v52 = vld [vmem:[#allocation2 + $0xdf0] sm:$0xff] }
 0x74c   :  { %4570 = vmatprep.subr.bf16.mxu0 %v4494_v38  ;;  %v4436_v38 = vld [vmem:[#allocation2 + $0xe18] sm:$0xff] }
 0x74f   :  { %4571 = vmatpush1.bf16.msra.mxu0 %v4493_v17  ;;  %v4435_v17 = vld [vmem:[#allocation2 + $0xe10] sm:$0xff] }
 0x750   :  { %4583 = vmatprep.subr.bf16.mxu0 %v4372_v44  ;;  %v4440_v44 = vld [vmem:[#allocation2 + $0xe38] sm:$0xff] }
 0x752   :  { %4573 = vmatmul.mubr.bf16.vlgmr.msra.gmra.mrb[36].mxu0 %v12211_v55 }
 0x753   :  { %4584 = vmatpush1.bf16.msra.mxu0 %v4371_v48  ;;  %4615 = vmatprep.mubr.bf16.mxu0 %v12056_v51  ;;  %v4395_v51 = vld [vmem:[#allocation2 + $0xcd0] sm:$0xff] }
 0x754   :  { %4585 = vmatprep.subr.bf16.mxu0 %v4376_v39  ;;  %v4439_v48 = vld [vmem:[#allocation2 + $0xe30] sm:$0xff]  ;;  %v4444_v39 = vld [vmem:[#allocation2 + $0xe58] sm:$0xff] }
 0x757   :  { %4586 = vmatpush1.bf16.msra.mxu0 %v4375_v22  ;;  %v4443_v22 = vld [vmem:[#allocation2 + $0xe50] sm:$0xff] }
 0x758   :  { %4587 = vmatprep.subr.bf16.mxu0 %v4380_v23  ;;  %v4448_v23 = vld [vmem:[#allocation2 + $0xe78] sm:$0xff] }
 0x75b   :  { %4588 = vmatpush1.bf16.msra.mxu0 %v4379_v37  ;;  %v4447_v37 = vld [vmem:[#allocation2 + $0xe70] sm:$0xff] }
 0x75c   :  { %4589 = vmatprep.subr.bf16.mxu0 %v4384_v9  ;;  %v4452_v9 = vld [vmem:[#allocation2 + $0xe98] sm:$0xff] }
 0x75f   :  { %4590 = vmatpush1.bf16.msra.mxu0 %v4383_v10  ;;  %v4451_v10 = vld [vmem:[#allocation2 + $0xe90] sm:$0xff] }
 0x760   :  { %4591 = vmatprep.subr.bf16.mxu0 %v4388_v16  ;;  %v4456_v16 = vld [vmem:[#allocation2 + $0xeb8] sm:$0xff] }
 0x763   :  { %4592 = vmatpush1.bf16.msra.mxu0 %v4387_v14  ;;  %v4460_v14 = vld [vmem:[#allocation2 + $0xed8] sm:$0xff] }
 0x764   :  { %4593 = vmatprep.subr.bf16.mxu0 %v4392_v12  ;;  %v4464_v12 = vld [vmem:[#allocation2 + $0xef8] sm:$0xff] }
 0x767   :  { %4594 = vmatpush1.bf16.msra.mxu0 %v4391_v28  ;;  %v4463_v28 = vld [vmem:[#allocation2 + $0xef0] sm:$0xff] }
 0x768   :  { %4595 = vmatprep.subr.bf16.mxu0 %v4396_v49  ;;  %v4468_v49 = vld [vmem:[#allocation2 + $0xf18] sm:$0xff] }
 0x76b   :  { %4596 = vmatpush1.bf16.msra.mxu0 %v4395_v51  ;;  %v4467_v51 = vld [vmem:[#allocation2 + $0xf10] sm:$0xff] }
 0x76c   :  { %4597 = vmatprep.subr.bf16.mxu0 %v4400_v1  ;;  %v4472_v1 = vld [vmem:[#allocation2 + $0xf38] sm:$0xff] }
 0x76f   :  { %4598 = vmatpush1.bf16.msra.mxu0 %v4399_v18  ;;  %v4471_v18 = vld [vmem:[#allocation2 + $0xf30] sm:$0xff] }
 0x770   :  { %4599 = vmatprep.subr.bf16.mxu0 %v4404_v46  ;;  %v4476_v46 = vld [vmem:[#allocation2 + $0xf58] sm:$0xff] }
 0x773   :  { %4600 = vmatpush1.bf16.msra.mxu0 %v4403_v43  ;;  %v4475_v43 = vld [vmem:[#allocation2 + $0xf50] sm:$0xff] }
 0x774   :  { %4601 = vmatprep.subr.bf16.mxu0 %v4408_v47  ;;  %v4480_v47 = vld [vmem:[#allocation2 + $0xf78] sm:$0xff] }
 0x777   :  { %4602 = vmatpush1.bf16.msra.mxu0 %v4407_v26  ;;  %v4479_v26 = vld [vmem:[#allocation2 + $0xf70] sm:$0xff] }
 0x778   :  { %4603 = vmatprep.subr.bf16.mxu0 %v4412_v57  ;;  %v4484_v57 = vld [vmem:[#allocation2 + $0xf98] sm:$0xff] }
 0x77b   :  { %4604 = vmatpush1.bf16.msra.mxu0 %v4411_v59  ;;  %v4483_v59 = vld [vmem:[#allocation2 + $0xf90] sm:$0xff] }
 0x77c   :  { %4605 = vmatprep.subr.bf16.mxu0 %v4416_v4  ;;  %v4488_v4 = vld [vmem:[#allocation2 + $0xfb8] sm:$0xff] }
 0x77f   :  { %4606 = vmatpush1.bf16.msra.mxu0 %v4415_v21  ;;  %v4487_v21 = vld [vmem:[#allocation2 + $0xfb0] sm:$0xff] }
 0x780   :  { %4607 = vmatprep.subr.bf16.mxu0 %v4420_v62  ;;  %v4492_v62 = vld [vmem:[#allocation2 + $0xfd8] sm:$0xff] }
 0x783   :  { %4608 = vmatpush1.bf16.msra.mxu0 %v4419_v24  ;;  %v4491_v24 = vld [vmem:[#allocation2 + $0xfd0] sm:$0xff] }
 0x784   :  { %4609 = vmatprep.subr.bf16.mxu0 %v4424_v15  ;;  %v4496_v15 = vld [vmem:[#allocation2 + $0xff8] sm:$0xff] }
 0x787   :  { %4610 = vmatpush1.bf16.msra.mxu0 %v4423_v36  ;;  %v4495_v36 = vld [vmem:[#allocation2 + $0xff0] sm:$0xff] }
 0x788   :  { %4611 = vmatprep.subr.bf16.mxu0 %v4428_v41  ;;  %v4682_v41 = vld [vmem:[#allocation2 + $0x1008] sm:$0xff] }
 0x78b   :  { %4612 = vmatpush1.bf16.msra.mxu0 %v4427_v7  ;;  %v4681_v7 = vld [vmem:[#allocation2 + $0x1000] sm:$0xff] }
 0x78c   :  { %4613 = vmatprep.subr.bf16.mxu0 %v4432_v50  ;;  %v4686_v50 = vld [vmem:[#allocation2 + $0x1028] sm:$0xff] }
 0x78f   :  { %4614 = vmatpush1.bf16.msra.mxu0 %v4431_v52  ;;  %v4685_v52 = vld [vmem:[#allocation2 + $0x1020] sm:$0xff] }
 0x790   :  { %4626 = vmatprep.subr.bf16.mxu0 %v4436_v38  ;;  %v4690_v38 = vld [vmem:[#allocation2 + $0x1048] sm:$0xff] }
 0x792   :  { %4616 = vmatmul.mubr.bf16.vlgmr.msra.gmra.mrb[32].mxu0 %v12053_v25  ;;  %v4455_v25 = vld [vmem:[#allocation2 + $0xeb0] sm:$0xff] }
 0x793   :  { %4627 = vmatpush1.bf16.msra.mxu0 %v4435_v17  ;;  %4658 = vmatprep.mubr.bf16.mxu0 %v12214_v56  ;;  %v4459_v56 = vld [vmem:[#allocation2 + $0xed0] sm:$0xff]  ;;  %v4689_v17 = vld [vmem:[#allocation2 + $0x1040] sm:$0xff] }
 0x794   :  { %4628 = vmatprep.subr.bf16.mxu0 %v4440_v44  ;;  %v4694_v44 = vld [vmem:[#allocation2 + $0x1068] sm:$0xff] }
 0x797   :  { %4629 = vmatpush1.bf16.msra.mxu0 %v4439_v48  ;;  %v4693_v48 = vld [vmem:[#allocation2 + $0x1060] sm:$0xff] }
 0x798   :  { %4630 = vmatprep.subr.bf16.mxu0 %v4444_v39  ;;  %v4698_v39 = vld [vmem:[#allocation2 + $0x1088] sm:$0xff] }
 0x79b   :  { %4631 = vmatpush1.bf16.msra.mxu0 %v4443_v22  ;;  %v4697_v22 = vld [vmem:[#allocation2 + $0x1080] sm:$0xff] }
 0x79c   :  { %4632 = vmatprep.subr.bf16.mxu0 %v4448_v23  ;;  %v4702_v23 = vld [vmem:[#allocation2 + $0x10a8] sm:$0xff] }
 0x79f   :  { %4633 = vmatpush1.bf16.msra.mxu0 %v4447_v37  ;;  %v4706_v37 = vld [vmem:[#allocation2 + $0x10c8] sm:$0xff] }
 0x7a0   :  { %4634 = vmatprep.subr.bf16.mxu0 %v4452_v9  ;;  %v4705_v9 = vld [vmem:[#allocation2 + $0x10c0] sm:$0xff] }
 0x7a3   :  { %4635 = vmatpush1.bf16.msra.mxu0 %v4451_v10  ;;  %v4710_v10 = vld [vmem:[#allocation2 + $0x10e8] sm:$0xff] }
 0x7a4   :  { %4636 = vmatprep.subr.bf16.mxu0 %v4456_v16  ;;  %v4709_v16 = vld [vmem:[#allocation2 + $0x10e0] sm:$0xff] }
 0x7a7   :  { %4637 = vmatpush1.bf16.msra.mxu0 %v4455_v25  ;;  %v4714_v25 = vld [vmem:[#allocation2 + $0x1108] sm:$0xff] }
 0x7a8   :  { %4638 = vmatprep.subr.bf16.mxu0 %v4460_v14  ;;  %v4713_v14 = vld [vmem:[#allocation2 + $0x1100] sm:$0xff] }
 0x7ab   :  { %4639 = vmatpush1.bf16.msra.mxu0 %v4459_v56  ;;  %v4718_v56 = vld [vmem:[#allocation2 + $0x1128] sm:$0xff] }
 0x7ac   :  { %4640 = vmatprep.subr.bf16.mxu0 %v4464_v12  ;;  %v4717_v12 = vld [vmem:[#allocation2 + $0x1120] sm:$0xff] }
 0x7af   :  { %4641 = vmatpush1.bf16.msra.mxu0 %v4463_v28  ;;  %v4722_v28 = vld [vmem:[#allocation2 + $0x1148] sm:$0xff] }
 0x7b0   :  { %4642 = vmatprep.subr.bf16.mxu0 %v4468_v49  ;;  %v4721_v49 = vld [vmem:[#allocation2 + $0x1140] sm:$0xff] }
 0x7b3   :  { %4643 = vmatpush1.bf16.msra.mxu0 %v4467_v51  ;;  %v4726_v51 = vld [vmem:[#allocation2 + $0x1168] sm:$0xff] }
 0x7b4   :  { %4644 = vmatprep.subr.bf16.mxu0 %v4472_v1  ;;  %v4725_v1 = vld [vmem:[#allocation2 + $0x1160] sm:$0xff] }
 0x7b7   :  { %4645 = vmatpush1.bf16.msra.mxu0 %v4471_v18  ;;  %v4730_v18 = vld [vmem:[#allocation2 + $0x1188] sm:$0xff] }
 0x7b8   :  { %4646 = vmatprep.subr.bf16.mxu0 %v4476_v46  ;;  %v4729_v46 = vld [vmem:[#allocation2 + $0x1180] sm:$0xff] }
 0x7bb   :  { %4647 = vmatpush1.bf16.msra.mxu0 %v4475_v43  ;;  %v4734_v43 = vld [vmem:[#allocation2 + $0x11a8] sm:$0xff] }
 0x7bc   :  { %4648 = vmatprep.subr.bf16.mxu0 %v4480_v47  ;;  %v4733_v47 = vld [vmem:[#allocation2 + $0x11a0] sm:$0xff] }
 0x7bf   :  { %4649 = vmatpush1.bf16.msra.mxu0 %v4479_v26  ;;  %v4738_v26 = vld [vmem:[#allocation2 + $0x11c8] sm:$0xff] }
 0x7c0   :  { %4650 = vmatprep.subr.bf16.mxu0 %v4484_v57  ;;  %v4737_v57 = vld [vmem:[#allocation2 + $0x11c0] sm:$0xff] }
 0x7c3   :  { %4651 = vmatpush1.bf16.msra.mxu0 %v4483_v59  ;;  %v4742_v59 = vld [vmem:[#allocation2 + $0x11e8] sm:$0xff] }
 0x7c4   :  { %4652 = vmatprep.subr.bf16.mxu0 %v4488_v4  ;;  %v4741_v4 = vld [vmem:[#allocation2 + $0x11e0] sm:$0xff] }
 0x7c7   :  { %4653 = vmatpush1.bf16.msra.mxu0 %v4487_v21  ;;  %v4746_v21 = vld [vmem:[#allocation2 + $0x1208] sm:$0xff] }
 0x7c8   :  { %4654 = vmatprep.subr.bf16.mxu0 %v4492_v62  ;;  %v4745_v62 = vld [vmem:[#allocation2 + $0x1200] sm:$0xff] }
 0x7cb   :  { %4655 = vmatpush1.bf16.msra.mxu0 %v4491_v24  ;;  %v4750_v24 = vld [vmem:[#allocation2 + $0x1228] sm:$0xff] }
 0x7cc   :  { %4656 = vmatprep.subr.bf16.mxu0 %v4496_v15  ;;  %v4749_v15 = vld [vmem:[#allocation2 + $0x1220] sm:$0xff] }
 0x7cf   :  { %4657 = vmatpush1.bf16.msra.mxu0 %v4495_v36  ;;  %v4754_v36 = vld [vmem:[#allocation2 + $0x1248] sm:$0xff] }
 0x7d0   :  { %4809 = vmatprep.subr.bf16.mxu0 %v4682_v41  ;;  %v4753_v41 = vld [vmem:[#allocation2 + $0x1240] sm:$0xff] }
 0x7d2   :  { %4659 = vmatmul.mubr.bf16.vlgmr.msra.gmra.mrb[32].mxu0 %v12211_v55  ;;  %v4701_v55 = vld [vmem:[#allocation2 + $0x10a0] sm:$0xff] }
 0x7d3   :  { %4810 = vmatpush1.bf16.msra.mxu0 %v4681_v7  ;;  %4841 = vmatprep.mubr.bf16.mxu0 %v12072_v31  ;;  %v4758_v7 = vld [vmem:[#allocation2 + $0x1268] sm:$0xff] }
 0x7d4   :  { %4811 = vmatprep.subr.bf16.mxu0 %v4686_v50  ;;  %v4757_v50 = vld [vmem:[#allocation2 + $0x1260] sm:$0xff] }
 0x7d7   :  { %4812 = vmatpush1.bf16.msra.mxu0 %v4685_v52  ;;  %v4762_v52 = vld [vmem:[#allocation2 + $0x1288] sm:$0xff] }
 0x7d8   :  { %4813 = vmatprep.subr.bf16.mxu0 %v4690_v38  ;;  %v4761_v38 = vld [vmem:[#allocation2 + $0x1280] sm:$0xff] }
 0x7db   :  { %4814 = vmatpush1.bf16.msra.mxu0 %v4689_v17  ;;  %v4766_v17 = vld [vmem:[#allocation2 + $0x12a8] sm:$0xff] }
 0x7dc   :  { %4815 = vmatprep.subr.bf16.mxu0 %v4694_v44  ;;  %v4765_v44 = vld [vmem:[#allocation2 + $0x12a0] sm:$0xff] }
 0x7df   :  { %4816 = vmatpush1.bf16.msra.mxu0 %v4693_v48  ;;  %v4770_v48 = vld [vmem:[#allocation2 + $0x12c8] sm:$0xff] }
 0x7e0   :  { %4817 = vmatprep.subr.bf16.mxu0 %v4698_v39  ;;  %v4769_v39 = vld [vmem:[#allocation2 + $0x12c0] sm:$0xff] }
 0x7e3   :  { %4818 = vmatpush1.bf16.msra.mxu0 %v4697_v22  ;;  %v4774_v22 = vld [vmem:[#allocation2 + $0x12e8] sm:$0xff] }
 0x7e4   :  { %4819 = vmatprep.subr.bf16.mxu0 %v4702_v23  ;;  %v4773_v23 = vld [vmem:[#allocation2 + $0x12e0] sm:$0xff] }
 0x7e7   :  { %4820 = vmatpush1.bf16.msra.mxu0 %v4701_v55  ;;  %v4778_v55 = vld [vmem:[#allocation2 + $0x1308] sm:$0xff] }
 0x7e8   :  { %4821 = vmatprep.subr.bf16.mxu0 %v4706_v37  ;;  %v4777_v37 = vld [vmem:[#allocation2 + $0x1300] sm:$0xff] }
 0x7eb   :  { %4822 = vmatpush1.bf16.msra.mxu0 %v4705_v9  ;;  %v4782_v9 = vld [vmem:[#allocation2 + $0x1328] sm:$0xff] }
 0x7ec   :  { %4823 = vmatprep.subr.bf16.mxu0 %v4710_v10  ;;  %v4781_v10 = vld [vmem:[#allocation2 + $0x1320] sm:$0xff] }
 0x7ef   :  { %4824 = vmatpush1.bf16.msra.mxu0 %v4709_v16  ;;  %v4786_v16 = vld [vmem:[#allocation2 + $0x1348] sm:$0xff] }
 0x7f0   :  { %4825 = vmatprep.subr.bf16.mxu0 %v4714_v25  ;;  %v4785_v25 = vld [vmem:[#allocation2 + $0x1340] sm:$0xff] }
 0x7f3   :  { %4826 = vmatpush1.bf16.msra.mxu0 %v4713_v14  ;;  %v4790_v14 = vld [vmem:[#allocation2 + $0x1368] sm:$0xff] }
 0x7f4   :  { %4827 = vmatprep.subr.bf16.mxu0 %v4718_v56  ;;  %v4789_v56 = vld [vmem:[#allocation2 + $0x1360] sm:$0xff] }
 0x7f7   :  { %4828 = vmatpush1.bf16.msra.mxu0 %v4717_v12  ;;  %v4794_v12 = vld [vmem:[#allocation2 + $0x1388] sm:$0xff] }
 0x7f8   :  { %4829 = vmatprep.subr.bf16.mxu0 %v4722_v28  ;;  %v4793_v28 = vld [vmem:[#allocation2 + $0x1380] sm:$0xff] }
 0x7fb   :  { %4830 = vmatpush1.bf16.msra.mxu0 %v4721_v49  ;;  %v4798_v49 = vld [vmem:[#allocation2 + $0x13a8] sm:$0xff] }
 0x7fc   :  { %4831 = vmatprep.subr.bf16.mxu0 %v4726_v51  ;;  %v4797_v51 = vld [vmem:[#allocation2 + $0x13a0] sm:$0xff] }
 0x7ff   :  { %4832 = vmatpush1.bf16.msra.mxu0 %v4725_v1  ;;  %v4802_v1 = vld [vmem:[#allocation2 + $0x13c8] sm:$0xff] }
 0x800   :  { %4833 = vmatprep.subr.bf16.mxu0 %v4730_v18  ;;  %v4801_v18 = vld [vmem:[#allocation2 + $0x13c0] sm:$0xff] }
 0x803   :  { %4834 = vmatpush1.bf16.msra.mxu0 %v4729_v46  ;;  %v4806_v46 = vld [vmem:[#allocation2 + $0x13e8] sm:$0xff] }
 0x804   :  { %4835 = vmatprep.subr.bf16.mxu0 %v4734_v43  ;;  %v4805_v43 = vld [vmem:[#allocation2 + $0x13e0] sm:$0xff] }
 0x807   :  { %4836 = vmatpush1.bf16.msra.mxu0 %v4733_v47  ;;  %v4684_v47 = vld [vmem:[#allocation2 + $0x1018] sm:$0xff] }
 0x808   :  { %4837 = vmatprep.subr.bf16.mxu0 %v4738_v26  ;;  %v4683_v26 = vld [vmem:[#allocation2 + $0x1010] sm:$0xff] }
 0x80b   :  { %4838 = vmatpush1.bf16.msra.mxu0 %v4737_v57  ;;  %v4688_v57 = vld [vmem:[#allocation2 + $0x1038] sm:$0xff] }
 0x80c   :  { %4839 = vmatprep.subr.bf16.mxu0 %v4742_v59  ;;  %v4687_v59 = vld [vmem:[#allocation2 + $0x1030] sm:$0xff] }
 0x80f   :  { %4840 = vmatpush1.bf16.msra.mxu0 %v4741_v4  ;;  %v4692_v4 = vld [vmem:[#allocation2 + $0x1058] sm:$0xff] }
 0x810   :  { %4852 = vmatprep.subr.bf16.mxu0 %v4746_v21  ;;  %v4691_v21 = vld [vmem:[#allocation2 + $0x1050] sm:$0xff] }
 0x812   :  { %4842 = vmatmul.mubr.bf16.vlgmr.msra.gmra.mrb[36].mxu0 %v12069_v19 }
 0x813   :  { %4853 = vmatpush1.bf16.msra.mxu0 %v4745_v62  ;;  %4884 = vmatprep.mubr.bf16.mxu0 %v12230_v11  ;;  %v4696_v62 = vld [vmem:[#allocation2 + $0x1078] sm:$0xff] }
 0x814   :  { %4854 = vmatprep.subr.bf16.mxu0 %v4750_v24  ;;  %v4695_v24 = vld [vmem:[#allocation2 + $0x1070] sm:$0xff] }
 0x817   :  { %4855 = vmatpush1.bf16.msra.mxu0 %v4749_v15  ;;  %v4700_v15 = vld [vmem:[#allocation2 + $0x1098] sm:$0xff] }
 0x818   :  { %4856 = vmatprep.subr.bf16.mxu0 %v4754_v36  ;;  %v4699_v36 = vld [vmem:[#allocation2 + $0x1090] sm:$0xff] }
 0x81b   :  { %4857 = vmatpush1.bf16.msra.mxu0 %v4753_v41  ;;  %v4704_v41 = vld [vmem:[#allocation2 + $0x10b8] sm:$0xff] }
 0x81c   :  { %4858 = vmatprep.subr.bf16.mxu0 %v4758_v7  ;;  %v4703_v7 = vld [vmem:[#allocation2 + $0x10b0] sm:$0xff] }
 0x81f   :  { %4859 = vmatpush1.bf16.msra.mxu0 %v4757_v50  ;;  %v4708_v50 = vld [vmem:[#allocation2 + $0x10d8] sm:$0xff] }
 0x820   :  { %4860 = vmatprep.subr.bf16.mxu0 %v4762_v52  ;;  %v4712_v52 = vld [vmem:[#allocation2 + $0x10f8] sm:$0xff] }
 0x823   :  { %4861 = vmatpush1.bf16.msra.mxu0 %v4761_v38  ;;  %v4711_v38 = vld [vmem:[#allocation2 + $0x10f0] sm:$0xff] }
 0x824   :  { %4862 = vmatprep.subr.bf16.mxu0 %v4766_v17  ;;  %v4716_v17 = vld [vmem:[#allocation2 + $0x1118] sm:$0xff] }
 0x827   :  { %4863 = vmatpush1.bf16.msra.mxu0 %v4765_v44  ;;  %v4715_v44 = vld [vmem:[#allocation2 + $0x1110] sm:$0xff] }
 0x828   :  { %4864 = vmatprep.subr.bf16.mxu0 %v4770_v48  ;;  %v4720_v48 = vld [vmem:[#allocation2 + $0x1138] sm:$0xff] }
 0x82b   :  { %4865 = vmatpush1.bf16.msra.mxu0 %v4769_v39  ;;  %v4719_v39 = vld [vmem:[#allocation2 + $0x1130] sm:$0xff] }
 0x82c   :  { %4866 = vmatprep.subr.bf16.mxu0 %v4774_v22  ;;  %v4724_v22 = vld [vmem:[#allocation2 + $0x1158] sm:$0xff] }
 0x82f   :  { %4867 = vmatpush1.bf16.msra.mxu0 %v4773_v23  ;;  %v4723_v23 = vld [vmem:[#allocation2 + $0x1150] sm:$0xff] }
 0x830   :  { %4868 = vmatprep.subr.bf16.mxu0 %v4778_v55  ;;  %v4728_v55 = vld [vmem:[#allocation2 + $0x1178] sm:$0xff] }
 0x833   :  { %4869 = vmatpush1.bf16.msra.mxu0 %v4777_v37  ;;  %v4727_v37 = vld [vmem:[#allocation2 + $0x1170] sm:$0xff] }
 0x834   :  { %4870 = vmatprep.subr.bf16.mxu0 %v4782_v9  ;;  %v4732_v9 = vld [vmem:[#allocation2 + $0x1198] sm:$0xff] }
 0x837   :  { %4871 = vmatpush1.bf16.msra.mxu0 %v4781_v10  ;;  %v4731_v10 = vld [vmem:[#allocation2 + $0x1190] sm:$0xff] }
 0x838   :  { %4872 = vmatprep.subr.bf16.mxu0 %v4786_v16  ;;  %v4736_v16 = vld [vmem:[#allocation2 + $0x11b8] sm:$0xff] }
 0x83b   :  { %4873 = vmatpush1.bf16.msra.mxu0 %v4785_v25  ;;  %v4735_v25 = vld [vmem:[#allocation2 + $0x11b0] sm:$0xff] }
 0x83c   :  { %4874 = vmatprep.subr.bf16.mxu0 %v4790_v14  ;;  %v4740_v14 = vld [vmem:[#allocation2 + $0x11d8] sm:$0xff] }
 0x83f   :  { %4875 = vmatpush1.bf16.msra.mxu0 %v4789_v56  ;;  %v4739_v56 = vld [vmem:[#allocation2 + $0x11d0] sm:$0xff] }
 0x840   :  { %4876 = vmatprep.subr.bf16.mxu0 %v4794_v12  ;;  %v4744_v12 = vld [vmem:[#allocation2 + $0x11f8] sm:$0xff] }
 0x843   :  { %4877 = vmatpush1.bf16.msra.mxu0 %v4793_v28  ;;  %v4743_v28 = vld [vmem:[#allocation2 + $0x11f0] sm:$0xff] }
 0x844   :  { %4878 = vmatprep.subr.bf16.mxu0 %v4798_v49  ;;  %v4748_v49 = vld [vmem:[#allocation2 + $0x1218] sm:$0xff] }
 0x847   :  { %4879 = vmatpush1.bf16.msra.mxu0 %v4797_v51  ;;  %v4747_v51 = vld [vmem:[#allocation2 + $0x1210] sm:$0xff] }
 0x848   :  { %4880 = vmatprep.subr.bf16.mxu0 %v4802_v1  ;;  %v4752_v1 = vld [vmem:[#allocation2 + $0x1238] sm:$0xff] }
 0x84b   :  { %4881 = vmatpush1.bf16.msra.mxu0 %v4801_v18  ;;  %v4751_v18 = vld [vmem:[#allocation2 + $0x1230] sm:$0xff] }
 0x84c   :  { %4882 = vmatprep.subr.bf16.mxu0 %v4806_v46  ;;  %v4756_v46 = vld [vmem:[#allocation2 + $0x1258] sm:$0xff] }
 0x84f   :  { %4883 = vmatpush1.bf16.msra.mxu0 %v4805_v43  ;;  %v4755_v43 = vld [vmem:[#allocation2 + $0x1250] sm:$0xff] }
 0x850   :  { %4895 = vmatprep.subr.bf16.mxu0 %v4684_v47  ;;  %v4760_v47 = vld [vmem:[#allocation2 + $0x1278] sm:$0xff] }
 0x852   :  { %4885 = vmatmul.mubr.bf16.vlgmr.msra.gmra.mrb[36].mxu0 %v12227_v61 }
 0x853   :  { %4896 = vmatpush1.bf16.msra.mxu0 %v4683_v26  ;;  %4927 = vmatprep.mubr.bf16.mxu0 %v12072_v31  ;;  %v4707_v31 = vld [vmem:[#allocation2 + $0x10d0] sm:$0xff] }
 0x854   :  { %4897 = vmatprep.subr.bf16.mxu0 %v4688_v57  ;;  %v4759_v26 = vld [vmem:[#allocation2 + $0x1270] sm:$0xff]  ;;  %v4764_v57 = vld [vmem:[#allocation2 + $0x1298] sm:$0xff] }
 0x857   :  { %4898 = vmatpush1.bf16.msra.mxu0 %v4687_v59  ;;  %v4763_v59 = vld [vmem:[#allocation2 + $0x1290] sm:$0xff] }
 0x858   :  { %4899 = vmatprep.subr.bf16.mxu0 %v4692_v4  ;;  %v4768_v4 = vld [vmem:[#allocation2 + $0x12b8] sm:$0xff] }
 0x85b   :  { %4900 = vmatpush1.bf16.msra.mxu0 %v4691_v21  ;;  %v4772_v21 = vld [vmem:[#allocation2 + $0x12d8] sm:$0xff] }
 0x85c   :  { %4901 = vmatprep.subr.bf16.mxu0 %v4696_v62  ;;  %v4776_v62 = vld [vmem:[#allocation2 + $0x12f8] sm:$0xff] }
 0x85f   :  { %4902 = vmatpush1.bf16.msra.mxu0 %v4695_v24  ;;  %v4775_v24 = vld [vmem:[#allocation2 + $0x12f0] sm:$0xff] }
 0x860   :  { %4903 = vmatprep.subr.bf16.mxu0 %v4700_v15  ;;  %v4780_v15 = vld [vmem:[#allocation2 + $0x1318] sm:$0xff] }
 0x863   :  { %4904 = vmatpush1.bf16.msra.mxu0 %v4699_v36  ;;  %v4779_v36 = vld [vmem:[#allocation2 + $0x1310] sm:$0xff] }
 0x864   :  { %4905 = vmatprep.subr.bf16.mxu0 %v4704_v41  ;;  %v4784_v41 = vld [vmem:[#allocation2 + $0x1338] sm:$0xff] }
 0x867   :  { %4906 = vmatpush1.bf16.msra.mxu0 %v4703_v7  ;;  %v4783_v7 = vld [vmem:[#allocation2 + $0x1330] sm:$0xff] }
 0x868   :  { %4907 = vmatprep.subr.bf16.mxu0 %v4708_v50  ;;  %v4788_v50 = vld [vmem:[#allocation2 + $0x1358] sm:$0xff] }
 0x86b   :  { %4908 = vmatpush1.bf16.msra.mxu0 %v4707_v31  ;;  %v4787_v31 = vld [vmem:[#allocation2 + $0x1350] sm:$0xff] }
 0x86c   :  { %4909 = vmatprep.subr.bf16.mxu0 %v4712_v52  ;;  %v4792_v52 = vld [vmem:[#allocation2 + $0x1378] sm:$0xff] }
 0x86f   :  { %4910 = vmatpush1.bf16.msra.mxu0 %v4711_v38  ;;  %v4791_v38 = vld [vmem:[#allocation2 + $0x1370] sm:$0xff] }
 0x870   :  { %4911 = vmatprep.subr.bf16.mxu0 %v4716_v17  ;;  %v4796_v17 = vld [vmem:[#allocation2 + $0x1398] sm:$0xff] }
 0x873   :  { %4912 = vmatpush1.bf16.msra.mxu0 %v4715_v44  ;;  %v4795_v44 = vld [vmem:[#allocation2 + $0x1390] sm:$0xff] }
 0x874   :  { %4913 = vmatprep.subr.bf16.mxu0 %v4720_v48  ;;  %v4800_v48 = vld [vmem:[#allocation2 + $0x13b8] sm:$0xff] }
 0x877   :  { %4914 = vmatpush1.bf16.msra.mxu0 %v4719_v39  ;;  %v4799_v39 = vld [vmem:[#allocation2 + $0x13b0] sm:$0xff] }
 0x878   :  { %4915 = vmatprep.subr.bf16.mxu0 %v4724_v22  ;;  %v4804_v22 = vld [vmem:[#allocation2 + $0x13d8] sm:$0xff] }
 0x87b   :  { %4916 = vmatpush1.bf16.msra.mxu0 %v4723_v23  ;;  %v4803_v23 = vld [vmem:[#allocation2 + $0x13d0] sm:$0xff] }
 0x87c   :  { %4917 = vmatprep.subr.bf16.mxu0 %v4728_v55  ;;  %v4808_v55 = vld [vmem:[#allocation2 + $0x13f8] sm:$0xff] }
 0x87f   :  { %4918 = vmatpush1.bf16.msra.mxu0 %v4727_v37  ;;  %v4807_v37 = vld [vmem:[#allocation2 + $0x13f0] sm:$0xff] }
 0x880   :  { %4919 = vmatprep.subr.bf16.mxu0 %v4732_v9  ;;  %v4994_v9 = vld [vmem:[#allocation2 + $0x1408] sm:$0xff] }
 0x883   :  { %4920 = vmatpush1.bf16.msra.mxu0 %v4731_v10  ;;  %v4993_v10 = vld [vmem:[#allocation2 + $0x1400] sm:$0xff] }
 0x884   :  { %4921 = vmatprep.subr.bf16.mxu0 %v4736_v16  ;;  %v4998_v16 = vld [vmem:[#allocation2 + $0x1428] sm:$0xff] }
 0x887   :  { %4922 = vmatpush1.bf16.msra.mxu0 %v4735_v25  ;;  %v4997_v25 = vld [vmem:[#allocation2 + $0x1420] sm:$0xff] }
 0x888   :  { %4923 = vmatprep.subr.bf16.mxu0 %v4740_v14  ;;  %v5002_v14 = vld [vmem:[#allocation2 + $0x1448] sm:$0xff] }
 0x88b   :  { %4924 = vmatpush1.bf16.msra.mxu0 %v4739_v56  ;;  %v5001_v56 = vld [vmem:[#allocation2 + $0x1440] sm:$0xff] }
 0x88c   :  { %4925 = vmatprep.subr.bf16.mxu0 %v4744_v12  ;;  %v5006_v12 = vld [vmem:[#allocation2 + $0x1468] sm:$0xff] }
 0x88f   :  { %4926 = vmatpush1.bf16.msra.mxu0 %v4743_v28  ;;  %v5005_v28 = vld [vmem:[#allocation2 + $0x1460] sm:$0xff] }
 0x890   :  { %4938 = vmatprep.subr.bf16.mxu0 %v4748_v49  ;;  %v5010_v49 = vld [vmem:[#allocation2 + $0x1488] sm:$0xff] }
 0x892   :  { %4928 = vmatmul.mubr.bf16.vlgmr.msra.gmra.mrb[32].mxu0 %v12069_v19  ;;  %v4767_v19 = vld [vmem:[#allocation2 + $0x12b0] sm:$0xff] }
 0x893   :  { %4939 = vmatpush1.bf16.msra.mxu0 %v4747_v51  ;;  %4970 = vmatprep.mubr.bf16.mxu0 %v12230_v11  ;;  %v4771_v11 = vld [vmem:[#allocation2 + $0x12d0] sm:$0xff]  ;;  %v5009_v51 = vld [vmem:[#allocation2 + $0x1480] sm:$0xff] }
 0x894   :  { %4940 = vmatprep.subr.bf16.mxu0 %v4752_v1  ;;  %v5014_v1 = vld [vmem:[#allocation2 + $0x14a8] sm:$0xff] }
 0x897   :  { %4941 = vmatpush1.bf16.msra.mxu0 %v4751_v18  ;;  %v5018_v18 = vld [vmem:[#allocation2 + $0x14c8] sm:$0xff] }
 0x898   :  { %4942 = vmatprep.subr.bf16.mxu0 %v4756_v46  ;;  %v5017_v46 = vld [vmem:[#allocation2 + $0x14c0] sm:$0xff] }
 0x89b   :  { %4943 = vmatpush1.bf16.msra.mxu0 %v4755_v43  ;;  %v5022_v43 = vld [vmem:[#allocation2 + $0x14e8] sm:$0xff] }
 0x89c   :  { %4944 = vmatprep.subr.bf16.mxu0 %v4760_v47  ;;  %v5021_v47 = vld [vmem:[#allocation2 + $0x14e0] sm:$0xff] }
 0x89f   :  { %4945 = vmatpush1.bf16.msra.mxu0 %v4759_v26  ;;  %v5026_v26 = vld [vmem:[#allocation2 + $0x1508] sm:$0xff] }
 0x8a0   :  { %4946 = vmatprep.subr.bf16.mxu0 %v4764_v57  ;;  %v5025_v57 = vld [vmem:[#allocation2 + $0x1500] sm:$0xff] }
 0x8a3   :  { %4947 = vmatpush1.bf16.msra.mxu0 %v4763_v59  ;;  %v5030_v59 = vld [vmem:[#allocation2 + $0x1528] sm:$0xff] }
 0x8a4   :  { %4948 = vmatprep.subr.bf16.mxu0 %v4768_v4  ;;  %v5029_v4 = vld [vmem:[#allocation2 + $0x1520] sm:$0xff] }
 0x8a7   :  { %4949 = vmatpush1.bf16.msra.mxu0 %v4767_v19  ;;  %v5034_v19 = vld [vmem:[#allocation2 + $0x1548] sm:$0xff] }
 0x8a8   :  { %4950 = vmatprep.subr.bf16.mxu0 %v4772_v21  ;;  %v5033_v21 = vld [vmem:[#allocation2 + $0x1540] sm:$0xff] }
 0x8ab   :  { %4951 = vmatpush1.bf16.msra.mxu0 %v4771_v11  ;;  %v5038_v11 = vld [vmem:[#allocation2 + $0x1568] sm:$0xff] }
 0x8ac   :  { %4952 = vmatprep.subr.bf16.mxu0 %v4776_v62  ;;  %v5037_v62 = vld [vmem:[#allocation2 + $0x1560] sm:$0xff] }
 0x8af   :  { %4953 = vmatpush1.bf16.msra.mxu0 %v4775_v24  ;;  %v5042_v24 = vld [vmem:[#allocation2 + $0x1588] sm:$0xff] }
 0x8b0   :  { %4954 = vmatprep.subr.bf16.mxu0 %v4780_v15  ;;  %v5041_v15 = vld [vmem:[#allocation2 + $0x1580] sm:$0xff] }
 0x8b3   :  { %4955 = vmatpush1.bf16.msra.mxu0 %v4779_v36  ;;  %v5046_v36 = vld [vmem:[#allocation2 + $0x15a8] sm:$0xff] }
 0x8b4   :  { %4956 = vmatprep.subr.bf16.mxu0 %v4784_v41  ;;  %v5045_v41 = vld [vmem:[#allocation2 + $0x15a0] sm:$0xff] }
 0x8b7   :  { %4957 = vmatpush1.bf16.msra.mxu0 %v4783_v7  ;;  %v5050_v7 = vld [vmem:[#allocation2 + $0x15c8] sm:$0xff] }
 0x8b8   :  { %4958 = vmatprep.subr.bf16.mxu0 %v4788_v50  ;;  %v5049_v50 = vld [vmem:[#allocation2 + $0x15c0] sm:$0xff] }
 0x8bb   :  { %4959 = vmatpush1.bf16.msra.mxu0 %v4787_v31  ;;  %v5054_v31 = vld [vmem:[#allocation2 + $0x15e8] sm:$0xff] }
 0x8bc   :  { %4960 = vmatprep.subr.bf16.mxu0 %v4792_v52  ;;  %v5053_v52 = vld [vmem:[#allocation2 + $0x15e0] sm:$0xff] }
 0x8bf   :  { %4961 = vmatpush1.bf16.msra.mxu0 %v4791_v38  ;;  %v5058_v38 = vld [vmem:[#allocation2 + $0x1608] sm:$0xff] }
 0x8c0   :  { %4962 = vmatprep.subr.bf16.mxu0 %v4796_v17  ;;  %v5057_v17 = vld [vmem:[#allocation2 + $0x1600] sm:$0xff] }
 0x8c3   :  { %4963 = vmatpush1.bf16.msra.mxu0 %v4795_v44  ;;  %v5062_v44 = vld [vmem:[#allocation2 + $0x1628] sm:$0xff] }
 0x8c4   :  { %4964 = vmatprep.subr.bf16.mxu0 %v4800_v48  ;;  %v5061_v48 = vld [vmem:[#allocation2 + $0x1620] sm:$0xff] }
 0x8c7   :  { %4965 = vmatpush1.bf16.msra.mxu0 %v4799_v39  ;;  %v5066_v39 = vld [vmem:[#allocation2 + $0x1648] sm:$0xff] }
 0x8c8   :  { %4966 = vmatprep.subr.bf16.mxu0 %v4804_v22  ;;  %v5065_v22 = vld [vmem:[#allocation2 + $0x1640] sm:$0xff] }
 0x8cb   :  { %4967 = vmatpush1.bf16.msra.mxu0 %v4803_v23  ;;  %v5070_v23 = vld [vmem:[#allocation2 + $0x1668] sm:$0xff] }
 0x8cc   :  { %4968 = vmatprep.subr.bf16.mxu0 %v4808_v55  ;;  %v5069_v55 = vld [vmem:[#allocation2 + $0x1660] sm:$0xff] }
 0x8cf   :  { %4969 = vmatpush1.bf16.msra.mxu0 %v4807_v37  ;;  %v5074_v37 = vld [vmem:[#allocation2 + $0x1688] sm:$0xff] }
 0x8d0   :  { %5121 = vmatprep.subr.bf16.mxu0 %v4994_v9  ;;  %v5073_v9 = vld [vmem:[#allocation2 + $0x1680] sm:$0xff] }
 0x8d2   :  { %4971 = vmatmul.mubr.bf16.vlgmr.msra.gmra.mrb[32].mxu0 %v12227_v61  ;;  %v5013_v61 = vld [vmem:[#allocation2 + $0x14a0] sm:$0xff] }
 0x8d3   :  { %5122 = vmatpush1.bf16.msra.mxu0 %v4993_v10  ;;  %5153 = vmatprep.mubr.bf16.mxu0 %v12088_v53  ;;  %v5078_v10 = vld [vmem:[#allocation2 + $0x16a8] sm:$0xff] }
 0x8d4   :  { %5123 = vmatprep.subr.bf16.mxu0 %v4998_v16  ;;  %v5077_v16 = vld [vmem:[#allocation2 + $0x16a0] sm:$0xff] }
 0x8d7   :  { %5124 = vmatpush1.bf16.msra.mxu0 %v4997_v25  ;;  %v5082_v25 = vld [vmem:[#allocation2 + $0x16c8] sm:$0xff] }
 0x8d8   :  { %5125 = vmatprep.subr.bf16.mxu0 %v5002_v14  ;;  %v5081_v14 = vld [vmem:[#allocation2 + $0x16c0] sm:$0xff] }
 0x8db   :  { %5126 = vmatpush1.bf16.msra.mxu0 %v5001_v56  ;;  %v5086_v56 = vld [vmem:[#allocation2 + $0x16e8] sm:$0xff] }
 0x8dc   :  { %5127 = vmatprep.subr.bf16.mxu0 %v5006_v12  ;;  %v5085_v12 = vld [vmem:[#allocation2 + $0x16e0] sm:$0xff] }
 0x8df   :  { %5128 = vmatpush1.bf16.msra.mxu0 %v5005_v28  ;;  %v5090_v28 = vld [vmem:[#allocation2 + $0x1708] sm:$0xff] }
 0x8e0   :  { %5129 = vmatprep.subr.bf16.mxu0 %v5010_v49  ;;  %v5089_v49 = vld [vmem:[#allocation2 + $0x1700] sm:$0xff] }
 0x8e3   :  { %5130 = vmatpush1.bf16.msra.mxu0 %v5009_v51  ;;  %v5094_v51 = vld [vmem:[#allocation2 + $0x1728] sm:$0xff] }
 0x8e4   :  { %5131 = vmatprep.subr.bf16.mxu0 %v5014_v1  ;;  %v5093_v1 = vld [vmem:[#allocation2 + $0x1720] sm:$0xff] }
 0x8e7   :  { %5132 = vmatpush1.bf16.msra.mxu0 %v5013_v61  ;;  %v5098_v61 = vld [vmem:[#allocation2 + $0x1748] sm:$0xff] }
 0x8e8   :  { %5133 = vmatprep.subr.bf16.mxu0 %v5018_v18  ;;  %v5097_v18 = vld [vmem:[#allocation2 + $0x1740] sm:$0xff] }
 0x8eb   :  { %5134 = vmatpush1.bf16.msra.mxu0 %v5017_v46  ;;  %v5102_v46 = vld [vmem:[#allocation2 + $0x1768] sm:$0xff] }
 0x8ec   :  { %5135 = vmatprep.subr.bf16.mxu0 %v5022_v43  ;;  %v5101_v43 = vld [vmem:[#allocation2 + $0x1760] sm:$0xff] }
 0x8ef   :  { %5136 = vmatpush1.bf16.msra.mxu0 %v5021_v47  ;;  %v5106_v47 = vld [vmem:[#allocation2 + $0x1788] sm:$0xff] }
 0x8f0   :  { %5137 = vmatprep.subr.bf16.mxu0 %v5026_v26  ;;  %v5105_v26 = vld [vmem:[#allocation2 + $0x1780] sm:$0xff] }
 0x8f3   :  { %5138 = vmatpush1.bf16.msra.mxu0 %v5025_v57  ;;  %v5110_v57 = vld [vmem:[#allocation2 + $0x17a8] sm:$0xff] }
 0x8f4   :  { %5139 = vmatprep.subr.bf16.mxu0 %v5030_v59  ;;  %v5109_v59 = vld [vmem:[#allocation2 + $0x17a0] sm:$0xff] }
 0x8f7   :  { %5140 = vmatpush1.bf16.msra.mxu0 %v5029_v4  ;;  %v5114_v4 = vld [vmem:[#allocation2 + $0x17c8] sm:$0xff] }
 0x8f8   :  { %5141 = vmatprep.subr.bf16.mxu0 %v5034_v19  ;;  %v5113_v19 = vld [vmem:[#allocation2 + $0x17c0] sm:$0xff] }
 0x8fb   :  { %5142 = vmatpush1.bf16.msra.mxu0 %v5033_v21  ;;  %v5118_v21 = vld [vmem:[#allocation2 + $0x17e8] sm:$0xff] }
 0x8fc   :  { %5143 = vmatprep.subr.bf16.mxu0 %v5038_v11  ;;  %v5117_v11 = vld [vmem:[#allocation2 + $0x17e0] sm:$0xff] }
 0x8ff   :  { %5144 = vmatpush1.bf16.msra.mxu0 %v5037_v62  ;;  %v4996_v62 = vld [vmem:[#allocation2 + $0x1418] sm:$0xff] }
 0x900   :  { %5145 = vmatprep.subr.bf16.mxu0 %v5042_v24  ;;  %v4995_v24 = vld [vmem:[#allocation2 + $0x1410] sm:$0xff] }
 0x903   :  { %5146 = vmatpush1.bf16.msra.mxu0 %v5041_v15  ;;  %v5000_v15 = vld [vmem:[#allocation2 + $0x1438] sm:$0xff] }
 0x904   :  { %5147 = vmatprep.subr.bf16.mxu0 %v5046_v36  ;;  %v4999_v36 = vld [vmem:[#allocation2 + $0x1430] sm:$0xff] }
 0x907   :  { %5148 = vmatpush1.bf16.msra.mxu0 %v5045_v41  ;;  %v5004_v41 = vld [vmem:[#allocation2 + $0x1458] sm:$0xff] }
 0x908   :  { %5149 = vmatprep.subr.bf16.mxu0 %v5050_v7  ;;  %v5003_v7 = vld [vmem:[#allocation2 + $0x1450] sm:$0xff] }
 0x90b   :  { %5150 = vmatpush1.bf16.msra.mxu0 %v5049_v50  ;;  %v5008_v50 = vld [vmem:[#allocation2 + $0x1478] sm:$0xff] }
 0x90c   :  { %5151 = vmatprep.subr.bf16.mxu0 %v5054_v31  ;;  %v5007_v31 = vld [vmem:[#allocation2 + $0x1470] sm:$0xff] }
 0x90f   :  { %5152 = vmatpush1.bf16.msra.mxu0 %v5053_v52  ;;  %v5012_v52 = vld [vmem:[#allocation2 + $0x1498] sm:$0xff] }
 0x910   :  { %5164 = vmatprep.subr.bf16.mxu0 %v5058_v38  ;;  %v5011_v38 = vld [vmem:[#allocation2 + $0x1490] sm:$0xff] }
 0x912   :  { %5154 = vmatmul.mubr.bf16.vlgmr.msra.gmra.mrb[36].mxu0 %v12085_v34 }
 0x913   :  { %5165 = vmatpush1.bf16.msra.mxu0 %v5057_v17  ;;  %5196 = vmatprep.mubr.bf16.mxu0 %v12246_v63  ;;  %v5016_v17 = vld [vmem:[#allocation2 + $0x14b8] sm:$0xff] }
 0x914   :  { %5166 = vmatprep.subr.bf16.mxu0 %v5062_v44  ;;  %v5015_v44 = vld [vmem:[#allocation2 + $0x14b0] sm:$0xff] }
 0x917   :  { %5167 = vmatpush1.bf16.msra.mxu0 %v5061_v48  ;;  %v5020_v48 = vld [vmem:[#allocation2 + $0x14d8] sm:$0xff] }
 0x918   :  { %5168 = vmatprep.subr.bf16.mxu0 %v5066_v39  ;;  %v5024_v39 = vld [vmem:[#allocation2 + $0x14f8] sm:$0xff] }
 0x91b   :  { %5169 = vmatpush1.bf16.msra.mxu0 %v5065_v22  ;;  %v5023_v22 = vld [vmem:[#allocation2 + $0x14f0] sm:$0xff] }
 0x91c   :  { %5170 = vmatprep.subr.bf16.mxu0 %v5070_v23  ;;  %v5028_v23 = vld [vmem:[#allocation2 + $0x1518] sm:$0xff] }
 0x91f   :  { %5171 = vmatpush1.bf16.msra.mxu0 %v5069_v55  ;;  %v5027_v55 = vld [vmem:[#allocation2 + $0x1510] sm:$0xff] }
 0x920   :  { %5172 = vmatprep.subr.bf16.mxu0 %v5074_v37  ;;  %v5032_v37 = vld [vmem:[#allocation2 + $0x1538] sm:$0xff] }
 0x923   :  { %5173 = vmatpush1.bf16.msra.mxu0 %v5073_v9  ;;  %v5031_v9 = vld [vmem:[#allocation2 + $0x1530] sm:$0xff] }
 0x924   :  { %5174 = vmatprep.subr.bf16.mxu0 %v5078_v10  ;;  %v5036_v10 = vld [vmem:[#allocation2 + $0x1558] sm:$0xff] }
 0x927   :  { %5175 = vmatpush1.bf16.msra.mxu0 %v5077_v16  ;;  %v5035_v16 = vld [vmem:[#allocation2 + $0x1550] sm:$0xff] }
 0x928   :  { %5176 = vmatprep.subr.bf16.mxu0 %v5082_v25  ;;  %v5040_v25 = vld [vmem:[#allocation2 + $0x1578] sm:$0xff] }
 0x92b   :  { %5177 = vmatpush1.bf16.msra.mxu0 %v5081_v14  ;;  %v5039_v14 = vld [vmem:[#allocation2 + $0x1570] sm:$0xff] }
 0x92c   :  { %5178 = vmatprep.subr.bf16.mxu0 %v5086_v56  ;;  %v5044_v56 = vld [vmem:[#allocation2 + $0x1598] sm:$0xff] }
 0x92f   :  { %5179 = vmatpush1.bf16.msra.mxu0 %v5085_v12  ;;  %v5043_v12 = vld [vmem:[#allocation2 + $0x1590] sm:$0xff] }
 0x930   :  { %5180 = vmatprep.subr.bf16.mxu0 %v5090_v28  ;;  %v5048_v28 = vld [vmem:[#allocation2 + $0x15b8] sm:$0xff] }
 0x933   :  { %5181 = vmatpush1.bf16.msra.mxu0 %v5089_v49  ;;  %v5047_v49 = vld [vmem:[#allocation2 + $0x15b0] sm:$0xff] }
 0x934   :  { %5182 = vmatprep.subr.bf16.mxu0 %v5094_v51  ;;  %v5052_v51 = vld [vmem:[#allocation2 + $0x15d8] sm:$0xff] }
 0x937   :  { %5183 = vmatpush1.bf16.msra.mxu0 %v5093_v1  ;;  %v5051_v1 = vld [vmem:[#allocation2 + $0x15d0] sm:$0xff] }
 0x938   :  { %5184 = vmatprep.subr.bf16.mxu0 %v5098_v61  ;;  %v5056_v61 = vld [vmem:[#allocation2 + $0x15f8] sm:$0xff] }
 0x93b   :  { %5185 = vmatpush1.bf16.msra.mxu0 %v5097_v18  ;;  %v5055_v18 = vld [vmem:[#allocation2 + $0x15f0] sm:$0xff] }
 0x93c   :  { %5186 = vmatprep.subr.bf16.mxu0 %v5102_v46  ;;  %v5060_v46 = vld [vmem:[#allocation2 + $0x1618] sm:$0xff] }
 0x93f   :  { %5187 = vmatpush1.bf16.msra.mxu0 %v5101_v43  ;;  %v5059_v43 = vld [vmem:[#allocation2 + $0x1610] sm:$0xff] }
 0x940   :  { %5188 = vmatprep.subr.bf16.mxu0 %v5106_v47  ;;  %v5064_v47 = vld [vmem:[#allocation2 + $0x1638] sm:$0xff] }
 0x943   :  { %5189 = vmatpush1.bf16.msra.mxu0 %v5105_v26  ;;  %v5063_v26 = vld [vmem:[#allocation2 + $0x1630] sm:$0xff] }
 0x944   :  { %5190 = vmatprep.subr.bf16.mxu0 %v5110_v57  ;;  %v5068_v57 = vld [vmem:[#allocation2 + $0x1658] sm:$0xff] }
 0x947   :  { %5191 = vmatpush1.bf16.msra.mxu0 %v5109_v59  ;;  %v5067_v59 = vld [vmem:[#allocation2 + $0x1650] sm:$0xff] }
 0x948   :  { %5192 = vmatprep.subr.bf16.mxu0 %v5114_v4  ;;  %v5072_v4 = vld [vmem:[#allocation2 + $0x1678] sm:$0xff] }
 0x94b   :  { %5193 = vmatpush1.bf16.msra.mxu0 %v5113_v19  ;;  %v5071_v19 = vld [vmem:[#allocation2 + $0x1670] sm:$0xff] }
 0x94c   :  { %5194 = vmatprep.subr.bf16.mxu0 %v5118_v21  ;;  %v5076_v21 = vld [vmem:[#allocation2 + $0x1698] sm:$0xff] }
 0x94f   :  { %5195 = vmatpush1.bf16.msra.mxu0 %v5117_v11  ;;  %v5075_v11 = vld [vmem:[#allocation2 + $0x1690] sm:$0xff] }
 0x950   :  { %5207 = vmatprep.subr.bf16.mxu0 %v4996_v62  ;;  %v5080_v62 = vld [vmem:[#allocation2 + $0x16b8] sm:$0xff] }
 0x952   :  { %5197 = vmatmul.mubr.bf16.vlgmr.msra.gmra.mrb[36].mxu0 %v12243_v20 }
 0x953   :  { %5208 = vmatpush1.bf16.msra.mxu0 %v4995_v24  ;;  %5239 = vmatprep.mubr.bf16.mxu0 %v12088_v53  ;;  %v5019_v53 = vld [vmem:[#allocation2 + $0x14d0] sm:$0xff]  ;;  %v5084_v24 = vld [vmem:[#allocation2 + $0x16d8] sm:$0xff] }
 0x954   :  { %5209 = vmatprep.subr.bf16.mxu0 %v5000_v15  ;;  %v5088_v15 = vld [vmem:[#allocation2 + $0x16f8] sm:$0xff] }
 0x957   :  { %5210 = vmatpush1.bf16.msra.mxu0 %v4999_v36  ;;  %v5087_v36 = vld [vmem:[#allocation2 + $0x16f0] sm:$0xff] }
 0x958   :  { %5211 = vmatprep.subr.bf16.mxu0 %v5004_v41  ;;  %v5092_v41 = vld [vmem:[#allocation2 + $0x1718] sm:$0xff] }
 0x95b   :  { %5212 = vmatpush1.bf16.msra.mxu0 %v5003_v7  ;;  %v5091_v7 = vld [vmem:[#allocation2 + $0x1710] sm:$0xff] }
 0x95c   :  { %5213 = vmatprep.subr.bf16.mxu0 %v5008_v50  ;;  %v5096_v50 = vld [vmem:[#allocation2 + $0x1738] sm:$0xff] }
 0x95f   :  { %5214 = vmatpush1.bf16.msra.mxu0 %v5007_v31  ;;  %v5095_v31 = vld [vmem:[#allocation2 + $0x1730] sm:$0xff] }
 0x960   :  { %5215 = vmatprep.subr.bf16.mxu0 %v5012_v52  ;;  %v5100_v52 = vld [vmem:[#allocation2 + $0x1758] sm:$0xff] }
 0x963   :  { %5216 = vmatpush1.bf16.msra.mxu0 %v5011_v38  ;;  %v5099_v38 = vld [vmem:[#allocation2 + $0x1750] sm:$0xff] }
 0x964   :  { %5217 = vmatprep.subr.bf16.mxu0 %v5016_v17  ;;  %v5104_v17 = vld [vmem:[#allocation2 + $0x1778] sm:$0xff] }
 0x967   :  { %5218 = vmatpush1.bf16.msra.mxu0 %v5015_v44  ;;  %v5103_v44 = vld [vmem:[#allocation2 + $0x1770] sm:$0xff] }
 0x968   :  { %5219 = vmatprep.subr.bf16.mxu0 %v5020_v48  ;;  %v5108_v48 = vld [vmem:[#allocation2 + $0x1798] sm:$0xff] }
 0x96b   :  { %5220 = vmatpush1.bf16.msra.mxu0 %v5019_v53  ;;  %v5107_v53 = vld [vmem:[#allocation2 + $0x1790] sm:$0xff] }
 0x96c   :  { %5221 = vmatprep.subr.bf16.mxu0 %v5024_v39  ;;  %v5112_v39 = vld [vmem:[#allocation2 + $0x17b8] sm:$0xff] }
 0x96f   :  { %5222 = vmatpush1.bf16.msra.mxu0 %v5023_v22  ;;  %v5111_v22 = vld [vmem:[#allocation2 + $0x17b0] sm:$0xff] }
 0x970   :  { %5223 = vmatprep.subr.bf16.mxu0 %v5028_v23  ;;  %v5116_v23 = vld [vmem:[#allocation2 + $0x17d8] sm:$0xff] }
 0x973   :  { %5224 = vmatpush1.bf16.msra.mxu0 %v5027_v55  ;;  %v5115_v55 = vld [vmem:[#allocation2 + $0x17d0] sm:$0xff] }
 0x974   :  { %5225 = vmatprep.subr.bf16.mxu0 %v5032_v37  ;;  %v5120_v37 = vld [vmem:[#allocation2 + $0x17f8] sm:$0xff] }
 0x977   :  { %5226 = vmatpush1.bf16.msra.mxu0 %v5031_v9  ;;  %v5119_v9 = vld [vmem:[#allocation2 + $0x17f0] sm:$0xff] }
 0x978   :  { %5227 = vmatprep.subr.bf16.mxu0 %v5036_v10  ;;  %v5306_v10 = vld [vmem:[#allocation2 + $0x1808] sm:$0xff] }
 0x97b   :  { %5228 = vmatpush1.bf16.msra.mxu0 %v5035_v16  ;;  %v5305_v16 = vld [vmem:[#allocation2 + $0x1800] sm:$0xff] }
 0x97c   :  { %5229 = vmatprep.subr.bf16.mxu0 %v5040_v25  ;;  %v5310_v25 = vld [vmem:[#allocation2 + $0x1828] sm:$0xff] }
 0x97f   :  { %5230 = vmatpush1.bf16.msra.mxu0 %v5039_v14  ;;  %v5309_v14 = vld [vmem:[#allocation2 + $0x1820] sm:$0xff] }
 0x980   :  { %5231 = vmatprep.subr.bf16.mxu0 %v5044_v56  ;;  %v5314_v56 = vld [vmem:[#allocation2 + $0x1848] sm:$0xff] }
 0x983   :  { %5232 = vmatpush1.bf16.msra.mxu0 %v5043_v12  ;;  %v5313_v12 = vld [vmem:[#allocation2 + $0x1840] sm:$0xff] }
 0x984   :  { %5233 = vmatprep.subr.bf16.mxu0 %v5048_v28  ;;  %v5318_v28 = vld [vmem:[#allocation2 + $0x1868] sm:$0xff] }
 0x987   :  { %5234 = vmatpush1.bf16.msra.mxu0 %v5047_v49  ;;  %v5317_v49 = vld [vmem:[#allocation2 + $0x1860] sm:$0xff] }
 0x988   :  { %5235 = vmatprep.subr.bf16.mxu0 %v5052_v51  ;;  %v5322_v51 = vld [vmem:[#allocation2 + $0x1888] sm:$0xff] }
 0x98b   :  { %5236 = vmatpush1.bf16.msra.mxu0 %v5051_v1  ;;  %v5321_v1 = vld [vmem:[#allocation2 + $0x1880] sm:$0xff] }
 0x98c   :  { %5237 = vmatprep.subr.bf16.mxu0 %v5056_v61  ;;  %v5326_v61 = vld [vmem:[#allocation2 + $0x18a8] sm:$0xff] }
 0x98f   :  { %5238 = vmatpush1.bf16.msra.mxu0 %v5055_v18  ;;  %v5330_v18 = vld [vmem:[#allocation2 + $0x18c8] sm:$0xff] }
 0x990   :  { %5250 = vmatprep.subr.bf16.mxu0 %v5060_v46  ;;  %v5329_v46 = vld [vmem:[#allocation2 + $0x18c0] sm:$0xff] }
 0x992   :  { %5240 = vmatmul.mubr.bf16.vlgmr.msra.gmra.mrb[32].mxu0 %v12085_v34  ;;  %v5079_v34 = vld [vmem:[#allocation2 + $0x16b0] sm:$0xff] }
 0x993   :  { %5251 = vmatpush1.bf16.msra.mxu0 %v5059_v43  ;;  %5282 = vmatprep.mubr.bf16.mxu0 %v12246_v63  ;;  %v5083_v63 = vld [vmem:[#allocation2 + $0x16d0] sm:$0xff]  ;;  %v5334_v43 = vld [vmem:[#allocation2 + $0x18e8] sm:$0xff] }
 0x994   :  { %5252 = vmatprep.subr.bf16.mxu0 %v5064_v47  ;;  %v5333_v47 = vld [vmem:[#allocation2 + $0x18e0] sm:$0xff] }
 0x997   :  { %5253 = vmatpush1.bf16.msra.mxu0 %v5063_v26  ;;  %v5338_v26 = vld [vmem:[#allocation2 + $0x1908] sm:$0xff] }
 0x998   :  { %5254 = vmatprep.subr.bf16.mxu0 %v5068_v57  ;;  %v5337_v57 = vld [vmem:[#allocation2 + $0x1900] sm:$0xff] }
 0x99b   :  { %5255 = vmatpush1.bf16.msra.mxu0 %v5067_v59  ;;  %v5342_v59 = vld [vmem:[#allocation2 + $0x1928] sm:$0xff] }
 0x99c   :  { %5256 = vmatprep.subr.bf16.mxu0 %v5072_v4  ;;  %v5341_v4 = vld [vmem:[#allocation2 + $0x1920] sm:$0xff] }
 0x99f   :  { %5257 = vmatpush1.bf16.msra.mxu0 %v5071_v19  ;;  %v5346_v19 = vld [vmem:[#allocation2 + $0x1948] sm:$0xff] }
 0x9a0   :  { %5258 = vmatprep.subr.bf16.mxu0 %v5076_v21  ;;  %v5345_v21 = vld [vmem:[#allocation2 + $0x1940] sm:$0xff] }
 0x9a3   :  { %5259 = vmatpush1.bf16.msra.mxu0 %v5075_v11  ;;  %v5350_v11 = vld [vmem:[#allocation2 + $0x1968] sm:$0xff] }
 0x9a4   :  { %5260 = vmatprep.subr.bf16.mxu0 %v5080_v62  ;;  %v3434_v62 = vld [vmem:[#allocation2 + $0x8] sm:$0xff] }
 0x9a5   :  { %3561 = vmatprep.subr.bf16.mxu1 %v3434_v62  ;;  %v3477_v62 = vld [vmem:[#allocation2 + $0x160] sm:$0xff] }
 0x9a7   :  { %5261 = vmatpush1.bf16.msra.mxu0 %v5079_v34  ;;  %v3433_v34 = vld [vmem:[#allocation2] sm:$0xff] }
 0x9a8   :  { %5262 = vmatprep.subr.bf16.mxu0 %v5084_v24  ;;  %v5349_v24 = vld [vmem:[#allocation2 + $0x1960] sm:$0xff]  ;;  %3562 = vmatpush1.bf16.msra.mxu1 %v3433_v34 }
 0x9a9   :  { %v5393_v34 = vld [vmem:[#allocation2 + $0x1ac0] sm:$0xff] }
 0x9ab   :  { %5263 = vmatpush1.bf16.msra.mxu0 %v5083_v63  ;;  %v5354_v63 = vld [vmem:[#allocation2 + $0x1988] sm:$0xff] }
 0x9ac   :  { %5264 = vmatprep.subr.bf16.mxu0 %v5088_v15  ;;  %v3438_v15 = vld [vmem:[#allocation2 + $0x28] sm:$0xff] }
 0x9ad   :  { %3563 = vmatprep.subr.bf16.mxu1 %v3438_v15  ;;  %v3481_v15 = vld [vmem:[#allocation2 + $0x180] sm:$0xff] }
 0x9af   :  { %5265 = vmatpush1.bf16.msra.mxu0 %v5087_v36  ;;  %v3437_v36 = vld [vmem:[#allocation2 + $0x20] sm:$0xff] }
 0x9b0   :  { %5266 = vmatprep.subr.bf16.mxu0 %v5092_v41  ;;  %v5353_v41 = vld [vmem:[#allocation2 + $0x1980] sm:$0xff]  ;;  %3564 = vmatpush1.bf16.msra.mxu1 %v3437_v36 }
 0x9b1   :  { %v5397_v36 = vld [vmem:[#allocation2 + $0x1ae0] sm:$0xff] }
 0x9b3   :  { %5267 = vmatpush1.bf16.msra.mxu0 %v5091_v7  ;;  %v5358_v7 = vld [vmem:[#allocation2 + $0x19a8] sm:$0xff] }
 0x9b4   :  { %5268 = vmatprep.subr.bf16.mxu0 %v5096_v50  ;;  %v3442_v50 = vld [vmem:[#allocation2 + $0x48] sm:$0xff] }
 0x9b5   :  { %3565 = vmatprep.subr.bf16.mxu1 %v3442_v50  ;;  %v3485_v50 = vld [vmem:[#allocation2 + $0x1a0] sm:$0xff] }
 0x9b7   :  { %5269 = vmatpush1.bf16.msra.mxu0 %v5095_v31  ;;  %v3441_v31 = vld [vmem:[#allocation2 + $0x40] sm:$0xff] }
 0x9b8   :  { %5270 = vmatprep.subr.bf16.mxu0 %v5100_v52  ;;  %v5357_v52 = vld [vmem:[#allocation2 + $0x19a0] sm:$0xff]  ;;  %3566 = vmatpush1.bf16.msra.mxu1 %v3441_v31 }
 0x9b9   :  { %v5401_v31 = vld [vmem:[#allocation2 + $0x1b00] sm:$0xff] }
 0x9bb   :  { %5271 = vmatpush1.bf16.msra.mxu0 %v5099_v38  ;;  %v5362_v38 = vld [vmem:[#allocation2 + $0x19c8] sm:$0xff] }
 0x9bc   :  { %5272 = vmatprep.subr.bf16.mxu0 %v5104_v17  ;;  %v3446_v17 = vld [vmem:[#allocation2 + $0x68] sm:$0xff] }
 0x9bd   :  { %3567 = vmatprep.subr.bf16.mxu1 %v3446_v17  ;;  %v3489_v17 = vld [vmem:[#allocation2 + $0x1c0] sm:$0xff] }
 0x9bf   :  { %5273 = vmatpush1.bf16.msra.mxu0 %v5103_v44  ;;  %v3445_v44 = vld [vmem:[#allocation2 + $0x60] sm:$0xff] }
 0x9c0   :  { %5274 = vmatprep.subr.bf16.mxu0 %v5108_v48  ;;  %v5361_v48 = vld [vmem:[#allocation2 + $0x19c0] sm:$0xff]  ;;  %3568 = vmatpush1.bf16.msra.mxu1 %v3445_v44 }
 0x9c1   :  { %v5405_v44 = vld [vmem:[#allocation2 + $0x1b20] sm:$0xff] }
 0x9c3   :  { %5275 = vmatpush1.bf16.msra.mxu0 %v5107_v53  ;;  %v5366_v53 = vld [vmem:[#allocation2 + $0x19e8] sm:$0xff] }
 0x9c4   :  { %5276 = vmatprep.subr.bf16.mxu0 %v5112_v39  ;;  %v3450_v39 = vld [vmem:[#allocation2 + $0x88] sm:$0xff] }
 0x9c5   :  { %3569 = vmatprep.subr.bf16.mxu1 %v3450_v39  ;;  %v3493_v39 = vld [vmem:[#allocation2 + $0x1e0] sm:$0xff] }
 0x9c7   :  { %5277 = vmatpush1.bf16.msra.mxu0 %v5111_v22  ;;  %v3449_v22 = vld [vmem:[#allocation2 + $0x80] sm:$0xff] }
 0x9c8   :  { %5278 = vmatprep.subr.bf16.mxu0 %v5116_v23  ;;  %v5365_v23 = vld [vmem:[#allocation2 + $0x19e0] sm:$0xff]  ;;  %3570 = vmatpush1.bf16.msra.mxu1 %v3449_v22 }
 0x9c9   :  { %v5409_v22 = vld [vmem:[#allocation2 + $0x1b40] sm:$0xff] }
 0x9cb   :  { %5279 = vmatpush1.bf16.msra.mxu0 %v5115_v55  ;;  %v5370_v55 = vld [vmem:[#allocation2 + $0x1a08] sm:$0xff] }
 0x9cc   :  { %5280 = vmatprep.subr.bf16.mxu0 %v5120_v37  ;;  %v3454_v37 = vld [vmem:[#allocation2 + $0xa8] sm:$0xff] }
 0x9cd   :  { %3571 = vmatprep.subr.bf16.mxu1 %v3454_v37  ;;  %v3497_v37 = vld [vmem:[#allocation2 + $0x200] sm:$0xff] }
 0x9cf   :  { %5281 = vmatpush1.bf16.msra.mxu0 %v5119_v9  ;;  %v3453_v9 = vld [vmem:[#allocation2 + $0xa0] sm:$0xff] }
 0x9d0   :  { %5433 = vmatprep.subr.bf16.mxu0 %v5306_v10  ;;  %v5369_v10 = vld [vmem:[#allocation2 + $0x1a00] sm:$0xff]  ;;  %3572 = vmatpush1.bf16.msra.mxu1 %v3453_v9 }
 0x9d1   :  { %v5413_v9 = vld [vmem:[#allocation2 + $0x1b60] sm:$0xff] }
 0x9d2   :  { %5283 = vmatmul.mubr.bf16.vlgmr.msra.gmra.mrb[32].mxu0 %v12243_v20  ;;  %v5325_v20 = vld [vmem:[#allocation2 + $0x18a0] sm:$0xff] }
 0x9d3   :  { %5434 = vmatpush1.bf16.msra.mxu0 %v5305_v16  ;;  %5465 = vmatprep.mubr.bf16.mxu0 %v12104_v33  ;;  %v5374_v16 = vld [vmem:[#allocation2 + $0x1a28] sm:$0xff] }
 0x9d4   :  { %5435 = vmatprep.subr.bf16.mxu0 %v5310_v25  ;;  %v3458_v25 = vld [vmem:[#allocation2 + $0xc8] sm:$0xff] }
 0x9d5   :  { %3573 = vmatprep.subr.bf16.mxu1 %v3458_v25  ;;  %v3501_v25 = vld [vmem:[#allocation2 + $0x220] sm:$0xff] }
 0x9d7   :  { %5436 = vmatpush1.bf16.msra.mxu0 %v5309_v14  ;;  %v3457_v14 = vld [vmem:[#allocation2 + $0xc0] sm:$0xff] }
 0x9d8   :  { %5437 = vmatprep.subr.bf16.mxu0 %v5314_v56  ;;  %v5373_v56 = vld [vmem:[#allocation2 + $0x1a20] sm:$0xff]  ;;  %3574 = vmatpush1.bf16.msra.mxu1 %v3457_v14 }
 0x9d9   :  { %v5417_v14 = vld [vmem:[#allocation2 + $0x1b80] sm:$0xff] }
 0x9db   :  { %5438 = vmatpush1.bf16.msra.mxu0 %v5313_v12  ;;  %v5378_v12 = vld [vmem:[#allocation2 + $0x1a48] sm:$0xff] }
 0x9dc   :  { %5439 = vmatprep.subr.bf16.mxu0 %v5318_v28  ;;  %v3462_v28 = vld [vmem:[#allocation2 + $0xe8] sm:$0xff] }
 0x9dd   :  { %3575 = vmatprep.subr.bf16.mxu1 %v3462_v28  ;;  %v3505_v28 = vld [vmem:[#allocation2 + $0x240] sm:$0xff] }
 0x9df   :  { %5440 = vmatpush1.bf16.msra.mxu0 %v5317_v49  ;;  %v3461_v49 = vld [vmem:[#allocation2 + $0xe0] sm:$0xff] }
 0x9e0   :  { %5441 = vmatprep.subr.bf16.mxu0 %v5322_v51  ;;  %v5377_v51 = vld [vmem:[#allocation2 + $0x1a40] sm:$0xff]  ;;  %3576 = vmatpush1.bf16.msra.mxu1 %v3461_v49 }
 0x9e1   :  { %v5421_v49 = vld [vmem:[#allocation2 + $0x1ba0] sm:$0xff] }
 0x9e3   :  { %5442 = vmatpush1.bf16.msra.mxu0 %v5321_v1  ;;  %v5382_v1 = vld [vmem:[#allocation2 + $0x1a68] sm:$0xff] }
 0x9e4   :  { %5443 = vmatprep.subr.bf16.mxu0 %v5326_v61  ;;  %v3466_v61 = vld [vmem:[#allocation2 + $0x108] sm:$0xff] }
 0x9e5   :  { %3577 = vmatprep.subr.bf16.mxu1 %v3466_v61  ;;  %v3509_v61 = vld [vmem:[#allocation2 + $0x260] sm:$0xff] }
 0x9e7   :  { %5444 = vmatpush1.bf16.msra.mxu0 %v5325_v20  ;;  %v3465_v20 = vld [vmem:[#allocation2 + $0x100] sm:$0xff] }
 0x9e8   :  { %5445 = vmatprep.subr.bf16.mxu0 %v5330_v18  ;;  %v5381_v18 = vld [vmem:[#allocation2 + $0x1a60] sm:$0xff]  ;;  %3578 = vmatpush1.bf16.msra.mxu1 %v3465_v20  ;;  %v5430_v20 = vld [vmem:[#allocation2 + $0x1be8] sm:$0xff] }
 0x9eb   :  { %5446 = vmatpush1.bf16.msra.mxu0 %v5329_v46  ;;  %v5386_v46 = vld [vmem:[#allocation2 + $0x1a88] sm:$0xff] }
 0x9ec   :  { %5447 = vmatprep.subr.bf16.mxu0 %v5334_v43  ;;  %v3470_v43 = vld [vmem:[#allocation2 + $0x128] sm:$0xff] }
 0x9ed   :  { %3579 = vmatprep.subr.bf16.mxu1 %v3470_v43  ;;  %v5429_v43 = vld [vmem:[#allocation2 + $0x1be0] sm:$0xff] }
 0x9ef   :  { %5448 = vmatpush1.bf16.msra.mxu0 %v5333_v47  ;;  %v3469_v47 = vld [vmem:[#allocation2 + $0x120] sm:$0xff] }
 0x9f0   :  { %5449 = vmatprep.subr.bf16.mxu0 %v5338_v26  ;;  %v5385_v26 = vld [vmem:[#allocation2 + $0x1a80] sm:$0xff]  ;;  %3580 = vmatpush1.bf16.msra.mxu1 %v3469_v47  ;;  %v5308_v47 = vld [vmem:[#allocation2 + $0x1818] sm:$0xff] }
 0x9f3   :  { %5450 = vmatpush1.bf16.msra.mxu0 %v5337_v57  ;;  %v5390_v57 = vld [vmem:[#allocation2 + $0x1aa8] sm:$0xff] }
 0x9f4   :  { %5451 = vmatprep.subr.bf16.mxu0 %v5342_v59  ;;  %v3474_v59 = vld [vmem:[#allocation2 + $0x148] sm:$0xff] }
 0x9f5   :  { %3581 = vmatprep.subr.bf16.mxu1 %v3474_v59  ;;  %v5307_v59 = vld [vmem:[#allocation2 + $0x1810] sm:$0xff] }
 0x9f7   :  { %5452 = vmatpush1.bf16.msra.mxu0 %v5341_v4  ;;  %v3473_v4 = vld [vmem:[#allocation2 + $0x140] sm:$0xff] }
 0x9f8   :  { %5453 = vmatprep.subr.bf16.mxu0 %v5346_v19  ;;  %v5389_v19 = vld [vmem:[#allocation2 + $0x1aa0] sm:$0xff]  ;;  %3582 = vmatpush1.bf16.msra.mxu1 %v3473_v4  ;;  %v5312_v4 = vld [vmem:[#allocation2 + $0x1838] sm:$0xff] }
 0x9fb   :  { %5454 = vmatpush1.bf16.msra.mxu0 %v5345_v21  ;;  %v5394_v21 = vld [vmem:[#allocation2 + $0x1ac8] sm:$0xff] }
 0x9fc   :  { %5455 = vmatprep.subr.bf16.mxu0 %v5350_v11  ;;  %v3478_v11 = vld [vmem:[#allocation2 + $0x168] sm:$0xff] }
 0x9fd   :  { %3583 = vmatprep.subr.bf16.mxu1 %v3478_v11  ;;  %v5311_v11 = vld [vmem:[#allocation2 + $0x1830] sm:$0xff] }
 0x9fe   :  { %3584 = vmatpush1.bf16.msra.mxu1 %v3477_v62  ;;  %v5316_v62 = vld [vmem:[#allocation2 + $0x1858] sm:$0xff] }
 0x9ff   :  { %5456 = vmatpush1.bf16.msra.mxu0 %v5349_v24  ;;  %v5398_v24 = vld [vmem:[#allocation2 + $0x1ae8] sm:$0xff] }
 0xa00   :  { %5457 = vmatprep.subr.bf16.mxu0 %v5354_v63  ;;  %v3482_v63 = vld [vmem:[#allocation2 + $0x188] sm:$0xff] }
 0xa01   :  { %3585 = vmatprep.subr.bf16.mxu1 %v3482_v63  ;;  %v5315_v63 = vld [vmem:[#allocation2 + $0x1850] sm:$0xff] }
 0xa02   :  { %3586 = vmatpush1.bf16.msra.mxu1 %v3481_v15  ;;  %v5320_v15 = vld [vmem:[#allocation2 + $0x1878] sm:$0xff] }
 0xa03   :  { %5458 = vmatpush1.bf16.msra.mxu0 %v5353_v41  ;;  %v5402_v41 = vld [vmem:[#allocation2 + $0x1b08] sm:$0xff] }
 0xa04   :  { %5459 = vmatprep.subr.bf16.mxu0 %v5358_v7  ;;  %v3486_v7 = vld [vmem:[#allocation2 + $0x1a8] sm:$0xff] }
 0xa05   :  { %3587 = vmatprep.subr.bf16.mxu1 %v3486_v7  ;;  %v5324_v7 = vld [vmem:[#allocation2 + $0x1898] sm:$0xff] }
 0xa06   :  { %3588 = vmatpush1.bf16.msra.mxu1 %v3485_v50  ;;  %v3534_v50 = vld [vmem:[#allocation2 + $0x328] sm:$0xff] }
 0xa07   :  { %5460 = vmatpush1.bf16.msra.mxu0 %v5357_v52  ;;  %v5406_v52 = vld [vmem:[#allocation2 + $0x1b28] sm:$0xff] }
 0xa08   :  { %5461 = vmatprep.subr.bf16.mxu0 %v5362_v38  ;;  %v3490_v38 = vld [vmem:[#allocation2 + $0x1c8] sm:$0xff] }
 0xa09   :  { %3589 = vmatprep.subr.bf16.mxu1 %v3490_v38  ;;  %v5328_v38 = vld [vmem:[#allocation2 + $0x18b8] sm:$0xff] }
 0xa0a   :  { %3590 = vmatpush1.bf16.msra.mxu1 %v3489_v17  ;;  %v3538_v17 = vld [vmem:[#allocation2 + $0x348] sm:$0xff] }
 0xa0b   :  { %5462 = vmatpush1.bf16.msra.mxu0 %v5361_v48  ;;  %v5410_v48 = vld [vmem:[#allocation2 + $0x1b48] sm:$0xff] }
 0xa0c   :  { %5463 = vmatprep.subr.bf16.mxu0 %v5366_v53  ;;  %v3494_v53 = vld [vmem:[#allocation2 + $0x1e8] sm:$0xff] }
 0xa0d   :  { %3591 = vmatprep.subr.bf16.mxu1 %v3494_v53  ;;  %v5332_v53 = vld [vmem:[#allocation2 + $0x18d8] sm:$0xff] }
 0xa0e   :  { %3592 = vmatpush1.bf16.msra.mxu1 %v3493_v39  ;;  %v3542_v39 = vld [vmem:[#allocation2 + $0x368] sm:$0xff] }
 0xa0f   :  { %5464 = vmatpush1.bf16.msra.mxu0 %v5365_v23  ;;  %v5414_v23 = vld [vmem:[#allocation2 + $0x1b68] sm:$0xff] }
 0xa10   :  { %5476 = vmatprep.subr.bf16.mxu0 %v5370_v55  ;;  %v3498_v55 = vld [vmem:[#allocation2 + $0x208] sm:$0xff] }
 0xa11   :  { %3604 = vmatprep.subr.bf16.mxu1 %v3498_v55  ;;  %3594 = vmatmul.mubr.bf16.vlgmr.msra.gmra.mrb[160].mxu1 %v12005_v35  ;;  %v5336_v55 = vld [vmem:[#allocation2 + $0x18f8] sm:$0xff] }
 0xa12   :  { %5466 = vmatmul.mubr.bf16.vlgmr.msra.gmra.mrb[36].mxu0 %v12101_v29  ;;  %3605 = vmatpush1.bf16.msra.mxu1 %v3497_v37  ;;  %v3546_v37 = vld [vmem:[#allocation2 + $0x388] sm:$0xff] }
 0xa13   :  { %5477 = vmatpush1.bf16.msra.mxu0 %v5369_v10  ;;  %5508 = vmatprep.mubr.bf16.mxu0 %v12262_v27  ;;  %v5418_v10 = vld [vmem:[#allocation2 + $0x1b88] sm:$0xff] }
 0xa14   :  { %5478 = vmatprep.subr.bf16.mxu0 %v5374_v16  ;;  %3636 = vmatprep.mubr.bf16.mxu1 %v12166_v5  ;;  %v3502_v16 = vld [vmem:[#allocation2 + $0x228] sm:$0xff]  ;;  %v5425_v5 = vld [vmem:[#allocation2 + $0x1bc0] sm:$0xff] }
 0xa15   :  { %3606 = vmatprep.subr.bf16.mxu1 %v3502_v16  ;;  %v5340_v16 = vld [vmem:[#allocation2 + $0x1918] sm:$0xff] }
 0xa16   :  { %3607 = vmatpush1.bf16.msra.mxu1 %v3501_v25  ;;  %v3550_v25 = vld [vmem:[#allocation2 + $0x3a8] sm:$0xff] }
 0xa17   :  { %5479 = vmatpush1.bf16.msra.mxu0 %v5373_v56  ;;  %v5422_v56 = vld [vmem:[#allocation2 + $0x1ba8] sm:$0xff] }
 0xa18   :  { %5480 = vmatprep.subr.bf16.mxu0 %v5378_v12  ;;  %v3506_v12 = vld [vmem:[#allocation2 + $0x248] sm:$0xff] }
 0xa19   :  { %3608 = vmatprep.subr.bf16.mxu1 %v3506_v12  ;;  %v5344_v12 = vld [vmem:[#allocation2 + $0x1938] sm:$0xff] }
 0xa1a   :  { %3609 = vmatpush1.bf16.msra.mxu1 %v3505_v28  ;;  %v3554_v28 = vld [vmem:[#allocation2 + $0x3c8] sm:$0xff] }
 0xa1b   :  { %5481 = vmatpush1.bf16.msra.mxu0 %v5377_v51  ;;  %v5426_v51 = vld [vmem:[#allocation2 + $0x1bc8] sm:$0xff] }
 0xa1c   :  { %5482 = vmatprep.subr.bf16.mxu0 %v5382_v1  ;;  %v3510_v1 = vld [vmem:[#allocation2 + $0x268] sm:$0xff] }
 0xa1d   :  { %3610 = vmatprep.subr.bf16.mxu1 %v3510_v1  ;;  %v5348_v1 = vld [vmem:[#allocation2 + $0x1958] sm:$0xff] }
 0xa1e   :  { %3611 = vmatpush1.bf16.msra.mxu1 %v3509_v61  ;;  %v3558_v61 = vld [vmem:[#allocation2 + $0x3e8] sm:$0xff] }
 0xa1f   :  { %5483 = vmatpush1.bf16.msra.mxu0 %v5381_v18  ;;  %v3514_v18 = vld [vmem:[#allocation2 + $0x288] sm:$0xff] }
 0xa20   :  { %5484 = vmatprep.subr.bf16.mxu0 %v5386_v46  ;;  %v3513_v46 = vld [vmem:[#allocation2 + $0x280] sm:$0xff]  ;;  %3612 = vmatprep.subr.bf16.mxu1 %v3514_v18  ;;  %v5352_v18 = vld [vmem:[#allocation2 + $0x1978] sm:$0xff] }
 0xa22   :  { %3613 = vmatpush1.bf16.msra.mxu1 %v3513_v46  ;;  %v3436_v46 = vld [vmem:[#allocation2 + $0x18] sm:$0xff] }
 0xa23   :  { %5485 = vmatpush1.bf16.msra.mxu0 %v5385_v26  ;;  %v3518_v26 = vld [vmem:[#allocation2 + $0x2a8] sm:$0xff] }
 0xa24   :  { %5486 = vmatprep.subr.bf16.mxu0 %v5390_v57  ;;  %v3517_v57 = vld [vmem:[#allocation2 + $0x2a0] sm:$0xff]  ;;  %3614 = vmatprep.subr.bf16.mxu1 %v3518_v26  ;;  %v5356_v26 = vld [vmem:[#allocation2 + $0x1998] sm:$0xff] }
 0xa26   :  { %3615 = vmatpush1.bf16.msra.mxu1 %v3517_v57  ;;  %v3440_v57 = vld [vmem:[#allocation2 + $0x38] sm:$0xff] }
 0xa27   :  { %5487 = vmatpush1.bf16.msra.mxu0 %v5389_v19  ;;  %v3522_v19 = vld [vmem:[#allocation2 + $0x2c8] sm:$0xff] }
 0xa28   :  { %5488 = vmatprep.subr.bf16.mxu0 %v5394_v21  ;;  %v3521_v21 = vld [vmem:[#allocation2 + $0x2c0] sm:$0xff]  ;;  %3616 = vmatprep.subr.bf16.mxu1 %v3522_v19  ;;  %v5360_v19 = vld [vmem:[#allocation2 + $0x19b8] sm:$0xff] }
 0xa2a   :  { %3617 = vmatpush1.bf16.msra.mxu1 %v3521_v21  ;;  %v3444_v21 = vld [vmem:[#allocation2 + $0x58] sm:$0xff] }
 0xa2b   :  { %5489 = vmatpush1.bf16.msra.mxu0 %v5393_v34  ;;  %v3526_v34 = vld [vmem:[#allocation2 + $0x2e8] sm:$0xff] }
 0xa2c   :  { %5490 = vmatprep.subr.bf16.mxu0 %v5398_v24  ;;  %v3525_v24 = vld [vmem:[#allocation2 + $0x2e0] sm:$0xff]  ;;  %3618 = vmatprep.subr.bf16.mxu1 %v3526_v34  ;;  %v5364_v34 = vld [vmem:[#allocation2 + $0x19d8] sm:$0xff] }
 0xa2e   :  { %3619 = vmatpush1.bf16.msra.mxu1 %v3525_v24  ;;  %v3447_v24 = vld [vmem:[#allocation2 + $0x70] sm:$0xff] }
 0xa2f   :  { %5491 = vmatpush1.bf16.msra.mxu0 %v5397_v36  ;;  %v3530_v36 = vld [vmem:[#allocation2 + $0x308] sm:$0xff] }
 0xa30   :  { %5492 = vmatprep.subr.bf16.mxu0 %v5402_v41  ;;  %v3529_v41 = vld [vmem:[#allocation2 + $0x300] sm:$0xff]  ;;  %3620 = vmatprep.subr.bf16.mxu1 %v3530_v36  ;;  %v3451_v36 = vld [vmem:[#allocation2 + $0x90] sm:$0xff] }
 0xa32   :  { %3621 = vmatpush1.bf16.msra.mxu1 %v3529_v41  ;;  %v5367_v41 = vld [vmem:[#allocation2 + $0x19f0] sm:$0xff] }
 0xa33   :  { %5493 = vmatpush1.bf16.msra.mxu0 %v5401_v31  ;;  %v3533_v31 = vld [vmem:[#allocation2 + $0x320] sm:$0xff]  ;;  %3622 = vmatprep.subr.bf16.mxu1 %v3534_v50  ;;  %v3455_v50 = vld [vmem:[#allocation2 + $0xb0] sm:$0xff] }
 0xa34   :  { %5494 = vmatprep.subr.bf16.mxu0 %v5406_v52  ;;  %v5323_v52 = vld [vmem:[#allocation2 + $0x1890] sm:$0xff] }
 0xa36   :  { %3623 = vmatpush1.bf16.msra.mxu1 %v3533_v31  ;;  %v5371_v31 = vld [vmem:[#allocation2 + $0x1a10] sm:$0xff] }
 0xa37   :  { %5495 = vmatpush1.bf16.msra.mxu0 %v5405_v44  ;;  %v3537_v44 = vld [vmem:[#allocation2 + $0x340] sm:$0xff]  ;;  %3624 = vmatprep.subr.bf16.mxu1 %v3538_v17  ;;  %v3459_v17 = vld [vmem:[#allocation2 + $0xd0] sm:$0xff] }
 0xa38   :  { %5496 = vmatprep.subr.bf16.mxu0 %v5410_v48  ;;  %v5327_v48 = vld [vmem:[#allocation2 + $0x18b0] sm:$0xff] }
 0xa3a   :  { %3625 = vmatpush1.bf16.msra.mxu1 %v3537_v44  ;;  %v5375_v44 = vld [vmem:[#allocation2 + $0x1a30] sm:$0xff] }
 0xa3b   :  { %5497 = vmatpush1.bf16.msra.mxu0 %v5409_v22  ;;  %v3541_v22 = vld [vmem:[#allocation2 + $0x360] sm:$0xff]  ;;  %3626 = vmatprep.subr.bf16.mxu1 %v3542_v39  ;;  %v3463_v39 = vld [vmem:[#allocation2 + $0xf0] sm:$0xff] }
 0xa3c   :  { %5498 = vmatprep.subr.bf16.mxu0 %v5414_v23  ;;  %v5331_v23 = vld [vmem:[#allocation2 + $0x18d0] sm:$0xff] }
 0xa3e   :  { %3627 = vmatpush1.bf16.msra.mxu1 %v3541_v22  ;;  %v5379_v22 = vld [vmem:[#allocation2 + $0x1a50] sm:$0xff] }
 0xa3f   :  { %5499 = vmatpush1.bf16.msra.mxu0 %v5413_v9  ;;  %v3545_v9 = vld [vmem:[#allocation2 + $0x380] sm:$0xff]  ;;  %3628 = vmatprep.subr.bf16.mxu1 %v3546_v37  ;;  %v5388_v37 = vld [vmem:[#allocation2 + $0x1a98] sm:$0xff] }
 0xa40   :  { %5500 = vmatprep.subr.bf16.mxu0 %v5418_v10  ;;  %v5335_v10 = vld [vmem:[#allocation2 + $0x18f0] sm:$0xff] }
 0xa42   :  { %3629 = vmatpush1.bf16.msra.mxu1 %v3545_v9  ;;  %v3472_v9 = vld [vmem:[#allocation2 + $0x138] sm:$0xff] }
 0xa43   :  { %5501 = vmatpush1.bf16.msra.mxu0 %v5417_v14  ;;  %v3549_v14 = vld [vmem:[#allocation2 + $0x3a0] sm:$0xff]  ;;  %3630 = vmatprep.subr.bf16.mxu1 %v3550_v25  ;;  %v5392_v25 = vld [vmem:[#allocation2 + $0x1ab8] sm:$0xff] }
 0xa44   :  { %5502 = vmatprep.subr.bf16.mxu0 %v5422_v56  ;;  %v5339_v56 = vld [vmem:[#allocation2 + $0x1910] sm:$0xff] }
 0xa46   :  { %3631 = vmatpush1.bf16.msra.mxu1 %v3549_v14  ;;  %v3476_v14 = vld [vmem:[#allocation2 + $0x158] sm:$0xff] }
 0xa47   :  { %5503 = vmatpush1.bf16.msra.mxu0 %v5421_v49  ;;  %v3553_v49 = vld [vmem:[#allocation2 + $0x3c0] sm:$0xff]  ;;  %3632 = vmatprep.subr.bf16.mxu1 %v3554_v28  ;;  %v5396_v28 = vld [vmem:[#allocation2 + $0x1ad8] sm:$0xff] }
 0xa48   :  { %5504 = vmatprep.subr.bf16.mxu0 %v5426_v51  ;;  %v5343_v51 = vld [vmem:[#allocation2 + $0x1930] sm:$0xff] }
 0xa4a   :  { %3633 = vmatpush1.bf16.msra.mxu1 %v3553_v49  ;;  %v3480_v49 = vld [vmem:[#allocation2 + $0x178] sm:$0xff] }
 0xa4b   :  { %5505 = vmatpush1.bf16.msra.mxu0 %v5425_v5  ;;  %v3557_v5 = vld [vmem:[#allocation2 + $0x3e0] sm:$0xff]  ;;  %3634 = vmatprep.subr.bf16.mxu1 %v3558_v61  ;;  %v5400_v61 = vld [vmem:[#allocation2 + $0x1af8] sm:$0xff] }
 0xa4c   :  { %5506 = vmatprep.subr.bf16.mxu0 %v5430_v20  ;;  %v5347_v20 = vld [vmem:[#allocation2 + $0x1950] sm:$0xff] }
 0xa4e   :  { %3635 = vmatpush1.bf16.msra.mxu1 %v3557_v5  ;;  %v3484_v5 = vld [vmem:[#allocation2 + $0x198] sm:$0xff] }
 0xa4f   :  { %5507 = vmatpush1.bf16.msra.mxu0 %v5429_v43  ;;  %v3435_v43 = vld [vmem:[#allocation2 + $0x10] sm:$0xff]  ;;  %3647 = vmatprep.subr.bf16.mxu1 %v3436_v46  ;;  %v5404_v46 = vld [vmem:[#allocation2 + $0x1b18] sm:$0xff] }
 0xa50   :  { %5519 = vmatprep.subr.bf16.mxu0 %v5308_v47  ;;  %v5351_v47 = vld [vmem:[#allocation2 + $0x1970] sm:$0xff] }
 0xa51   :  { %3637 = vmatmul.mubr.bf16.vlgmr.msra.gmra.mrb[160].mxu1 %v12163_v42  ;;  %v3448_v42 = vld [vmem:[#allocation2 + $0x78] sm:$0xff] }
 0xa52   :  { %5509 = vmatmul.mubr.bf16.vlgmr.msra.gmra.mrb[36].mxu0 %v12259_v54  ;;  %3648 = vmatpush1.bf16.msra.mxu1 %v3435_v43  ;;  %v3488_v43 = vld [vmem:[#allocation2 + $0x1b8] sm:$0xff] }
 0xa53   :  { %5520 = vmatpush1.bf16.msra.mxu0 %v5307_v59  ;;  %5551 = vmatprep.mubr.bf16.mxu0 %v12104_v33  ;;  %v5319_v33 = vld [vmem:[#allocation2 + $0x1870] sm:$0xff] }
 0xa54   :  { %5521 = vmatprep.subr.bf16.mxu0 %v5312_v4  ;;  %3679 = vmatprep.mubr.bf16.mxu1 %v12008_v40  ;;  %v3439_v59 = vld [vmem:[#allocation2 + $0x30] sm:$0xff] }
 0xa55   :  { %v5355_v4 = vld [vmem:[#allocation2 + $0x1990] sm:$0xff]  ;;  %3649 = vmatprep.subr.bf16.mxu1 %v3440_v57  ;;  %v5408_v57 = vld [vmem:[#allocation2 + $0x1b38] sm:$0xff] }
 0xa56   :  { %3650 = vmatpush1.bf16.msra.mxu1 %v3439_v59  ;;  %v5363_v40 = vld [vmem:[#allocation2 + $0x19d0] sm:$0xff]  ;;  %v3492_v59 = vld [vmem:[#allocation2 + $0x1d8] sm:$0xff] }
 0xa57   :  { %5522 = vmatpush1.bf16.msra.mxu0 %v5311_v11  ;;  %v3443_v11 = vld [vmem:[#allocation2 + $0x50] sm:$0xff]  ;;  %3651 = vmatprep.subr.bf16.mxu1 %v3444_v21  ;;  %v5412_v21 = vld [vmem:[#allocation2 + $0x1b58] sm:$0xff] }
 0xa58   :  { %5523 = vmatprep.subr.bf16.mxu0 %v5316_v62  ;;  %v5359_v62 = vld [vmem:[#allocation2 + $0x19b0] sm:$0xff] }
 0xa5a   :  { %3652 = vmatpush1.bf16.msra.mxu1 %v3443_v11  ;;  %v3496_v11 = vld [vmem:[#allocation2 + $0x1f8] sm:$0xff] }
 0xa5b   :  { %5524 = vmatpush1.bf16.msra.mxu0 %v5315_v63  ;;  %3653 = vmatprep.subr.bf16.mxu1 %v3448_v42  ;;  %v5368_v63 = vld [vmem:[#allocation2 + $0x19f8] sm:$0xff] }
 0xa5c   :  { %5525 = vmatprep.subr.bf16.mxu0 %v5320_v15  ;;  %v3452_v15 = vld [vmem:[#allocation2 + $0x98] sm:$0xff] }
 0xa5d   :  { %v5416_v42 = vld [vmem:[#allocation2 + $0x1b78] sm:$0xff] }
 0xa5e   :  { %3654 = vmatpush1.bf16.msra.mxu1 %v3447_v24  ;;  %v12331_v24 = vld [vmem:[#allocation17 + $0x4] ss:$16 sps:$4 sm:$0xff]  }
 0xa5f   :  { %5526 = vmatpush1.bf16.msra.mxu0 %v5319_v33  ;;  %3655 = vmatprep.subr.bf16.mxu1 %v3452_v15  ;;  %v5372_v33 = vld [vmem:[#allocation2 + $0x1a18] sm:$0xff] }
 0xa60   :  { %5527 = vmatprep.subr.bf16.mxu0 %v5324_v7  ;;  %v3456_v7 = vld [vmem:[#allocation2 + $0xb8] sm:$0xff] }
 0xa61   :  { %v5420_v15 = vld [vmem:[#allocation2 + $0x1b98] sm:$0xff] }
 0xa62   :  { %3656 = vmatpush1.bf16.msra.mxu1 %v3451_v36  ;;  %v12338_v36 = vld [vmem:[#allocation17 + $0x24] ss:$16 sps:$4 sm:$0xff]  }
 0xa63   :  { %5528 = vmatpush1.bf16.msra.mxu0 %v5323_v52  ;;  %3657 = vmatprep.subr.bf16.mxu1 %v3456_v7  ;;  %v5376_v52 = vld [vmem:[#allocation2 + $0x1a38] sm:$0xff] }
 0xa64   :  { %5529 = vmatprep.subr.bf16.mxu0 %v5328_v38  ;;  %v3460_v38 = vld [vmem:[#allocation2 + $0xd8] sm:$0xff] }
 0xa65   :  { %v5424_v7 = vld [vmem:[#allocation2 + $0x1bb8] sm:$0xff] }
 0xa66   :  { %3658 = vmatpush1.bf16.msra.mxu1 %v3455_v50  ;;  %v12345_v50 = vld [vmem:[#allocation17 + $0x44] ss:$16 sps:$4 sm:$0xff]  }
 0xa67   :  { %5530 = vmatpush1.bf16.msra.mxu0 %v5327_v48  ;;  %3659 = vmatprep.subr.bf16.mxu1 %v3460_v38  ;;  %v5380_v48 = vld [vmem:[#allocation2 + $0x1a58] sm:$0xff]  ;;  %v12351_v38 = vld [vmem:[#allocation17 + $0x64] ss:$16 sps:$4 sm:$0xff]  }
 0xa68   :  { %5531 = vmatprep.subr.bf16.mxu0 %v5332_v53  ;;  %v3464_v53 = vld [vmem:[#allocation2 + $0xf8] sm:$0xff] }
 0xa6a   :  { %3660 = vmatpush1.bf16.msra.mxu1 %v3459_v17  ;;  %v12353_v17 = vld [vmem:[#allocation17 + $0x60] ss:$16 sps:$4 sm:$0xff]  }
 0xa6b   :  { %5532 = vmatpush1.bf16.msra.mxu0 %v5331_v23  ;;  %3661 = vmatprep.subr.bf16.mxu1 %v3464_v53  ;;  %v5384_v23 = vld [vmem:[#allocation2 + $0x1a78] sm:$0xff]  ;;  %v12357_v53 = vld [vmem:[#allocation17 + $0x84] ss:$16 sps:$4 sm:$0xff]  }
 0xa6c   :  { %5533 = vmatprep.subr.bf16.mxu0 %v5336_v55  ;;  %v3467_v55 = vld [vmem:[#allocation2 + $0x110] sm:$0xff] }
 0xa6e   :  { %3662 = vmatpush1.bf16.msra.mxu1 %v3463_v39  ;;  %v12359_v39 = vld [vmem:[#allocation17 + $0x80] ss:$16 sps:$4 sm:$0xff]  }
 0xa6f   :  { %5534 = vmatpush1.bf16.msra.mxu0 %v5335_v10  ;;  %v3471_v10 = vld [vmem:[#allocation2 + $0x130] sm:$0xff] }
 0xa70   :  { %5535 = vmatprep.subr.bf16.mxu0 %v5340_v16  ;;  %v5387_v16 = vld [vmem:[#allocation2 + $0x1a90] sm:$0xff] }
 0xa73   :  { %5536 = vmatpush1.bf16.msra.mxu0 %v5339_v56  ;;  %v3475_v56 = vld [vmem:[#allocation2 + $0x150] sm:$0xff] }
 0xa74   :  { %5537 = vmatprep.subr.bf16.mxu0 %v5344_v12  ;;  %v5391_v12 = vld [vmem:[#allocation2 + $0x1ab0] sm:$0xff] }
 0xa77   :  { %5538 = vmatpush1.bf16.msra.mxu0 %v5343_v51  ;;  %v3479_v51 = vld [vmem:[#allocation2 + $0x170] sm:$0xff] }
 0xa78   :  { %5539 = vmatprep.subr.bf16.mxu0 %v5348_v1  ;;  %v5395_v1 = vld [vmem:[#allocation2 + $0x1ad0] sm:$0xff] }
 0xa7b   :  { %5540 = vmatpush1.bf16.msra.mxu0 %v5347_v20  ;;  %v3483_v20 = vld [vmem:[#allocation2 + $0x190] sm:$0xff] }
 0xa7c   :  { %5541 = vmatprep.subr.bf16.mxu0 %v5352_v18  ;;  %v5399_v18 = vld [vmem:[#allocation2 + $0x1af0] sm:$0xff] }
 0xa7f   :  { %5542 = vmatpush1.bf16.msra.mxu0 %v5351_v47  ;;  %v3487_v47 = vld [vmem:[#allocation2 + $0x1b0] sm:$0xff] }
 0xa80   :  { %5543 = vmatprep.subr.bf16.mxu0 %v5356_v26  ;;  %v5403_v26 = vld [vmem:[#allocation2 + $0x1b10] sm:$0xff] }
 0xa83   :  { %5544 = vmatpush1.bf16.msra.mxu0 %v5355_v4  ;;  %v3491_v4 = vld [vmem:[#allocation2 + $0x1d0] sm:$0xff] }
 0xa84   :  { %5545 = vmatprep.subr.bf16.mxu0 %v5360_v19  ;;  %v5407_v19 = vld [vmem:[#allocation2 + $0x1b30] sm:$0xff] }
 0xa87   :  { %5546 = vmatpush1.bf16.msra.mxu0 %v5359_v62  ;;  %v3495_v62 = vld [vmem:[#allocation2 + $0x1f0] sm:$0xff] }
 0xa88   :  { %5547 = vmatprep.subr.bf16.mxu0 %v5364_v34  ;;  %v5411_v34 = vld [vmem:[#allocation2 + $0x1b50] sm:$0xff] }
 0xa8b   :  { %5548 = vmatpush1.bf16.msra.mxu0 %v5363_v40  ;;  %v12333_v40 = vld [vmem:[#allocation17] ss:$16 sps:$4 sm:$0xff]  }
 0xa8c   :  { %5549 = vmatprep.subr.bf16.mxu0 %v5368_v63  ;;  %v5415_v63 = vld [vmem:[#allocation2 + $0x1b70] sm:$0xff] }
 0xa8f   :  { %5550 = vmatpush1.bf16.msra.mxu0 %v5367_v41  ;;  %v12341_v41 = vld [vmem:[#allocation17 + $0x20] ss:$16 sps:$4 sm:$0xff]  }
 0xa90   :  { %5562 = vmatprep.subr.bf16.mxu0 %v5372_v33  ;;  %v5419_v33 = vld [vmem:[#allocation2 + $0x1b90] sm:$0xff] }
 0xa92   :  { %5552 = vmatmul.mubr.bf16.vlgmr.msra.gmra.mrb[32].mxu0 %v12101_v29  ;;  %v3468_v29 = vld [vmem:[#allocation2 + $0x118] sm:$0xff] }
 0xa93   :  { %5563 = vmatpush1.bf16.msra.mxu0 %v5371_v31  ;;  %5594 = vmatprep.mubr.bf16.mxu0 %v12262_v27  ;;  %v5383_v27 = vld [vmem:[#allocation2 + $0x1a70] sm:$0xff] }
 0xa94   :  { %5564 = vmatprep.subr.bf16.mxu0 %v5376_v52  ;;  %3663 = vmatprep.subr.bf16.mxu1 %v3468_v29  ;;  %v5423_v31 = vld [vmem:[#allocation2 + $0x1bb0] sm:$0xff]  ;;  %v5428_v52 = vld [vmem:[#allocation2 + $0x1bd8] sm:$0xff] }
 0xa95   :  { %3664 = vmatpush1.bf16.msra.mxu1 %v3467_v55  ;;  %v12363_v29 = vld [vmem:[#allocation17 + $0xa4] ss:$16 sps:$4 sm:$0xff]   ;;  %v12365_v55 = vld [vmem:[#allocation17 + $0xa0] ss:$16 sps:$4 sm:$0xff]  }
 0xa96   :  { %3665 = vmatprep.subr.bf16.mxu1 %v3472_v9  ;;  %v12370_v9 = vld [vmem:[#allocation17 + $0xc4] ss:$16 sps:$4 sm:$0xff]  }
 0xa97   :  { %5565 = vmatpush1.bf16.msra.mxu0 %v5375_v44  ;;  %v5427_v44 = vld [vmem:[#allocation2 + $0x1bd0] sm:$0xff] }
 0xa98   :  { %5566 = vmatprep.subr.bf16.mxu0 %v5380_v48  ;;  %v5432_v48 = vld [vmem:[#allocation2 + $0x1bf8] sm:$0xff] }
 0xa99   :  { %3666 = vmatpush1.bf16.msra.mxu1 %v3471_v10  ;;  %v12373_v10 = vld [vmem:[#allocation17 + $0xc0] ss:$16 sps:$4 sm:$0xff]  }
 0xa9a   :  { %3667 = vmatprep.subr.bf16.mxu1 %v3476_v14  ;;  %v12377_v14 = vld [vmem:[#allocation17 + $0xe4] ss:$16 sps:$4 sm:$0xff]  }
 0xa9b   :  { %5567 = vmatpush1.bf16.msra.mxu0 %v5379_v22  ;;  %v5431_v22 = vld [vmem:[#allocation2 + $0x1bf0] sm:$0xff] }
 0xa9c   :  { %5568 = vmatprep.subr.bf16.mxu0 %v5384_v23  ;;  %v5618_v23 = vld [vmem:[#allocation2 + $0x1c08] sm:$0xff] }
 0xa9d   :  { %3668 = vmatpush1.bf16.msra.mxu1 %v3475_v56  ;;  %v5625_v56 = vld [vmem:[#allocation2 + $0x1c40] sm:$0xff] }
 0xa9e   :  { %3669 = vmatprep.subr.bf16.mxu1 %v3480_v49  ;;  %v5634_v49 = vld [vmem:[#allocation2 + $0x1c88] sm:$0xff] }
 0xa9f   :  { %5569 = vmatpush1.bf16.msra.mxu0 %v5383_v27  ;;  %v5617_v27 = vld [vmem:[#allocation2 + $0x1c00] sm:$0xff] }
 0xaa0   :  { %5570 = vmatprep.subr.bf16.mxu0 %v5388_v37  ;;  %v5622_v37 = vld [vmem:[#allocation2 + $0x1c28] sm:$0xff] }
 0xaa1   :  { %3670 = vmatpush1.bf16.msra.mxu1 %v3479_v51  ;;  %v5633_v51 = vld [vmem:[#allocation2 + $0x1c80] sm:$0xff] }
 0xaa2   :  { %3671 = vmatprep.subr.bf16.mxu1 %v3484_v5  ;;  %v5642_v5 = vld [vmem:[#allocation2 + $0x1cc8] sm:$0xff] }
 0xaa3   :  { %5571 = vmatpush1.bf16.msra.mxu0 %v5387_v16  ;;  %v5621_v16 = vld [vmem:[#allocation2 + $0x1c20] sm:$0xff] }
 0xaa4   :  { %5572 = vmatprep.subr.bf16.mxu0 %v5392_v25  ;;  %v5626_v25 = vld [vmem:[#allocation2 + $0x1c48] sm:$0xff] }
 0xaa5   :  { %3672 = vmatpush1.bf16.msra.mxu1 %v3483_v20  ;;  %v5641_v20 = vld [vmem:[#allocation2 + $0x1cc0] sm:$0xff] }
 0xaa6   :  { %3673 = vmatprep.subr.bf16.mxu1 %v3488_v43  ;;  %v5650_v43 = vld [vmem:[#allocation2 + $0x1d08] sm:$0xff] }
 0xaa7   :  { %5573 = vmatpush1.bf16.msra.mxu0 %v5391_v12  ;;  %v5630_v12 = vld [vmem:[#allocation2 + $0x1c68] sm:$0xff] }
 0xaa8   :  { %5574 = vmatprep.subr.bf16.mxu0 %v5396_v28  ;;  %v5629_v28 = vld [vmem:[#allocation2 + $0x1c60] sm:$0xff] }
 0xaa9   :  { %3674 = vmatpush1.bf16.msra.mxu1 %v3487_v47  ;;  %v5649_v47 = vld [vmem:[#allocation2 + $0x1d00] sm:$0xff] }
 0xaaa   :  { %3675 = vmatprep.subr.bf16.mxu1 %v3492_v59  ;;  %v5658_v59 = vld [vmem:[#allocation2 + $0x1d48] sm:$0xff] }
 0xaab   :  { %5575 = vmatpush1.bf16.msra.mxu0 %v5395_v1  ;;  %v5638_v1 = vld [vmem:[#allocation2 + $0x1ca8] sm:$0xff] }
 0xaac   :  { %5576 = vmatprep.subr.bf16.mxu0 %v5400_v61  ;;  %v5637_v61 = vld [vmem:[#allocation2 + $0x1ca0] sm:$0xff] }
 0xaad   :  { %3676 = vmatpush1.bf16.msra.mxu1 %v3491_v4  ;;  %v5657_v4 = vld [vmem:[#allocation2 + $0x1d40] sm:$0xff] }
 0xaae   :  { %3677 = vmatprep.subr.bf16.mxu1 %v3496_v11  ;;  %v5666_v11 = vld [vmem:[#allocation2 + $0x1d88] sm:$0xff] }
 0xaaf   :  { %5577 = vmatpush1.bf16.msra.mxu0 %v5399_v18  ;;  %v5646_v18 = vld [vmem:[#allocation2 + $0x1ce8] sm:$0xff] }
 0xab0   :  { %5578 = vmatprep.subr.bf16.mxu0 %v5404_v46  ;;  %v5645_v46 = vld [vmem:[#allocation2 + $0x1ce0] sm:$0xff] }
 0xab1   :  { %3678 = vmatpush1.bf16.msra.mxu1 %v3495_v62  ;;  %v5665_v62 = vld [vmem:[#allocation2 + $0x1d80] sm:$0xff] }
 0xab2   :  { %6129 = vmatprep.subr.bf16.mxu1 %v12331_v24 }
 0xab3   :  { %5579 = vmatpush1.bf16.msra.mxu0 %v5403_v26  ;;  %v5654_v26 = vld [vmem:[#allocation2 + $0x1d28] sm:$0xff] }
 0xab4   :  { %5580 = vmatprep.subr.bf16.mxu0 %v5408_v57  ;;  %3680 = vmatmul.mubr.bf16.vlgmr.msra.gmra.mrb[164].mxu1 %v12005_v35  ;;  %v12347_v35 = vld [vmem:[#allocation17 + $0x40] ss:$16 sps:$4 sm:$0xff]  }
 0xab5   :  { %6130 = vmatpush1.bf16.msra.mxu1 %v12333_v40  ;;  %6161 = vmatprep.mubr.bf16.mxu1 %v13318_v0  ;;  %v5653_v57 = vld [vmem:[#allocation2 + $0x1d20] sm:$0xff] }
 0xab6   :  { %6131 = vmatprep.subr.bf16.mxu1 %v12338_v36 }
 0xab7   :  { %5581 = vmatpush1.bf16.msra.mxu0 %v5407_v19  ;;  %v5662_v19 = vld [vmem:[#allocation2 + $0x1d68] sm:$0xff] }
 0xab8   :  { %5582 = vmatprep.subr.bf16.mxu0 %v5412_v21  ;;  %v5661_v21 = vld [vmem:[#allocation2 + $0x1d60] sm:$0xff] }
 0xab9   :  { %6132 = vmatpush1.bf16.msra.mxu1 %v12341_v41 }
 0xaba   :  { %6133 = vmatprep.subr.bf16.mxu1 %v12345_v50 }
 0xabb   :  { %5583 = vmatpush1.bf16.msra.mxu0 %v5411_v34  ;;  %v5670_v34 = vld [vmem:[#allocation2 + $0x1da8] sm:$0xff] }
 0xabc   :  { %5584 = vmatprep.subr.bf16.mxu0 %v5416_v42  ;;  %v5669_v42 = vld [vmem:[#allocation2 + $0x1da0] sm:$0xff] }
 0xabd   :  { %6134 = vmatpush1.bf16.msra.mxu1 %v12347_v35 }
 0xabe   :  { %6135 = vmatprep.subr.bf16.mxu1 %v12351_v38 }
 0xabf   :  { %5585 = vmatpush1.bf16.msra.mxu0 %v5415_v63  ;;  %v5674_v63 = vld [vmem:[#allocation2 + $0x1dc8] sm:$0xff] }
 0xac0   :  { %5586 = vmatprep.subr.bf16.mxu0 %v5420_v15  ;;  %v5673_v15 = vld [vmem:[#allocation2 + $0x1dc0] sm:$0xff] }
 0xac1   :  { %6136 = vmatpush1.bf16.msra.mxu1 %v12353_v17 }
 0xac2   :  { %6137 = vmatprep.subr.bf16.mxu1 %v12357_v53 }
 0xac3   :  { %5587 = vmatpush1.bf16.msra.mxu0 %v5419_v33  ;;  %v5678_v33 = vld [vmem:[#allocation2 + $0x1de8] sm:$0xff] }
 0xac4   :  { %5588 = vmatprep.subr.bf16.mxu0 %v5424_v7  ;;  %v5677_v7 = vld [vmem:[#allocation2 + $0x1de0] sm:$0xff] }
 0xac5   :  { %6138 = vmatpush1.bf16.msra.mxu1 %v12359_v39 }
 0xac6   :  { %6139 = vmatprep.subr.bf16.mxu1 %v12363_v29 }
 0xac7   :  { %5589 = vmatpush1.bf16.msra.mxu0 %v5423_v31  ;;  %v5682_v31 = vld [vmem:[#allocation2 + $0x1e08] sm:$0xff] }
 0xac8   :  { %5590 = vmatprep.subr.bf16.mxu0 %v5428_v52  ;;  %v5681_v52 = vld [vmem:[#allocation2 + $0x1e00] sm:$0xff] }
 0xac9   :  { %6140 = vmatpush1.bf16.msra.mxu1 %v12365_v55 }
 0xaca   :  { %6141 = vmatprep.subr.bf16.mxu1 %v12370_v9 }
 0xacb   :  { %5591 = vmatpush1.bf16.msra.mxu0 %v5427_v44  ;;  %v5686_v44 = vld [vmem:[#allocation2 + $0x1e28] sm:$0xff] }
 0xacc   :  { %5592 = vmatprep.subr.bf16.mxu0 %v5432_v48  ;;  %v5685_v48 = vld [vmem:[#allocation2 + $0x1e20] sm:$0xff] }
 0xacd   :  { %6142 = vmatpush1.bf16.msra.mxu1 %v12373_v10 }
 0xace   :  { %6143 = vmatprep.subr.bf16.mxu1 %v12377_v14 }
 0xacf   :  { %5593 = vmatpush1.bf16.msra.mxu0 %v5431_v22  ;;  %v5690_v22 = vld [vmem:[#allocation2 + $0x1e48] sm:$0xff] }
 0xad0   :  { %5745 = vmatprep.subr.bf16.mxu0 %v5618_v23  ;;  %v5689_v23 = vld [vmem:[#allocation2 + $0x1e40] sm:$0xff] }
 0xad2   :  { %5595 = vmatmul.mubr.bf16.vlgmr.msra.gmra.mrb[32].mxu0 %v12259_v54  ;;  %v12379_v54 = vld [vmem:[#allocation17 + $0xe0] ss:$16 sps:$4 sm:$0xff]  }
 0xad3   :  { %5746 = vmatpush1.bf16.msra.mxu0 %v5617_v27  ;;  %5777 = vmatprep.mubr.bf16.mxu0 %v12117_v30  ;;  %v5694_v27 = vld [vmem:[#allocation2 + $0x1e68] sm:$0xff] }
 0xad4   :  { %5747 = vmatprep.subr.bf16.mxu0 %v5622_v37  ;;  %6144 = vmatpush1.bf16.msra.mxu1 %v12379_v54  ;;  %v5693_v37 = vld [vmem:[#allocation2 + $0x1e60] sm:$0xff] }
 0xad7   :  { %5748 = vmatpush1.bf16.msra.mxu0 %v5621_v16  ;;  %6162 = vmatmul.mubr.bf16.vlgmr.msra.gmra.mrb[168].mxu1 %v13318_v0  ;;  %v5698_v16 = vld [vmem:[#allocation2 + $0x1e88] sm:$0xff] }
 0xad8   :  { %5749 = vmatprep.subr.bf16.mxu0 %v5626_v25  ;;  %6202 = vmatprep.mubr.bf16.mxu1 %v13318_v0  ;;  %v5697_v25 = vld [vmem:[#allocation2 + $0x1e80] sm:$0xff] }
 0xadb   :  { %5750 = vmatpush1.bf16.msra.mxu0 %v5625_v56  ;;  %v5702_v56 = vld [vmem:[#allocation2 + $0x1ea8] sm:$0xff] }
 0xadc   :  { %5751 = vmatprep.subr.bf16.mxu0 %v5630_v12  ;;  %v5701_v12 = vld [vmem:[#allocation2 + $0x1ea0] sm:$0xff] }
 0xadf   :  { %5752 = vmatpush1.bf16.msra.mxu0 %v5629_v28  ;;  %v5706_v28 = vld [vmem:[#allocation2 + $0x1ec8] sm:$0xff] }
 0xae0   :  { %5753 = vmatprep.subr.bf16.mxu0 %v5634_v49  ;;  %v5705_v49 = vld [vmem:[#allocation2 + $0x1ec0] sm:$0xff] }
 0xae3   :  { %5754 = vmatpush1.bf16.msra.mxu0 %v5633_v51  ;;  %v5710_v51 = vld [vmem:[#allocation2 + $0x1ee8] sm:$0xff] }
 0xae4   :  { %5755 = vmatprep.subr.bf16.mxu0 %v5638_v1  ;;  %v5709_v1 = vld [vmem:[#allocation2 + $0x1ee0] sm:$0xff] }
 0xae7   :  { %5756 = vmatpush1.bf16.msra.mxu0 %v5637_v61  ;;  %v5714_v61 = vld [vmem:[#allocation2 + $0x1f08] sm:$0xff] }
 0xae8   :  { %5757 = vmatprep.subr.bf16.mxu0 %v5642_v5  ;;  %v5713_v5 = vld [vmem:[#allocation2 + $0x1f00] sm:$0xff] }
 0xaeb   :  { %5758 = vmatpush1.bf16.msra.mxu0 %v5641_v20  ;;  %v5718_v20 = vld [vmem:[#allocation2 + $0x1f28] sm:$0xff] }
 0xaec   :  { %5759 = vmatprep.subr.bf16.mxu0 %v5646_v18  ;;  %v5717_v18 = vld [vmem:[#allocation2 + $0x1f20] sm:$0xff] }
 0xaef   :  { %5760 = vmatpush1.bf16.msra.mxu0 %v5645_v46  ;;  %v5722_v46 = vld [vmem:[#allocation2 + $0x1f48] sm:$0xff] }
 0xaf0   :  { %5761 = vmatprep.subr.bf16.mxu0 %v5650_v43  ;;  %v12387_v43 = vld [vmem:[#allocation17 + $0xc] ss:$16 sps:$4 sm:$0xff]  }
 0xaf1   :  { %6170 = vmatprep.subr.bf16.mxu1 %v12387_v43 }
 0xaf3   :  { %5762 = vmatpush1.bf16.msra.mxu0 %v5649_v47  ;;  %v5721_v47 = vld [vmem:[#allocation2 + $0x1f40] sm:$0xff] }
 0xaf4   :  { %5763 = vmatprep.subr.bf16.mxu0 %v5654_v26  ;;  %v12389_v26 = vld [vmem:[#allocation17 + $0x8] ss:$16 sps:$4 sm:$0xff]  }
 0xaf5   :  { %6171 = vmatpush1.bf16.msra.mxu1 %v12389_v26 }
 0xaf7   :  { %5764 = vmatpush1.bf16.msra.mxu0 %v5653_v57  ;;  %v5726_v57 = vld [vmem:[#allocation2 + $0x1f68] sm:$0xff] }
 0xaf8   :  { %5765 = vmatprep.subr.bf16.mxu0 %v5658_v59  ;;  %v12393_v59 = vld [vmem:[#allocation17 + $0x2c] ss:$16 sps:$4 sm:$0xff]  }
 0xaf9   :  { %6172 = vmatprep.subr.bf16.mxu1 %v12393_v59 }
 0xafb   :  { %5766 = vmatpush1.bf16.msra.mxu0 %v5657_v4  ;;  %v5725_v4 = vld [vmem:[#allocation2 + $0x1f60] sm:$0xff] }
 0xafc   :  { %5767 = vmatprep.subr.bf16.mxu0 %v5662_v19  ;;  %v12395_v19 = vld [vmem:[#allocation17 + $0x28] ss:$16 sps:$4 sm:$0xff]  }
 0xafd   :  { %6173 = vmatpush1.bf16.msra.mxu1 %v12395_v19 }
 0xaff   :  { %5768 = vmatpush1.bf16.msra.mxu0 %v5661_v21  ;;  %v5730_v21 = vld [vmem:[#allocation2 + $0x1f88] sm:$0xff] }
 0xb00   :  { %5769 = vmatprep.subr.bf16.mxu0 %v5666_v11  ;;  %v12399_v11 = vld [vmem:[#allocation17 + $0x4c] ss:$16 sps:$4 sm:$0xff]  }
 0xb01   :  { %6174 = vmatprep.subr.bf16.mxu1 %v12399_v11 }
 0xb03   :  { %5770 = vmatpush1.bf16.msra.mxu0 %v5665_v62  ;;  %v5729_v62 = vld [vmem:[#allocation2 + $0x1f80] sm:$0xff] }
 0xb04   :  { %5771 = vmatprep.subr.bf16.mxu0 %v5670_v34  ;;  %v12401_v34 = vld [vmem:[#allocation17 + $0x48] ss:$16 sps:$4 sm:$0xff]  }
 0xb05   :  { %6175 = vmatpush1.bf16.msra.mxu1 %v12401_v34 }
 0xb07   :  { %5772 = vmatpush1.bf16.msra.mxu0 %v5669_v42  ;;  %v5734_v42 = vld [vmem:[#allocation2 + $0x1fa8] sm:$0xff] }
 0xb08   :  { %5773 = vmatprep.subr.bf16.mxu0 %v5674_v63  ;;  %v12405_v63 = vld [vmem:[#allocation17 + $0x6c] ss:$16 sps:$4 sm:$0xff]  }
 0xb09   :  { %6176 = vmatprep.subr.bf16.mxu1 %v12405_v63 }
 0xb0b   :  { %5774 = vmatpush1.bf16.msra.mxu0 %v5673_v15  ;;  %v5733_v15 = vld [vmem:[#allocation2 + $0x1fa0] sm:$0xff] }
 0xb0c   :  { %5775 = vmatprep.subr.bf16.mxu0 %v5678_v33  ;;  %v12407_v33 = vld [vmem:[#allocation17 + $0x68] ss:$16 sps:$4 sm:$0xff]  }
 0xb0d   :  { %6177 = vmatpush1.bf16.msra.mxu1 %v12407_v33 }
 0xb0f   :  { %5776 = vmatpush1.bf16.msra.mxu0 %v5677_v7  ;;  %v5738_v7 = vld [vmem:[#allocation2 + $0x1fc8] sm:$0xff] }
 0xb10   :  { %5788 = vmatprep.subr.bf16.mxu0 %v5682_v31  ;;  %v12411_v31 = vld [vmem:[#allocation17 + $0x8c] ss:$16 sps:$4 sm:$0xff]  }
 0xb11   :  { %6178 = vmatprep.subr.bf16.mxu1 %v12411_v31 }
 0xb12   :  { %5778 = vmatmul.mubr.bf16.vlgmr.msra.gmra.mrb[36].mxu0 %v12115_v45 }
 0xb13   :  { %5789 = vmatpush1.bf16.msra.mxu0 %v5681_v52  ;;  %5820 = vmatprep.mubr.bf16.mxu0 %v12275_v32  ;;  %v5737_v52 = vld [vmem:[#allocation2 + $0x1fc0] sm:$0xff] }
 0xb14   :  { %5790 = vmatprep.subr.bf16.mxu0 %v5686_v44  ;;  %v12413_v44 = vld [vmem:[#allocation17 + $0x88] ss:$16 sps:$4 sm:$0xff]  }
 0xb15   :  { %6179 = vmatpush1.bf16.msra.mxu1 %v12413_v44 }
 0xb17   :  { %5791 = vmatpush1.bf16.msra.mxu0 %v5685_v48  ;;  %v5742_v48 = vld [vmem:[#allocation2 + $0x1fe8] sm:$0xff] }
 0xb18   :  { %5792 = vmatprep.subr.bf16.mxu0 %v5690_v22  ;;  %v12417_v22 = vld [vmem:[#allocation17 + $0xac] ss:$16 sps:$4 sm:$0xff]  }
 0xb19   :  { %6180 = vmatprep.subr.bf16.mxu1 %v12417_v22 }
 0xb1b   :  { %5793 = vmatpush1.bf16.msra.mxu0 %v5689_v23  ;;  %v5741_v23 = vld [vmem:[#allocation2 + $0x1fe0] sm:$0xff] }
 0xb1c   :  { %5794 = vmatprep.subr.bf16.mxu0 %v5694_v27  ;;  %v12419_v27 = vld [vmem:[#allocation17 + $0xa8] ss:$16 sps:$4 sm:$0xff]  }
 0xb1d   :  { %6181 = vmatpush1.bf16.msra.mxu1 %v12419_v27 }
 0xb1f   :  { %5795 = vmatpush1.bf16.msra.mxu0 %v5693_v37  ;;  %v5620_v37 = vld [vmem:[#allocation2 + $0x1c18] sm:$0xff] }
 0xb20   :  { %5796 = vmatprep.subr.bf16.mxu0 %v5698_v16  ;;  %v12423_v16 = vld [vmem:[#allocation17 + $0xcc] ss:$16 sps:$4 sm:$0xff]  }
 0xb21   :  { %6182 = vmatprep.subr.bf16.mxu1 %v12423_v16 }
 0xb23   :  { %5797 = vmatpush1.bf16.msra.mxu0 %v5697_v25  ;;  %v5619_v25 = vld [vmem:[#allocation2 + $0x1c10] sm:$0xff] }
 0xb24   :  { %5798 = vmatprep.subr.bf16.mxu0 %v5702_v56  ;;  %v12425_v56 = vld [vmem:[#allocation17 + $0xc8] ss:$16 sps:$4 sm:$0xff]  }
 0xb25   :  { %6183 = vmatpush1.bf16.msra.mxu1 %v12425_v56 }
 0xb27   :  { %5799 = vmatpush1.bf16.msra.mxu0 %v5701_v12  ;;  %v5624_v12 = vld [vmem:[#allocation2 + $0x1c38] sm:$0xff] }
 0xb28   :  { %5800 = vmatprep.subr.bf16.mxu0 %v5706_v28  ;;  %v12430_v28 = vld [vmem:[#allocation17 + $0xec] ss:$16 sps:$4 sm:$0xff]  }
 0xb29   :  { %6184 = vmatprep.subr.bf16.mxu1 %v12430_v28 }
 0xb2b   :  { %5801 = vmatpush1.bf16.msra.mxu0 %v5705_v49  ;;  %v12432_v49 = vld [vmem:[#allocation17 + $0xe8] ss:$16 sps:$4 sm:$0xff]  }
 0xb2c   :  { %5802 = vmatprep.subr.bf16.mxu0 %v5710_v51  ;;  %v12434_v51 = vpop.f32.mrb[160].mxu1  ;;  %6185 = vmatpush1.bf16.msra.mxu1 %v12432_v49 }
 0xb2d   :  { %6245 = vmatprep.subr.bf16.mxu1 %v12331_v24 }
 0xb2f   :  { %5803 = vmatpush1.bf16.msra.mxu0 %v5709_v1  ;;  %v12437_v1 = vpop.f32.mrb[161].mxu1  ;;  %6203 = vmatmul.mubr.bf16.vlgmr.msra.gmra.mrb[172].mxu1 %v13318_v0 }
 0xb30   :  { %5804 = vmatprep.subr.bf16.mxu0 %v5714_v61  ;;  %v5623_v61 = vld [vmem:[#allocation2 + $0x1c30] sm:$0xff]  ;;  %6246 = vmatpush1.bf16.msra.mxu1 %v12333_v40 }
 0xb31   :  { %6277 = vmatprep.mubr.bf16.mxu1 %v13318_v0  ;;  %6247 = vmatprep.subr.bf16.mxu1 %v12338_v36 }
 0xb33   :  { %5805 = vmatpush1.bf16.msra.mxu0 %v5713_v5  ;;  %v12440_v5 = vpop.f32.mrb[162].mxu1 }
 0xb34   :  { %5806 = vmatprep.subr.bf16.mxu0 %v5718_v20  ;;  %v5628_v20 = vld [vmem:[#allocation2 + $0x1c58] sm:$0xff]  ;;  %6248 = vmatpush1.bf16.msra.mxu1 %v12341_v41 }
 0xb35   :  { %6249 = vmatprep.subr.bf16.mxu1 %v12345_v50 }
 0xb37   :  { %5807 = vmatpush1.bf16.msra.mxu0 %v5717_v18  ;;  %v12442_v18 = vpop.f32.mrb[163].mxu1 }
 0xb38   :  { %5808 = vmatprep.subr.bf16.mxu0 %v5722_v46  ;;  %v5627_v46 = vld [vmem:[#allocation2 + $0x1c50] sm:$0xff]  ;;  %6250 = vmatpush1.bf16.msra.mxu1 %v12347_v35 }
 0xb39   :  { %6251 = vmatprep.subr.bf16.mxu1 %v12351_v38 }
 0xb3b   :  { %5809 = vmatpush1.bf16.msra.mxu0 %v5721_v47  ;;  %v5632_v47 = vld [vmem:[#allocation2 + $0x1c78] sm:$0xff] }
 0xb3c   :  { %5810 = vmatprep.subr.bf16.mxu0 %v5726_v57  ;;  %v5636_v57 = vld [vmem:[#allocation2 + $0x1c98] sm:$0xff]  ;;  %6252 = vmatpush1.bf16.msra.mxu1 %v12353_v17 }
 0xb3d   :  { %6253 = vmatprep.subr.bf16.mxu1 %v12357_v53 }
 0xb3f   :  { %5811 = vmatpush1.bf16.msra.mxu0 %v5725_v4  ;;  %v5635_v4 = vld [vmem:[#allocation2 + $0x1c90] sm:$0xff] }
 0xb40   :  { %5812 = vmatprep.subr.bf16.mxu0 %v5730_v21  ;;  %v5640_v21 = vld [vmem:[#allocation2 + $0x1cb8] sm:$0xff]  ;;  %6254 = vmatpush1.bf16.msra.mxu1 %v12359_v39 }
 0xb41   :  { %6255 = vmatprep.subr.bf16.mxu1 %v12363_v29 }
 0xb43   :  { %5813 = vmatpush1.bf16.msra.mxu0 %v5729_v62  ;;  %v5639_v62 = vld [vmem:[#allocation2 + $0x1cb0] sm:$0xff] }
 0xb44   :  { %5814 = vmatprep.subr.bf16.mxu0 %v5734_v42  ;;  %v5644_v42 = vld [vmem:[#allocation2 + $0x1cd8] sm:$0xff]  ;;  %6256 = vmatpush1.bf16.msra.mxu1 %v12365_v55 }
 0xb45   :  { %6257 = vmatprep.subr.bf16.mxu1 %v12370_v9 }
 0xb47   :  { %5815 = vmatpush1.bf16.msra.mxu0 %v5733_v15  ;;  %v5643_v15 = vld [vmem:[#allocation2 + $0x1cd0] sm:$0xff] }
 0xb48   :  { %5816 = vmatprep.subr.bf16.mxu0 %v5738_v7  ;;  %v5648_v7 = vld [vmem:[#allocation2 + $0x1cf8] sm:$0xff]  ;;  %6258 = vmatpush1.bf16.msra.mxu1 %v12373_v10 }
 0xb49   :  { %6259 = vmatprep.subr.bf16.mxu1 %v12377_v14 }
 0xb4b   :  { %5817 = vmatpush1.bf16.msra.mxu0 %v5737_v52  ;;  %v5647_v52 = vld [vmem:[#allocation2 + $0x1cf0] sm:$0xff] }
 0xb4c   :  { %5818 = vmatprep.subr.bf16.mxu0 %v5742_v48  ;;  %v5652_v48 = vld [vmem:[#allocation2 + $0x1d18] sm:$0xff]  ;;  %6260 = vmatpush1.bf16.msra.mxu1 %v12379_v54 }
 0xb4d   :  { %6286 = vmatprep.subr.bf16.mxu1 %v12387_v43 }
 0xb4f   :  { %5819 = vmatpush1.bf16.msra.mxu0 %v5741_v23  ;;  %v5651_v23 = vld [vmem:[#allocation2 + $0x1d10] sm:$0xff] }
 0xb50   :  { %5831 = vmatprep.subr.bf16.mxu0 %v5620_v37  ;;  %v5656_v37 = vld [vmem:[#allocation2 + $0x1d38] sm:$0xff] }
 0xb52   :  { %5821 = vmatmul.mubr.bf16.vlgmr.msra.gmra.mrb[36].mxu0 %v12273_v6 }
 0xb53   :  { %5832 = vmatpush1.bf16.msra.mxu0 %v5619_v25  ;;  %5863 = vmatprep.mubr.bf16.mxu0 %v12117_v30  ;;  %v5631_v30 = vld [vmem:[#allocation2 + $0x1c70] sm:$0xff] }
 0xb54   :  { %5833 = vmatprep.subr.bf16.mxu0 %v5624_v12  ;;  %v5655_v25 = vld [vmem:[#allocation2 + $0x1d30] sm:$0xff]  ;;  %v5660_v12 = vld [vmem:[#allocation2 + $0x1d58] sm:$0xff] }
 0xb57   :  { %5834 = vmatpush1.bf16.msra.mxu0 %v5623_v61  ;;  %v5659_v61 = vld [vmem:[#allocation2 + $0x1d50] sm:$0xff] }
 0xb58   :  { %5835 = vmatprep.subr.bf16.mxu0 %v5628_v20  ;;  %v5664_v20 = vld [vmem:[#allocation2 + $0x1d78] sm:$0xff] }
 0xb5b   :  { %5836 = vmatpush1.bf16.msra.mxu0 %v5627_v46  ;;  %v5663_v46 = vld [vmem:[#allocation2 + $0x1d70] sm:$0xff] }
 0xb5c   :  { %5837 = vmatprep.subr.bf16.mxu0 %v5632_v47  ;;  %v5668_v47 = vld [vmem:[#allocation2 + $0x1d98] sm:$0xff] }
 0xb5f   :  { %5838 = vmatpush1.bf16.msra.mxu0 %v5631_v30  ;;  %v5667_v30 = vld [vmem:[#allocation2 + $0x1d90] sm:$0xff] }
 0xb60   :  { %5839 = vmatprep.subr.bf16.mxu0 %v5636_v57  ;;  %v5672_v57 = vld [vmem:[#allocation2 + $0x1db8] sm:$0xff] }
 0xb63   :  { %5840 = vmatpush1.bf16.msra.mxu0 %v5635_v4  ;;  %v5671_v4 = vld [vmem:[#allocation2 + $0x1db0] sm:$0xff] }
 0xb64   :  { %5841 = vmatprep.subr.bf16.mxu0 %v5640_v21  ;;  %v5676_v21 = vld [vmem:[#allocation2 + $0x1dd8] sm:$0xff] }
 0xb67   :  { %5842 = vmatpush1.bf16.msra.mxu0 %v5639_v62  ;;  %v5675_v62 = vld [vmem:[#allocation2 + $0x1dd0] sm:$0xff] }
 0xb68   :  { %5843 = vmatprep.subr.bf16.mxu0 %v5644_v42  ;;  %v5680_v42 = vld [vmem:[#allocation2 + $0x1df8] sm:$0xff] }
 0xb6b   :  { %5844 = vmatpush1.bf16.msra.mxu0 %v5643_v15  ;;  %v5679_v15 = vld [vmem:[#allocation2 + $0x1df0] sm:$0xff] }
 0xb6c   :  { %5845 = vmatprep.subr.bf16.mxu0 %v5648_v7  ;;  %v5684_v7 = vld [vmem:[#allocation2 + $0x1e18] sm:$0xff] }
 0xb6f   :  { %5846 = vmatpush1.bf16.msra.mxu0 %v5647_v52  ;;  %v5683_v52 = vld [vmem:[#allocation2 + $0x1e10] sm:$0xff] }
 0xb70   :  { %5847 = vmatprep.subr.bf16.mxu0 %v5652_v48  ;;  %v5688_v48 = vld [vmem:[#allocation2 + $0x1e38] sm:$0xff] }
 0xb73   :  { %5848 = vmatpush1.bf16.msra.mxu0 %v5651_v23  ;;  %v5687_v23 = vld [vmem:[#allocation2 + $0x1e30] sm:$0xff] }
 0xb74   :  { %5849 = vmatprep.subr.bf16.mxu0 %v5656_v37  ;;  %v5692_v37 = vld [vmem:[#allocation2 + $0x1e58] sm:$0xff] }
 0xb77   :  { %5850 = vmatpush1.bf16.msra.mxu0 %v5655_v25  ;;  %v5691_v25 = vld [vmem:[#allocation2 + $0x1e50] sm:$0xff] }
 0xb78   :  { %5851 = vmatprep.subr.bf16.mxu0 %v5660_v12  ;;  %v5696_v12 = vld [vmem:[#allocation2 + $0x1e78] sm:$0xff] }
 0xb7b   :  { %5852 = vmatpush1.bf16.msra.mxu0 %v5659_v61  ;;  %v5695_v61 = vld [vmem:[#allocation2 + $0x1e70] sm:$0xff] }
 0xb7c   :  { %5853 = vmatprep.subr.bf16.mxu0 %v5664_v20  ;;  %v5700_v20 = vld [vmem:[#allocation2 + $0x1e98] sm:$0xff] }
 0xb7f   :  { %5854 = vmatpush1.bf16.msra.mxu0 %v5663_v46  ;;  %v5699_v46 = vld [vmem:[#allocation2 + $0x1e90] sm:$0xff] }
 0xb80   :  { %5855 = vmatprep.subr.bf16.mxu0 %v5668_v47  ;;  %v5704_v47 = vld [vmem:[#allocation2 + $0x1eb8] sm:$0xff] }
 0xb83   :  { %5856 = vmatpush1.bf16.msra.mxu0 %v5667_v30  ;;  %v5708_v30 = vld [vmem:[#allocation2 + $0x1ed8] sm:$0xff] }
 0xb84   :  { %5857 = vmatprep.subr.bf16.mxu0 %v5672_v57  ;;  %v5712_v57 = vld [vmem:[#allocation2 + $0x1ef8] sm:$0xff] }
 0xb87   :  { %5858 = vmatpush1.bf16.msra.mxu0 %v5671_v4  ;;  %v12466_v4 = vpop.f32.mrb[164].mxu1 }
 0xb88   :  { %5859 = vmatprep.subr.bf16.mxu0 %v5676_v21  ;;  %v5711_v21 = vld [vmem:[#allocation2 + $0x1ef0] sm:$0xff] }
 0xb8b   :  { %5860 = vmatpush1.bf16.msra.mxu0 %v5675_v62  ;;  %v12468_v62 = vpop.f32.mrb[165].mxu1 }
 0xb8c   :  { %5861 = vmatprep.subr.bf16.mxu0 %v5680_v42  ;;  %v5716_v42 = vld [vmem:[#allocation2 + $0x1f18] sm:$0xff] }
 0xb8f   :  { %5862 = vmatpush1.bf16.msra.mxu0 %v5679_v15  ;;  %v12470_v15 = vpop.f32.mrb[166].mxu1 }
 0xb90   :  { %5874 = vmatprep.subr.bf16.mxu0 %v5684_v7  ;;  %v12472_v7 = vpop.f32.mrb[167].mxu1 }
 0xb92   :  { %5864 = vmatmul.mubr.bf16.vlgmr.msra.gmra.mrb[32].mxu0 %v12115_v45  ;;  %v5703_v45 = vld [vmem:[#allocation2 + $0x1eb0] sm:$0xff] }
 0xb93   :  { %5875 = vmatpush1.bf16.msra.mxu0 %v5683_v52  ;;  %5906 = vmatprep.mubr.bf16.mxu0 %v12275_v32  ;;  %v5707_v32 = vld [vmem:[#allocation2 + $0x1ed0] sm:$0xff] }
 0xb94   :  { %5876 = vmatprep.subr.bf16.mxu0 %v5688_v48  ;;  %v5715_v52 = vld [vmem:[#allocation2 + $0x1f10] sm:$0xff] }
 0xb97   :  { %5877 = vmatpush1.bf16.msra.mxu0 %v5687_v23  ;;  %v5720_v23 = vld [vmem:[#allocation2 + $0x1f38] sm:$0xff] }
 0xb98   :  { %5878 = vmatprep.subr.bf16.mxu0 %v5692_v37 }
 0xb9b   :  { %5879 = vmatpush1.bf16.msra.mxu0 %v5691_v25 }
 0xb9c   :  { %5880 = vmatprep.subr.bf16.mxu0 %v5696_v12 }
 0xb9f   :  { %5881 = vmatpush1.bf16.msra.mxu0 %v5695_v61  ;;  %v5719_v61 = vld [vmem:[#allocation2 + $0x1f30] sm:$0xff] }
 0xba0   :  { %5882 = vmatprep.subr.bf16.mxu0 %v5700_v20  ;;  %v5724_v20 = vld [vmem:[#allocation2 + $0x1f58] sm:$0xff] }
 0xba3   :  { %5883 = vmatpush1.bf16.msra.mxu0 %v5699_v46  ;;  %v5723_v46 = vld [vmem:[#allocation2 + $0x1f50] sm:$0xff] }
 0xba4   :  { %5884 = vmatprep.subr.bf16.mxu0 %v5704_v47  ;;  %v5728_v47 = vld [vmem:[#allocation2 + $0x1f78] sm:$0xff] }
 0xba7   :  { %5885 = vmatpush1.bf16.msra.mxu0 %v5703_v45  ;;  %v5727_v45 = vld [vmem:[#allocation2 + $0x1f70] sm:$0xff] }
 0xba8   :  { %5886 = vmatprep.subr.bf16.mxu0 %v5708_v30  ;;  %v5732_v30 = vld [vmem:[#allocation2 + $0x1f98] sm:$0xff] }
 0xbaa   :  { %v6163_v48 = vpop.f32.mrb[168].mxu1 }
 0xbab   :  { %5887 = vmatpush1.bf16.msra.mxu0 %v5707_v32  ;;  %v6165_v37 = vpop.f32.mrb[169].mxu1  ;;  %v5731_v32 = vld [vmem:[#allocation2 + $0x1f90] sm:$0xff] }
 0xbac   :  { %5888 = vmatprep.subr.bf16.mxu0 %v5712_v57  ;;  %v6167_v25 = vpop.f32.mrb[170].mxu1  ;;  %v5736_v57 = vld [vmem:[#allocation2 + $0x1fb8] sm:$0xff] }
 0xbad   :  { %v6168_v12 = vpop.f32.mrb[171].mxu1  ;;  %v5743_v25 = vld [vmem:[#allocation2 + $0x1ff0] sm:$0xff] }
 0xbae   :  { %v3403_v12 = vld [vmem:[#allocation18] ss:$2 sm:$0xf] }
 0xbaf   :  { %5889 = vmatpush1.bf16.msra.mxu0 %v5711_v21  ;;  %v5735_v21 = vld [vmem:[#allocation2 + $0x1fb0] sm:$0xff] }
 0xbb0   :  { %5890 = vmatprep.subr.bf16.mxu0 %v5716_v42  ;;  %v5740_v42 = vld [vmem:[#allocation2 + $0x1fd8] sm:$0xff] }
 0xbb3   :  { %5891 = vmatpush1.bf16.msra.mxu0 %v5715_v52  ;;  %v5739_v52 = vld [vmem:[#allocation2 + $0x1fd0] sm:$0xff] }
 0xbb4   :  { %5892 = vmatprep.subr.bf16.mxu0 %v5720_v23  ;;  %v5744_v23 = vld [vmem:[#allocation2 + $0x1ff8] sm:$0xff] }
 0xbb7   :  { %5893 = vmatpush1.bf16.msra.mxu0 %v5719_v61  ;;  %v3408_v61 = vrot.slane %v3403_v12, %v11668_v8 }
 0xbb8   :  { %5894 = vmatprep.subr.bf16.mxu0 %v5724_v20  ;;  %v3412_v20 = vrot.slane %v3403_v12, %v11671_v13 }
 0xbbb   :  { %5895 = vmatpush1.bf16.msra.mxu0 %v5723_v46  ;;  %v10079_v46 = vadd.f32 %v12434_v51, %v3408_v61 }
 0xbbc   :  { %5896 = vmatprep.subr.bf16.mxu0 %v5728_v47  ;;  %v10081_v47 = vadd.f32 %v12437_v1, %v3412_v20 }
 0xbbf   :  { %5897 = vmatpush1.bf16.msra.mxu0 %v5727_v45 }
 0xbc0   :  { %5898 = vmatprep.subr.bf16.mxu0 %v5732_v30  ;;  %v10083_v30 = vadd.f32 %v12440_v5, %v3408_v61 }
 0xbc3   :  { %5899 = vmatpush1.bf16.msra.mxu0 %v5731_v32 }
 0xbc4   :  { %5900 = vmatprep.subr.bf16.mxu0 %v5736_v57 }
 0xbc7   :  { %5901 = vmatpush1.bf16.msra.mxu0 %v5735_v21  ;;  %v10085_v21 = vadd.f32 %v12442_v18, %v3412_v20  ;;  %v3416_v18 = vrot.slane %v3403_v12, %v12120_v58  ;;  %v3420_v20 = vrot.slane %v3403_v12, %v12123_v60 }
 0xbc8   :  { %5902 = vmatprep.subr.bf16.mxu0 %v5740_v42 }
 0xbcb   :  { %5903 = vmatpush1.bf16.msra.mxu0 %v5739_v52 }
 0xbcc   :  { %5904 = vmatprep.subr.bf16.mxu0 %v5744_v23 }
 0xbcf   :  { %5905 = vmatpush1.bf16.msra.mxu0 %v5743_v25 }
 0xbd2   :  { %5907 = vmatmul.mubr.bf16.vlgmr.msra.gmra.mrb[32].mxu0 %v12273_v6 }
 0xc02   :  { %v6204_v2 = vpop.f32.mrb[172].mxu1 }
 0xc03   :  { %v6206_v51 = vpop.f32.mrb[173].mxu1 }
 0xc04   :  { %v6208_v0 = vpop.f32.mrb[174].mxu1 }
 0xc05   :  { %v6209_v1 = vpop.f32.mrb[175].mxu1  ;;  %v10091_v0 = vadd.f32 %v12470_v15, %v3416_v18 }
 0xc25   :  { %v5822_v45 = vpop.f32.mrb[36].mxu0 }
 0xc26   :  { %v10080_v32 = vadd.f32 %v10079_v46, %v5822_v45  ;;  %v5824_v57 = vpop.f32.mrb[37].mxu0 }
 0xc27   :  { %v10082_v42 = vadd.f32 %v10081_v47, %v5824_v57  ;;  %v5826_v52 = vpop.f32.mrb[38].mxu0  ;;  %v10087_v47 = vadd.f32 %v12466_v4, %v3416_v18 }
 0xc28   :  { %5925 = vst [vmem:[#allocation6] sm:$0xff] %v10080_v32  ;;  %v10084_v6 = vadd.f32 %v10083_v30, %v5826_v52  ;;  %v5828_v23 = vpop.f32.mrb[39].mxu0  ;;  %v10089_v30 = vadd.f32 %v12468_v62, %v3420_v20 }
 0xc29   :  { %5926 = vst [vmem:[#allocation6 + $0x8] sm:$0xff] %v10082_v42  ;;  %v10086_v25 = vadd.f32 %v10085_v21, %v5828_v23 }
 0xc2a   :  { %5929 = vst [vmem:[#allocation6 + $0x20] sm:$0xf] %v10084_v6 }
 0xc2b   :  { %5930 = vst [vmem:[#allocation6 + $0x28] sm:$0xf] %v10086_v25 }
 0xc2f   :  { %v5965_v13 = vld [vmem:[#allocation6] sm:$0x3] }
 0xc30   :  { %v5966_v3 = vld [vmem:[#allocation6 + $0x8] sm:$0x3]  ;;  %v6211_v61 = vadd.f32 %v6163_v48, %v5965_v13 }
 0xc31   :  { %v6212_v5 = vadd.f32 %v6165_v37, %v5966_v3  ;;  %v10093_v3 = vadd.f32 %v12472_v7, %v3420_v20 }
 0xc32   :  { %v9684_v45 = vmul.f32 -1.442695, %v6211_v61 }
 0xc33   :  { %v9685_v46 = vmul.f32 -1.442695, %v6212_v5 }
 0xc35   :  { %10916 = vpow2.f32 %v9685_v46 }
 0xc36   :  { %10918 = vpow2.f32 %v9684_v45 }
 0xc3f   :  { %v10917_v52 = vpop.eup %10916 }
 0xc40   :  { %v10919_v12 = vpop.eup %10918  ;;  %v6224_v4 = vadd.f32 1.0, %v10917_v52 }
 0xc41   :  { %v6218_v62 = vadd.f32 1.0, %v10919_v12 }
 0xc42   :  { %10920 = vrcp.f32 %v6224_v4 }
 0xc43   :  { %10922 = vrcp.f32 %v6218_v62 }
 0xc4c   :  { %v10921_v5 = vpop.eup %10920 }
 0xc4d   :  { %v10923_v61 = vpop.eup %10922  ;;  %v6234_v45 = vmul.f32 0.0, %v10921_v5 }
 0xca5   :  { %v5908_v32 = vpop.f32.mrb[32].mxu0 }
 0xca6   :  { %v10088_v57 = vadd.f32 %v10087_v47, %v5908_v32  ;;  %v5910_v21 = vpop.f32.mrb[33].mxu0 }
 0xca7   :  { %v10090_v13 = vadd.f32 %v10089_v30, %v5910_v21  ;;  %v5912_v48 = vpop.f32.mrb[34].mxu0 }
 0xca8   :  { %5927 = vst [vmem:[#allocation6 + $0x10] sm:$0xff] %v10088_v57  ;;  %v10092_v37 = vadd.f32 %v10091_v0, %v5912_v48  ;;  %v5914_v42 = vpop.f32.mrb[35].mxu0  ;;  %v13325_v57 = vmov 0  }
 0xca9   :  { %5928 = vst [vmem:[#allocation6 + $0x18] sm:$0xff] %v10090_v13  ;;  %v10094_v6 = vadd.f32 %v10093_v3, %v5914_v42 }
 0xcaa   :  { %5931 = vst [vmem:[#allocation6 + $0x30] sm:$0xf] %v10092_v37 }
 0xcab   :  { %5932 = vst [vmem:[#allocation6 + $0x38] sm:$0xf] %v10094_v6 }
 0xcaf   :  { %v5967_v23 = vld [vmem:[#allocation6 + $0x10] sm:$0x3]  ;;  %v6242_v52 = vld [vmem:[#allocation6 + $0x10] sm:$0xc] }
 0xcb0   :  { %v6213_v15 = vadd.f32 %v6204_v2, %v5967_v23  ;;  %v5968_v25 = vld [vmem:[#allocation6 + $0x18] sm:$0x3]  ;;  %v6243_v62 = vld [vmem:[#allocation6 + $0x18] sm:$0xc] }
 0xcb1   :  { %v6214_v1 = vadd.f32 %v6206_v51, %v5968_v25 }
 0xcb2   :  { %10924 = vtanh.f32 %v6213_v15 }
 0xcb3   :  { %v9686_v7 = vmul.f32 -1.442695, %v6214_v1 }
 0xcb5   :  { %10926 = vpow2.f32 %v9686_v7 }
 0xcbc   :  { %v10925_v46 = vpop.eup %10924 }
 0xcbd   :  { %v6235_v18 = vmul.f32 %v10925_v46, %v10923_v61 }
 0xcbf   :  { %v10927_v20 = vpop.eup %10926  ;;  %v12487_v47 = vadd.f32 %v6235_v18, %v6234_v45 }
 0xcc0   :  { %v6231_v30 = vadd.f32 1.0, %v10927_v20 }
 0xcc1   :  { %10928 = vtanh.f32 %v12487_v47 }
 0xcc2   :  { %10930 = vrcp.f32 %v6231_v30 }
 0xccb   :  { %v10929_v32 = vpop.eup %10928 }
 0xccc   :  { %v10931_v2 = vpop.eup %10930 }
 0xccd   :  { %v6238_v0 = vmul.f32 %v10931_v2, %v10929_v32  ;;  %v12544_v2 = vld [vmem:[#allocation17 + $0x4] ss:$16 sps:$4 sm:$0xff]  }
 0xccf   :  { %6239 = vst [vmem:[#allocation8] sm:$0x3] %v6238_v0  ;;  %v6244_v51 = vpack.c.bf16 %v6238_v0, %v6238_v0  ;;  %v12547_v0 = vld [vmem:[#allocation17] ss:$16 sps:$4 sm:$0xff]  }
 0xcd1   :  { %6278 = vmatmul.mubr.bf16.vlgmr.msra.gmra.mrb[176].mxu1 %v6244_v51 }
 0xcd2   :  { %6287 = vmatpush1.bf16.msra.mxu1 %v12389_v26  ;;  %6318 = vmatprep.mubr.bf16.mxu1 %v13325_v57 }
 0xcd3   :  { %6288 = vmatprep.subr.bf16.mxu1 %v12393_v59 }
 0xcd6   :  { %6289 = vmatpush1.bf16.msra.mxu1 %v12395_v19 }
 0xcd7   :  { %6290 = vmatprep.subr.bf16.mxu1 %v12399_v11 }
 0xcda   :  { %6291 = vmatpush1.bf16.msra.mxu1 %v12401_v34 }
 0xcdb   :  { %6292 = vmatprep.subr.bf16.mxu1 %v12405_v63 }
 0xcde   :  { %6293 = vmatpush1.bf16.msra.mxu1 %v12407_v33 }
 0xcdf   :  { %6294 = vmatprep.subr.bf16.mxu1 %v12411_v31 }
 0xce2   :  { %6295 = vmatpush1.bf16.msra.mxu1 %v12413_v44 }
 0xce3   :  { %6296 = vmatprep.subr.bf16.mxu1 %v12417_v22 }
 0xce6   :  { %6297 = vmatpush1.bf16.msra.mxu1 %v12419_v27 }
 0xce7   :  { %6298 = vmatprep.subr.bf16.mxu1 %v12423_v16 }
 0xcea   :  { %6299 = vmatpush1.bf16.msra.mxu1 %v12425_v56 }
 0xceb   :  { %6300 = vmatprep.subr.bf16.mxu1 %v12430_v28 }
 0xcee   :  { %6301 = vmatpush1.bf16.msra.mxu1 %v12432_v49 }
 0xcef   :  { %6379 = vmatprep.subr.bf16.mxu1 %v12331_v24 }
 0xcf1   :  { %6319 = vmatmul.mubr.bf16.vlgmr.msra.gmra.mrb[180].mxu1 %v6244_v51  ;;  %v12551_v51 = vld [vmem:[#allocation17 + $0x24] ss:$16 sps:$4 sm:$0xff]  }
 0xcf2   :  { %6380 = vmatpush1.bf16.msra.mxu1 %v12333_v40  ;;  %6411 = vmatprep.mubr.bf16.mxu1 %v13325_v57 }
 0xcf3   :  { %6381 = vmatprep.subr.bf16.mxu1 %v12338_v36 }
 0xcf6   :  { %6382 = vmatpush1.bf16.msra.mxu1 %v12341_v41 }
 0xcf7   :  { %6383 = vmatprep.subr.bf16.mxu1 %v12345_v50  ;;  %v6241_v50 = vld [vmem:[#allocation6 + $0x8] sm:$0xc] }
 0xcfa   :  { %6384 = vmatpush1.bf16.msra.mxu1 %v12347_v35 }
 0xcfb   :  { %6385 = vmatprep.subr.bf16.mxu1 %v12351_v38 }
 0xcfe   :  { %6386 = vmatpush1.bf16.msra.mxu1 %v12353_v17 }
 0xcff   :  { %6387 = vmatprep.subr.bf16.mxu1 %v12357_v53 }
 0xd02   :  { %6388 = vmatpush1.bf16.msra.mxu1 %v12359_v39  ;;  %v6240_v39 = vld [vmem:[#allocation6] sm:$0xc] }
 0xd03   :  { %6389 = vmatprep.subr.bf16.mxu1 %v12363_v29 }
 0xd06   :  { %6390 = vmatpush1.bf16.msra.mxu1 %v12365_v55 }
 0xd07   :  { %6391 = vmatprep.subr.bf16.mxu1 %v12370_v9 }
 0xd0a   :  { %6392 = vmatpush1.bf16.msra.mxu1 %v12373_v10 }
 0xd0b   :  { %6393 = vmatprep.subr.bf16.mxu1 %v12377_v14 }
 0xd0e   :  { %6394 = vmatpush1.bf16.msra.mxu1 %v12379_v54  ;;  %v6363_v54 = vrot.slane %v12487_v47, 6 }
 0xd0f   :  { %6420 = vmatprep.subr.bf16.mxu1 %v12387_v43 }
 0xda4   :  { %v6279_v24 = vpop.f32.mrb[176].mxu1 }
 0xda5   :  { %v6281_v40 = vpop.f32.mrb[177].mxu1  ;;  %v6331_v53 = vrot.slane %v6279_v24, 6  ;;  %v12554_v24 = vld [vmem:[#allocation17 + $0x20] ss:$16 sps:$4 sm:$0xff]  }
 0xda6   :  { %v6332_v36 = vrot.slane %v6281_v40, 6  ;;  %v6283_v41 = vpop.f32.mrb[178].mxu1  ;;  %v12557_v40 = vld [vmem:[#allocation17 + $0x44] ss:$16 sps:$4 sm:$0xff]  }
 0xda7   :  { %v6284_v35 = vpop.f32.mrb[179].mxu1  ;;  %v6339_v29 = vadd.f32 %v6331_v53, %v6240_v39  ;;  %v12563_v41 = vld [vmem:[#allocation17 + $0x64] ss:$16 sps:$4 sm:$0xff]   ;;  %v12578_v53 = vld [vmem:[#allocation17 + $0xa0] ss:$16 sps:$4 sm:$0xff]  }
 0xda8   :  { %v6340_v38 = vadd.f32 %v6332_v36, %v6241_v50  ;;  %v12560_v36 = vld [vmem:[#allocation17 + $0x40] ss:$16 sps:$4 sm:$0xff]   ;;  %v12569_v35 = vld [vmem:[#allocation17 + $0x84] ss:$16 sps:$4 sm:$0xff]  }
 0xda9   :  { %v9687_v55 = vmul.f32 -1.442695, %v6339_v29  ;;  %v12566_v50 = vld [vmem:[#allocation17 + $0x60] ss:$16 sps:$4 sm:$0xff]   ;;  %v12581_v39 = vld [vmem:[#allocation17 + $0xc4] ss:$16 sps:$4 sm:$0xff]  }
 0xdaa   :  { %v9688_v17 = vmul.f32 -1.442695, %v6340_v38  ;;  %v12572_v38 = vld [vmem:[#allocation17 + $0x80] ss:$16 sps:$4 sm:$0xff]  }
 0xdab   :  { %v12584_v29 = vld [vmem:[#allocation17 + $0xc0] ss:$16 sps:$4 sm:$0xff]  }
 0xdac   :  { %10932 = vpow2.f32 %v9688_v17  ;;  %v12575_v17 = vld [vmem:[#allocation17 + $0xa4] ss:$16 sps:$4 sm:$0xff]  }
 0xdad   :  { %10934 = vpow2.f32 %v9687_v55  ;;  %v12587_v55 = vld [vmem:[#allocation17 + $0xe4] ss:$16 sps:$4 sm:$0xff]  }
 0xdb6   :  { %v10933_v9 = vpop.eup %10932 }
 0xdb7   :  { %v6352_v10 = vadd.f32 1.0, %v10933_v9  ;;  %v10935_v14 = vpop.eup %10934  ;;  %v12590_v9 = vld [vmem:[#allocation17 + $0xe0] ss:$16 sps:$4 sm:$0xff]  }
 0xdb8   :  { %v6346_v3 = vadd.f32 1.0, %v10935_v14 }
 0xdb9   :  { %10936 = vrcp.f32 %v6352_v10 }
 0xdba   :  { %10938 = vrcp.f32 %v6346_v3  ;;  %v6372_v3 = vld [vmem:[#allocation6 + $0x8] sm:$0x30] }
 0xdc3   :  { %v10937_v21 = vpop.eup %10936 }
 0xdc4   :  { %v6365_v13 = vmul.f32 %v10937_v21, %v6363_v54  ;;  %v6320_v48 = vpop.f32.mrb[180].mxu1  ;;  %v10939_v1 = vpop.eup %10938 }
 0xdc5   :  { %v6333_v37 = vrot.slane %v6320_v48, 6  ;;  %v6322_v42 = vpop.f32.mrb[181].mxu1 }
 0xdc6   :  { %v6334_v6 = vrot.slane %v6322_v42, 6  ;;  %v6324_v12 = vpop.f32.mrb[182].mxu1 }
 0xdc7   :  { %v6341_v4 = vadd.f32 %v6333_v37, %v6242_v52  ;;  %v6325_v23 = vpop.f32.mrb[183].mxu1  ;;  %v6371_v52 = vld [vmem:[#allocation6] sm:$0x30] }
 0xdc8   :  { %v6342_v15 = vadd.f32 %v6334_v6, %v6243_v62 }
 0xdc9   :  { %10940 = vtanh.f32 %v6341_v4 }
 0xdca   :  { %v9689_v25 = vmul.f32 -1.442695, %v6342_v15 }
 0xdcc   :  { %10942 = vpow2.f32 %v9689_v25 }
 0xdd3   :  { %v10941_v7 = vpop.eup %10940 }
 0xdd4   :  { %v6366_v5 = vmul.f32 %v10941_v7, %v10939_v1 }
 0xdd6   :  { %v10943_v61 = vpop.eup %10942  ;;  %v12525_v46 = vadd.f32 %v6366_v5, %v6365_v13 }
 0xdd7   :  { %v6359_v45 = vadd.f32 1.0, %v10943_v61 }
 0xdd8   :  { %10944 = vtanh.f32 %v12525_v46  ;;  %v6497_v15 = vrot.slane %v12525_v46, 6 }
 0xdd9   :  { %10946 = vrcp.f32 %v6359_v45 }
 0xde2   :  { %v10945_v18 = vpop.eup %10944 }
 0xde3   :  { %v10947_v20 = vpop.eup %10946 }
 0xde4   :  { %v6369_v47 = vmul.f32 %v10947_v20, %v10945_v18  ;;  %v6373_v18 = vld [vmem:[#allocation6 + $0x10] sm:$0x30] }
 0xde6   :  { %6370 = vst [vmem:[#allocation8] sm:$0xc] %v6369_v47  ;;  %v6375_v30 = vpack.c.bf16 %v6369_v47, %v6369_v47 }
 0xde8   :  { %v6377_v32 = vrot.slane %v6375_v30, 1 }
 0xdea   :  { %6412 = vmatmul.mubr.bf16.vlgmr.msra.gmra.mrb[184].mxu1 %v6377_v32 }
 0xdeb   :  { %6421 = vmatpush1.bf16.msra.mxu1 %v12389_v26  ;;  %6452 = vmatprep.mubr.bf16.mxu1 %v13325_v57 }
 0xdec   :  { %6422 = vmatprep.subr.bf16.mxu1 %v12393_v59 }
 0xdef   :  { %6423 = vmatpush1.bf16.msra.mxu1 %v12395_v19 }
 0xdf0   :  { %6424 = vmatprep.subr.bf16.mxu1 %v12399_v11 }
 0xdf3   :  { %6425 = vmatpush1.bf16.msra.mxu1 %v12401_v34 }
 0xdf4   :  { %6426 = vmatprep.subr.bf16.mxu1 %v12405_v63 }
 0xdf7   :  { %6427 = vmatpush1.bf16.msra.mxu1 %v12407_v33 }
 0xdf8   :  { %6428 = vmatprep.subr.bf16.mxu1 %v12411_v31 }
 0xdfb   :  { %6429 = vmatpush1.bf16.msra.mxu1 %v12413_v44 }
 0xdfc   :  { %6430 = vmatprep.subr.bf16.mxu1 %v12417_v22 }
 0xdff   :  { %6431 = vmatpush1.bf16.msra.mxu1 %v12419_v27 }
 0xe00   :  { %6432 = vmatprep.subr.bf16.mxu1 %v12423_v16 }
 0xe03   :  { %6433 = vmatpush1.bf16.msra.mxu1 %v12425_v56 }
 0xe04   :  { %6434 = vmatprep.subr.bf16.mxu1 %v12430_v28 }
 0xe07   :  { %6435 = vmatpush1.bf16.msra.mxu1 %v12432_v49 }
 0xe08   :  { %6513 = vmatprep.subr.bf16.mxu1 %v12544_v2 }
 0xe0a   :  { %6453 = vmatmul.mubr.bf16.vlgmr.msra.gmra.mrb[188].mxu1 %v6377_v32  ;;  %v6374_v32 = vld [vmem:[#allocation6 + $0x18] sm:$0x30] }
 0xe0b   :  { %6514 = vmatpush1.bf16.msra.mxu1 %v12547_v0  ;;  %6545 = vmatprep.mubr.bf16.mxu1 %v13325_v57 }
 0xe0c   :  { %6515 = vmatprep.subr.bf16.mxu1 %v12551_v51 }
 0xe0f   :  { %6516 = vmatpush1.bf16.msra.mxu1 %v12554_v24 }
 0xe10   :  { %6517 = vmatprep.subr.bf16.mxu1 %v12557_v40 }
 0xe13   :  { %6518 = vmatpush1.bf16.msra.mxu1 %v12560_v36 }
 0xe14   :  { %6519 = vmatprep.subr.bf16.mxu1 %v12563_v41 }
 0xe17   :  { %6520 = vmatpush1.bf16.msra.mxu1 %v12566_v50 }
 0xe18   :  { %6521 = vmatprep.subr.bf16.mxu1 %v12569_v35 }
 0xe1b   :  { %6522 = vmatpush1.bf16.msra.mxu1 %v12572_v38 }
 0xe1c   :  { %6523 = vmatprep.subr.bf16.mxu1 %v12575_v17 }
 0xe1f   :  { %6524 = vmatpush1.bf16.msra.mxu1 %v12578_v53 }
 0xe20   :  { %6525 = vmatprep.subr.bf16.mxu1 %v12581_v39 }
 0xe23   :  { %6526 = vmatpush1.bf16.msra.mxu1 %v12584_v29 }
 0xe24   :  { %6527 = vmatprep.subr.bf16.mxu1 %v12587_v55 }
 0xe27   :  { %6528 = vmatpush1.bf16.msra.mxu1 %v12590_v9 }
 0xe28   :  { %6554 = vmatprep.subr.bf16.mxu1 %v12387_v43 }
 0xebd   :  { %v6413_v10 = vpop.f32.mrb[184].mxu1 }
 0xebe   :  { %v6415_v14 = vpop.f32.mrb[185].mxu1  ;;  %v6465_v42 = vrot.slane %v6413_v10, 4 }
 0xebf   :  { %v6466_v54 = vrot.slane %v6415_v14, 4  ;;  %v6417_v21 = vpop.f32.mrb[186].mxu1 }
 0xec0   :  { %v6418_v13 = vpop.f32.mrb[187].mxu1  ;;  %v6473_v6 = vadd.f32 %v6465_v42, %v6371_v52 }
 0xec1   :  { %v6474_v48 = vadd.f32 %v6466_v54, %v6372_v3 }
 0xec2   :  { %v9690_v12 = vmul.f32 -1.442695, %v6473_v6 }
 0xec3   :  { %v9691_v37 = vmul.f32 -1.442695, %v6474_v48 }
 0xec5   :  { %10948 = vpow2.f32 %v9691_v37 }
 0xec6   :  { %10950 = vpow2.f32 %v9690_v12 }
 0xecf   :  { %v10949_v4 = vpop.eup %10948 }
 0xed0   :  { %v6486_v62 = vadd.f32 1.0, %v10949_v4  ;;  %v10951_v23 = vpop.eup %10950 }
 0xed1   :  { %v6480_v1 = vadd.f32 1.0, %v10951_v23 }
 0xed2   :  { %10952 = vrcp.f32 %v6486_v62 }
 0xed3   :  { %10954 = vrcp.f32 %v6480_v1 }
 0xedc   :  { %v10953_v25 = vpop.eup %10952 }
 0xedd   :  { %v6499_v7 = vmul.f32 %v10953_v25, %v6497_v15  ;;  %v6454_v5 = vpop.f32.mrb[188].mxu1  ;;  %v10955_v21 = vpop.eup %10954 }
 0xede   :  { %v6467_v61 = vrot.slane %v6454_v5, 4  ;;  %v6456_v45 = vpop.f32.mrb[189].mxu1  ;;  %v6507_v5 = vld [vmem:[#allocation6 + $0x10] sm:$0xc0] }
 0xedf   :  { %v6468_v20 = vrot.slane %v6456_v45, 4  ;;  %v6458_v47 = vpop.f32.mrb[190].mxu1 }
 0xee0   :  { %v6475_v30 = vadd.f32 %v6467_v61, %v6373_v18  ;;  %v6459_v10 = vpop.f32.mrb[191].mxu1 }
 0xee1   :  { %v6476_v14 = vadd.f32 %v6468_v20, %v6374_v32  ;;  %v6508_v20 = vld [vmem:[#allocation6 + $0x18] sm:$0xc0] }
 0xee2   :  { %10956 = vtanh.f32 %v6475_v30 }
 0xee3   :  { %v9692_v54 = vmul.f32 -1.442695, %v6476_v14 }
 0xee5   :  { %10958 = vpow2.f32 %v9692_v54 }
 0xeec   :  { %v10957_v3 = vpop.eup %10956 }
 0xeed   :  { %v6500_v46 = vmul.f32 %v10957_v3, %v10955_v21 }
 0xeef   :  { %v10959_v13 = vpop.eup %10958  ;;  %v12595_v48 = vadd.f32 %v6500_v46, %v6499_v7 }
 0xef0   :  { %v6493_v37 = vadd.f32 1.0, %v10959_v13 }
 0xef1   :  { %10960 = vtanh.f32 %v12595_v48 }
 0xef2   :  { %10962 = vrcp.f32 %v6493_v37 }
 0xefb   :  { %v10961_v42 = vpop.eup %10960 }
 0xefc   :  { %v10963_v52 = vpop.eup %10962 }
 0xefd   :  { %v6503_v6 = vmul.f32 %v10963_v52, %v10961_v42 }
 0xeff   :  { %6504 = vst [vmem:[#allocation8] sm:$0x30] %v6503_v6  ;;  %v6509_v12 = vpack.c.bf16 %v6503_v6, %v6503_v6  ;;  %v12636_v6 = vld [vmem:[#allocation17 + $0x8] ss:$16 sps:$4 sm:$0xff]  }
 0xf01   :  { %v6511_v4 = vrot.slane %v6509_v12, 2  ;;  %v12640_v12 = vld [vmem:[#allocation17 + $0x2c] ss:$16 sps:$4 sm:$0xff]  }
 0xf03   :  { %6546 = vmatmul.mubr.bf16.vlgmr.msra.gmra.mrb[192].mxu1 %v6511_v4 }
 0xf04   :  { %6555 = vmatpush1.bf16.msra.mxu1 %v12389_v26  ;;  %6586 = vmatprep.mubr.bf16.mxu1 %v13325_v57 }
 0xf05   :  { %6556 = vmatprep.subr.bf16.mxu1 %v12393_v59 }
 0xf08   :  { %6557 = vmatpush1.bf16.msra.mxu1 %v12395_v19 }
 0xf09   :  { %6558 = vmatprep.subr.bf16.mxu1 %v12399_v11 }
 0xf0c   :  { %6559 = vmatpush1.bf16.msra.mxu1 %v12401_v34  ;;  %v6506_v34 = vld [vmem:[#allocation6 + $0x8] sm:$0xc0] }
 0xf0d   :  { %6560 = vmatprep.subr.bf16.mxu1 %v12405_v63 }
 0xf10   :  { %6561 = vmatpush1.bf16.msra.mxu1 %v12407_v33 }
 0xf11   :  { %6562 = vmatprep.subr.bf16.mxu1 %v12411_v31 }
 0xf14   :  { %6563 = vmatpush1.bf16.msra.mxu1 %v12413_v44 }
 0xf15   :  { %6564 = vmatprep.subr.bf16.mxu1 %v12417_v22  ;;  %v6505_v22 = vld [vmem:[#allocation6] sm:$0xc0] }
 0xf18   :  { %6565 = vmatpush1.bf16.msra.mxu1 %v12419_v27 }
 0xf19   :  { %6566 = vmatprep.subr.bf16.mxu1 %v12423_v16 }
 0xf1c   :  { %6567 = vmatpush1.bf16.msra.mxu1 %v12425_v56 }
 0xf1d   :  { %6568 = vmatprep.subr.bf16.mxu1 %v12430_v28 }
 0xf20   :  { %6569 = vmatpush1.bf16.msra.mxu1 %v12432_v49 }
 0xf21   :  { %6647 = vmatprep.subr.bf16.mxu1 %v12544_v2 }
 0xf23   :  { %6587 = vmatmul.mubr.bf16.vlgmr.msra.gmra.mrb[196].mxu1 %v6511_v4  ;;  %v12643_v4 = vld [vmem:[#allocation17 + $0x28] ss:$16 sps:$4 sm:$0xff]  }
 0xf24   :  { %6648 = vmatpush1.bf16.msra.mxu1 %v12547_v0  ;;  %6679 = vmatprep.mubr.bf16.mxu1 %v13325_v57 }
 0xf25   :  { %6649 = vmatprep.subr.bf16.mxu1 %v12551_v51 }
 0xf28   :  { %6650 = vmatpush1.bf16.msra.mxu1 %v12554_v24 }
 0xf29   :  { %6651 = vmatprep.subr.bf16.mxu1 %v12557_v40 }
 0xf2c   :  { %6652 = vmatpush1.bf16.msra.mxu1 %v12560_v36 }
 0xf2d   :  { %6653 = vmatprep.subr.bf16.mxu1 %v12563_v41 }
 0xf30   :  { %6654 = vmatpush1.bf16.msra.mxu1 %v12566_v50 }
 0xf31   :  { %6655 = vmatprep.subr.bf16.mxu1 %v12569_v35 }
 0xf34   :  { %6656 = vmatpush1.bf16.msra.mxu1 %v12572_v38 }
 0xf35   :  { %6657 = vmatprep.subr.bf16.mxu1 %v12575_v17 }
 0xf38   :  { %6658 = vmatpush1.bf16.msra.mxu1 %v12578_v53 }
 0xf39   :  { %6659 = vmatprep.subr.bf16.mxu1 %v12581_v39 }
 0xf3c   :  { %6660 = vmatpush1.bf16.msra.mxu1 %v12584_v29 }
 0xf3d   :  { %6661 = vmatprep.subr.bf16.mxu1 %v12587_v55 }
 0xf40   :  { %6662 = vmatpush1.bf16.msra.mxu1 %v12590_v9 }
 0xf41   :  { %6688 = vmatprep.subr.bf16.mxu1 %v12387_v43  ;;  %v6631_v43 = vrot.slane %v12595_v48, 6 }
 0xfd6   :  { %v6547_v26 = vpop.f32.mrb[192].mxu1 }
 0xfd7   :  { %v6549_v59 = vpop.f32.mrb[193].mxu1  ;;  %v6599_v44 = vrot.slane %v6547_v26, 2  ;;  %v12646_v26 = vld [vmem:[#allocation17 + $0x4c] ss:$16 sps:$4 sm:$0xff]  }
 0xfd8   :  { %v6600_v19 = vrot.slane %v6549_v59, 2  ;;  %v6551_v11 = vpop.f32.mrb[194].mxu1  ;;  %v12649_v59 = vld [vmem:[#allocation17 + $0x48] ss:$16 sps:$4 sm:$0xff]  }
 0xfd9   :  { %v6552_v63 = vpop.f32.mrb[195].mxu1  ;;  %v6607_v27 = vadd.f32 %v6599_v44, %v6505_v22  ;;  %v12655_v11 = vld [vmem:[#allocation17 + $0x68] ss:$16 sps:$4 sm:$0xff]   ;;  %v12670_v44 = vld [vmem:[#allocation17 + $0xcc] ss:$16 sps:$4 sm:$0xff]  }
 0xfda   :  { %v6608_v33 = vadd.f32 %v6600_v19, %v6506_v34  ;;  %v12652_v19 = vld [vmem:[#allocation17 + $0x6c] ss:$16 sps:$4 sm:$0xff]   ;;  %v12661_v63 = vld [vmem:[#allocation17 + $0x88] ss:$16 sps:$4 sm:$0xff]  }
 0xfdb   :  { %v9693_v16 = vmul.f32 -1.442695, %v6607_v27  ;;  %v12658_v34 = vld [vmem:[#allocation17 + $0x8c] ss:$16 sps:$4 sm:$0xff]   ;;  %v12673_v22 = vld [vmem:[#allocation17 + $0xc8] ss:$16 sps:$4 sm:$0xff]  }
 0xfdc   :  { %v9694_v31 = vmul.f32 -1.442695, %v6608_v33  ;;  %v12664_v33 = vld [vmem:[#allocation17 + $0xac] ss:$16 sps:$4 sm:$0xff]  }
 0xfdd   :  { %v12676_v27 = vld [vmem:[#allocation17 + $0xec] ss:$16 sps:$4 sm:$0xff]  }
 0xfde   :  { %10964 = vpow2.f32 %v9694_v31  ;;  %v12667_v31 = vld [vmem:[#allocation17 + $0xa8] ss:$16 sps:$4 sm:$0xff]  }
 0xfdf   :  { %10966 = vpow2.f32 %v9693_v16  ;;  %v12679_v16 = vld [vmem:[#allocation17 + $0xe8] ss:$16 sps:$4 sm:$0xff]  }
 0xfe8   :  { %v10965_v56 = vpop.eup %10964 }
 0xfe9   :  { %v6620_v28 = vadd.f32 1.0, %v10965_v56  ;;  %v10967_v49 = vpop.eup %10966 }
 0xfea   :  { %v6614_v23 = vadd.f32 1.0, %v10967_v49  ;;  %v6641_v49 = vld [vmem:[#allocation6 + $0x30] sm:$0x3] }
 0xfeb   :  { %10968 = vrcp.f32 %v6620_v28 }
 0xfec   :  { %10970 = vrcp.f32 %v6614_v23  ;;  %v6642_v23 = vld [vmem:[#allocation6 + $0x38] sm:$0x3] }
 0xff5   :  { %v10969_v62 = vpop.eup %10968 }
 0xff6   :  { %v6633_v15 = vmul.f32 %v10969_v62, %v6631_v43  ;;  %v6588_v25 = vpop.f32.mrb[196].mxu1  ;;  %v10971_v10 = vpop.eup %10970 }
 0xff7   :  { %v6601_v1 = vrot.slane %v6588_v25, 2  ;;  %v6590_v7 = vpop.f32.mrb[197].mxu1 }
 0xff8   :  { %v6602_v61 = vrot.slane %v6590_v7, 2  ;;  %v6592_v45 = vpop.f32.mrb[198].mxu1 }
 0xff9   :  { %v6609_v18 = vadd.f32 %v6601_v1, %v6507_v5  ;;  %v6593_v47 = vpop.f32.mrb[199].mxu1 }
 0xffa   :  { %v6610_v30 = vadd.f32 %v6602_v61, %v6508_v20 }
 0xffb   :  { %10972 = vtanh.f32 %v6609_v18 }
 0xffc   :  { %v9695_v32 = vmul.f32 -1.442695, %v6610_v30 }
 0xffe   :  { %10974 = vpow2.f32 %v9695_v32 }
0x1005   :  { %v10973_v14 = vpop.eup %10972 }
0x1006   :  { %v6634_v54 = vmul.f32 %v10973_v14, %v10971_v10 }
0x1008   :  { %v10975_v21 = vpop.eup %10974  ;;  %v12633_v3 = vadd.f32 %v6634_v54, %v6633_v15 }
0x1009   :  { %v6627_v46 = vadd.f32 1.0, %v10975_v21  ;;  %v10768_v21 = vld [vmem:[#allocation17 + $0x104] ss:$16 sps:$4 sm:$0xff]  }
0x100a   :  { %10976 = vtanh.f32 %v12633_v3 }
0x100b   :  { %10978 = vrcp.f32 %v6627_v46  ;;  %v10771_v46 = vld [vmem:[#allocation17 + $0x124] ss:$16 sps:$4 sm:$0xff]  }
0x1014   :  { %v10977_v13 = vpop.eup %10976 }
0x1015   :  { %v10979_v48 = vpop.eup %10978 }
0x1016   :  { %v6637_v37 = vmul.f32 %v10979_v48, %v10977_v13  ;;  %v10769_v13 = vld [vmem:[#allocation17 + $0x120] ss:$16 sps:$4 sm:$0xff]   ;;  %v10774_v48 = vld [vmem:[#allocation17 + $0x144] ss:$16 sps:$4 sm:$0xff]  }
0x1018   :  { %6638 = vst [vmem:[#allocation8] sm:$0xc0] %v6637_v37  ;;  %v6643_v42 = vpack.c.bf16 %v6637_v37, %v6637_v37  ;;  %v10772_v37 = vld [vmem:[#allocation17 + $0x140] ss:$16 sps:$4 sm:$0xff]  }
0x101a   :  { %v6645_v52 = vrot.slane %v6643_v42, 3  ;;  %v10777_v42 = vld [vmem:[#allocation17 + $0x164] ss:$16 sps:$4 sm:$0xff]  }
0x101c   :  { %6680 = vmatmul.mubr.bf16.vlgmr.msra.gmra.mrb[200].mxu1 %v6645_v52 }
0x101d   :  { %6689 = vmatpush1.bf16.msra.mxu1 %v12636_v6  ;;  %6720 = vmatprep.mubr.bf16.mxu1 %v13325_v57 }
0x101e   :  { %6690 = vmatprep.subr.bf16.mxu1 %v12640_v12 }
0x1021   :  { %6691 = vmatpush1.bf16.msra.mxu1 %v12643_v4 }
0x1022   :  { %6692 = vmatprep.subr.bf16.mxu1 %v12646_v26 }
0x1025   :  { %6693 = vmatpush1.bf16.msra.mxu1 %v12649_v59 }
0x1026   :  { %6694 = vmatprep.subr.bf16.mxu1 %v12652_v19 }
0x1029   :  { %6695 = vmatpush1.bf16.msra.mxu1 %v12655_v11 }
0x102a   :  { %6696 = vmatprep.subr.bf16.mxu1 %v12658_v34 }
0x102d   :  { %6697 = vmatpush1.bf16.msra.mxu1 %v12661_v63 }
0x102e   :  { %6698 = vmatprep.subr.bf16.mxu1 %v12664_v33 }
0x1031   :  { %6699 = vmatpush1.bf16.msra.mxu1 %v12667_v31 }
0x1032   :  { %6700 = vmatprep.subr.bf16.mxu1 %v12670_v44 }
0x1035   :  { %6701 = vmatpush1.bf16.msra.mxu1 %v12673_v22 }
0x1036   :  { %6702 = vmatprep.subr.bf16.mxu1 %v12676_v27 }
0x1039   :  { %6703 = vmatpush1.bf16.msra.mxu1 %v12679_v16 }
0x103a   :  { %6766 = vmatprep.subr.bf16.mxu1 %v12544_v2  ;;  %v11159_v2 = vld [vmem:[#allocation17 + $0xc] ss:$16 sps:$4 sm:$0xff]  }
0x103c   :  { %6721 = vmatmul.mubr.bf16.vlgmr.msra.gmra.mrb[204].mxu1 %v6645_v52  ;;  %v10775_v52 = vld [vmem:[#allocation17 + $0x160] ss:$16 sps:$4 sm:$0xff]  }
0x103d   :  { %6767 = vmatpush1.bf16.msra.mxu1 %v12547_v0  ;;  %6798 = vmatprep.mubr.bf16.mxu1 %v13325_v57 }
0x103e   :  { %6768 = vmatprep.subr.bf16.mxu1 %v12551_v51  ;;  %v6640_v51 = vld [vmem:[#allocation6 + $0x28] sm:$0x3] }
0x1041   :  { %6769 = vmatpush1.bf16.msra.mxu1 %v12554_v24 }
0x1042   :  { %6770 = vmatprep.subr.bf16.mxu1 %v12557_v40 }
0x1045   :  { %6771 = vmatpush1.bf16.msra.mxu1 %v12560_v36 }
0x1046   :  { %6772 = vmatprep.subr.bf16.mxu1 %v12563_v41 }
0x1049   :  { %6773 = vmatpush1.bf16.msra.mxu1 %v12566_v50 }
0x104a   :  { %6774 = vmatprep.subr.bf16.mxu1 %v12569_v35  ;;  %v6639_v35 = vld [vmem:[#allocation6 + $0x20] sm:$0x3] }
0x104d   :  { %6775 = vmatpush1.bf16.msra.mxu1 %v12572_v38 }
0x104e   :  { %6776 = vmatprep.subr.bf16.mxu1 %v12575_v17 }
0x1051   :  { %6777 = vmatpush1.bf16.msra.mxu1 %v12578_v53 }
0x1052   :  { %6778 = vmatprep.subr.bf16.mxu1 %v12581_v39 }
0x1055   :  { %6779 = vmatpush1.bf16.msra.mxu1 %v12584_v29 }
0x1056   :  { %6780 = vmatprep.subr.bf16.mxu1 %v12587_v55  ;;  %v6753_v55 = vrot.slane %v12633_v3, 6  ;;  %v10766_v3 = vld [vmem:[#allocation17 + $0x100] ss:$16 sps:$4 sm:$0xff]  }
0x1059   :  { %6781 = vmatpush1.bf16.msra.mxu1 %v12590_v9 }
0x105a   :  { %6807 = vmatprep.subr.bf16.mxu1 %v11159_v2 }
0x10ef   :  { %v6681_v0 = vpop.f32.mrb[200].mxu1 }
0x10f0   :  { %v6683_v24 = vpop.f32.mrb[201].mxu1  ;;  %v6729_v38 = vadd.f32 %v6681_v0, %v6639_v35 }
0x10f1   :  { %v6730_v40 = vadd.f32 %v6683_v24, %v6640_v51  ;;  %v6685_v36 = vpop.f32.mrb[202].mxu1  ;;  %v6761_v24 = vld [vmem:[#allocation6 + $0x20] sm:$0xc] }
0x10f2   :  { %v6686_v41 = vpop.f32.mrb[203].mxu1  ;;  %v9696_v17 = vmul.f32 -1.442695, %v6729_v38 }
0x10f3   :  { %v9697_v50 = vmul.f32 -1.442695, %v6730_v40 }
0x10f5   :  { %10980 = vpow2.f32 %v9697_v50 }
0x10f6   :  { %10982 = vpow2.f32 %v9696_v17 }
0x10ff   :  { %v10981_v53 = vpop.eup %10980 }
0x1100   :  { %v6742_v39 = vadd.f32 1.0, %v10981_v53  ;;  %v10983_v29 = vpop.eup %10982 }
0x1101   :  { %v6736_v56 = vadd.f32 1.0, %v10983_v29 }
0x1102   :  { %10984 = vrcp.f32 %v6742_v39 }
0x1103   :  { %10986 = vrcp.f32 %v6736_v56  ;;  %v6763_v56 = vld [vmem:[#allocation6 + $0x30] sm:$0xc] }
0x110c   :  { %v10985_v9 = vpop.eup %10984 }
0x110d   :  { %v6755_v28 = vmul.f32 %v10985_v9, %v6753_v55  ;;  %v10987_v61 = vpop.eup %10986 }
0x110f   :  { %v6722_v43 = vpop.f32.mrb[204].mxu1 }
0x1110   :  { %v6731_v62 = vadd.f32 %v6722_v43, %v6641_v49  ;;  %v6724_v15 = vpop.f32.mrb[205].mxu1 }
0x1111   :  { %v6732_v25 = vadd.f32 %v6724_v15, %v6642_v23  ;;  %v6726_v1 = vpop.f32.mrb[206].mxu1 }
0x1112   :  { %10988 = vtanh.f32 %v6731_v62  ;;  %v6727_v7 = vpop.f32.mrb[207].mxu1  ;;  %v6764_v62 = vld [vmem:[#allocation6 + $0x38] sm:$0xc] }
0x1113   :  { %v9698_v5 = vmul.f32 -1.442695, %v6732_v25 }
0x1115   :  { %10990 = vpow2.f32 %v9698_v5 }
0x111c   :  { %v10989_v45 = vpop.eup %10988 }
0x111d   :  { %v6756_v18 = vmul.f32 %v10989_v45, %v10987_v61 }
0x111f   :  { %v10991_v20 = vpop.eup %10990  ;;  %v12700_v47 = vadd.f32 %v6756_v18, %v6755_v28 }
0x1120   :  { %v6749_v30 = vadd.f32 1.0, %v10991_v20 }
0x1121   :  { %10992 = vtanh.f32 %v12700_v47  ;;  %v6884_v38 = vrot.slane %v12700_v47, 6 }
0x1122   :  { %10994 = vrcp.f32 %v6749_v30 }
0x112b   :  { %v10993_v32 = vpop.eup %10992 }
0x112c   :  { %v10995_v10 = vpop.eup %10994 }
0x112d   :  { %v6759_v14 = vmul.f32 %v10995_v10, %v10993_v32  ;;  %v10790_v32 = vld [vmem:[#allocation17 + $0x108] ss:$16 sps:$4 sm:$0xff]   ;;  %v6892_v10 = vld [vmem:[#allocation8] sm:$0xff] }
0x112f   :  { %6760 = vst [vmem:[#allocation8 + $0x8] sm:$0x3] %v6759_v14  ;;  %v6765_v54 = vpack.c.bf16 %v6759_v14, %v6759_v14 }
0x1131   :  { %6799 = vmatmul.mubr.bf16.vlgmr.msra.gmra.mrb[208].mxu1 %v6765_v54 }
0x1132   :  { %6808 = vmatpush1.bf16.msra.mxu1 %v12636_v6  ;;  %6839 = vmatprep.mubr.bf16.mxu1 %v13325_v57  ;;  %v10780_v6 = vld [vmem:[#allocation17 + $0x184] ss:$16 sps:$4 sm:$0xff]  }
0x1133   :  { %6809 = vmatprep.subr.bf16.mxu1 %v12640_v12  ;;  %v10778_v12 = vld [vmem:[#allocation17 + $0x180] ss:$16 sps:$4 sm:$0xff]  }
0x1136   :  { %6810 = vmatpush1.bf16.msra.mxu1 %v12643_v4  ;;  %v10783_v4 = vld [vmem:[#allocation17 + $0x1a4] ss:$16 sps:$4 sm:$0xff]  }
0x1137   :  { %6811 = vmatprep.subr.bf16.mxu1 %v12646_v26  ;;  %v10781_v26 = vld [vmem:[#allocation17 + $0x1a0] ss:$16 sps:$4 sm:$0xff]  }
0x113a   :  { %6812 = vmatpush1.bf16.msra.mxu1 %v12649_v59  ;;  %v10786_v59 = vld [vmem:[#allocation17 + $0x1c4] ss:$16 sps:$4 sm:$0xff]  }
0x113b   :  { %6813 = vmatprep.subr.bf16.mxu1 %v12652_v19  ;;  %v10784_v19 = vld [vmem:[#allocation17 + $0x1c0] ss:$16 sps:$4 sm:$0xff]  }
0x113e   :  { %6814 = vmatpush1.bf16.msra.mxu1 %v12655_v11  ;;  %v10789_v11 = vld [vmem:[#allocation17 + $0x1e4] ss:$16 sps:$4 sm:$0xff]  }
0x113f   :  { %6815 = vmatprep.subr.bf16.mxu1 %v12658_v34  ;;  %v10787_v34 = vld [vmem:[#allocation17 + $0x1e0] ss:$16 sps:$4 sm:$0xff]  }
0x1142   :  { %6816 = vmatpush1.bf16.msra.mxu1 %v12661_v63  ;;  %v10792_v63 = vld [vmem:[#allocation17 + $0x10c] ss:$16 sps:$4 sm:$0xff]  }
0x1143   :  { %6817 = vmatprep.subr.bf16.mxu1 %v12664_v33 }
0x1146   :  { %6818 = vmatpush1.bf16.msra.mxu1 %v12667_v31 }
0x1147   :  { %6819 = vmatprep.subr.bf16.mxu1 %v12670_v44 }
0x114a   :  { %6820 = vmatpush1.bf16.msra.mxu1 %v12673_v22 }
0x114b   :  { %6821 = vmatprep.subr.bf16.mxu1 %v12676_v27  ;;  %v6762_v27 = vld [vmem:[#allocation6 + $0x28] sm:$0xc] }
0x114e   :  { %6822 = vmatpush1.bf16.msra.mxu1 %v12679_v16 }
0x114f   :  { %7111 = vmatprep.subr.bf16.mxu1 %v10768_v21  ;;  %v10795_v21 = vld [vmem:[#allocation17 + $0x12c] ss:$16 sps:$4 sm:$0xff]  }
0x1151   :  { %6840 = vmatmul.mubr.bf16.vlgmr.msra.gmra.mrb[212].mxu1 %v6765_v54 }
0x1152   :  { %7143 = vmatprep.mubr.bf16.mxu1 %v13325_v57  ;;  %7112 = vmatpush1.bf16.msra.mxu1 %v10766_v3  ;;  %v10793_v3 = vld [vmem:[#allocation17 + $0x128] ss:$16 sps:$4 sm:$0xff]  }
0x1153   :  { %7113 = vmatprep.subr.bf16.mxu1 %v10771_v46  ;;  %v10798_v46 = vld [vmem:[#allocation17 + $0x14c] ss:$16 sps:$4 sm:$0xff]  }
0x1156   :  { %7114 = vmatpush1.bf16.msra.mxu1 %v10769_v13  ;;  %v10796_v13 = vld [vmem:[#allocation17 + $0x148] ss:$16 sps:$4 sm:$0xff]  }
0x1157   :  { %7115 = vmatprep.subr.bf16.mxu1 %v10774_v48  ;;  %v10801_v48 = vld [vmem:[#allocation17 + $0x16c] ss:$16 sps:$4 sm:$0xff]  }
0x115a   :  { %7116 = vmatpush1.bf16.msra.mxu1 %v10772_v37  ;;  %v10799_v37 = vld [vmem:[#allocation17 + $0x168] ss:$16 sps:$4 sm:$0xff]  }
0x115b   :  { %7117 = vmatprep.subr.bf16.mxu1 %v10777_v42  ;;  %v10804_v42 = vld [vmem:[#allocation17 + $0x18c] ss:$16 sps:$4 sm:$0xff]  }
0x115e   :  { %7118 = vmatpush1.bf16.msra.mxu1 %v10775_v52  ;;  %v10802_v52 = vld [vmem:[#allocation17 + $0x188] ss:$16 sps:$4 sm:$0xff]  }
0x115f   :  { %7119 = vmatprep.subr.bf16.mxu1 %v10780_v6  ;;  %v10807_v6 = vld [vmem:[#allocation17 + $0x1ac] ss:$16 sps:$4 sm:$0xff]  }
0x1162   :  { %7120 = vmatpush1.bf16.msra.mxu1 %v10778_v12  ;;  %v10805_v12 = vld [vmem:[#allocation17 + $0x1a8] ss:$16 sps:$4 sm:$0xff]  }
0x1163   :  { %7121 = vmatprep.subr.bf16.mxu1 %v10783_v4  ;;  %v10810_v4 = vld [vmem:[#allocation17 + $0x1cc] ss:$16 sps:$4 sm:$0xff]  }
0x1166   :  { %7122 = vmatpush1.bf16.msra.mxu1 %v10781_v26  ;;  %v10808_v26 = vld [vmem:[#allocation17 + $0x1c8] ss:$16 sps:$4 sm:$0xff]  }
0x1167   :  { %7123 = vmatprep.subr.bf16.mxu1 %v10786_v59  ;;  %v10813_v59 = vld [vmem:[#allocation17 + $0x1ec] ss:$16 sps:$4 sm:$0xff]  }
0x116a   :  { %7124 = vmatpush1.bf16.msra.mxu1 %v10784_v19  ;;  %v10811_v19 = vld [vmem:[#allocation17 + $0x1e8] ss:$16 sps:$4 sm:$0xff]  }
0x116b   :  { %7125 = vmatprep.subr.bf16.mxu1 %v10789_v11  ;;  %v12722_v11 = vld [vmem:[#allocation17 + $0x204] ss:$16 sps:$4 sm:$0xff]  }
0x116e   :  { %7126 = vmatpush1.bf16.msra.mxu1 %v10787_v34  ;;  %v12724_v34 = vld [vmem:[#allocation17 + $0x200] ss:$16 sps:$4 sm:$0xff]  }
0x116f   :  { %7154 = vmatprep.subr.bf16.mxu1 %v10792_v63  ;;  %v12727_v63 = vld [vmem:[#allocation17 + $0x224] ss:$16 sps:$4 sm:$0xff]  }
0x1204   :  { %v6800_v33 = vpop.f32.mrb[208].mxu1 }
0x1205   :  { %v6802_v31 = vpop.f32.mrb[209].mxu1  ;;  %v6852_v51 = vrot.slane %v6800_v33, 6  ;;  %v12730_v33 = vld [vmem:[#allocation17 + $0x220] ss:$16 sps:$4 sm:$0xff]  }
0x1206   :  { %v6853_v44 = vrot.slane %v6802_v31, 6  ;;  %v6804_v22 = vpop.f32.mrb[210].mxu1  ;;  %v12734_v31 = vld [vmem:[#allocation17 + $0x244] ss:$16 sps:$4 sm:$0xff]  }
0x1207   :  { %v6805_v16 = vpop.f32.mrb[211].mxu1  ;;  %v6860_v40 = vadd.f32 %v6852_v51, %v6761_v24  ;;  %v12740_v22 = vld [vmem:[#allocation17 + $0x264] ss:$16 sps:$4 sm:$0xff]   ;;  %v12755_v51 = vld [vmem:[#allocation17 + $0x2a0] ss:$16 sps:$4 sm:$0xff]  }
0x1208   :  { %v6861_v2 = vadd.f32 %v6853_v44, %v6762_v27  ;;  %v12737_v44 = vld [vmem:[#allocation17 + $0x240] ss:$16 sps:$4 sm:$0xff]   ;;  %v12746_v16 = vld [vmem:[#allocation17 + $0x284] ss:$16 sps:$4 sm:$0xff]  }
0x1209   :  { %v9699_v36 = vmul.f32 -1.442695, %v6860_v40  ;;  %v12743_v27 = vld [vmem:[#allocation17 + $0x260] ss:$16 sps:$4 sm:$0xff]   ;;  %v12758_v24 = vld [vmem:[#allocation17 + $0x2c4] ss:$16 sps:$4 sm:$0xff]  }
0x120a   :  { %v9700_v0 = vmul.f32 -1.442695, %v6861_v2  ;;  %v12749_v2 = vld [vmem:[#allocation17 + $0x280] ss:$16 sps:$4 sm:$0xff]  }
0x120b   :  { %v12761_v40 = vld [vmem:[#allocation17 + $0x2c0] ss:$16 sps:$4 sm:$0xff]  }
0x120c   :  { %10996 = vpow2.f32 %v9700_v0  ;;  %v12752_v0 = vld [vmem:[#allocation17 + $0x2a4] ss:$16 sps:$4 sm:$0xff]  }
0x120d   :  { %10998 = vpow2.f32 %v9699_v36  ;;  %v12764_v36 = vld [vmem:[#allocation17 + $0x2e4] ss:$16 sps:$4 sm:$0xff]  }
0x1216   :  { %v10997_v41 = vpop.eup %10996 }
0x1217   :  { %v6873_v50 = vadd.f32 1.0, %v10997_v41  ;;  %v10999_v35 = vpop.eup %10998  ;;  %v12767_v41 = vld [vmem:[#allocation17 + $0x2e0] ss:$16 sps:$4 sm:$0xff]  }
0x1218   :  { %v6867_v53 = vadd.f32 1.0, %v10999_v35  ;;  %v12773_v35 = vld [vmem:[#allocation17 + $0x208] ss:$16 sps:$4 sm:$0xff]  }
0x1219   :  { %11000 = vrcp.f32 %v6873_v50  ;;  %v12770_v50 = vld [vmem:[#allocation17 + $0x20c] ss:$16 sps:$4 sm:$0xff]  }
0x121a   :  { %11002 = vrcp.f32 %v6867_v53  ;;  %v12784_v53 = vld [vmem:[#allocation17 + $0x24c] ss:$16 sps:$4 sm:$0xff]  }
0x1223   :  { %v11001_v17 = vpop.eup %11000 }
0x1224   :  { %v6886_v39 = vmul.f32 %v11001_v17, %v6884_v38  ;;  %v6841_v29 = vpop.f32.mrb[212].mxu1  ;;  %v11003_v1 = vpop.eup %11002  ;;  %v12776_v38 = vld [vmem:[#allocation17 + $0x22c] ss:$16 sps:$4 sm:$0xff]   ;;  %v12780_v17 = vld [vmem:[#allocation17 + $0x228] ss:$16 sps:$4 sm:$0xff]  }
0x1225   :  { %v6854_v55 = vrot.slane %v6841_v29, 6  ;;  %v6843_v9 = vpop.f32.mrb[213].mxu1  ;;  %v12790_v29 = vld [vmem:[#allocation17 + $0x26c] ss:$16 sps:$4 sm:$0xff]  }
0x1226   :  { %v6855_v28 = vrot.slane %v6843_v9, 6  ;;  %v6845_v49 = vpop.f32.mrb[214].mxu1  ;;  %v12796_v9 = vld [vmem:[#allocation17 + $0x28c] ss:$16 sps:$4 sm:$0xff]  }
0x1227   :  { %v6862_v43 = vadd.f32 %v6854_v55, %v6763_v56  ;;  %v6846_v23 = vpop.f32.mrb[215].mxu1  ;;  %v12793_v55 = vld [vmem:[#allocation17 + $0x268] ss:$16 sps:$4 sm:$0xff]  }
0x1228   :  { %v6863_v15 = vadd.f32 %v6855_v28, %v6764_v62  ;;  %v12799_v56 = vld [vmem:[#allocation17 + $0x288] ss:$16 sps:$4 sm:$0xff]   ;;  %v12802_v28 = vld [vmem:[#allocation17 + $0x2ac] ss:$16 sps:$4 sm:$0xff]  }
0x1229   :  { %11004 = vtanh.f32 %v6862_v43  ;;  %v12805_v49 = vld [vmem:[#allocation17 + $0x2a8] ss:$16 sps:$4 sm:$0xff]   ;;  %v12808_v43 = vld [vmem:[#allocation17 + $0x2cc] ss:$16 sps:$4 sm:$0xff]  }
0x122a   :  { %v9701_v25 = vmul.f32 -1.442695, %v6863_v15  ;;  %v12811_v62 = vld [vmem:[#allocation17 + $0x2c8] ss:$16 sps:$4 sm:$0xff]   ;;  %v12814_v23 = vld [vmem:[#allocation17 + $0x2ec] ss:$16 sps:$4 sm:$0xff]  }
0x122b   :  { %v12817_v15 = vld [vmem:[#allocation17 + $0x2e8] ss:$16 sps:$4 sm:$0xff]  }
0x122c   :  { %11006 = vpow2.f32 %v9701_v25  ;;  %v6929_v25 = vld [vmem:[#allocation18 + $0x1] ss:$2 sm:$0xf] }
0x1233   :  { %v11005_v7 = vpop.eup %11004 }
0x1234   :  { %v6887_v5 = vmul.f32 %v11005_v7, %v11003_v1  ;;  %v6934_v1 = vrot.slane %v6929_v25, %v11668_v8  ;;  %v13326_v7 = vld [vmem:[#allocation29_spill] sm:$0xff] }
0x1236   :  { %v11007_v61 = vpop.eup %11006  ;;  %v6888_v45 = vadd.f32 %v6887_v5, %v6886_v39  ;;  %v12787_v39 = vld [vmem:[#allocation17 + $0x248] ss:$16 sps:$4 sm:$0xff]   ;;  %v6938_v5 = vrot.slane %v6929_v25, %v13326_v7 }
0x1237   :  { %v6880_v18 = vadd.f32 1.0, %v11007_v61 }
0x1238   :  { %11008 = vtanh.f32 %v6888_v45 }
0x1239   :  { %11010 = vrcp.f32 %v6880_v18 }
0x1242   :  { %v11009_v20 = vpop.eup %11008 }
0x1243   :  { %v11011_v47 = vpop.eup %11010 }
0x1244   :  { %v6890_v30 = vmul.f32 %v11011_v47, %v11009_v20 }
0x1246   :  { %6891 = vst [vmem:[#allocation8 + $0x8] sm:$0xc] %v6890_v30 }
0x124d   :  { %v6893_v14 = vld [vmem:[#allocation8 + $0x8] sm:$0xf] }
0x124e   :  { %v6894_v54 = vpack.c.bf16 %v6893_v14, %v6892_v10  ;;  %v6942_v14 = vrot.slane %v6929_v25, %v12120_v58 }
0x1250   :  { %7144 = vmatmul.mubr.bf16.vlgmr.msra.gmra.mrb[216].mxu1 %v6894_v54 }
0x1251   :  { %7155 = vmatpush1.bf16.msra.mxu1 %v10790_v32  ;;  %7186 = vmatprep.mubr.bf16.mxu1 %v13325_v57 }
0x1252   :  { %7156 = vmatprep.subr.bf16.mxu1 %v10795_v21 }
0x1255   :  { %7157 = vmatpush1.bf16.msra.mxu1 %v10793_v3 }
0x1256   :  { %7158 = vmatprep.subr.bf16.mxu1 %v10798_v46 }
0x1259   :  { %7159 = vmatpush1.bf16.msra.mxu1 %v10796_v13 }
0x125a   :  { %7160 = vmatprep.subr.bf16.mxu1 %v10801_v48 }
0x125d   :  { %7161 = vmatpush1.bf16.msra.mxu1 %v10799_v37 }
0x125e   :  { %7162 = vmatprep.subr.bf16.mxu1 %v10804_v42 }
0x1261   :  { %7163 = vmatpush1.bf16.msra.mxu1 %v10802_v52 }
0x1262   :  { %7164 = vmatprep.subr.bf16.mxu1 %v10807_v6 }
0x1265   :  { %7165 = vmatpush1.bf16.msra.mxu1 %v10805_v12 }
0x1266   :  { %7166 = vmatprep.subr.bf16.mxu1 %v10810_v4 }
0x1269   :  { %7167 = vmatpush1.bf16.msra.mxu1 %v10808_v26 }
0x126a   :  { %7168 = vmatprep.subr.bf16.mxu1 %v10813_v59 }
0x126d   :  { %7169 = vmatpush1.bf16.msra.mxu1 %v10811_v19 }
0x126e   :  { %7402 = vmatprep.subr.bf16.mxu1 %v12722_v11 }
0x1270   :  { %7187 = vmatmul.mubr.bf16.vlgmr.msra.gmra.mrb[220].mxu1 %v6894_v54  ;;  %v6946_v54 = vrot.slane %v6929_v25, %v12123_v60 }
0x1271   :  { %7403 = vmatpush1.bf16.msra.mxu1 %v12724_v34  ;;  %7434 = vmatprep.mubr.bf16.mxu1 %v13325_v57 }
0x1272   :  { %7404 = vmatprep.subr.bf16.mxu1 %v12727_v63 }
0x1275   :  { %7405 = vmatpush1.bf16.msra.mxu1 %v12730_v33 }
0x1276   :  { %7406 = vmatprep.subr.bf16.mxu1 %v12734_v31 }
0x1279   :  { %7407 = vmatpush1.bf16.msra.mxu1 %v12737_v44 }
0x127a   :  { %7408 = vmatprep.subr.bf16.mxu1 %v12740_v22 }
0x127d   :  { %7409 = vmatpush1.bf16.msra.mxu1 %v12743_v27 }
0x127e   :  { %7410 = vmatprep.subr.bf16.mxu1 %v12746_v16 }
0x1281   :  { %7411 = vmatpush1.bf16.msra.mxu1 %v12749_v2 }
0x1282   :  { %7412 = vmatprep.subr.bf16.mxu1 %v12752_v0 }
0x1285   :  { %7413 = vmatpush1.bf16.msra.mxu1 %v12755_v51 }
0x1286   :  { %7414 = vmatprep.subr.bf16.mxu1 %v12758_v24 }
0x1289   :  { %7415 = vmatpush1.bf16.msra.mxu1 %v12761_v40 }
0x128a   :  { %7416 = vmatprep.subr.bf16.mxu1 %v12764_v36 }
0x128d   :  { %7417 = vmatpush1.bf16.msra.mxu1 %v12767_v41 }
0x128e   :  { %7443 = vmatprep.subr.bf16.mxu1 %v12770_v50 }
0x1290   :  { %7435 = vmatmul.mubr.bf16.vlgmr.msra.gmra.mrb[224].mxu1 %v13325_v57 }
0x1291   :  { %7444 = vmatpush1.bf16.msra.mxu1 %v12773_v35  ;;  %7475 = vmatprep.mubr.bf16.mxu1 %v13325_v57 }
0x1292   :  { %7445 = vmatprep.subr.bf16.mxu1 %v12776_v38 }
0x1295   :  { %7446 = vmatpush1.bf16.msra.mxu1 %v12780_v17 }
0x1296   :  { %7447 = vmatprep.subr.bf16.mxu1 %v12784_v53 }
0x1299   :  { %7448 = vmatpush1.bf16.msra.mxu1 %v12787_v39 }
0x129a   :  { %7449 = vmatprep.subr.bf16.mxu1 %v12790_v29 }
0x129d   :  { %7450 = vmatpush1.bf16.msra.mxu1 %v12793_v55 }
0x129e   :  { %7451 = vmatprep.subr.bf16.mxu1 %v12796_v9 }
0x12a1   :  { %7452 = vmatpush1.bf16.msra.mxu1 %v12799_v56 }
0x12a2   :  { %7453 = vmatprep.subr.bf16.mxu1 %v12802_v28 }
0x12a5   :  { %7454 = vmatpush1.bf16.msra.mxu1 %v12805_v49 }
0x12a6   :  { %7455 = vmatprep.subr.bf16.mxu1 %v12808_v43 }
0x12a9   :  { %7456 = vmatpush1.bf16.msra.mxu1 %v12811_v62 }
0x12aa   :  { %7457 = vmatprep.subr.bf16.mxu1 %v12814_v23 }
0x12ad   :  { %7458 = vmatpush1.bf16.msra.mxu1 %v12817_v15 }
0x12ae   :  { %7518 = vmatprep.subr.bf16.mxu1 %v12722_v11 }
0x12b0   :  { %7476 = vmatmul.mubr.bf16.vlgmr.msra.gmra.mrb[228].mxu1 %v13325_v57 }
0x12b1   :  { %7519 = vmatpush1.bf16.msra.mxu1 %v12724_v34  ;;  %7550 = vmatprep.mubr.bf16.mxu1 %v13325_v57 }
0x12b2   :  { %7520 = vmatprep.subr.bf16.mxu1 %v12727_v63 }
0x12b5   :  { %7521 = vmatpush1.bf16.msra.mxu1 %v12730_v33 }
0x12b6   :  { %7522 = vmatprep.subr.bf16.mxu1 %v12734_v31 }
0x12b9   :  { %7523 = vmatpush1.bf16.msra.mxu1 %v12737_v44 }
0x12ba   :  { %7524 = vmatprep.subr.bf16.mxu1 %v12740_v22 }
0x12bd   :  { %7525 = vmatpush1.bf16.msra.mxu1 %v12743_v27 }
0x12be   :  { %7526 = vmatprep.subr.bf16.mxu1 %v12746_v16 }
0x12c1   :  { %7527 = vmatpush1.bf16.msra.mxu1 %v12749_v2 }
0x12c2   :  { %7528 = vmatprep.subr.bf16.mxu1 %v12752_v0 }
0x12c5   :  { %7529 = vmatpush1.bf16.msra.mxu1 %v12755_v51 }
0x12c6   :  { %7530 = vmatprep.subr.bf16.mxu1 %v12758_v24 }
0x12c9   :  { %7531 = vmatpush1.bf16.msra.mxu1 %v12761_v40 }
0x12ca   :  { %7532 = vmatprep.subr.bf16.mxu1 %v12764_v36 }
0x12cd   :  { %7533 = vmatpush1.bf16.msra.mxu1 %v12767_v41 }
0x12ce   :  { %7559 = vmatprep.subr.bf16.mxu1 %v12770_v50 }
0x1323   :  { %v7145_v61 = vpop.f32.mrb[216].mxu1 }
0x1324   :  { %v7146_v45 = vadd.f32 %v7145_v61, %v6934_v1  ;;  %v7147_v18 = vpop.f32.mrb[217].mxu1 }
0x1325   :  { %v7148_v20 = vadd.f32 %v7147_v18, %v6938_v5  ;;  %v7149_v47 = vpop.f32.mrb[218].mxu1 }
0x1326   :  { %7197 = vst [vmem:[#allocation7] sm:$0xff] %v7146_v45  ;;  %v7150_v30 = vadd.f32 %v7149_v47, %v6934_v1  ;;  %v7151_v32 = vpop.f32.mrb[219].mxu1 }
0x1327   :  { %7198 = vst [vmem:[#allocation7 + $0x8] sm:$0xff] %v7148_v20  ;;  %v7152_v10 = vadd.f32 %v7151_v32, %v6938_v5 }
0x1328   :  { %7201 = vst [vmem:[#allocation7 + $0x20] sm:$0xf] %v7150_v30 }
0x1329   :  { %7202 = vst [vmem:[#allocation7 + $0x28] sm:$0xf] %v7152_v10 }
0x132d   :  { %v7238_v58 = vld [vmem:[#allocation7] sm:$0x3] }
0x132e   :  { %v7239_v59 = vld [vmem:[#allocation7 + $0x8] sm:$0x3] }
0x1343   :  { %v7188_v21 = vpop.f32.mrb[220].mxu1 }
0x1344   :  { %v7189_v3 = vadd.f32 %v7188_v21, %v6942_v14  ;;  %v7190_v46 = vpop.f32.mrb[221].mxu1 }
0x1345   :  { %v7191_v13 = vadd.f32 %v7190_v46, %v6946_v54  ;;  %v7192_v48 = vpop.f32.mrb[222].mxu1 }
0x1346   :  { %7199 = vst [vmem:[#allocation7 + $0x10] sm:$0xff] %v7189_v3  ;;  %v7193_v37 = vadd.f32 %v7192_v48, %v6942_v14  ;;  %v7194_v42 = vpop.f32.mrb[223].mxu1 }
0x1347   :  { %7200 = vst [vmem:[#allocation7 + $0x18] sm:$0xff] %v7191_v13  ;;  %v7195_v52 = vadd.f32 %v7194_v42, %v6946_v54 }
0x1348   :  { %7203 = vst [vmem:[#allocation7 + $0x30] sm:$0xf] %v7193_v37 }
0x1349   :  { %7204 = vst [vmem:[#allocation7 + $0x38] sm:$0xf] %v7195_v52 }
0x134d   :  { %v7240_v20 = vld [vmem:[#allocation7 + $0x10] sm:$0x3] }
0x134e   :  { %v7241_v32 = vld [vmem:[#allocation7 + $0x18] sm:$0x3] }
0x1363   :  { %v7436_v6 = vpop.f32.mrb[224].mxu1 }
0x1364   :  { %v7438_v12 = vpop.f32.mrb[225].mxu1  ;;  %v7484_v60 = vadd.f32 %v7436_v6, %v7238_v58 }
0x1365   :  { %v7440_v4 = vpop.f32.mrb[226].mxu1  ;;  %v7485_v19 = vadd.f32 %v7438_v12, %v7239_v59 }
0x1366   :  { %v7441_v26 = vpop.f32.mrb[227].mxu1  ;;  %v9766_v1 = vmul.f32 -1.442695, %v7484_v60 }
0x1367   :  { %v9767_v25 = vmul.f32 -1.442695, %v7485_v19 }
0x1369   :  { %11012 = vpow2.f32 %v9767_v25 }
0x136a   :  { %11014 = vpow2.f32 %v9766_v1 }
0x1373   :  { %v11013_v5 = vpop.eup %11012 }
0x1374   :  { %v11015_v61 = vpop.eup %11014  ;;  %v7497_v45 = vadd.f32 1.0, %v11013_v5  ;;  %v7514_v5 = vld [vmem:[#allocation7 + $0x8] sm:$0xc] }
0x1375   :  { %v7491_v18 = vadd.f32 1.0, %v11015_v61 }
0x1376   :  { %11016 = vrcp.f32 %v7497_v45 }
0x1377   :  { %11018 = vrcp.f32 %v7491_v18 }
0x1380   :  { %v11017_v46 = vpop.eup %11016 }
0x1381   :  { %v11019_v13 = vpop.eup %11018  ;;  %v7507_v37 = vmul.f32 0.0, %v11017_v46 }
0x1383   :  { %v7477_v47 = vpop.f32.mrb[228].mxu1 }
0x1384   :  { %v7486_v30 = vadd.f32 %v7477_v47, %v7240_v20  ;;  %v7479_v10 = vpop.f32.mrb[229].mxu1  ;;  %v7513_v47 = vld [vmem:[#allocation7] sm:$0xc] }
0x1385   :  { %v7487_v14 = vadd.f32 %v7479_v10, %v7241_v32  ;;  %v7481_v54 = vpop.f32.mrb[230].mxu1 }
0x1386   :  { %11020 = vtanh.f32 %v7486_v30  ;;  %v7482_v21 = vpop.f32.mrb[231].mxu1 }
0x1387   :  { %v9768_v3 = vmul.f32 -1.442695, %v7487_v14 }
0x1389   :  { %11022 = vpow2.f32 %v9768_v3 }
0x1390   :  { %v11021_v48 = vpop.eup %11020 }
0x1391   :  { %v7508_v42 = vmul.f32 %v11021_v48, %v11019_v13 }
0x1393   :  { %v11023_v52 = vpop.eup %11022  ;;  %v12844_v6 = vadd.f32 %v7508_v42, %v7507_v37 }
0x1394   :  { %v7504_v12 = vadd.f32 1.0, %v11023_v52  ;;  %v7515_v52 = vld [vmem:[#allocation7 + $0x10] sm:$0xc] }
0x1395   :  { %11024 = vtanh.f32 %v12844_v6  ;;  %v7636_v21 = vrot.slane %v12844_v6, 6 }
0x1396   :  { %11026 = vrcp.f32 %v7504_v12 }
0x139f   :  { %v11025_v4 = vpop.eup %11024 }
0x13a0   :  { %v11027_v26 = vpop.eup %11026 }
0x13a1   :  { %v7511_v59 = vmul.f32 %v11027_v26, %v11025_v4 }
0x13a3   :  { %7512 = vst [vmem:[#allocation9] sm:$0x3] %v7511_v59  ;;  %v7517_v58 = vpack.c.bf16 %v7511_v59, %v7511_v59  ;;  %v7516_v59 = vld [vmem:[#allocation7 + $0x18] sm:$0xc] }
0x13a5   :  { %7551 = vmatmul.mubr.bf16.vlgmr.msra.gmra.mrb[232].mxu1 %v7517_v58 }
0x13a6   :  { %7560 = vmatpush1.bf16.msra.mxu1 %v12773_v35  ;;  %7591 = vmatprep.mubr.bf16.mxu1 %v13325_v57 }
0x13a7   :  { %7561 = vmatprep.subr.bf16.mxu1 %v12776_v38 }
0x13aa   :  { %7562 = vmatpush1.bf16.msra.mxu1 %v12780_v17 }
0x13ab   :  { %7563 = vmatprep.subr.bf16.mxu1 %v12784_v53 }
0x13ae   :  { %7564 = vmatpush1.bf16.msra.mxu1 %v12787_v39 }
0x13af   :  { %7565 = vmatprep.subr.bf16.mxu1 %v12790_v29 }
0x13b2   :  { %7566 = vmatpush1.bf16.msra.mxu1 %v12793_v55 }
0x13b3   :  { %7567 = vmatprep.subr.bf16.mxu1 %v12796_v9 }
0x13b6   :  { %7568 = vmatpush1.bf16.msra.mxu1 %v12799_v56 }
0x13b7   :  { %7569 = vmatprep.subr.bf16.mxu1 %v12802_v28 }
0x13ba   :  { %7570 = vmatpush1.bf16.msra.mxu1 %v12805_v49 }
0x13bb   :  { %7571 = vmatprep.subr.bf16.mxu1 %v12808_v43 }
0x13be   :  { %7572 = vmatpush1.bf16.msra.mxu1 %v12811_v62 }
0x13bf   :  { %7573 = vmatprep.subr.bf16.mxu1 %v12814_v23 }
0x13c2   :  { %7574 = vmatpush1.bf16.msra.mxu1 %v12817_v15 }
0x13c3   :  { %7652 = vmatprep.subr.bf16.mxu1 %v12722_v11 }
0x13c5   :  { %7592 = vmatmul.mubr.bf16.vlgmr.msra.gmra.mrb[236].mxu1 %v7517_v58 }
0x13c6   :  { %7653 = vmatpush1.bf16.msra.mxu1 %v12724_v34  ;;  %7684 = vmatprep.mubr.bf16.mxu1 %v13325_v57 }
0x13c7   :  { %7654 = vmatprep.subr.bf16.mxu1 %v12727_v63 }
0x13ca   :  { %7655 = vmatpush1.bf16.msra.mxu1 %v12730_v33 }
0x13cb   :  { %7656 = vmatprep.subr.bf16.mxu1 %v12734_v31 }
0x13ce   :  { %7657 = vmatpush1.bf16.msra.mxu1 %v12737_v44 }
0x13cf   :  { %7658 = vmatprep.subr.bf16.mxu1 %v12740_v22 }
0x13d2   :  { %7659 = vmatpush1.bf16.msra.mxu1 %v12743_v27 }
0x13d3   :  { %7660 = vmatprep.subr.bf16.mxu1 %v12746_v16 }
0x13d6   :  { %7661 = vmatpush1.bf16.msra.mxu1 %v12749_v2 }
0x13d7   :  { %7662 = vmatprep.subr.bf16.mxu1 %v12752_v0 }
0x13da   :  { %7663 = vmatpush1.bf16.msra.mxu1 %v12755_v51 }
0x13db   :  { %7664 = vmatprep.subr.bf16.mxu1 %v12758_v24 }
0x13de   :  { %7665 = vmatpush1.bf16.msra.mxu1 %v12761_v40 }
0x13df   :  { %7666 = vmatprep.subr.bf16.mxu1 %v12764_v36 }
0x13e2   :  { %7667 = vmatpush1.bf16.msra.mxu1 %v12767_v41 }
0x13e3   :  { %7693 = vmatprep.subr.bf16.mxu1 %v12770_v50 }
0x1478   :  { %v7552_v19 = vpop.f32.mrb[232].mxu1 }
0x1479   :  { %v7554_v60 = vpop.f32.mrb[233].mxu1  ;;  %v7604_v20 = vrot.slane %v7552_v19, 6 }
0x147a   :  { %v7605_v25 = vrot.slane %v7554_v60, 6  ;;  %v7556_v1 = vpop.f32.mrb[234].mxu1 }
0x147b   :  { %v7557_v61 = vpop.f32.mrb[235].mxu1  ;;  %v7612_v30 = vadd.f32 %v7604_v20, %v7513_v47 }
0x147c   :  { %v7613_v45 = vadd.f32 %v7605_v25, %v7514_v5 }
0x147d   :  { %v9769_v32 = vmul.f32 -1.442695, %v7612_v30 }
0x147e   :  { %v9770_v18 = vmul.f32 -1.442695, %v7613_v45 }
0x1480   :  { %11028 = vpow2.f32 %v9770_v18 }
0x1481   :  { %11030 = vpow2.f32 %v9769_v32 }
0x148a   :  { %v11029_v10 = vpop.eup %11028 }
0x148b   :  { %v7625_v14 = vadd.f32 1.0, %v11029_v10  ;;  %v11031_v54 = vpop.eup %11030 }
0x148c   :  { %v7619_v46 = vadd.f32 1.0, %v11031_v54 }
0x148d   :  { %11032 = vrcp.f32 %v7625_v14 }
0x148e   :  { %11034 = vrcp.f32 %v7619_v46 }
0x1497   :  { %v11033_v3 = vpop.eup %11032 }
0x1498   :  { %v7638_v13 = vmul.f32 %v11033_v3, %v7636_v21  ;;  %v7593_v48 = vpop.f32.mrb[236].mxu1  ;;  %v11035_v25 = vpop.eup %11034  ;;  %v7645_v3 = vld [vmem:[#allocation7 + $0x8] sm:$0x30] }
0x1499   :  { %v7606_v37 = vrot.slane %v7593_v48, 6  ;;  %v7595_v42 = vpop.f32.mrb[237].mxu1 }
0x149a   :  { %v7607_v12 = vrot.slane %v7595_v42, 6  ;;  %v7597_v4 = vpop.f32.mrb[238].mxu1  ;;  %v7644_v42 = vld [vmem:[#allocation7] sm:$0x30] }
0x149b   :  { %v7614_v26 = vadd.f32 %v7606_v37, %v7515_v52  ;;  %v7598_v58 = vpop.f32.mrb[239].mxu1 }
0x149c   :  { %v7615_v19 = vadd.f32 %v7607_v12, %v7516_v59 }
0x149d   :  { %11036 = vtanh.f32 %v7614_v26 }
0x149e   :  { %v9771_v60 = vmul.f32 -1.442695, %v7615_v19 }
0x14a0   :  { %11038 = vpow2.f32 %v9771_v60 }
0x14a7   :  { %v11037_v1 = vpop.eup %11036 }
0x14a8   :  { %v7639_v6 = vmul.f32 %v11037_v1, %v11035_v25 }
0x14aa   :  { %v11039_v5 = vpop.eup %11038  ;;  %v12882_v61 = vadd.f32 %v7639_v6, %v7638_v13 }
0x14ab   :  { %v7632_v45 = vadd.f32 1.0, %v11039_v5 }
0x14ac   :  { %11040 = vtanh.f32 %v12882_v61  ;;  %v7770_v58 = vrot.slane %v12882_v61, 6 }
0x14ad   :  { %11042 = vrcp.f32 %v7632_v45  ;;  %v7646_v45 = vld [vmem:[#allocation7 + $0x10] sm:$0x30] }
0x14b6   :  { %v11041_v18 = vpop.eup %11040 }
0x14b7   :  { %v11043_v20 = vpop.eup %11042 }
0x14b8   :  { %v7642_v47 = vmul.f32 %v11043_v20, %v11041_v18 }
0x14ba   :  { %7643 = vst [vmem:[#allocation9] sm:$0xc] %v7642_v47  ;;  %v7648_v30 = vpack.c.bf16 %v7642_v47, %v7642_v47 }
0x14bc   :  { %v7650_v32 = vrot.slane %v7648_v30, 1  ;;  %v7647_v30 = vld [vmem:[#allocation7 + $0x18] sm:$0x30] }
0x14be   :  { %7685 = vmatmul.mubr.bf16.vlgmr.msra.gmra.mrb[240].mxu1 %v7650_v32 }
0x14bf   :  { %7694 = vmatpush1.bf16.msra.mxu1 %v12773_v35  ;;  %7725 = vmatprep.mubr.bf16.mxu1 %v13325_v57 }
0x14c0   :  { %7695 = vmatprep.subr.bf16.mxu1 %v12776_v38 }
0x14c3   :  { %7696 = vmatpush1.bf16.msra.mxu1 %v12780_v17 }
0x14c4   :  { %7697 = vmatprep.subr.bf16.mxu1 %v12784_v53 }
0x14c7   :  { %7698 = vmatpush1.bf16.msra.mxu1 %v12787_v39 }
0x14c8   :  { %7699 = vmatprep.subr.bf16.mxu1 %v12790_v29 }
0x14cb   :  { %7700 = vmatpush1.bf16.msra.mxu1 %v12793_v55 }
0x14cc   :  { %7701 = vmatprep.subr.bf16.mxu1 %v12796_v9 }
0x14cf   :  { %7702 = vmatpush1.bf16.msra.mxu1 %v12799_v56 }
0x14d0   :  { %7703 = vmatprep.subr.bf16.mxu1 %v12802_v28 }
0x14d3   :  { %7704 = vmatpush1.bf16.msra.mxu1 %v12805_v49 }
0x14d4   :  { %7705 = vmatprep.subr.bf16.mxu1 %v12808_v43 }
0x14d7   :  { %7706 = vmatpush1.bf16.msra.mxu1 %v12811_v62 }
0x14d8   :  { %7707 = vmatprep.subr.bf16.mxu1 %v12814_v23 }
0x14db   :  { %7708 = vmatpush1.bf16.msra.mxu1 %v12817_v15 }
0x14dc   :  { %7786 = vmatprep.subr.bf16.mxu1 %v12722_v11 }
0x14de   :  { %7726 = vmatmul.mubr.bf16.vlgmr.msra.gmra.mrb[244].mxu1 %v7650_v32 }
0x14df   :  { %7787 = vmatpush1.bf16.msra.mxu1 %v12724_v34  ;;  %7818 = vmatprep.mubr.bf16.mxu1 %v13325_v57 }
0x14e0   :  { %7788 = vmatprep.subr.bf16.mxu1 %v12727_v63 }
0x14e3   :  { %7789 = vmatpush1.bf16.msra.mxu1 %v12730_v33 }
0x14e4   :  { %7790 = vmatprep.subr.bf16.mxu1 %v12734_v31 }
0x14e7   :  { %7791 = vmatpush1.bf16.msra.mxu1 %v12737_v44 }
0x14e8   :  { %7792 = vmatprep.subr.bf16.mxu1 %v12740_v22 }
0x14eb   :  { %7793 = vmatpush1.bf16.msra.mxu1 %v12743_v27 }
0x14ec   :  { %7794 = vmatprep.subr.bf16.mxu1 %v12746_v16 }
0x14ef   :  { %7795 = vmatpush1.bf16.msra.mxu1 %v12749_v2 }
0x14f0   :  { %7796 = vmatprep.subr.bf16.mxu1 %v12752_v0 }
0x14f3   :  { %7797 = vmatpush1.bf16.msra.mxu1 %v12755_v51 }
0x14f4   :  { %7798 = vmatprep.subr.bf16.mxu1 %v12758_v24 }
0x14f7   :  { %7799 = vmatpush1.bf16.msra.mxu1 %v12761_v40 }
0x14f8   :  { %7800 = vmatprep.subr.bf16.mxu1 %v12764_v36 }
0x14fb   :  { %7801 = vmatpush1.bf16.msra.mxu1 %v12767_v41 }
0x14fc   :  { %7827 = vmatprep.subr.bf16.mxu1 %v12770_v50 }
0x1591   :  { %v7686_v10 = vpop.f32.mrb[240].mxu1 }
0x1592   :  { %v7688_v14 = vpop.f32.mrb[241].mxu1  ;;  %v7738_v37 = vrot.slane %v7686_v10, 4 }
0x1593   :  { %v7739_v54 = vrot.slane %v7688_v14, 4  ;;  %v7690_v21 = vpop.f32.mrb[242].mxu1 }
0x1594   :  { %v7691_v46 = vpop.f32.mrb[243].mxu1  ;;  %v7746_v52 = vadd.f32 %v7738_v37, %v7644_v42 }
0x1595   :  { %v7747_v13 = vadd.f32 %v7739_v54, %v7645_v3 }
0x1596   :  { %v9772_v12 = vmul.f32 -1.442695, %v7746_v52 }
0x1597   :  { %v9773_v48 = vmul.f32 -1.442695, %v7747_v13 }
0x1599   :  { %11044 = vpow2.f32 %v9773_v48 }
0x159a   :  { %11046 = vpow2.f32 %v9772_v12 }
0x15a3   :  { %v11045_v4 = vpop.eup %11044 }
0x15a4   :  { %v7759_v26 = vadd.f32 1.0, %v11045_v4  ;;  %v11047_v59 = vpop.eup %11046 }
0x15a5   :  { %v7753_v60 = vadd.f32 1.0, %v11047_v59 }
0x15a6   :  { %11048 = vrcp.f32 %v7759_v26 }
0x15a7   :  { %11050 = vrcp.f32 %v7753_v60 }
0x15b0   :  { %v11049_v19 = vpop.eup %11048 }
0x15b1   :  { %v7772_v25 = vmul.f32 %v11049_v19, %v7770_v58  ;;  %v7727_v1 = vpop.f32.mrb[244].mxu1  ;;  %v11051_v54 = vpop.eup %11050  ;;  %v7779_v19 = vld [vmem:[#allocation7 + $0x8] sm:$0xc0] }
0x15b2   :  { %v7740_v6 = vrot.slane %v7727_v1, 4  ;;  %v7729_v5 = vpop.f32.mrb[245].mxu1 }
0x15b3   :  { %v7741_v18 = vrot.slane %v7729_v5, 4  ;;  %v7731_v20 = vpop.f32.mrb[246].mxu1  ;;  %v7778_v5 = vld [vmem:[#allocation7] sm:$0xc0] }
0x15b4   :  { %v7748_v47 = vadd.f32 %v7740_v6, %v7646_v45  ;;  %v7732_v32 = vpop.f32.mrb[247].mxu1 }
0x15b5   :  { %v7749_v10 = vadd.f32 %v7741_v18, %v7647_v30 }
0x15b6   :  { %11052 = vtanh.f32 %v7748_v47 }
0x15b7   :  { %v9774_v14 = vmul.f32 -1.442695, %v7749_v10 }
0x15b9   :  { %11054 = vpow2.f32 %v9774_v14 }
0x15c0   :  { %v11053_v21 = vpop.eup %11052 }
0x15c1   :  { %v7773_v61 = vmul.f32 %v11053_v21, %v11051_v54 }
0x15c3   :  { %v11055_v3 = vpop.eup %11054  ;;  %v12920_v46 = vadd.f32 %v7773_v61, %v7772_v25 }
0x15c4   :  { %v7766_v13 = vadd.f32 1.0, %v11055_v3 }
0x15c5   :  { %11056 = vtanh.f32 %v12920_v46  ;;  %v7904_v32 = vrot.slane %v12920_v46, 6 }
0x15c6   :  { %11058 = vrcp.f32 %v7766_v13  ;;  %v7780_v13 = vld [vmem:[#allocation7 + $0x10] sm:$0xc0] }
0x15cf   :  { %v11057_v48 = vpop.eup %11056 }
0x15d0   :  { %v11059_v37 = vpop.eup %11058 }
0x15d1   :  { %v7776_v42 = vmul.f32 %v11059_v37, %v11057_v48 }
0x15d3   :  { %7777 = vst [vmem:[#allocation9] sm:$0x30] %v7776_v42  ;;  %v7782_v52 = vpack.c.bf16 %v7776_v42, %v7776_v42 }
0x15d5   :  { %v7784_v12 = vrot.slane %v7782_v52, 2  ;;  %v7781_v52 = vld [vmem:[#allocation7 + $0x18] sm:$0xc0] }
0x15d7   :  { %7819 = vmatmul.mubr.bf16.vlgmr.msra.gmra.mrb[248].mxu1 %v7784_v12 }
0x15d8   :  { %7828 = vmatpush1.bf16.msra.mxu1 %v12773_v35  ;;  %7859 = vmatprep.mubr.bf16.mxu1 %v13325_v57 }
0x15d9   :  { %7829 = vmatprep.subr.bf16.mxu1 %v12776_v38 }
0x15dc   :  { %7830 = vmatpush1.bf16.msra.mxu1 %v12780_v17 }
0x15dd   :  { %7831 = vmatprep.subr.bf16.mxu1 %v12784_v53 }
0x15e0   :  { %7832 = vmatpush1.bf16.msra.mxu1 %v12787_v39 }
0x15e1   :  { %7833 = vmatprep.subr.bf16.mxu1 %v12790_v29 }
0x15e4   :  { %7834 = vmatpush1.bf16.msra.mxu1 %v12793_v55 }
0x15e5   :  { %7835 = vmatprep.subr.bf16.mxu1 %v12796_v9 }
0x15e8   :  { %7836 = vmatpush1.bf16.msra.mxu1 %v12799_v56 }
0x15e9   :  { %7837 = vmatprep.subr.bf16.mxu1 %v12802_v28 }
0x15ec   :  { %7838 = vmatpush1.bf16.msra.mxu1 %v12805_v49 }
0x15ed   :  { %7839 = vmatprep.subr.bf16.mxu1 %v12808_v43 }
0x15f0   :  { %7840 = vmatpush1.bf16.msra.mxu1 %v12811_v62 }
0x15f1   :  { %7841 = vmatprep.subr.bf16.mxu1 %v12814_v23 }
0x15f4   :  { %7842 = vmatpush1.bf16.msra.mxu1 %v12817_v15 }
0x15f5   :  { %7920 = vmatprep.subr.bf16.mxu1 %v12722_v11 }
0x15f7   :  { %7860 = vmatmul.mubr.bf16.vlgmr.msra.gmra.mrb[252].mxu1 %v7784_v12 }
0x15f8   :  { %7921 = vmatpush1.bf16.msra.mxu1 %v12724_v34  ;;  %7952 = vmatprep.mubr.bf16.mxu1 %v13325_v57 }
0x15f9   :  { %7922 = vmatprep.subr.bf16.mxu1 %v12727_v63 }
0x15fc   :  { %7923 = vmatpush1.bf16.msra.mxu1 %v12730_v33 }
0x15fd   :  { %7924 = vmatprep.subr.bf16.mxu1 %v12734_v31 }
0x1600   :  { %7925 = vmatpush1.bf16.msra.mxu1 %v12737_v44 }
0x1601   :  { %7926 = vmatprep.subr.bf16.mxu1 %v12740_v22 }
0x1604   :  { %7927 = vmatpush1.bf16.msra.mxu1 %v12743_v27 }
0x1605   :  { %7928 = vmatprep.subr.bf16.mxu1 %v12746_v16 }
0x1608   :  { %7929 = vmatpush1.bf16.msra.mxu1 %v12749_v2 }
0x1609   :  { %7930 = vmatprep.subr.bf16.mxu1 %v12752_v0 }
0x160c   :  { %7931 = vmatpush1.bf16.msra.mxu1 %v12755_v51 }
0x160d   :  { %7932 = vmatprep.subr.bf16.mxu1 %v12758_v24 }
0x1610   :  { %7933 = vmatpush1.bf16.msra.mxu1 %v12761_v40 }
0x1611   :  { %7934 = vmatprep.subr.bf16.mxu1 %v12764_v36 }
0x1614   :  { %7935 = vmatpush1.bf16.msra.mxu1 %v12767_v41 }
0x1615   :  { %7961 = vmatprep.subr.bf16.mxu1 %v12770_v50 }
0x16aa   :  { %v7820_v4 = vpop.f32.mrb[248].mxu1 }
0x16ab   :  { %v7822_v26 = vpop.f32.mrb[249].mxu1  ;;  %v7872_v6 = vrot.slane %v7820_v4, 2 }
0x16ac   :  { %v7873_v59 = vrot.slane %v7822_v26, 2  ;;  %v7824_v58 = vpop.f32.mrb[250].mxu1 }
0x16ad   :  { %v7825_v60 = vpop.f32.mrb[251].mxu1  ;;  %v7880_v45 = vadd.f32 %v7872_v6, %v7778_v5 }
0x16ae   :  { %v7881_v25 = vadd.f32 %v7873_v59, %v7779_v19 }
0x16af   :  { %v9775_v18 = vmul.f32 -1.442695, %v7880_v45 }
0x16b0   :  { %v9776_v1 = vmul.f32 -1.442695, %v7881_v25 }
0x16b2   :  { %11060 = vpow2.f32 %v9776_v1 }
0x16b3   :  { %11062 = vpow2.f32 %v9775_v18 }
0x16bc   :  { %v11061_v20 = vpop.eup %11060 }
0x16bd   :  { %v7893_v47 = vadd.f32 1.0, %v11061_v20  ;;  %v11063_v30 = vpop.eup %11062  ;;  %v7914_v20 = vld [vmem:[#allocation7 + $0x30] sm:$0x3] }
0x16be   :  { %v7887_v14 = vadd.f32 1.0, %v11063_v30 }
0x16bf   :  { %11064 = vrcp.f32 %v7893_v47 }
0x16c0   :  { %11066 = vrcp.f32 %v7887_v14 }
0x16c9   :  { %v11065_v10 = vpop.eup %11064 }
0x16ca   :  { %v7906_v54 = vmul.f32 %v11065_v10, %v7904_v32  ;;  %v7861_v21 = vpop.f32.mrb[252].mxu1  ;;  %v11067_v59 = vpop.eup %11066  ;;  %v7915_v32 = vld [vmem:[#allocation7 + $0x38] sm:$0x3] }
0x16cb   :  { %v7874_v61 = vrot.slane %v7861_v21, 2  ;;  %v7863_v3 = vpop.f32.mrb[253].mxu1 }
0x16cc   :  { %v7875_v48 = vrot.slane %v7863_v3, 2  ;;  %v7865_v37 = vpop.f32.mrb[254].mxu1 }
0x16cd   :  { %v7882_v42 = vadd.f32 %v7874_v61, %v7780_v13  ;;  %v7866_v12 = vpop.f32.mrb[255].mxu1 }
0x16ce   :  { %v7883_v4 = vadd.f32 %v7875_v48, %v7781_v52 }
0x16cf   :  { %11068 = vtanh.f32 %v7882_v42 }
0x16d0   :  { %v9777_v26 = vmul.f32 -1.442695, %v7883_v4 }
0x16d2   :  { %11070 = vpow2.f32 %v9777_v26 }
0x16d9   :  { %v11069_v58 = vpop.eup %11068 }
0x16da   :  { %v7907_v46 = vmul.f32 %v11069_v58, %v11067_v59  ;;  %v11343_v58 = vmov 0.0  }
0x16db   :  { %9929 = vmatprep.mubr.msk.f32.mxu0 %vm11344_vm2, %v11343_v58 }
0x16dc   :  { %v11071_v19 = vpop.eup %11070  ;;  %v12958_v60 = vadd.f32 %v7907_v46, %v7906_v54 }
0x16dd   :  { %v7900_v25 = vadd.f32 1.0, %v11071_v19 }
0x16de   :  { %11072 = vtanh.f32 %v12958_v60 }
0x16df   :  { %11074 = vrcp.f32 %v7900_v25 }
0x16e8   :  { %v11073_v1 = vpop.eup %11072 }
0x16e9   :  { %v11075_v6 = vpop.eup %11074 }
0x16ea   :  { %v7910_v5 = vmul.f32 %v11075_v6, %v11073_v1  ;;  %v8035_v1 = vld [vmem:[#allocation7 + $0x28] sm:$0xc] }
0x16ec   :  { %7911 = vst [vmem:[#allocation9] sm:$0xc0] %v7910_v5  ;;  %v7916_v45 = vpack.c.bf16 %v7910_v5, %v7910_v5 }
0x16ee   :  { %v7918_v18 = vrot.slane %v7916_v45, 3 }
0x16f0   :  { %7953 = vmatmul.mubr.bf16.vlgmr.msra.gmra.mrb[32].mxu1 %v7918_v18 }
0x16f1   :  { %7962 = vmatpush1.bf16.msra.mxu1 %v12773_v35  ;;  %7993 = vmatprep.mubr.bf16.mxu1 %v13325_v57 }
0x16f2   :  { %7963 = vmatprep.subr.bf16.mxu1 %v12776_v38 }
0x16f5   :  { %7964 = vmatpush1.bf16.msra.mxu1 %v12780_v17 }
0x16f6   :  { %7965 = vmatprep.subr.bf16.mxu1 %v12784_v53 }
0x16f9   :  { %7966 = vmatpush1.bf16.msra.mxu1 %v12787_v39 }
0x16fa   :  { %7967 = vmatprep.subr.bf16.mxu1 %v12790_v29 }
0x16fd   :  { %7968 = vmatpush1.bf16.msra.mxu1 %v12793_v55 }
0x16fe   :  { %7969 = vmatprep.subr.bf16.mxu1 %v12796_v9 }
0x1701   :  { %7970 = vmatpush1.bf16.msra.mxu1 %v12799_v56 }
0x1702   :  { %7971 = vmatprep.subr.bf16.mxu1 %v12802_v28 }
0x1705   :  { %7972 = vmatpush1.bf16.msra.mxu1 %v12805_v49 }
0x1706   :  { %7973 = vmatprep.subr.bf16.mxu1 %v12808_v43 }
0x1709   :  { %7974 = vmatpush1.bf16.msra.mxu1 %v12811_v62 }
0x170a   :  { %7975 = vmatprep.subr.bf16.mxu1 %v12814_v23 }
0x170d   :  { %7976 = vmatpush1.bf16.msra.mxu1 %v12817_v15 }
0x170e   :  { %8039 = vmatprep.subr.bf16.mxu1 %v12722_v11 }
0x1710   :  { %7994 = vmatmul.mubr.bf16.vlgmr.msra.gmra.mrb[36].mxu1 %v7918_v18 }
0x1711   :  { %8040 = vmatpush1.bf16.msra.mxu1 %v12724_v34  ;;  %8071 = vmatprep.mubr.bf16.mxu1 %v13325_v57  ;;  %v7913_v34 = vld [vmem:[#allocation7 + $0x28] sm:$0x3] }
0x1712   :  { %8041 = vmatprep.subr.bf16.mxu1 %v12727_v63 }
0x1715   :  { %8042 = vmatpush1.bf16.msra.mxu1 %v12730_v33 }
0x1716   :  { %8043 = vmatprep.subr.bf16.mxu1 %v12734_v31 }
0x1719   :  { %8044 = vmatpush1.bf16.msra.mxu1 %v12737_v44 }
0x171a   :  { %8045 = vmatprep.subr.bf16.mxu1 %v12740_v22 }
0x171d   :  { %8046 = vmatpush1.bf16.msra.mxu1 %v12743_v27  ;;  %v7912_v27 = vld [vmem:[#allocation7 + $0x20] sm:$0x3] }
0x171e   :  { %8047 = vmatprep.subr.bf16.mxu1 %v12746_v16 }
0x1721   :  { %8048 = vmatpush1.bf16.msra.mxu1 %v12749_v2 }
0x1722   :  { %8049 = vmatprep.subr.bf16.mxu1 %v12752_v0 }
0x1725   :  { %8050 = vmatpush1.bf16.msra.mxu1 %v12755_v51 }
0x1726   :  { %8051 = vmatprep.subr.bf16.mxu1 %v12758_v24 }
0x1729   :  { %8052 = vmatpush1.bf16.msra.mxu1 %v12761_v40  ;;  %v8026_v40 = vrot.slane %v12958_v60, 6 }
0x172a   :  { %8053 = vmatprep.subr.bf16.mxu1 %v12764_v36 }
0x172d   :  { %8054 = vmatpush1.bf16.msra.mxu1 %v12767_v41 }
0x172e   :  { %8080 = vmatprep.subr.bf16.mxu1 %v12770_v50 }
0x17c3   :  { %v7954_v11 = vpop.f32.mrb[32].mxu1 }
0x17c4   :  { %v7956_v63 = vpop.f32.mrb[33].mxu1  ;;  %v8002_v16 = vadd.f32 %v7954_v11, %v7912_v27  ;;  %v8034_v11 = vld [vmem:[#allocation7 + $0x20] sm:$0xc] }
0x17c5   :  { %v8003_v33 = vadd.f32 %v7956_v63, %v7913_v34  ;;  %v7958_v31 = vpop.f32.mrb[34].mxu1 }
0x17c6   :  { %v7959_v44 = vpop.f32.mrb[35].mxu1  ;;  %v9778_v2 = vmul.f32 -1.442695, %v8002_v16 }
0x17c7   :  { %v9779_v22 = vmul.f32 -1.442695, %v8003_v33 }
0x17c9   :  { %11076 = vpow2.f32 %v9779_v22 }
0x17ca   :  { %11078 = vpow2.f32 %v9778_v2 }
0x17d3   :  { %v11077_v0 = vpop.eup %11076 }
0x17d4   :  { %v8015_v51 = vadd.f32 1.0, %v11077_v0  ;;  %v11079_v24 = vpop.eup %11078 }
0x17d5   :  { %v8009_v41 = vadd.f32 1.0, %v11079_v24 }
0x17d6   :  { %11080 = vrcp.f32 %v8015_v51 }
0x17d7   :  { %11082 = vrcp.f32 %v8009_v41 }
0x17e0   :  { %v11081_v36 = vpop.eup %11080 }
0x17e1   :  { %v8028_v50 = vmul.f32 %v11081_v36, %v8026_v40  ;;  %v11083_v3 = vpop.eup %11082  ;;  %v8036_v40 = vld [vmem:[#allocation7 + $0x30] sm:$0xc] }
0x17e3   :  { %v7995_v47 = vpop.f32.mrb[36].mxu1 }
0x17e4   :  { %v8004_v30 = vadd.f32 %v7995_v47, %v7914_v20  ;;  %v7997_v10 = vpop.f32.mrb[37].mxu1  ;;  %v8037_v20 = vld [vmem:[#allocation7 + $0x38] sm:$0xc] }
0x17e5   :  { %v8005_v14 = vadd.f32 %v7997_v10, %v7915_v32  ;;  %v7999_v54 = vpop.f32.mrb[38].mxu1 }
0x17e6   :  { %11084 = vtanh.f32 %v8004_v30  ;;  %v8000_v21 = vpop.f32.mrb[39].mxu1 }
0x17e7   :  { %v9780_v61 = vmul.f32 -1.442695, %v8005_v14 }
0x17e9   :  { %11086 = vpow2.f32 %v9780_v61 }
0x17f0   :  { %v11085_v13 = vpop.eup %11084 }
0x17f1   :  { %v8029_v48 = vmul.f32 %v11085_v13, %v11083_v3 }
0x17f3   :  { %v11087_v37 = vpop.eup %11086  ;;  %v12996_v42 = vadd.f32 %v8029_v48, %v8028_v50 }
0x17f4   :  { %v8022_v52 = vadd.f32 1.0, %v11087_v37 }
0x17f5   :  { %11088 = vtanh.f32 %v12996_v42  ;;  %v8157_v22 = vrot.slane %v12996_v42, 6  ;;  %v8165_v42 = vld [vmem:[#allocation9] sm:$0xff] }
0x17f6   :  { %11090 = vrcp.f32 %v8022_v52 }
0x17ff   :  { %v11089_v12 = vpop.eup %11088 }
0x1800   :  { %v11091_v4 = vpop.eup %11090 }
0x1801   :  { %v8032_v26 = vmul.f32 %v11091_v4, %v11089_v12  ;;  %v10886_v12 = vld [vmem:[%s13312_s8] ss:$20 sps:$4 sm:$0xff]  }
0x1803   :  { %8033 = vst [vmem:[#allocation9 + $0x8] sm:$0x3] %v8032_v26  ;;  %v8038_v59 = vpack.c.bf16 %v8032_v26, %v8032_v26  ;;  %v10887_v26 = vld [vmem:[%s13312_s8 + $0x28] ss:$20 sps:$4 sm:$0xff]  }
0x1805   :  { %8072 = vmatmul.mubr.bf16.vlgmr.msra.gmra.mrb[40].mxu1 %v8038_v59 }
0x1806   :  { %8081 = vmatpush1.bf16.msra.mxu1 %v12773_v35  ;;  %8112 = vmatprep.mubr.bf16.mxu1 %v13325_v57  ;;  %v10864_v35 = vld [vmem:[%s13312_s8 + $0x8] ss:$20 sps:$4 sm:$0xff]  }
0x1807   :  { %8082 = vmatprep.subr.bf16.mxu1 %v12776_v38  ;;  %v10862_v38 = vld [vmem:[%s13312_s8 + $0x4] ss:$20 sps:$4 sm:$0xff]  }
0x180a   :  { %8083 = vmatpush1.bf16.msra.mxu1 %v12780_v17  ;;  %v10867_v17 = vld [vmem:[%s13312_s8 + $0x30] ss:$20 sps:$4 sm:$0xff]  }
0x180b   :  { %8084 = vmatprep.subr.bf16.mxu1 %v12784_v53  ;;  %v10865_v53 = vld [vmem:[%s13312_s8 + $0x2c] ss:$20 sps:$4 sm:$0xff]  }
0x180e   :  { %8085 = vmatpush1.bf16.msra.mxu1 %v12787_v39  ;;  %v10868_v39 = vld [vmem:[%s13312_s8 + $0x54] ss:$20 sps:$4 sm:$0xff]  }
0x180f   :  { %8086 = vmatprep.subr.bf16.mxu1 %v12790_v29  ;;  %v10873_v29 = vld [vmem:[%s13312_s8 + $0x80] ss:$20 sps:$4 sm:$0xff]  }
0x1812   :  { %8087 = vmatpush1.bf16.msra.mxu1 %v12793_v55  ;;  %v10871_v55 = vld [vmem:[%s13312_s8 + $0x7c] ss:$20 sps:$4 sm:$0xff]  }
0x1813   :  { %8088 = vmatprep.subr.bf16.mxu1 %v12796_v9  ;;  %v10876_v9 = vld [vmem:[%s13312_s8 + $0xa8] ss:$20 sps:$4 sm:$0xff]  }
0x1816   :  { %8089 = vmatpush1.bf16.msra.mxu1 %v12799_v56  ;;  %v10874_v56 = vld [vmem:[%s13312_s8 + $0xa4] ss:$20 sps:$4 sm:$0xff]  }
0x1817   :  { %8090 = vmatprep.subr.bf16.mxu1 %v12802_v28  ;;  %v10879_v28 = vld [vmem:[%s13312_s8 + $0xd0] ss:$20 sps:$4 sm:$0xff]  }
0x181a   :  { %8091 = vmatpush1.bf16.msra.mxu1 %v12805_v49  ;;  %v10877_v49 = vld [vmem:[%s13312_s8 + $0xcc] ss:$20 sps:$4 sm:$0xff]  }
0x181b   :  { %8092 = vmatprep.subr.bf16.mxu1 %v12808_v43  ;;  %v10882_v43 = vld [vmem:[%s13312_s8 + $0xf8] ss:$20 sps:$4 sm:$0xff]  }
0x181e   :  { %8093 = vmatpush1.bf16.msra.mxu1 %v12811_v62  ;;  %v10880_v62 = vld [vmem:[%s13312_s8 + $0xf4] ss:$20 sps:$4 sm:$0xff]  }
0x181f   :  { %8094 = vmatprep.subr.bf16.mxu1 %v12814_v23  ;;  %v10885_v23 = vld [vmem:[%s13312_s8 + $0x120] ss:$20 sps:$4 sm:$0xff]  }
0x1822   :  { %8095 = vmatpush1.bf16.msra.mxu1 %v12817_v15  ;;  %v10883_v15 = vld [vmem:[%s13312_s8 + $0x11c] ss:$20 sps:$4 sm:$0xff]  }
0x1823   :  { %8277 = vmatprep.subr.bf16.mxu1 %v10864_v35  ;;  %v10889_v35 = vld [vmem:[%s13312_s8 + $0x78] ss:$20 sps:$4 sm:$0xff]  }
0x1825   :  { %8113 = vmatmul.mubr.bf16.vlgmr.msra.gmra.mrb[44].mxu1 %v8038_v59  ;;  %v10888_v59 = vld [vmem:[%s13312_s8 + $0x50] ss:$20 sps:$4 sm:$0xff]  }
0x1826   :  { %8309 = vmatprep.mubr.bf16.mxu1 %v13325_v57  ;;  %8278 = vmatpush1.bf16.msra.mxu1 %v10862_v38  ;;  %v10870_v57 = vld [vmem:[%s13312_s8 + $0x58] ss:$20 sps:$4 sm:$0xff]   ;;  %v10890_v38 = vld [vmem:[%s13312_s8 + $0xa0] ss:$20 sps:$4 sm:$0xff]  }
0x1827   :  { %8279 = vmatprep.subr.bf16.mxu1 %v10867_v17  ;;  %v10891_v17 = vld [vmem:[%s13312_s8 + $0xc8] ss:$20 sps:$4 sm:$0xff]  }
0x182a   :  { %8280 = vmatpush1.bf16.msra.mxu1 %v10865_v53  ;;  %v10892_v53 = vld [vmem:[%s13312_s8 + $0xf0] ss:$20 sps:$4 sm:$0xff]  }
0x182b   :  { %8281 = vmatprep.subr.bf16.mxu1 %v10870_v57  ;;  %v10893_v57 = vld [vmem:[%s13312_s8 + $0x118] ss:$20 sps:$4 sm:$0xff]  }
0x182e   :  { %8282 = vmatpush1.bf16.msra.mxu1 %v10868_v39 }
0x182f   :  { %8283 = vmatprep.subr.bf16.mxu1 %v10873_v29 }
0x1832   :  { %8284 = vmatpush1.bf16.msra.mxu1 %v10871_v55  ;;  %v11345_v55 = vmov 0.0|0.0  }
0x1833   :  { %8285 = vmatprep.subr.bf16.mxu1 %v10876_v9  ;;  %10037 = vmatprep.subr.bf16.mxu0 %v11345_v55  ;;  %v8185_v9 = vld [vmem:[#allocation20 + $0x8] ss:$8 sm:$0x3] }
0x1836   :  { %8286 = vmatpush1.bf16.msra.mxu1 %v10874_v56  ;;  %v8190_v56 = vrot.slane %v8185_v9, %v11668_v8 }
0x1837   :  { %8287 = vmatprep.subr.bf16.mxu1 %v10879_v28 }
0x183a   :  { %8288 = vmatpush1.bf16.msra.mxu1 %v10877_v49  ;;  %v8194_v49 = vrot.slane %v8185_v9, %v13326_v7 }
0x183b   :  { %8289 = vmatprep.subr.bf16.mxu1 %v10882_v43 }
0x183e   :  { %8290 = vmatpush1.bf16.msra.mxu1 %v10880_v62 }
0x183f   :  { %8291 = vmatprep.subr.bf16.mxu1 %v10885_v23 }
0x1842   :  { %8292 = vmatpush1.bf16.msra.mxu1 %v10883_v15 }
0x1843   :  { %9905 = vmatprep.subr.bf16.mxu1 %v11343_v58 }
0x18d8   :  { %v8073_v46 = vpop.f32.mrb[40].mxu1 }
0x18d9   :  { %v8075_v19 = vpop.f32.mrb[41].mxu1  ;;  %v8125_v18 = vrot.slane %v8073_v46, 6 }
0x18da   :  { %v8126_v60 = vrot.slane %v8075_v19, 6  ;;  %v8077_v25 = vpop.f32.mrb[42].mxu1 }
0x18db   :  { %v8078_v6 = vpop.f32.mrb[43].mxu1  ;;  %v8133_v34 = vadd.f32 %v8125_v18, %v8034_v11 }
0x18dc   :  { %v8134_v5 = vadd.f32 %v8126_v60, %v8035_v1 }
0x18dd   :  { %v9781_v63 = vmul.f32 -1.442695, %v8133_v34 }
0x18de   :  { %v9782_v45 = vmul.f32 -1.442695, %v8134_v5  ;;  %v8338_v5 = vld [vmem:[#allocation20] ss:$0 sm:$0xff] }
0x18e0   :  { %11092 = vpow2.f32 %v9782_v45 }
0x18e1   :  { %11094 = vpow2.f32 %v9781_v63 }
0x18ea   :  { %v11093_v33 = vpop.eup %11092 }
0x18eb   :  { %v8146_v31 = vadd.f32 1.0, %v11093_v33  ;;  %v11095_v44 = vpop.eup %11094 }
0x18ec   :  { %v8140_v16 = vadd.f32 1.0, %v11095_v44 }
0x18ed   :  { %11096 = vrcp.f32 %v8146_v31  ;;  %v13329_v31 = vlaneseq }
0x18ee   :  { %11098 = vrcp.f32 %v8140_v16 }
0x18ef   :  { %v8431_v44 = vand.u32 127, %v13329_v31 }
0x18f7   :  { %v11097_v27 = vpop.eup %11096 }
0x18f8   :  { %v8159_v2 = vmul.f32 %v11097_v27, %v8157_v22  ;;  %v8114_v0 = vpop.f32.mrb[44].mxu1  ;;  %v11099_v10 = vpop.eup %11098  ;;  %v8436_v22 = vand.u32 1, %v8431_v44  ;;  %v13330_v27 = vld [vmem:[#allocation28_spill] sm:$0xff] }
0x18f9   :  { %v8127_v51 = vrot.slane %v8114_v0, 6  ;;  %v8116_v24 = vpop.f32.mrb[45].mxu1 }
0x18fa   :  { %v8128_v36 = vrot.slane %v8116_v24, 6  ;;  %v8118_v41 = vpop.f32.mrb[46].mxu1  ;;  %vm13132_vm6 = vcmp.eq.s32.totalorder %v13330_v27, %v8436_v22 }
0x18fb   :  { %v8135_v50 = vadd.f32 %v8127_v51, %v8036_v40  ;;  %v8119_v47 = vpop.f32.mrb[47].mxu1 }
0x18fc   :  { %v8136_v30 = vadd.f32 %v8128_v36, %v8037_v20 }
0x18fd   :  { %11100 = vtanh.f32 %v8135_v50 }
0x18fe   :  { %v9783_v32 = vmul.f32 -1.442695, %v8136_v30 }
0x1900   :  { %11102 = vpow2.f32 %v9783_v32 }
0x1907   :  { %v11101_v14 = vpop.eup %11100 }
0x1908   :  { %v8160_v54 = vmul.f32 %v11101_v14, %v11099_v10 }
0x190a   :  { %v11103_v21 = vpop.eup %11102  ;;  %v8161_v61 = vadd.f32 %v8160_v54, %v8159_v2 }
0x190b   :  { %v8153_v3 = vadd.f32 1.0, %v11103_v21 }
0x190c   :  { %11104 = vtanh.f32 %v8161_v61 }
0x190d   :  { %11106 = vrcp.f32 %v8153_v3 }
0x1916   :  { %v11105_v13 = vpop.eup %11104 }
0x1917   :  { %v11107_v48 = vpop.eup %11106 }
0x1918   :  { %v8163_v37 = vmul.f32 %v11107_v48, %v11105_v13 }
0x191a   :  { %8164 = vst [vmem:[#allocation9 + $0x8] sm:$0xc] %v8163_v37 }
0x1921   :  { %v8166_v52 = vld [vmem:[#allocation9 + $0x8] sm:$0xf] }
0x1922   :  { %v8167_v4 = vpack.c.bf16 %v8166_v52, %v8165_v42  ;;  %v8320_v39 = vld [vmem:[#allocation9 + $0xa] sm:$0x3] }
0x1923   :  { %v8321_v29 = vpack.c.bf16 %v8320_v39, %v8320_v39 }
0x1924   :  { %8310 = vmatmul.mubr.bf16.vlgmr.msra.gmra.mrb[0].mxu1 %v8167_v4 }
0x1925   :  { %9906 = vmatpush3.bf16.msra.mxu1 %v10886_v12  ;;  %9921 = vmatprep.mubr.msk.bf16.mxu1 %vm11344_vm2, %v11343_v58 }
0x1926   :  { %9907 = vmatprep.subr.bf16.mxu1 %v11343_v58 }
0x1929   :  { %9908 = vmatpush3.bf16.msra.mxu1 %v10887_v26 }
0x192a   :  { %9909 = vmatprep.subr.bf16.mxu1 %v11343_v58 }
0x192d   :  { %9910 = vmatpush3.bf16.msra.mxu1 %v10888_v59 }
0x192e   :  { %9911 = vmatprep.subr.bf16.mxu1 %v11343_v58 }
0x1931   :  { %9912 = vmatpush3.bf16.msra.mxu1 %v10889_v35 }
0x1932   :  { %9913 = vmatprep.subr.bf16.mxu1 %v11343_v58 }
0x1935   :  { %9914 = vmatpush3.bf16.msra.mxu1 %v10890_v38 }
0x1936   :  { %9915 = vmatprep.subr.bf16.mxu1 %v11343_v58 }
0x1939   :  { %9916 = vmatpush3.bf16.msra.mxu1 %v10891_v17 }
0x193a   :  { %9917 = vmatprep.subr.bf16.mxu1 %v11343_v58 }
0x193d   :  { %9918 = vmatpush3.bf16.msra.mxu1 %v10892_v53 }
0x193e   :  { %9919 = vmatprep.subr.bf16.mxu1 %v11343_v58 }
0x1941   :  { %9920 = vmatpush3.bf16.msra.mxu1 %v10893_v57 }
0x1942   :  { %9932 = vmatprep.subr.bf16.mxu1 %v11343_v58 }
0x1944   :  { %9922 = vmatmul.mubr.bf16.vlgmr.msra.gmra.mrb[4].mxu1 %v8321_v29 }
0x1945   :  { %9934 = vmatprep.mubr.msk.bf16.mxu1 %vm11344_vm2, %v11343_v58 }
0x19f7   :  { %v8311_v28 = vpop.f32.mrb[0].mxu1 }
0x19f8   :  { %v8313_v43 = vpop.f32.mrb[1].mxu1  ;;  %v8312_v23 = vadd.f32 %v8311_v28, %v8190_v56 }
0x19f9   :  { %v8315_v62 = vpop.f32.mrb[2].mxu1  ;;  %v8314_v19 = vadd.f32 %v8313_v43, %v8194_v49 }
0x19fa   :  { %v8316_v15 = vadd.f32 %v8315_v62, %v8190_v56  ;;  %v8317_v46 = vpop.f32.mrb[3].mxu1 }
0x19fb   :  { %v8318_v60 = vadd.f32 %v8317_v46, %v8194_v49 }
0x19fc   :  { %v10038_v1 = vpack.c.bf16 %v8316_v15, %v8312_v23  ;;  %v13113_v8 = vpack.i.bf16 %v8316_v15, %v8312_v23 }
0x19fd   :  { %v13115_v6 = vpack.c.bf16 %v8318_v60, %v8314_v19 }
0x19fe   :  { %10704 = vrot.lane.b32.xlu1 %v13113_v8, %s11346_s29  ;;  %10040 = vmatpush3.bf16.xpose.msk.msra.mxu0 %vm13109_vm4, %v10038_v1 }
0x19ff   :  { %v8546_v7 = vsel %vm8544_vm5, %v13115_v6, 0 }
0x1a00   :  { %9933 = vmatpush3.bf16.msra.mxu1 %v8546_v7 }
0x1a01   :  { %10041 = vmatprep.subr.bf16.mxu1 %v11345_v55 }
0x1a17   :  { %v8421_v45 = vpop.f32.mrb[4].mxu1 }
0x1a18   :  { %v8422_v18 = vadd.f32 %v8421_v45, %v8338_v5  ;;  %v9923_v11 = vpop.f32.mrb[5].mxu1 }
0x1a19   :  { %v8424_v34 = vpop.f32.mrb[6].mxu1 }
0x1a1a   :  { %v13124_v63 = vmul.f32 0.17677669, %v8422_v18  ;;  %v9924_v33 = vpop.f32.mrb[7].mxu1 }
0x1a1c   :  { %8588 = vrot.lane.b32.xlu1 %v13124_v63, %s11346_s29  ;;  %9930 = vmatmul.mubr.msk.f32.vlgmr.msra.gmra.mrb[40].mxu0 %vm8445_vm3, %v13124_v63 }
0x1a70   :  { %v10705_v30 = vpop.permute.xlu1 %10704 }
0x1a71   :  { %v10707_v10 = vunpack.i.h.bf16 %v10705_v30  ;;  %v10706_v14 = vunpack.i.l.bf16 %v10705_v30 }
0x1a73   :  { %v10042_v61 = vpack.c.bf16 %v10707_v10, %v10706_v14 }
0x1a8e   :  { %v8589_v3 = vpop.permute.xlu1 %8588 }
0x1aef   :  { %v8521_v2 = vpop.f32.mrb[40].mxu0 }
0x1af0   :  { %v8525_v0 = vsel %vm13132_vm6, %v8521_v2, -1e+30  ;;  %v9931_v51 = vpop.f32.mrb[41].mxu0 }
0x1af1   :  { %v8527_v24 = vsel %vm8526_vm7, %v8525_v0, -inf }
0x1af2   :  { %8528 = vmax.xlane.f32.xlu0 %v8527_v24 }
0x1b7f   :  { %v8529_v40 = vpop.xlane.xlu0 %8528 }
0x1b80   :  { %v8530_v36 = vsub.f32 %v8525_v0, %v8529_v40 }
0x1b82   :  { %v8531_v41 = vmul.f32 1.442695, %v8530_v36 }
0x1b84   :  { %11108 = vpow2.f32 %v8531_v41 }
0x1b8e   :  { %v11109_v50 = vpop.eup %11108 }
0x1b8f   :  { %v8533_v20 = vsel %vm8526_vm7, %v11109_v50, 0.0 }
0x1b90   :  { %8534 = vadd.xlane.f32.xlu0 %v8533_v20 }
0x1c1d   :  { %v8535_v47 = vpop.xlane.xlu0 %8534 }
0x1c1e   :  { %11110 = vrcp.f32 %v8535_v47 }
0x1c28   :  { %v11111_v32 = vpop.eup %11110 }
0x1c29   :  { %v8537_v54 = vmul.f32 %v11111_v32, %v11109_v50 }
0x1c2b   :  { %v8538_v21 = vpack.c.bf16 %v8537_v54, %v8537_v54 }
0x1c2d   :  { %9935 = vmatmul.mubr.msk.bf16.vlgmr.msra.gmra.mrb[8].mxu1 %vm8540_vm8, %v8538_v21 }
0x1c2e   :  { %10044 = vmatpush3.bf16.xpose.msk.msra.mxu1 %vm13109_vm4, %v10042_v61  ;;  %9942 = vmatprep.mubr.msk.f32.mxu1 %vm11344_vm2, %v11343_v58 }
0x1c2f   :  { %9945 = vmatprep.subr.bf16.mxu1 %v11343_v58 }
0x1c35   :  { %9943 = vmatmul.mubr.msk.f32.vlgmr.msra.gmra.mrb[12].mxu1 %vm8445_vm3, %v8589_v3 }
0x1c36   :  { %9947 = vmatprep.mubr.msk.bf16.mxu1 %vm11344_vm2, %v11343_v58 }
0x1d00   :  { %v13149_v13 = vpop.f32.mrb[8].mxu1 }
0x1d01   :  { %v9936_v48 = vpop.f32.mrb[9].mxu1 }
0x1d02   :  { %v8585_v37 = vpop.f32.mrb[10].mxu1 }
0x1d03   :  { %v9937_v42 = vpop.f32.mrb[11].mxu1 }
0x1d08   :  { %v8666_v52 = vpop.f32.mrb[12].mxu1 }
0x1d09   :  { %v8670_v12 = vsel %vm13132_vm6, %v8666_v52, -1e+30  ;;  %v9944_v4 = vpop.f32.mrb[13].mxu1 }
0x1d0a   :  { %v8671_v26 = vsel %vm8526_vm7, %v8670_v12, -inf  ;;  %v10895_v4 = vld [vmem:[%s13312_s8 + $0x34] ss:$20 sps:$4 sm:$0xff]  }
0x1d0b   :  { %8672 = vmax.xlane.f32.xlu0 %v8671_v26  ;;  %v10896_v26 = vld [vmem:[%s13312_s8 + $0x5c] ss:$20 sps:$4 sm:$0xff]  }
0x1d21   :  { %8684 = vrot.lane.b32.xlu0 %v13115_v6, %s11346_s29 }
0x1d25   :  { %10709 = vrot.lane.b32.xlu0 %v13113_v8, %s11338_s9 }
0x1d29   :  { %8732 = vrot.lane.b32.xlu0 %v13124_v63, %s11338_s9 }
0x1d98   :  { %v8673_v59 = vpop.xlane.xlu0 %8672 }
0x1d99   :  { %v8674_v35 = vsub.f32 %v8670_v12, %v8673_v59  ;;  %v10894_v12 = vld [vmem:[%s13312_s8 + $0xc] ss:$20 sps:$4 sm:$0xff]   ;;  %v10897_v59 = vld [vmem:[%s13312_s8 + $0x84] ss:$20 sps:$4 sm:$0xff]  }
0x1d9b   :  { %v8675_v38 = vmul.f32 1.442695, %v8674_v35  ;;  %v10898_v35 = vld [vmem:[%s13312_s8 + $0xac] ss:$20 sps:$4 sm:$0xff]  }
0x1d9c   :  { %v8685_v17 = vpop.permute.xlu0 %8684 }
0x1d9d   :  { %11112 = vpow2.f32 %v8675_v38  ;;  %v8690_v53 = vsel %vm8544_vm5, %v8685_v17, 0  ;;  %v10899_v38 = vld [vmem:[%s13312_s8 + $0xd4] ss:$20 sps:$4 sm:$0xff]   ;;  %v10900_v17 = vld [vmem:[%s13312_s8 + $0xfc] ss:$20 sps:$4 sm:$0xff]  }
0x1d9e   :  { %9946 = vmatpush3.bf16.msra.mxu1 %v8690_v53  ;;  %v10901_v53 = vld [vmem:[%s13312_s8 + $0x124] ss:$20 sps:$4 sm:$0xff]  }
0x1d9f   :  { %10045 = vmatprep.subr.bf16.mxu1 %v11345_v55 }
0x1da0   :  { %v10710_v9 = vpop.permute.xlu0 %10709 }
0x1da1   :  { %v10712_v28 = vunpack.i.h.bf16 %v10710_v9  ;;  %v10711_v49 = vunpack.i.l.bf16 %v10710_v9 }
0x1da3   :  { %v10046_v23 = vpack.c.bf16 %v10712_v28, %v10711_v49 }
0x1da4   :  { %v8733_v46 = vpop.permute.xlu0 %8732 }
0x1da7   :  { %v11113_v57 = vpop.eup %11112 }
0x1da8   :  { %v8677_v39 = vsel %vm8526_vm7, %v11113_v57, 0.0 }
0x1da9   :  { %8678 = vadd.xlane.f32.xlu1 %v8677_v39 }
0x1dba   :  { %8827 = vrot.lane.b32.xlu1 %v13115_v6, %s11338_s9 }
0x1e36   :  { %v8679_v29 = vpop.xlane.xlu1 %8678 }
0x1e37   :  { %11114 = vrcp.f32 %v8679_v29 }
0x1e3a   :  { %v8828_v15 = vpop.permute.xlu1 %8827 }
0x1e3b   :  { %v8833_v19 = vsel %vm8544_vm5, %v8828_v15, 0  ;;  %v10902_v15 = vld [vmem:[%s13312_s8 + $0x10] ss:$20 sps:$4 sm:$0xff]  }
0x1e41   :  { %v11115_v56 = vpop.eup %11114 }
0x1e42   :  { %v8681_v43 = vmul.f32 %v11115_v56, %v11113_v57 }
0x1e44   :  { %v8682_v62 = vpack.c.bf16 %v8681_v43, %v8681_v43 }
0x1e46   :  { %9948 = vmatmul.mubr.msk.bf16.vlgmr.msra.gmra.mrb[16].mxu1 %vm8540_vm8, %v8682_v62 }
0x1e47   :  { %10048 = vmatpush3.bf16.xpose.msk.msra.mxu1 %vm13109_vm4, %v10046_v23  ;;  %9955 = vmatprep.mubr.msk.f32.mxu1 %vm11344_vm2, %v11343_v58 }
0x1e48   :  { %9958 = vmatprep.subr.bf16.mxu1 %v11343_v58 }
0x1e4e   :  { %9956 = vmatmul.mubr.msk.f32.vlgmr.msra.gmra.mrb[14].mxu1 %vm8445_vm3, %v8733_v46 }
0x1e4f   :  { %9959 = vmatpush3.bf16.msra.mxu1 %v8833_v19  ;;  %9960 = vmatprep.mubr.msk.bf16.mxu1 %vm11344_vm2, %v11343_v58  ;;  %v10903_v19 = vld [vmem:[%s13312_s8 + $0x38] ss:$20 sps:$4 sm:$0xff]  }
0x1e50   :  { %10049 = vmatprep.subr.bf16.mxu1 %v11345_v55 }
0x1f19   :  { %v8726_v60 = vpop.f32.mrb[16].mxu1 }
0x1f1a   :  { %v9949_v1 = vpop.f32.mrb[17].mxu1 }
0x1f1b   :  { %v8729_v7 = vpop.f32.mrb[18].mxu1  ;;  %v10906_v1 = vld [vmem:[%s13312_s8 + $0xb0] ss:$20 sps:$4 sm:$0xff]  }
0x1f1c   :  { %v9950_v5 = vpop.f32.mrb[19].mxu1  ;;  %v10907_v7 = vld [vmem:[%s13312_s8 + $0xd8] ss:$20 sps:$4 sm:$0xff]  }
0x1f1d   :  { %v10908_v5 = vld [vmem:[%s13312_s8 + $0x100] ss:$20 sps:$4 sm:$0xff]  }
0x1f21   :  { %v8810_v45 = vpop.f32.mrb[14].mxu1 }
0x1f22   :  { %v8814_v18 = vsel %vm13132_vm6, %v8810_v45, -1e+30  ;;  %v9957_v11 = vpop.f32.mrb[15].mxu1  ;;  %v10909_v45 = vld [vmem:[%s13312_s8 + $0x128] ss:$20 sps:$4 sm:$0xff]  }
0x1f23   :  { %v8815_v34 = vsel %vm8526_vm7, %v8814_v18, -inf }
0x1f24   :  { %8816 = vmax.xlane.f32.xlu0 %v8815_v34 }
0x1fb1   :  { %v8817_v33 = vpop.xlane.xlu0 %8816 }
0x1fb2   :  { %v8818_v31 = vsub.f32 %v8814_v18, %v8817_v33  ;;  %v9052_v18 = vld [vmem:[#allocation20 + $0x1] ss:$0 sm:$0xff] }
0x1fb4   :  { %v8819_v44 = vmul.f32 1.442695, %v8818_v31 }
0x1fb6   :  { %11116 = vpow2.f32 %v8819_v44  ;;  %v10910_v44 = vld [vmem:[%s13314_s10] sm:$0xff]  }
0x1fc0   :  { %v11117_v22 = vpop.eup %11116 }
0x1fc1   :  { %v8821_v27 = vsel %vm8526_vm7, %v11117_v22, 0.0 }
0x1fc2   :  { %8822 = vadd.xlane.f32.xlu1 %v8821_v27 }
0x1fd3   :  { %10714 = vrot.lane.b32.xlu1 %v13113_v8, %s11347_s14 }
0x1fd7   :  { %8875 = vrot.lane.b32.xlu1 %v13124_v63, %s11347_s14 }
0x204f   :  { %v8823_v55 = vpop.xlane.xlu1 %8822 }
0x2050   :  { %11118 = vrcp.f32 %v8823_v55  ;;  %v10911_v55 = vld [vmem:[%s13314_s10 + $0x8] sm:$0xff]  }
0x2053   :  { %v10715_v2 = vpop.permute.xlu1 %10714 }
0x2054   :  { %v10717_v51 = vunpack.i.h.bf16 %v10715_v2  ;;  %v10716_v24 = vunpack.i.l.bf16 %v10715_v2  ;;  %v10912_v2 = vld [vmem:[%s13314_s10 + $0x10] sm:$0xff]  }
0x2056   :  { %v10050_v41 = vpack.c.bf16 %v10717_v51, %v10716_v24  ;;  %v9158_v51 = vld [vmem:[#allocation20 + $0x2] ss:$0 sm:$0xff] }
0x2057   :  { %v8876_v8 = vpop.permute.xlu1 %8875 }
0x205a   :  { %v11119_v0 = vpop.eup %11118 }
0x205b   :  { %v8825_v40 = vmul.f32 %v11119_v0, %v11117_v22  ;;  %v10913_v0 = vld [vmem:[%s13314_s10 + $0x18] sm:$0xff]  }
0x205d   :  { %v8826_v36 = vpack.c.bf16 %v8825_v40, %v8825_v40 }
0x205f   :  { %9961 = vmatmul.mubr.msk.bf16.vlgmr.msra.gmra.mrb[20].mxu1 %vm8540_vm8, %v8826_v36 }
0x2060   :  { %10052 = vmatpush3.bf16.xpose.msk.msra.mxu1 %vm13109_vm4, %v10050_v41  ;;  %9968 = vmatprep.mubr.msk.f32.mxu1 %vm11344_vm2, %v11343_v58 }
0x2061   :  { %9971 = vmatprep.subr.bf16.mxu1 %v11343_v58 }
0x2067   :  { %9969 = vmatmul.mubr.msk.f32.vlgmr.msra.gmra.mrb[24].mxu1 %vm8445_vm3, %v8876_v8 }
0x2068   :  { %9973 = vmatprep.mubr.msk.bf16.mxu1 %vm11344_vm2, %v11343_v58 }
0x2132   :  { %v8869_v63 = vpop.f32.mrb[20].mxu1 }
0x2133   :  { %v9962_v50 = vpop.f32.mrb[21].mxu1 }
0x2134   :  { %v8872_v20 = vpop.f32.mrb[22].mxu1  ;;  %v10914_v50 = vld [vmem:[%s13315_s11] sm:$0xff]  }
0x2135   :  { %v9963_v47 = vpop.f32.mrb[23].mxu1 }
0x2136   :  { %v10915_v47 = vld [vmem:[%s13315_s11 + $0x8] sm:$0xff]  }
0x213a   :  { %v8953_v30 = vpop.f32.mrb[24].mxu1 }
0x213b   :  { %v8957_v25 = vsel %vm13132_vm6, %v8953_v30, -1e+30  ;;  %v9970_v32 = vpop.f32.mrb[25].mxu1  ;;  %v9257_v30 = vld [vmem:[#allocation20 + $0x3] ss:$0 sm:$0xff] }
0x213c   :  { %v8958_v10 = vsel %vm8526_vm7, %v8957_v25, -inf }
0x213d   :  { %8959 = vmax.xlane.f32.xlu0 %v8958_v10 }
0x2153   :  { %8970 = vrot.lane.b32.xlu0 %v13115_v6, %s11347_s14 }
0x2157   :  { %9019 = vrot.lane.b32.xlu0 %v8726_v60, %s11347_s14  ;;  %v10905_v60 = vld [vmem:[%s13312_s8 + $0x88] ss:$20 sps:$4 sm:$0xff]  }
0x215b   :  { %9023 = vrot.lane.b32.xlu0 %v8869_v63, %s11338_s9 }
0x21ca   :  { %v8960_v14 = vpop.xlane.xlu0 %8959 }
0x21cb   :  { %v8961_v54 = vsub.f32 %v8957_v25, %v8960_v14 }
0x21cd   :  { %v8962_v21 = vmul.f32 1.442695, %v8961_v54 }
0x21ce   :  { %v8971_v61 = vpop.permute.xlu0 %8970 }
0x21cf   :  { %11120 = vpow2.f32 %v8962_v21  ;;  %v8976_v3 = vsel %vm8544_vm5, %v8971_v61, 0 }
0x21d0   :  { %9972 = vmatpush3.bf16.msra.mxu1 %v8976_v3  ;;  %v9331_v3 = vld [vmem:[#allocation20 + $0x4] ss:$0 sm:$0xff] }
0x21d1   :  { %9977 = vmatprep.subr.bf16.mxu1 %v11343_v58 }
0x21d2   :  { %v9020_v56 = vpop.permute.xlu0 %9019 }
0x21d3   :  { %v9030_v49 = vsel %vm8445_vm3, %v13149_v13, %v9020_v56  ;;  %v10904_v13 = vld [vmem:[%s13312_s8 + $0x60] ss:$20 sps:$4 sm:$0xff]  }
0x21d6   :  { %v9024_v28 = vpop.permute.xlu0 %9023 }
0x21d7   :  { %v9032_v43 = vsel %vm9031_vm9, %v9030_v49, %v9024_v28 }
0x21d9   :  { %v11121_v16 = vpop.eup %11120 }
0x21da   :  { %v8964_v48 = vsel %vm8526_vm7, %v11121_v16, 0.0 }
0x21db   :  { %8965 = vadd.xlane.f32.xlu1 %v8964_v48 }
0x2268   :  { %v8966_v37 = vpop.xlane.xlu1 %8965 }
0x2269   :  { %11122 = vrcp.f32 %v8966_v37 }
0x2273   :  { %v11123_v6 = vpop.eup %11122 }
0x2274   :  { %v8968_v42 = vmul.f32 %v11123_v6, %v11121_v16 }
0x2276   :  { %v8969_v52 = vpack.c.bf16 %v8968_v42, %v8968_v42 }
0x2278   :  { %9974 = vmatmul.mubr.msk.bf16.vlgmr.msra.gmra.mrb[28].mxu1 %vm8540_vm8, %v8969_v52 }
0x2279   :  { %9993 = vmatprep.mubr.msk.bf16.mxu1 %vm11344_vm2, %v11343_v58  ;;  %9978 = vmatpush3.bf16.msra.mxu1 %v10894_v12 }
0x227a   :  { %9979 = vmatprep.subr.bf16.mxu1 %v11343_v58 }
0x227d   :  { %9980 = vmatpush3.bf16.msra.mxu1 %v10895_v4 }
0x227e   :  { %9981 = vmatprep.subr.bf16.mxu1 %v11343_v58 }
0x2281   :  { %9982 = vmatpush3.bf16.msra.mxu1 %v10896_v26 }
0x2282   :  { %9983 = vmatprep.subr.bf16.mxu1 %v11343_v58 }
0x2285   :  { %9984 = vmatpush3.bf16.msra.mxu1 %v10897_v59 }
0x2286   :  { %9985 = vmatprep.subr.bf16.mxu1 %v11343_v58 }
0x2289   :  { %9986 = vmatpush3.bf16.msra.mxu1 %v10898_v35 }
0x228a   :  { %9987 = vmatprep.subr.bf16.mxu1 %v11343_v58 }
0x228d   :  { %9988 = vmatpush3.bf16.msra.mxu1 %v10899_v38 }
0x228e   :  { %9989 = vmatprep.subr.bf16.mxu1 %v11343_v58 }
0x2291   :  { %9990 = vmatpush3.bf16.msra.mxu1 %v10900_v17 }
0x2292   :  { %9991 = vmatprep.subr.bf16.mxu1 %v11343_v58 }
0x2295   :  { %9992 = vmatpush3.bf16.msra.mxu1 %v10901_v53 }
0x2296   :  { %9997 = vmatprep.subr.bf16.mxu1 %v11343_v58 }
0x234b   :  { %v9012_v57 = vpop.f32.mrb[28].mxu1 }
0x234c   :  { %9027 = vrot.lane.b32.xlu0 %v9012_v57, %s11346_s29  ;;  %v9975_v39 = vpop.f32.mrb[29].mxu1 }
0x234d   :  { %v9015_v29 = vpop.f32.mrb[30].mxu1 }
0x234e   :  { %v9976_v9 = vpop.f32.mrb[31].mxu1 }
0x23be   :  { %v9028_v62 = vpop.permute.xlu0 %9027 }
0x23bf   :  { %v9034_v23 = vsel %vm9033_vm10, %v9032_v43, %v9028_v62 }
0x23c0   :  { %v9035_v46 = vpack.c.bf16 %v9034_v23, %v9034_v23 }
0x23c2   :  { %9994 = vmatmul.mubr.bf16.vlgmr.msra.gmra.mrb[80].mxu1 %v9035_v46 }
0x23c3   :  { %9998 = vmatpush3.bf16.msra.mxu1 %v10902_v15  ;;  %10013 = vmatprep.mubr.msk.bf16.mxu1 %vm11344_vm2, %v11343_v58 }
0x23c4   :  { %9999 = vmatprep.subr.bf16.mxu1 %v11343_v58 }
0x23c7   :  { %10000 = vmatpush3.bf16.msra.mxu1 %v10903_v19 }
0x23c8   :  { %10001 = vmatprep.subr.bf16.mxu1 %v11343_v58 }
0x23cb   :  { %10002 = vmatpush3.bf16.msra.mxu1 %v10904_v13 }
0x23cc   :  { %10003 = vmatprep.subr.bf16.mxu1 %v11343_v58 }
0x23cf   :  { %10004 = vmatpush3.bf16.msra.mxu1 %v10905_v60 }
0x23d0   :  { %10005 = vmatprep.subr.bf16.mxu1 %v11343_v58 }
0x23d3   :  { %10006 = vmatpush3.bf16.msra.mxu1 %v10906_v1 }
0x23d4   :  { %10007 = vmatprep.subr.bf16.mxu1 %v11343_v58 }
0x23d7   :  { %10008 = vmatpush3.bf16.msra.mxu1 %v10907_v7 }
0x23d8   :  { %10009 = vmatprep.subr.bf16.mxu1 %v11343_v58 }
0x23db   :  { %10010 = vmatpush3.bf16.msra.mxu1 %v10908_v5 }
0x23dc   :  { %10011 = vmatprep.subr.bf16.mxu1 %v11343_v58 }
0x23df   :  { %10012 = vmatpush3.bf16.msra.mxu1 %v10909_v45 }
0x23e0   :  { %10017 = vmatprep.subr.bf16.mxu1 %v11343_v58 }
0x2495   :  { %v9135_v11 = vpop.f32.mrb[80].mxu1 }
0x2496   :  { %v9136_v34 = vadd.f32 %v9135_v11, %v9052_v18  ;;  %v9995_v33 = vpop.f32.mrb[81].mxu1 }
0x2497   :  { %v9138_v31 = vpop.f32.mrb[82].mxu1 }
0x2498   :  { %v9141_v22 = vpack.c.bf16 %v9136_v34, %v9136_v34  ;;  %v9996_v27 = vpop.f32.mrb[83].mxu1 }
0x249a   :  { %10014 = vmatmul.mubr.bf16.vlgmr.msra.gmra.mrb[84].mxu1 %v9141_v22 }
0x249b   :  { %10018 = vmatpush3.bf16.msra.mxu1 %v10910_v44  ;;  %10025 = vmatprep.mubr.msk.bf16.mxu1 %vm11344_vm2, %v11343_v58 }
0x249c   :  { %10019 = vmatprep.subr.bf16.mxu1 %v11343_v58 }
0x249f   :  { %10020 = vmatpush3.bf16.msra.mxu1 %v10911_v55 }
0x24a0   :  { %10021 = vmatprep.subr.bf16.mxu1 %v11343_v58 }
0x24a3   :  { %10022 = vmatpush3.bf16.msra.mxu1 %v10912_v2 }
0x24a4   :  { %10023 = vmatprep.subr.bf16.mxu1 %v11343_v58 }
0x24a7   :  { %10024 = vmatpush3.bf16.msra.mxu1 %v10913_v0 }
0x24a8   :  { %10029 = vmatprep.subr.bf16.mxu1 %v11343_v58 }
0x256d   :  { %v9241_v24 = vpop.f32.mrb[84].mxu1 }
0x256e   :  { %v9242_v40 = vadd.f32 %v9241_v24, %v9158_v51  ;;  %v10015_v36 = vpop.f32.mrb[85].mxu1 }
0x256f   :  { %v9244_v41 = vpop.f32.mrb[86].mxu1 }
0x2570   :  { %v9247_v8 = vmax.f32 %v9242_v40, 0.0  ;;  %v10016_v63 = vpop.f32.mrb[87].mxu1 }
0x2572   :  { %v9248_v20 = vpack.c.bf16 %v9247_v8, %v9247_v8 }
0x2574   :  { %10026 = vmatmul.mubr.msk.bf16.vlgmr.msra.gmra.mrb[120].mxu1 %vm9031_vm9, %v9248_v20 }
0x2575   :  { %10030 = vmatpush3.bf16.msra.mxu1 %v10914_v50  ;;  %10033 = vmatprep.mubr.msk.bf16.mxu1 %vm11344_vm2, %v11343_v58 }
0x2576   :  { %10031 = vmatprep.subr.bf16.mxu1 %v11343_v58 }
0x2579   :  { %10032 = vmatpush3.bf16.msra.mxu1 %v10915_v47 }
0x2647   :  { %v9319_v25 = vpop.f32.mrb[120].mxu1 }
0x2648   :  { %v9320_v32 = vadd.f32 %v9319_v25, %v9257_v30  ;;  %v10027_v10 = vpop.f32.mrb[121].mxu1 }
0x2649   :  { %v9322_v14 = vpop.f32.mrb[122].mxu1 }
0x264a   :  { %v9325_v54 = vmax.f32 %v9320_v32, 0.0  ;;  %v10028_v21 = vpop.f32.mrb[123].mxu1 }
0x264c   :  { %v9326_v61 = vpack.c.bf16 %v9325_v54, %v9325_v54 }
0x264e   :  { %10034 = vmatmul.mubr.msk.bf16.vlgmr.msra.gmra.mrb[124].mxu1 %vm8445_vm3, %v9326_v61 }
0x2721   :  { %v9381_v16 = vpop.f32.mrb[124].mxu1 }
0x2722   :  { %v9382_v48 = vadd.f32 %v9381_v16, %v9331_v3  ;;  %v10035_v37 = vpop.f32.mrb[125].mxu1 }
0x2723   :  { %v9384_v58 = vpop.f32.mrb[126].mxu1 }
0x2724   :  { %v9848_v6 = vmul.f32 -1.442695, %v9382_v48  ;;  %v10036_v42 = vpop.f32.mrb[127].mxu1 }
0x2726   :  { %11124 = vpow2.f32 %v9848_v6 }
0x2730   :  { %v11125_v52 = vpop.eup %11124 }
0x2731   :  { %v9390_v12 = vadd.f32 1.0, %v11125_v52 }
0x2733   :  { %11126 = vrcp.f32 %v9390_v12 }
0x273d   :  { %v11127_v4 = vpop.eup %11126 }
0x273e   :  { %9394 = vst.msk [vmem:[%s13316_s12] sm:$0x3] %vm9393_vm11, %v11127_v4 }
0x273f   :  { %9399 = vsyncpa [#allocation11], 1 }
0x2740   :  { %9400 = vsyncpa [#allocation13], 1 }
0x2741   :  { %9401 = vsyncpa [#allocation16], 1 }
0x2742   :  { %9402 = vsyncpa [#allocation19], 1 }
0x2743   :  { %9403 = vsyncmov [#allocation3] }
0x2746   :  { %s9404_s25 = vpop.sfrf %9403 }
0x2747   :  { %p9849_p0 = scmp.ne.s32.totalorder %s9404_s25, 0 }
0x2749   :  { %9408 = shalt.err (%p9849_p0)  }

</bundles_post_ra>
